<compile_context>
chip_gen: v6e
topology: v6e:2x2x1
jax: 0.10.0
libtpu: 0.0.40
codegen_flags: <defaults>
</compile_context>

<pallas_src>
import functools
import math

import jax
import jax.numpy as jnp
from jax import lax
from jax.experimental import pallas as pl
from jax.experimental.pallas import tpu as pltpu


NEG_BIG = jnp.float32(-1e30)  # finite "-inf": robust for padded keys


def _round_up(x, m):
    return (x + m - 1) // m * m


# ----------------------------------------------------------------------------
# In-kernel building blocks (pure functions of loaded VMEM values)
# ----------------------------------------------------------------------------

def _mm(x, w, b=None):
    """x:(M,K) @ w:(N,K)^T (+ b:(1,N)) -> (M,N), f32 accumulation, no transpose."""
    y = lax.dot_general(x, w, (((1,), (1,)), ((), ())),
                        preferred_element_type=jnp.float32)
    if b is not None:
        y = y + b
    return y


def _layernorm(x, g, b, eps=1e-5):
    mean = jnp.mean(x, axis=-1, keepdims=True)
    xc = x - mean
    var = jnp.mean(xc * xc, axis=-1, keepdims=True)   # biased, like torch LN
    return xc * lax.rsqrt(var + eps) * g + b


def _softmax(s):
    m = jnp.max(s, axis=-1, keepdims=True)
    p = jnp.exp(s - m)
    return p / jnp.sum(p, axis=-1, keepdims=True)


def _mha(xq, xkv, w_in, b_in, w_out, b_out, key_bias, num_heads):
    """nn.MultiheadAttention forward (key-padding bias only, no attn mask).

    xq:(Sq,D) xkv:(Sk,D)  w_in:(3D,D) b_in:(1,3D)  w_out:(D,D) b_out:(1,D)
    key_bias:(1,Sk) additive.  Head merge is fused into the out-projection:
    o @ Wo^T == sum_h o_h @ Wo[:, h*Dh:(h+1)*Dh]^T  (no concat / transpose).
    """
    D = xq.shape[-1]
    Dh = D // num_heads
    scale = 1.0 / math.sqrt(Dh)
    q = _mm(xq, w_in[:D], b_in[:, :D])
    k = _mm(xkv, w_in[D:2 * D], b_in[:, D:2 * D])
    v = _mm(xkv, w_in[2 * D:], b_in[:, 2 * D:])
    acc = None
    for h in range(num_heads):                      # static unroll (H small)
        sl = slice(h * Dh, (h + 1) * Dh)
        s = _mm(q[:, sl], k[:, sl]) * scale + key_bias          # (Sq, Sk)
        p = _softmax(s)
        oh = jnp.dot(p, v[:, sl], preferred_element_type=jnp.float32)  # (Sq,Dh)
        ph = _mm(oh, w_out[:, sl])                               # (Sq, D)
        acc = ph if acc is None else acc + ph
    return acc + b_out


def _encoder_layer(x, p, key_bias, num_heads, eps=1e-5):
    a = _mha(x, x, p["attn_in_w"], p["attn_in_b"],
             p["attn_out_w"], p["attn_out_b"], key_bias, num_heads)
    x = _layernorm(x + a, p["norm1_w"], p["norm1_b"], eps)
    h = jnp.maximum(_mm(x, p["ff1_w"], p["ff1_b"]), 0.0)
    h = _mm(h, p["ff2_w"], p["ff2_b"])
    return _layernorm(x + h, p["norm2_w"], p["norm2_b"], eps)


def _decoder_layer(y, memory, p, tgt_bias, mem_bias, num_heads, eps=1e-5):
    a = _mha(y, y, p["attn_in_w"], p["attn_in_b"],
             p["attn_out_w"], p["attn_out_b"], tgt_bias, num_heads)
    y = _layernorm(y + a, p["norm1_w"], p["norm1_b"], eps)
    c = _mha(y, memory, p["cross_in_w"], p["cross_in_b"],
             p["cross_out_w"], p["cross_out_b"], mem_bias, num_heads)
    y = _layernorm(y + c, p["norm2_w"], p["norm2_b"], eps)
    h = jnp.maximum(_mm(y, p["ff1_w"], p["ff1_b"]), 0.0)
    h = _mm(h, p["ff2_w"], p["ff2_b"])
    return _layernorm(y + h, p["norm3_w"], p["norm3_b"], eps)


# ----------------------------------------------------------------------------
# The single fused transformer kernel (one grid step = one batch element)
# ----------------------------------------------------------------------------

def _transformer_kernel(*refs, treedef, n_params, num_heads, n_enc, n_dec):
    src_ref, tgt_ref, sbias_ref, tbias_ref = refs[:4]
    param_refs = refs[4:4 + n_params]
    out_ref = refs[4 + n_params]
    P = jax.tree_util.tree_unflatten(treedef, list(param_refs))

    x = src_ref[0]              # (Ss, D) embedded+PE source
    y = tgt_ref[0]              # (St, D) embedded+PE target
    src_bias = sbias_ref[0]     # (1, Ss) key-padding bias (also memory bias)
    tgt_bias = tbias_ref[0]     # (1, St)

    # Encoder stack (TransformerEncoder built with norm=None: no final LN).
    for l in range(n_enc):
        lp = {k: r[l] for k, r in P["enc"].items()}
        x = _encoder_layer(x, lp, src_bias, num_heads)
    memory = x

    # Decoder stack (norm=None: no final LN, and NO causal mask — exactly what
    # TransformerSeparate.forward passes).
    for l in range(n_dec):
        lp = {k: r[l] for k, r in P["dec"].items()}
        y = _decoder_layer(y, memory, lp, tgt_bias, src_bias, num_heads)

    # Final vocab projection; out_w pre-padded to a 128-lane multiple so the
    # store is lane-dense.
    out_ref[0] = _mm(y, P["out_w"][...], P["out_b"][...])


# ----------------------------------------------------------------------------
# Host-side wrapper (glue: embedding gather + PE + masks, then ONE pallas_call)
# ----------------------------------------------------------------------------

def transformer_forward(params, src_tokens, tgt_tokens, *,
                        num_heads, vocab_size, pad_id=0):
    """Reproduces TransformerSeparate.forward (eval / no dropout)."""
    B, Ss = src_tokens.shape
    _, St = tgt_tokens.shape
    emb = params["embedding"]
    pe = params["pe"]
    kp = params["kernel_params"]
    D = emb.shape[1]
    Vp = kp["out_w"].shape[0]
    n_enc = kp["enc"]["attn_in_w"].shape[0]
    n_dec = kp["dec"]["attn_in_w"].shape[0]

    # TODO(synk): embedding gather is data-dependent; kept as one XLA take.
    src = jnp.take(emb, src_tokens, axis=0)          # (B, Ss, D)
    tgt = jnp.take(emb, tgt_tokens, axis=0)          # (B, St, D)

    # PositionalEncoding: the module indexes pe with x.size(0) — the BATCH dim
    # (batch_first=True) — so pe[batch_idx] is broadcast over seq. Reproduced.
    src = src + pe[:B][:, None, :]
    tgt = tgt + pe[:B][:, None, :]

    # Key-padding-only additive biases, shape (B, 1, Sk).
    src_bias = jnp.where((src_tokens == pad_id)[:, None, :], NEG_BIG,
                         0.0).astype(jnp.float32)
    tgt_bias = jnp.where((tgt_tokens == pad_id)[:, None, :], NEG_BIG,
                         0.0).astype(jnp.float32)

    flat, treedef = jax.tree_util.tree_flatten(kp)
    n_params = len(flat)

    kernel = functools.partial(
        _transformer_kernel, treedef=treedef, n_params=n_params,
        num_heads=num_heads, n_enc=n_enc, n_dec=n_dec)

    def full_spec(shape):
        nd = len(shape)
        return pl.BlockSpec(tuple(shape), lambda b, _nd=nd: (0,) * _nd)

    in_specs = [
        pl.BlockSpec((1, Ss, D), lambda b: (b, 0, 0)),
        pl.BlockSpec((1, St, D), lambda b: (b, 0, 0)),
        pl.BlockSpec((1, 1, Ss), lambda b: (b, 0, 0)),
        pl.BlockSpec((1, 1, St), lambda b: (b, 0, 0)),
    ] + [full_spec(a.shape) for a in flat]

    # TODO(synk): activations + full score matrices are VMEM-resident per batch
    # element; for long sequences this needs flash-style Sk tiling (v7x 64 MiB).
    logits_p = pl.pallas_call(
        kernel,
        out_shape=jax.ShapeDtypeStruct((B, St, Vp), jnp.float32),
        grid=(B,),
        in_specs=in_specs,
        out_specs=pl.BlockSpec((1, St, Vp), lambda b: (b, 0, 0)),
        compiler_params=pltpu.CompilerParams(
            dimension_semantics=("parallel",)),
    )(src, tgt, src_bias, tgt_bias, *flat)

    return logits_p[:, :, :vocab_size]


# ----------------------------------------------------------------------------
# Deterministic parameter construction (kernel-layout: built once, no per-call
# pad / reshape / cast)
# ----------------------------------------------------------------------------

def positional_encoding_table(max_len, d_model):
    position = jnp.arange(max_len, dtype=jnp.float32)[:, None]
    div_term = jnp.exp(jnp.arange(0, d_model, 2, dtype=jnp.float32)
                       * (-math.log(10000.0) / d_model))
    pe = jnp.zeros((max_len, d_model), dtype=jnp.float32)
    pe = pe.at[:, 0::2].set(jnp.sin(position * div_term))
    pe = pe.at[:, 1::2].set(jnp.cos(position * div_term))
    return pe


def make_params(key, vocab_size, d_model, dim_ff, n_enc, n_dec,
                pad_id=0, max_len=5000):
    keys = iter(jax.random.split(key, 12 * (n_enc + n_dec) + 4))

    def w(shape, scale=0.02):
        return scale * jax.random.normal(next(keys), shape, dtype=jnp.float32)

    def enc_layer():
        return {
            "attn_in_w": w((3 * d_model, d_model)),
            "attn_in_b": w((1, 3 * d_model)),
            "attn_out_w": w((d_model, d_model)),
            "attn_out_b": w((1, d_model)),
            "ff1_w": w((dim_ff, d_model)),
            "ff1_b": w((1, dim_ff)),
            "ff2_w": w((d_model, dim_ff)),
            "ff2_b": w((1, d_model)),
            "norm1_w": jnp.ones((1, d_model), jnp.float32),
            "norm1_b": jnp.zeros((1, d_model), jnp.float32),
            "norm2_w": jnp.ones((1, d_model), jnp.float32),
            "norm2_b": jnp.zeros((1, d_model), jnp.float32),
        }

    def dec_layer():
        p = enc_layer()
        p.update({
            "cross_in_w": w((3 * d_model, d_model)),
            "cross_in_b": w((1, 3 * d_model)),
            "cross_out_w": w((d_model, d_model)),
            "cross_out_b": w((1, d_model)),
            "norm3_w": jnp.ones((1, d_model), jnp.float32),
            "norm3_b": jnp.zeros((1, d_model), jnp.float32),
        })
        return p

    def stack(layers):
        return {k: jnp.stack([l[k] for l in layers]) for k in layers[0]}

    enc_layers = [enc_layer() for _ in range(n_enc)]
    dec_layers = [dec_layer() for _ in range(n_dec)]

    # Vocab projection pre-padded once to a 128-lane multiple (lane-dense store).
    vocab_pad = _round_up(vocab_size, 128)
    out_w = jnp.zeros((vocab_pad, d_model), jnp.float32)
    out_w = out_w.at[:vocab_size].set(w((vocab_size, d_model)))
    out_b = jnp.zeros((1, vocab_pad), jnp.float32)
    out_b = out_b.at[:, :vocab_size].set(w((1, vocab_size)))

    emb = jax.random.normal(next(keys), (vocab_size, d_model), dtype=jnp.float32)
    emb = emb.at[pad_id].set(0.0)          # nn.Embedding padding_idx row zeroed

    return {
        "embedding": emb,
        "pe": positional_encoding_table(max_len, d_model),
        "kernel_params": {
            "enc": stack(enc_layers),
            "dec": stack(dec_layers),
            "out_w": out_w,
            "out_b": out_b,
        },
    }


# ----------------------------------------------------------------------------
# Main
# ----------------------------------------------------------------------------

if __name__ == "__main__":
    VOCAB = 50
    D_MODEL = 32
    NUM_HEADS = 4
    DIM_FF = 64
    N_ENC = 2
    N_DEC = 2
    PAD_ID = 0
    B, S_SRC, S_TGT = 2, 8, 8

    key = jax.random.PRNGKey(0)
    k_param, k_src, k_tgt = jax.random.split(key, 3)

    params = make_params(k_param, VOCAB, D_MODEL, DIM_FF, N_ENC, N_DEC,
                         pad_id=PAD_ID, max_len=64)

    # Deterministic token inputs; keep first positions non-pad so no attention
    # row is fully masked (same well-posedness condition PyTorch needs).
    src = jax.random.randint(k_src, (B, S_SRC), 1, VOCAB, dtype=jnp.int32)
    tgt = jax.random.randint(k_tgt, (B, S_TGT), 1, VOCAB, dtype=jnp.int32)
    src = src.at[:, -1].set(PAD_ID)   # exercise src / memory key-padding mask

    fwd = jax.jit(functools.partial(transformer_forward,
                                    num_heads=NUM_HEADS, vocab_size=VOCAB,
                                    pad_id=PAD_ID))
    logits = fwd(params, src, tgt)
    logits = jax.block_until_ready(logits)

    assert logits.shape == (B, S_TGT, VOCAB), logits.shape
    assert bool(jnp.all(jnp.isfinite(logits))), "non-finite logits"

    # TODO(synk): dropout (p=0.1) is modelled as identity (eval mode).
    print("KERNEL_OK")
</pallas_src>

<mosaic_0001>
module attributes {stable_mosaic.version = 11 : i64} {
  func.func @_transformer_kernel(%arg0: i32, %arg1: memref<1x8x32xf32, #tpu.memory_space<vmem>>, %arg2: memref<1x8x32xf32, #tpu.memory_space<vmem>>, %arg3: memref<1x1x8xf32, #tpu.memory_space<vmem>>, %arg4: memref<1x1x8xf32, #tpu.memory_space<vmem>>, %arg5: memref<2x1x96xf32, #tpu.memory_space<vmem>>, %arg6: memref<2x96x32xf32, #tpu.memory_space<vmem>>, %arg7: memref<2x1x32xf32, #tpu.memory_space<vmem>>, %arg8: memref<2x32x32xf32, #tpu.memory_space<vmem>>, %arg9: memref<2x1x96xf32, #tpu.memory_space<vmem>>, %arg10: memref<2x96x32xf32, #tpu.memory_space<vmem>>, %arg11: memref<2x1x32xf32, #tpu.memory_space<vmem>>, %arg12: memref<2x32x32xf32, #tpu.memory_space<vmem>>, %arg13: memref<2x1x64xf32, #tpu.memory_space<vmem>>, %arg14: memref<2x64x32xf32, #tpu.memory_space<vmem>>, %arg15: memref<2x1x32xf32, #tpu.memory_space<vmem>>, %arg16: memref<2x32x64xf32, #tpu.memory_space<vmem>>, %arg17: memref<2x1x32xf32, #tpu.memory_space<vmem>>, %arg18: memref<2x1x32xf32, #tpu.memory_space<vmem>>, %arg19: memref<2x1x32xf32, #tpu.memory_space<vmem>>, %arg20: memref<2x1x32xf32, #tpu.memory_space<vmem>>, %arg21: memref<2x1x32xf32, #tpu.memory_space<vmem>>, %arg22: memref<2x1x32xf32, #tpu.memory_space<vmem>>, %arg23: memref<2x1x96xf32, #tpu.memory_space<vmem>>, %arg24: memref<2x96x32xf32, #tpu.memory_space<vmem>>, %arg25: memref<2x1x32xf32, #tpu.memory_space<vmem>>, %arg26: memref<2x32x32xf32, #tpu.memory_space<vmem>>, %arg27: memref<2x1x64xf32, #tpu.memory_space<vmem>>, %arg28: memref<2x64x32xf32, #tpu.memory_space<vmem>>, %arg29: memref<2x1x32xf32, #tpu.memory_space<vmem>>, %arg30: memref<2x32x64xf32, #tpu.memory_space<vmem>>, %arg31: memref<2x1x32xf32, #tpu.memory_space<vmem>>, %arg32: memref<2x1x32xf32, #tpu.memory_space<vmem>>, %arg33: memref<2x1x32xf32, #tpu.memory_space<vmem>>, %arg34: memref<2x1x32xf32, #tpu.memory_space<vmem>>, %arg35: memref<1x128xf32, #tpu.memory_space<vmem>>, %arg36: memref<128x32xf32, #tpu.memory_space<vmem>>, %arg37: memref<1x8x128xf32, #tpu.memory_space<vmem>>) attributes {dimension_semantics = [#tpu.dimension_semantics<parallel>], iteration_bounds = array<i64: 2>, scalar_prefetch = 0 : i64, scratch_operands = 0 : i64, tpu.core_type = #tpu.core_type<tc>, window_params = [{transform_indices = @transform_0, window_bounds = array<i64: 1, 8, 32>}, {transform_indices = @transform_1, window_bounds = array<i64: 1, 8, 32>}, {transform_indices = @transform_2, window_bounds = array<i64: 1, 1, 8>}, {transform_indices = @transform_3, window_bounds = array<i64: 1, 1, 8>}, {pipeline_mode = #tpu.pipeline_mode<synchronous>, transform_indices = @transform_4, window_bounds = array<i64: 2, 1, 96>}, {pipeline_mode = #tpu.pipeline_mode<synchronous>, transform_indices = @transform_5, window_bounds = array<i64: 2, 96, 32>}, {pipeline_mode = #tpu.pipeline_mode<synchronous>, transform_indices = @transform_6, window_bounds = array<i64: 2, 1, 32>}, {pipeline_mode = #tpu.pipeline_mode<synchronous>, transform_indices = @transform_7, window_bounds = array<i64: 2, 32, 32>}, {pipeline_mode = #tpu.pipeline_mode<synchronous>, transform_indices = @transform_8, window_bounds = array<i64: 2, 1, 96>}, {pipeline_mode = #tpu.pipeline_mode<synchronous>, transform_indices = @transform_9, window_bounds = array<i64: 2, 96, 32>}, {pipeline_mode = #tpu.pipeline_mode<synchronous>, transform_indices = @transform_10, window_bounds = array<i64: 2, 1, 32>}, {pipeline_mode = #tpu.pipeline_mode<synchronous>, transform_indices = @transform_11, window_bounds = array<i64: 2, 32, 32>}, {pipeline_mode = #tpu.pipeline_mode<synchronous>, transform_indices = @transform_12, window_bounds = array<i64: 2, 1, 64>}, {pipeline_mode = #tpu.pipeline_mode<synchronous>, transform_indices = @transform_13, window_bounds = array<i64: 2, 64, 32>}, {pipeline_mode = #tpu.pipeline_mode<synchronous>, transform_indices = @transform_14, window_bounds = array<i64: 2, 1, 32>}, {pipeline_mode = #tpu.pipeline_mode<synchronous>, transform_indices = @transform_15, window_bounds = array<i64: 2, 32, 64>}, {pipeline_mode = #tpu.pipeline_mode<synchronous>, transform_indices = @transform_16, window_bounds = array<i64: 2, 1, 32>}, {pipeline_mode = #tpu.pipeline_mode<synchronous>, transform_indices = @transform_17, window_bounds = array<i64: 2, 1, 32>}, {pipeline_mode = #tpu.pipeline_mode<synchronous>, transform_indices = @transform_18, window_bounds = array<i64: 2, 1, 32>}, {pipeline_mode = #tpu.pipeline_mode<synchronous>, transform_indices = @transform_19, window_bounds = array<i64: 2, 1, 32>}, {pipeline_mode = #tpu.pipeline_mode<synchronous>, transform_indices = @transform_20, window_bounds = array<i64: 2, 1, 32>}, {pipeline_mode = #tpu.pipeline_mode<synchronous>, transform_indices = @transform_21, window_bounds = array<i64: 2, 1, 32>}, {pipeline_mode = #tpu.pipeline_mode<synchronous>, transform_indices = @transform_22, window_bounds = array<i64: 2, 1, 96>}, {pipeline_mode = #tpu.pipeline_mode<synchronous>, transform_indices = @transform_23, window_bounds = array<i64: 2, 96, 32>}, {pipeline_mode = #tpu.pipeline_mode<synchronous>, transform_indices = @transform_24, window_bounds = array<i64: 2, 1, 32>}, {pipeline_mode = #tpu.pipeline_mode<synchronous>, transform_indices = @transform_25, window_bounds = array<i64: 2, 32, 32>}, {pipeline_mode = #tpu.pipeline_mode<synchronous>, transform_indices = @transform_26, window_bounds = array<i64: 2, 1, 64>}, {pipeline_mode = #tpu.pipeline_mode<synchronous>, transform_indices = @transform_27, window_bounds = array<i64: 2, 64, 32>}, {pipeline_mode = #tpu.pipeline_mode<synchronous>, transform_indices = @transform_28, window_bounds = array<i64: 2, 1, 32>}, {pipeline_mode = #tpu.pipeline_mode<synchronous>, transform_indices = @transform_29, window_bounds = array<i64: 2, 32, 64>}, {pipeline_mode = #tpu.pipeline_mode<synchronous>, transform_indices = @transform_30, window_bounds = array<i64: 2, 1, 32>}, {pipeline_mode = #tpu.pipeline_mode<synchronous>, transform_indices = @transform_31, window_bounds = array<i64: 2, 1, 32>}, {pipeline_mode = #tpu.pipeline_mode<synchronous>, transform_indices = @transform_32, window_bounds = array<i64: 2, 1, 32>}, {pipeline_mode = #tpu.pipeline_mode<synchronous>, transform_indices = @transform_33, window_bounds = array<i64: 2, 1, 32>}, {pipeline_mode = #tpu.pipeline_mode<synchronous>, transform_indices = @transform_34, window_bounds = array<i64: 1, 128>}, {pipeline_mode = #tpu.pipeline_mode<synchronous>, transform_indices = @transform_35, window_bounds = array<i64: 128, 32>}, {transform_indices = @transform_36, window_bounds = array<i64: 1, 8, 128>}]} {
    %c0 = arith.constant 0 : index
    %c0_0 = arith.constant 0 : index
    %c0_1 = arith.constant 0 : index
    %0 = vector.load %arg1[%c0, %c0_0, %c0_1] : memref<1x8x32xf32, #tpu.memory_space<vmem>>, vector<1x8x32xf32>
    %1 = vector.shape_cast %0 : vector<1x8x32xf32> to vector<8x32xf32>
    %c0_2 = arith.constant 0 : index
    %c0_3 = arith.constant 0 : index
    %c0_4 = arith.constant 0 : index
    %2 = vector.load %arg2[%c0_2, %c0_3, %c0_4] : memref<1x8x32xf32, #tpu.memory_space<vmem>>, vector<1x8x32xf32>
    %3 = vector.shape_cast %2 : vector<1x8x32xf32> to vector<8x32xf32>
    %c0_5 = arith.constant 0 : index
    %c0_6 = arith.constant 0 : index
    %c0_7 = arith.constant 0 : index
    %4 = vector.load %arg3[%c0_5, %c0_6, %c0_7] : memref<1x1x8xf32, #tpu.memory_space<vmem>>, vector<1x1x8xf32>
    %5 = vector.shape_cast %4 : vector<1x1x8xf32> to vector<1x8xf32>
    %c0_8 = arith.constant 0 : index
    %c0_9 = arith.constant 0 : index
    %c0_10 = arith.constant 0 : index
    %6 = vector.load %arg4[%c0_8, %c0_9, %c0_10] : memref<1x1x8xf32, #tpu.memory_space<vmem>>, vector<1x1x8xf32>
    %7 = vector.shape_cast %6 : vector<1x1x8xf32> to vector<1x8xf32>
    %c0_11 = arith.constant 0 : index
    %c0_12 = arith.constant 0 : index
    %c0_13 = arith.constant 0 : index
    %8 = vector.load %arg23[%c0_11, %c0_12, %c0_13] : memref<2x1x96xf32, #tpu.memory_space<vmem>>, vector<1x1x96xf32>
    %9 = vector.shape_cast %8 : vector<1x1x96xf32> to vector<1x96xf32>
    %c0_14 = arith.constant 0 : index
    %c0_15 = arith.constant 0 : index
    %c0_16 = arith.constant 0 : index
    %10 = vector.load %arg24[%c0_14, %c0_15, %c0_16] : memref<2x96x32xf32, #tpu.memory_space<vmem>>, vector<1x96x32xf32>
    %11 = vector.shape_cast %10 : vector<1x96x32xf32> to vector<96x32xf32>
    %c0_17 = arith.constant 0 : index
    %c0_18 = arith.constant 0 : index
    %c0_19 = arith.constant 0 : index
    %12 = vector.load %arg25[%c0_17, %c0_18, %c0_19] : memref<2x1x32xf32, #tpu.memory_space<vmem>>, vector<1x1x32xf32>
    %13 = vector.shape_cast %12 : vector<1x1x32xf32> to vector<1x32xf32>
    %c0_20 = arith.constant 0 : index
    %c0_21 = arith.constant 0 : index
    %c0_22 = arith.constant 0 : index
    %14 = vector.load %arg26[%c0_20, %c0_21, %c0_22] : memref<2x32x32xf32, #tpu.memory_space<vmem>>, vector<1x32x32xf32>
    %15 = vector.shape_cast %14 : vector<1x32x32xf32> to vector<32x32xf32>
    %c0_23 = arith.constant 0 : index
    %c0_24 = arith.constant 0 : index
    %c0_25 = arith.constant 0 : index
    %16 = vector.load %arg27[%c0_23, %c0_24, %c0_25] : memref<2x1x64xf32, #tpu.memory_space<vmem>>, vector<1x1x64xf32>
    %17 = vector.shape_cast %16 : vector<1x1x64xf32> to vector<1x64xf32>
    %c0_26 = arith.constant 0 : index
    %c0_27 = arith.constant 0 : index
    %c0_28 = arith.constant 0 : index
    %18 = vector.load %arg28[%c0_26, %c0_27, %c0_28] : memref<2x64x32xf32, #tpu.memory_space<vmem>>, vector<1x64x32xf32>
    %19 = vector.shape_cast %18 : vector<1x64x32xf32> to vector<64x32xf32>
    %c0_29 = arith.constant 0 : index
    %c0_30 = arith.constant 0 : index
    %c0_31 = arith.constant 0 : index
    %20 = vector.load %arg29[%c0_29, %c0_30, %c0_31] : memref<2x1x32xf32, #tpu.memory_space<vmem>>, vector<1x1x32xf32>
    %21 = vector.shape_cast %20 : vector<1x1x32xf32> to vector<1x32xf32>
    %c0_32 = arith.constant 0 : index
    %c0_33 = arith.constant 0 : index
    %c0_34 = arith.constant 0 : index
    %22 = vector.load %arg30[%c0_32, %c0_33, %c0_34] : memref<2x32x64xf32, #tpu.memory_space<vmem>>, vector<1x32x64xf32>
    %23 = vector.shape_cast %22 : vector<1x32x64xf32> to vector<32x64xf32>
    %c0_35 = arith.constant 0 : index
    %c0_36 = arith.constant 0 : index
    %c0_37 = arith.constant 0 : index
    %24 = vector.load %arg31[%c0_35, %c0_36, %c0_37] : memref<2x1x32xf32, #tpu.memory_space<vmem>>, vector<1x1x32xf32>
    %25 = vector.shape_cast %24 : vector<1x1x32xf32> to vector<1x32xf32>
    %c0_38 = arith.constant 0 : index
    %c0_39 = arith.constant 0 : index
    %c0_40 = arith.constant 0 : index
    %26 = vector.load %arg32[%c0_38, %c0_39, %c0_40] : memref<2x1x32xf32, #tpu.memory_space<vmem>>, vector<1x1x32xf32>
    %27 = vector.shape_cast %26 : vector<1x1x32xf32> to vector<1x32xf32>
    %c0_41 = arith.constant 0 : index
    %c0_42 = arith.constant 0 : index
    %c0_43 = arith.constant 0 : index
    %28 = vector.load %arg33[%c0_41, %c0_42, %c0_43] : memref<2x1x32xf32, #tpu.memory_space<vmem>>, vector<1x1x32xf32>
    %29 = vector.shape_cast %28 : vector<1x1x32xf32> to vector<1x32xf32>
    %c0_44 = arith.constant 0 : index
    %c0_45 = arith.constant 0 : index
    %c0_46 = arith.constant 0 : index
    %30 = vector.load %arg34[%c0_44, %c0_45, %c0_46] : memref<2x1x32xf32, #tpu.memory_space<vmem>>, vector<1x1x32xf32>
    %31 = vector.shape_cast %30 : vector<1x1x32xf32> to vector<1x32xf32>
    %32 = vector.extract_strided_slice %11 {offsets = [0, 0], sizes = [32, 32], strides = [1, 1]} : vector<96x32xf32> to vector<32x32xf32>
    %33 = vector.extract_strided_slice %9 {offsets = [0, 0], sizes = [1, 32], strides = [1, 1]} : vector<1x96xf32> to vector<1x32xf32>
    %cst = arith.constant dense<0.000000e+00> : vector<8x32xf32>
    %34 = tpu.matmul %1, %32, %cst {dimension_numbers = #tpu.dot_dimension_numbers<[1], [1], [0], [0], [0, 0, 1, 0], [], []>} : vector<8x32xf32>, vector<32x32xf32>, vector<8x32xf32> -> vector<8x32xf32>
    %35 = vector.broadcast %33 : vector<1x32xf32> to vector<8x32xf32>
    %36 = arith.addf %34, %35 : vector<8x32xf32>
    %37 = vector.extract_strided_slice %11 {offsets = [32, 0], sizes = [32, 32], strides = [1, 1]} : vector<96x32xf32> to vector<32x32xf32>
    %38 = vector.extract_strided_slice %9 {offsets = [0, 32], sizes = [1, 32], strides = [1, 1]} : vector<1x96xf32> to vector<1x32xf32>
    %cst_47 = arith.constant dense<0.000000e+00> : vector<8x32xf32>
    %39 = tpu.matmul %1, %37, %cst_47 {dimension_numbers = #tpu.dot_dimension_numbers<[1], [1], [0], [0], [0, 0, 1, 0], [], []>} : vector<8x32xf32>, vector<32x32xf32>, vector<8x32xf32> -> vector<8x32xf32>
    %40 = vector.broadcast %38 : vector<1x32xf32> to vector<8x32xf32>
    %41 = arith.addf %39, %40 : vector<8x32xf32>
    %42 = vector.extract_strided_slice %11 {offsets = [64, 0], sizes = [32, 32], strides = [1, 1]} : vector<96x32xf32> to vector<32x32xf32>
    %43 = vector.extract_strided_slice %9 {offsets = [0, 64], sizes = [1, 32], strides = [1, 1]} : vector<1x96xf32> to vector<1x32xf32>
    %cst_48 = arith.constant dense<0.000000e+00> : vector<8x32xf32>
    %44 = tpu.matmul %1, %42, %cst_48 {dimension_numbers = #tpu.dot_dimension_numbers<[1], [1], [0], [0], [0, 0, 1, 0], [], []>} : vector<8x32xf32>, vector<32x32xf32>, vector<8x32xf32> -> vector<8x32xf32>
    %45 = vector.broadcast %43 : vector<1x32xf32> to vector<8x32xf32>
    %46 = arith.addf %44, %45 : vector<8x32xf32>
    %47 = vector.extract_strided_slice %36 {offsets = [0, 0], sizes = [8, 8], strides = [1, 1]} : vector<8x32xf32> to vector<8x8xf32>
    %48 = vector.extract_strided_slice %41 {offsets = [0, 0], sizes = [8, 8], strides = [1, 1]} : vector<8x32xf32> to vector<8x8xf32>
    %cst_49 = arith.constant dense<0.000000e+00> : vector<8x8xf32>
    %49 = tpu.matmul %47, %48, %cst_49 {dimension_numbers = #tpu.dot_dimension_numbers<[1], [1], [0], [0], [0, 0, 1, 0], [], []>} : vector<8x8xf32>, vector<8x8xf32>, vector<8x8xf32> -> vector<8x8xf32>
    %cst_50 = arith.constant 0.353553385 : f32
    %50 = vector.broadcast %cst_50 : f32 to vector<8x8xf32>
    %51 = arith.mulf %49, %50 : vector<8x8xf32>
    %52 = vector.broadcast %5 : vector<1x8xf32> to vector<8x8xf32>
    %53 = arith.addf %51, %52 : vector<8x8xf32>
    %cst_51 = arith.constant dense<0xFF800000> : vector<8xf32>
    %54 = vector.multi_reduction <maximumf>, %53, %cst_51 [1] : vector<8x8xf32> to vector<8xf32>
    %55 = vector.shape_cast %54 : vector<8xf32> to vector<8x1xf32>
    %56 = vector.broadcast %55 : vector<8x1xf32> to vector<8x8xf32>
    %57 = arith.subf %53, %56 : vector<8x8xf32>
    %58 = math.exp %57 : vector<8x8xf32>
    %cst_52 = arith.constant dense<0.000000e+00> : vector<8xf32>
    %59 = vector.multi_reduction <add>, %58, %cst_52 [1] : vector<8x8xf32> to vector<8xf32>
    %60 = vector.shape_cast %59 : vector<8xf32> to vector<8x1xf32>
    %61 = vector.broadcast %60 : vector<8x1xf32> to vector<8x8xf32>
    %62 = arith.divf %58, %61 : vector<8x8xf32>
    %63 = vector.extract_strided_slice %46 {offsets = [0, 0], sizes = [8, 8], strides = [1, 1]} : vector<8x32xf32> to vector<8x8xf32>
    %cst_53 = arith.constant dense<0.000000e+00> : vector<8x8xf32>
    %64 = tpu.matmul %62, %63, %cst_53 {dimension_numbers = #tpu.dot_dimension_numbers<[1], [0], [0], [1], [0, 0, 1, 1], [], []>} : vector<8x8xf32>, vector<8x8xf32>, vector<8x8xf32> -> vector<8x8xf32>
    %65 = vector.extract_strided_slice %15 {offsets = [0, 0], sizes = [32, 8], strides = [1, 1]} : vector<32x32xf32> to vector<32x8xf32>
    %cst_54 = arith.constant dense<0.000000e+00> : vector<8x32xf32>
    %66 = tpu.matmul %64, %65, %cst_54 {dimension_numbers = #tpu.dot_dimension_numbers<[1], [1], [0], [0], [0, 0, 1, 0], [], []>} : vector<8x8xf32>, vector<32x8xf32>, vector<8x32xf32> -> vector<8x32xf32>
    %67 = vector.extract_strided_slice %36 {offsets = [0, 8], sizes = [8, 8], strides = [1, 1]} : vector<8x32xf32> to vector<8x8xf32>
    %68 = vector.extract_strided_slice %41 {offsets = [0, 8], sizes = [8, 8], strides = [1, 1]} : vector<8x32xf32> to vector<8x8xf32>
    %cst_55 = arith.constant dense<0.000000e+00> : vector<8x8xf32>
    %69 = tpu.matmul %67, %68, %cst_55 {dimension_numbers = #tpu.dot_dimension_numbers<[1], [1], [0], [0], [0, 0, 1, 0], [], []>} : vector<8x8xf32>, vector<8x8xf32>, vector<8x8xf32> -> vector<8x8xf32>
    %cst_56 = arith.constant 0.353553385 : f32
    %70 = vector.broadcast %cst_56 : f32 to vector<8x8xf32>
    %71 = arith.mulf %69, %70 : vector<8x8xf32>
    %72 = vector.broadcast %5 : vector<1x8xf32> to vector<8x8xf32>
    %73 = arith.addf %71, %72 : vector<8x8xf32>
    %cst_57 = arith.constant dense<0xFF800000> : vector<8xf32>
    %74 = vector.multi_reduction <maximumf>, %73, %cst_57 [1] : vector<8x8xf32> to vector<8xf32>
    %75 = vector.shape_cast %74 : vector<8xf32> to vector<8x1xf32>
    %76 = vector.broadcast %75 : vector<8x1xf32> to vector<8x8xf32>
    %77 = arith.subf %73, %76 : vector<8x8xf32>
    %78 = math.exp %77 : vector<8x8xf32>
    %cst_58 = arith.constant dense<0.000000e+00> : vector<8xf32>
    %79 = vector.multi_reduction <add>, %78, %cst_58 [1] : vector<8x8xf32> to vector<8xf32>
    %80 = vector.shape_cast %79 : vector<8xf32> to vector<8x1xf32>
    %81 = vector.broadcast %80 : vector<8x1xf32> to vector<8x8xf32>
    %82 = arith.divf %78, %81 : vector<8x8xf32>
    %83 = vector.extract_strided_slice %46 {offsets = [0, 8], sizes = [8, 8], strides = [1, 1]} : vector<8x32xf32> to vector<8x8xf32>
    %cst_59 = arith.constant dense<0.000000e+00> : vector<8x8xf32>
    %84 = tpu.matmul %82, %83, %cst_59 {dimension_numbers = #tpu.dot_dimension_numbers<[1], [0], [0], [1], [0, 0, 1, 1], [], []>} : vector<8x8xf32>, vector<8x8xf32>, vector<8x8xf32> -> vector<8x8xf32>
    %85 = vector.extract_strided_slice %15 {offsets = [0, 8], sizes = [32, 8], strides = [1, 1]} : vector<32x32xf32> to vector<32x8xf32>
    %cst_60 = arith.constant dense<0.000000e+00> : vector<8x32xf32>
    %86 = tpu.matmul %84, %85, %cst_60 {dimension_numbers = #tpu.dot_dimension_numbers<[1], [1], [0], [0], [0, 0, 1, 0], [], []>} : vector<8x8xf32>, vector<32x8xf32>, vector<8x32xf32> -> vector<8x32xf32>
    %87 = arith.addf %66, %86 : vector<8x32xf32>
    %88 = vector.extract_strided_slice %36 {offsets = [0, 16], sizes = [8, 8], strides = [1, 1]} : vector<8x32xf32> to vector<8x8xf32>
    %89 = vector.extract_strided_slice %41 {offsets = [0, 16], sizes = [8, 8], strides = [1, 1]} : vector<8x32xf32> to vector<8x8xf32>
    %cst_61 = arith.constant dense<0.000000e+00> : vector<8x8xf32>
    %90 = tpu.matmul %88, %89, %cst_61 {dimension_numbers = #tpu.dot_dimension_numbers<[1], [1], [0], [0], [0, 0, 1, 0], [], []>} : vector<8x8xf32>, vector<8x8xf32>, vector<8x8xf32> -> vector<8x8xf32>
    %cst_62 = arith.constant 0.353553385 : f32
    %91 = vector.broadcast %cst_62 : f32 to vector<8x8xf32>
    %92 = arith.mulf %90, %91 : vector<8x8xf32>
    %93 = vector.broadcast %5 : vector<1x8xf32> to vector<8x8xf32>
    %94 = arith.addf %92, %93 : vector<8x8xf32>
    %cst_63 = arith.constant dense<0xFF800000> : vector<8xf32>
    %95 = vector.multi_reduction <maximumf>, %94, %cst_63 [1] : vector<8x8xf32> to vector<8xf32>
    %96 = vector.shape_cast %95 : vector<8xf32> to vector<8x1xf32>
    %97 = vector.broadcast %96 : vector<8x1xf32> to vector<8x8xf32>
    %98 = arith.subf %94, %97 : vector<8x8xf32>
    %99 = math.exp %98 : vector<8x8xf32>
    %cst_64 = arith.constant dense<0.000000e+00> : vector<8xf32>
    %100 = vector.multi_reduction <add>, %99, %cst_64 [1] : vector<8x8xf32> to vector<8xf32>
    %101 = vector.shape_cast %100 : vector<8xf32> to vector<8x1xf32>
    %102 = vector.broadcast %101 : vector<8x1xf32> to vector<8x8xf32>
    %103 = arith.divf %99, %102 : vector<8x8xf32>
    %104 = vector.extract_strided_slice %46 {offsets = [0, 16], sizes = [8, 8], strides = [1, 1]} : vector<8x32xf32> to vector<8x8xf32>
    %cst_65 = arith.constant dense<0.000000e+00> : vector<8x8xf32>
    %105 = tpu.matmul %103, %104, %cst_65 {dimension_numbers = #tpu.dot_dimension_numbers<[1], [0], [0], [1], [0, 0, 1, 1], [], []>} : vector<8x8xf32>, vector<8x8xf32>, vector<8x8xf32> -> vector<8x8xf32>
    %106 = vector.extract_strided_slice %15 {offsets = [0, 16], sizes = [32, 8], strides = [1, 1]} : vector<32x32xf32> to vector<32x8xf32>
    %cst_66 = arith.constant dense<0.000000e+00> : vector<8x32xf32>
    %107 = tpu.matmul %105, %106, %cst_66 {dimension_numbers = #tpu.dot_dimension_numbers<[1], [1], [0], [0], [0, 0, 1, 0], [], []>} : vector<8x8xf32>, vector<32x8xf32>, vector<8x32xf32> -> vector<8x32xf32>
    %108 = arith.addf %87, %107 : vector<8x32xf32>
    %109 = vector.extract_strided_slice %36 {offsets = [0, 24], sizes = [8, 8], strides = [1, 1]} : vector<8x32xf32> to vector<8x8xf32>
    %110 = vector.extract_strided_slice %41 {offsets = [0, 24], sizes = [8, 8], strides = [1, 1]} : vector<8x32xf32> to vector<8x8xf32>
    %cst_67 = arith.constant dense<0.000000e+00> : vector<8x8xf32>
    %111 = tpu.matmul %109, %110, %cst_67 {dimension_numbers = #tpu.dot_dimension_numbers<[1], [1], [0], [0], [0, 0, 1, 0], [], []>} : vector<8x8xf32>, vector<8x8xf32>, vector<8x8xf32> -> vector<8x8xf32>
    %cst_68 = arith.constant 0.353553385 : f32
    %112 = vector.broadcast %cst_68 : f32 to vector<8x8xf32>
    %113 = arith.mulf %111, %112 : vector<8x8xf32>
    %114 = vector.broadcast %5 : vector<1x8xf32> to vector<8x8xf32>
    %115 = arith.addf %113, %114 : vector<8x8xf32>
    %cst_69 = arith.constant dense<0xFF800000> : vector<8xf32>
    %116 = vector.multi_reduction <maximumf>, %115, %cst_69 [1] : vector<8x8xf32> to vector<8xf32>
    %117 = vector.shape_cast %116 : vector<8xf32> to vector<8x1xf32>
    %118 = vector.broadcast %117 : vector<8x1xf32> to vector<8x8xf32>
    %119 = arith.subf %115, %118 : vector<8x8xf32>
    %120 = math.exp %119 : vector<8x8xf32>
    %cst_70 = arith.constant dense<0.000000e+00> : vector<8xf32>
    %121 = vector.multi_reduction <add>, %120, %cst_70 [1] : vector<8x8xf32> to vector<8xf32>
    %122 = vector.shape_cast %121 : vector<8xf32> to vector<8x1xf32>
    %123 = vector.broadcast %122 : vector<8x1xf32> to vector<8x8xf32>
    %124 = arith.divf %120, %123 : vector<8x8xf32>
    %125 = vector.extract_strided_slice %46 {offsets = [0, 24], sizes = [8, 8], strides = [1, 1]} : vector<8x32xf32> to vector<8x8xf32>
    %cst_71 = arith.constant dense<0.000000e+00> : vector<8x8xf32>
    %126 = tpu.matmul %124, %125, %cst_71 {dimension_numbers = #tpu.dot_dimension_numbers<[1], [0], [0], [1], [0, 0, 1, 1], [], []>} : vector<8x8xf32>, vector<8x8xf32>, vector<8x8xf32> -> vector<8x8xf32>
    %127 = vector.extract_strided_slice %15 {offsets = [0, 24], sizes = [32, 8], strides = [1, 1]} : vector<32x32xf32> to vector<32x8xf32>
    %cst_72 = arith.constant dense<0.000000e+00> : vector<8x32xf32>
    %128 = tpu.matmul %126, %127, %cst_72 {dimension_numbers = #tpu.dot_dimension_numbers<[1], [1], [0], [0], [0, 0, 1, 0], [], []>} : vector<8x8xf32>, vector<32x8xf32>, vector<8x32xf32> -> vector<8x32xf32>
    %129 = arith.addf %108, %128 : vector<8x32xf32>
    %130 = vector.broadcast %13 : vector<1x32xf32> to vector<8x32xf32>
    %131 = arith.addf %129, %130 : vector<8x32xf32>
    %132 = arith.addf %1, %131 : vector<8x32xf32>
    %cst_73 = arith.constant dense<0.000000e+00> : vector<8xf32>
    %133 = vector.multi_reduction <add>, %132, %cst_73 [1] : vector<8x32xf32> to vector<8xf32>
    %134 = vector.shape_cast %133 : vector<8xf32> to vector<8x1xf32>
    %cst_74 = arith.constant 3.200000e+01 : f32
    %135 = vector.broadcast %cst_74 : f32 to vector<8x1xf32>
    %136 = arith.divf %134, %135 : vector<8x1xf32>
    %137 = vector.broadcast %136 : vector<8x1xf32> to vector<8x32xf32>
    %138 = arith.subf %132, %137 : vector<8x32xf32>
    %139 = arith.mulf %138, %138 : vector<8x32xf32>
    %cst_75 = arith.constant dense<0.000000e+00> : vector<8xf32>
    %140 = vector.multi_reduction <add>, %139, %cst_75 [1] : vector<8x32xf32> to vector<8xf32>
    %141 = vector.shape_cast %140 : vector<8xf32> to vector<8x1xf32>
    %cst_76 = arith.constant 3.200000e+01 : f32
    %142 = vector.broadcast %cst_76 : f32 to vector<8x1xf32>
    %143 = arith.divf %141, %142 : vector<8x1xf32>
    %cst_77 = arith.constant 9.99999974E-6 : f32
    %144 = vector.broadcast %cst_77 : f32 to vector<8x1xf32>
    %145 = arith.addf %143, %144 : vector<8x1xf32>
    %146 = math.rsqrt %145 : vector<8x1xf32>
    %147 = vector.broadcast %146 : vector<8x1xf32> to vector<8x32xf32>
    %148 = arith.mulf %138, %147 : vector<8x32xf32>
    %149 = vector.broadcast %27 : vector<1x32xf32> to vector<8x32xf32>
    %150 = arith.mulf %148, %149 : vector<8x32xf32>
    %151 = vector.broadcast %25 : vector<1x32xf32> to vector<8x32xf32>
    %152 = arith.addf %150, %151 : vector<8x32xf32>
    %cst_78 = arith.constant dense<0.000000e+00> : vector<8x64xf32>
    %153 = tpu.matmul %152, %19, %cst_78 {dimension_numbers = #tpu.dot_dimension_numbers<[1], [1], [0], [0], [0, 0, 1, 0], [], []>} : vector<8x32xf32>, vector<64x32xf32>, vector<8x64xf32> -> vector<8x64xf32>
    %154 = vector.broadcast %17 : vector<1x64xf32> to vector<8x64xf32>
    %155 = arith.addf %153, %154 : vector<8x64xf32>
    %cst_79 = arith.constant 0.000000e+00 : f32
    %156 = vector.broadcast %cst_79 : f32 to vector<8x64xf32>
    %157 = arith.maximumf %155, %156 : vector<8x64xf32>
    %cst_80 = arith.constant dense<0.000000e+00> : vector<8x32xf32>
    %158 = tpu.matmul %157, %23, %cst_80 {dimension_numbers = #tpu.dot_dimension_numbers<[1], [1], [0], [0], [0, 0, 1, 0], [], []>} : vector<8x64xf32>, vector<32x64xf32>, vector<8x32xf32> -> vector<8x32xf32>
    %159 = vector.broadcast %21 : vector<1x32xf32> to vector<8x32xf32>
    %160 = arith.addf %158, %159 : vector<8x32xf32>
    %161 = arith.addf %152, %160 : vector<8x32xf32>
    %cst_81 = arith.constant dense<0.000000e+00> : vector<8xf32>
    %162 = vector.multi_reduction <add>, %161, %cst_81 [1] : vector<8x32xf32> to vector<8xf32>
    %163 = vector.shape_cast %162 : vector<8xf32> to vector<8x1xf32>
    %cst_82 = arith.constant 3.200000e+01 : f32
    %164 = vector.broadcast %cst_82 : f32 to vector<8x1xf32>
    %165 = arith.divf %163, %164 : vector<8x1xf32>
    %166 = vector.broadcast %165 : vector<8x1xf32> to vector<8x32xf32>
    %167 = arith.subf %161, %166 : vector<8x32xf32>
    %168 = arith.mulf %167, %167 : vector<8x32xf32>
    %cst_83 = arith.constant dense<0.000000e+00> : vector<8xf32>
    %169 = vector.multi_reduction <add>, %168, %cst_83 [1] : vector<8x32xf32> to vector<8xf32>
    %170 = vector.shape_cast %169 : vector<8xf32> to vector<8x1xf32>
    %cst_84 = arith.constant 3.200000e+01 : f32
    %171 = vector.broadcast %cst_84 : f32 to vector<8x1xf32>
    %172 = arith.divf %170, %171 : vector<8x1xf32>
    %cst_85 = arith.constant 9.99999974E-6 : f32
    %173 = vector.broadcast %cst_85 : f32 to vector<8x1xf32>
    %174 = arith.addf %172, %173 : vector<8x1xf32>
    %175 = math.rsqrt %174 : vector<8x1xf32>
    %176 = vector.broadcast %175 : vector<8x1xf32> to vector<8x32xf32>
    %177 = arith.mulf %167, %176 : vector<8x32xf32>
    %178 = vector.broadcast %31 : vector<1x32xf32> to vector<8x32xf32>
    %179 = arith.mulf %177, %178 : vector<8x32xf32>
    %180 = vector.broadcast %29 : vector<1x32xf32> to vector<8x32xf32>
    %181 = arith.addf %179, %180 : vector<8x32xf32>
    %c1 = arith.constant 1 : index
    %c0_86 = arith.constant 0 : index
    %c0_87 = arith.constant 0 : index
    %182 = vector.load %arg23[%c1, %c0_86, %c0_87] : memref<2x1x96xf32, #tpu.memory_space<vmem>>, vector<1x1x96xf32>
    %183 = vector.shape_cast %182 : vector<1x1x96xf32> to vector<1x96xf32>
    %c1_88 = arith.constant 1 : index
    %c0_89 = arith.constant 0 : index
    %c0_90 = arith.constant 0 : index
    %184 = vector.load %arg24[%c1_88, %c0_89, %c0_90] : memref<2x96x32xf32, #tpu.memory_space<vmem>>, vector<1x96x32xf32>
    %185 = vector.shape_cast %184 : vector<1x96x32xf32> to vector<96x32xf32>
    %c1_91 = arith.constant 1 : index
    %c0_92 = arith.constant 0 : index
    %c0_93 = arith.constant 0 : index
    %186 = vector.load %arg25[%c1_91, %c0_92, %c0_93] : memref<2x1x32xf32, #tpu.memory_space<vmem>>, vector<1x1x32xf32>
    %187 = vector.shape_cast %186 : vector<1x1x32xf32> to vector<1x32xf32>
    %c1_94 = arith.constant 1 : index
    %c0_95 = arith.constant 0 : index
    %c0_96 = arith.constant 0 : index
    %188 = vector.load %arg26[%c1_94, %c0_95, %c0_96] : memref<2x32x32xf32, #tpu.memory_space<vmem>>, vector<1x32x32xf32>
    %189 = vector.shape_cast %188 : vector<1x32x32xf32> to vector<32x32xf32>
    %c1_97 = arith.constant 1 : index
    %c0_98 = arith.constant 0 : index
    %c0_99 = arith.constant 0 : index
    %190 = vector.load %arg27[%c1_97, %c0_98, %c0_99] : memref<2x1x64xf32, #tpu.memory_space<vmem>>, vector<1x1x64xf32>
    %191 = vector.shape_cast %190 : vector<1x1x64xf32> to vector<1x64xf32>
    %c1_100 = arith.constant 1 : index
    %c0_101 = arith.constant 0 : index
    %c0_102 = arith.constant 0 : index
    %192 = vector.load %arg28[%c1_100, %c0_101, %c0_102] : memref<2x64x32xf32, #tpu.memory_space<vmem>>, vector<1x64x32xf32>
    %193 = vector.shape_cast %192 : vector<1x64x32xf32> to vector<64x32xf32>
    %c1_103 = arith.constant 1 : index
    %c0_104 = arith.constant 0 : index
    %c0_105 = arith.constant 0 : index
    %194 = vector.load %arg29[%c1_103, %c0_104, %c0_105] : memref<2x1x32xf32, #tpu.memory_space<vmem>>, vector<1x1x32xf32>
    %195 = vector.shape_cast %194 : vector<1x1x32xf32> to vector<1x32xf32>
    %c1_106 = arith.constant 1 : index
    %c0_107 = arith.constant 0 : index
    %c0_108 = arith.constant 0 : index
    %196 = vector.load %arg30[%c1_106, %c0_107, %c0_108] : memref<2x32x64xf32, #tpu.memory_space<vmem>>, vector<1x32x64xf32>
    %197 = vector.shape_cast %196 : vector<1x32x64xf32> to vector<32x64xf32>
    %c1_109 = arith.constant 1 : index
    %c0_110 = arith.constant 0 : index
    %c0_111 = arith.constant 0 : index
    %198 = vector.load %arg31[%c1_109, %c0_110, %c0_111] : memref<2x1x32xf32, #tpu.memory_space<vmem>>, vector<1x1x32xf32>
    %199 = vector.shape_cast %198 : vector<1x1x32xf32> to vector<1x32xf32>
    %c1_112 = arith.constant 1 : index
    %c0_113 = arith.constant 0 : index
    %c0_114 = arith.constant 0 : index
    %200 = vector.load %arg32[%c1_112, %c0_113, %c0_114] : memref<2x1x32xf32, #tpu.memory_space<vmem>>, vector<1x1x32xf32>
    %201 = vector.shape_cast %200 : vector<1x1x32xf32> to vector<1x32xf32>
    %c1_115 = arith.constant 1 : index
    %c0_116 = arith.constant 0 : index
    %c0_117 = arith.constant 0 : index
    %202 = vector.load %arg33[%c1_115, %c0_116, %c0_117] : memref<2x1x32xf32, #tpu.memory_space<vmem>>, vector<1x1x32xf32>
    %203 = vector.shape_cast %202 : vector<1x1x32xf32> to vector<1x32xf32>
    %c1_118 = arith.constant 1 : index
    %c0_119 = arith.constant 0 : index
    %c0_120 = arith.constant 0 : index
    %204 = vector.load %arg34[%c1_118, %c0_119, %c0_120] : memref<2x1x32xf32, #tpu.memory_space<vmem>>, vector<1x1x32xf32>
    %205 = vector.shape_cast %204 : vector<1x1x32xf32> to vector<1x32xf32>
    %206 = vector.extract_strided_slice %185 {offsets = [0, 0], sizes = [32, 32], strides = [1, 1]} : vector<96x32xf32> to vector<32x32xf32>
    %207 = vector.extract_strided_slice %183 {offsets = [0, 0], sizes = [1, 32], strides = [1, 1]} : vector<1x96xf32> to vector<1x32xf32>
    %cst_121 = arith.constant dense<0.000000e+00> : vector<8x32xf32>
    %208 = tpu.matmul %181, %206, %cst_121 {dimension_numbers = #tpu.dot_dimension_numbers<[1], [1], [0], [0], [0, 0, 1, 0], [], []>} : vector<8x32xf32>, vector<32x32xf32>, vector<8x32xf32> -> vector<8x32xf32>
    %209 = vector.broadcast %207 : vector<1x32xf32> to vector<8x32xf32>
    %210 = arith.addf %208, %209 : vector<8x32xf32>
    %211 = vector.extract_strided_slice %185 {offsets = [32, 0], sizes = [32, 32], strides = [1, 1]} : vector<96x32xf32> to vector<32x32xf32>
    %212 = vector.extract_strided_slice %183 {offsets = [0, 32], sizes = [1, 32], strides = [1, 1]} : vector<1x96xf32> to vector<1x32xf32>
    %cst_122 = arith.constant dense<0.000000e+00> : vector<8x32xf32>
    %213 = tpu.matmul %181, %211, %cst_122 {dimension_numbers = #tpu.dot_dimension_numbers<[1], [1], [0], [0], [0, 0, 1, 0], [], []>} : vector<8x32xf32>, vector<32x32xf32>, vector<8x32xf32> -> vector<8x32xf32>
    %214 = vector.broadcast %212 : vector<1x32xf32> to vector<8x32xf32>
    %215 = arith.addf %213, %214 : vector<8x32xf32>
    %216 = vector.extract_strided_slice %185 {offsets = [64, 0], sizes = [32, 32], strides = [1, 1]} : vector<96x32xf32> to vector<32x32xf32>
    %217 = vector.extract_strided_slice %183 {offsets = [0, 64], sizes = [1, 32], strides = [1, 1]} : vector<1x96xf32> to vector<1x32xf32>
    %cst_123 = arith.constant dense<0.000000e+00> : vector<8x32xf32>
    %218 = tpu.matmul %181, %216, %cst_123 {dimension_numbers = #tpu.dot_dimension_numbers<[1], [1], [0], [0], [0, 0, 1, 0], [], []>} : vector<8x32xf32>, vector<32x32xf32>, vector<8x32xf32> -> vector<8x32xf32>
    %219 = vector.broadcast %217 : vector<1x32xf32> to vector<8x32xf32>
    %220 = arith.addf %218, %219 : vector<8x32xf32>
    %221 = vector.extract_strided_slice %210 {offsets = [0, 0], sizes = [8, 8], strides = [1, 1]} : vector<8x32xf32> to vector<8x8xf32>
    %222 = vector.extract_strided_slice %215 {offsets = [0, 0], sizes = [8, 8], strides = [1, 1]} : vector<8x32xf32> to vector<8x8xf32>
    %cst_124 = arith.constant dense<0.000000e+00> : vector<8x8xf32>
    %223 = tpu.matmul %221, %222, %cst_124 {dimension_numbers = #tpu.dot_dimension_numbers<[1], [1], [0], [0], [0, 0, 1, 0], [], []>} : vector<8x8xf32>, vector<8x8xf32>, vector<8x8xf32> -> vector<8x8xf32>
    %cst_125 = arith.constant 0.353553385 : f32
    %224 = vector.broadcast %cst_125 : f32 to vector<8x8xf32>
    %225 = arith.mulf %223, %224 : vector<8x8xf32>
    %226 = vector.broadcast %5 : vector<1x8xf32> to vector<8x8xf32>
    %227 = arith.addf %225, %226 : vector<8x8xf32>
    %cst_126 = arith.constant dense<0xFF800000> : vector<8xf32>
    %228 = vector.multi_reduction <maximumf>, %227, %cst_126 [1] : vector<8x8xf32> to vector<8xf32>
    %229 = vector.shape_cast %228 : vector<8xf32> to vector<8x1xf32>
    %230 = vector.broadcast %229 : vector<8x1xf32> to vector<8x8xf32>
    %231 = arith.subf %227, %230 : vector<8x8xf32>
    %232 = math.exp %231 : vector<8x8xf32>
    %cst_127 = arith.constant dense<0.000000e+00> : vector<8xf32>
    %233 = vector.multi_reduction <add>, %232, %cst_127 [1] : vector<8x8xf32> to vector<8xf32>
    %234 = vector.shape_cast %233 : vector<8xf32> to vector<8x1xf32>
    %235 = vector.broadcast %234 : vector<8x1xf32> to vector<8x8xf32>
    %236 = arith.divf %232, %235 : vector<8x8xf32>
    %237 = vector.extract_strided_slice %220 {offsets = [0, 0], sizes = [8, 8], strides = [1, 1]} : vector<8x32xf32> to vector<8x8xf32>
    %cst_128 = arith.constant dense<0.000000e+00> : vector<8x8xf32>
    %238 = tpu.matmul %236, %237, %cst_128 {dimension_numbers = #tpu.dot_dimension_numbers<[1], [0], [0], [1], [0, 0, 1, 1], [], []>} : vector<8x8xf32>, vector<8x8xf32>, vector<8x8xf32> -> vector<8x8xf32>
    %239 = vector.extract_strided_slice %189 {offsets = [0, 0], sizes = [32, 8], strides = [1, 1]} : vector<32x32xf32> to vector<32x8xf32>
    %cst_129 = arith.constant dense<0.000000e+00> : vector<8x32xf32>
    %240 = tpu.matmul %238, %239, %cst_129 {dimension_numbers = #tpu.dot_dimension_numbers<[1], [1], [0], [0], [0, 0, 1, 0], [], []>} : vector<8x8xf32>, vector<32x8xf32>, vector<8x32xf32> -> vector<8x32xf32>
    %241 = vector.extract_strided_slice %210 {offsets = [0, 8], sizes = [8, 8], strides = [1, 1]} : vector<8x32xf32> to vector<8x8xf32>
    %242 = vector.extract_strided_slice %215 {offsets = [0, 8], sizes = [8, 8], strides = [1, 1]} : vector<8x32xf32> to vector<8x8xf32>
    %cst_130 = arith.constant dense<0.000000e+00> : vector<8x8xf32>
    %243 = tpu.matmul %241, %242, %cst_130 {dimension_numbers = #tpu.dot_dimension_numbers<[1], [1], [0], [0], [0, 0, 1, 0], [], []>} : vector<8x8xf32>, vector<8x8xf32>, vector<8x8xf32> -> vector<8x8xf32>
    %cst_131 = arith.constant 0.353553385 : f32
    %244 = vector.broadcast %cst_131 : f32 to vector<8x8xf32>
    %245 = arith.mulf %243, %244 : vector<8x8xf32>
    %246 = vector.broadcast %5 : vector<1x8xf32> to vector<8x8xf32>
    %247 = arith.addf %245, %246 : vector<8x8xf32>
    %cst_132 = arith.constant dense<0xFF800000> : vector<8xf32>
    %248 = vector.multi_reduction <maximumf>, %247, %cst_132 [1] : vector<8x8xf32> to vector<8xf32>
    %249 = vector.shape_cast %248 : vector<8xf32> to vector<8x1xf32>
    %250 = vector.broadcast %249 : vector<8x1xf32> to vector<8x8xf32>
    %251 = arith.subf %247, %250 : vector<8x8xf32>
    %252 = math.exp %251 : vector<8x8xf32>
    %cst_133 = arith.constant dense<0.000000e+00> : vector<8xf32>
    %253 = vector.multi_reduction <add>, %252, %cst_133 [1] : vector<8x8xf32> to vector<8xf32>
    %254 = vector.shape_cast %253 : vector<8xf32> to vector<8x1xf32>
    %255 = vector.broadcast %254 : vector<8x1xf32> to vector<8x8xf32>
    %256 = arith.divf %252, %255 : vector<8x8xf32>
    %257 = vector.extract_strided_slice %220 {offsets = [0, 8], sizes = [8, 8], strides = [1, 1]} : vector<8x32xf32> to vector<8x8xf32>
    %cst_134 = arith.constant dense<0.000000e+00> : vector<8x8xf32>
    %258 = tpu.matmul %256, %257, %cst_134 {dimension_numbers = #tpu.dot_dimension_numbers<[1], [0], [0], [1], [0, 0, 1, 1], [], []>} : vector<8x8xf32>, vector<8x8xf32>, vector<8x8xf32> -> vector<8x8xf32>
    %259 = vector.extract_strided_slice %189 {offsets = [0, 8], sizes = [32, 8], strides = [1, 1]} : vector<32x32xf32> to vector<32x8xf32>
    %cst_135 = arith.constant dense<0.000000e+00> : vector<8x32xf32>
    %260 = tpu.matmul %258, %259, %cst_135 {dimension_numbers = #tpu.dot_dimension_numbers<[1], [1], [0], [0], [0, 0, 1, 0], [], []>} : vector<8x8xf32>, vector<32x8xf32>, vector<8x32xf32> -> vector<8x32xf32>
    %261 = arith.addf %240, %260 : vector<8x32xf32>
    %262 = vector.extract_strided_slice %210 {offsets = [0, 16], sizes = [8, 8], strides = [1, 1]} : vector<8x32xf32> to vector<8x8xf32>
    %263 = vector.extract_strided_slice %215 {offsets = [0, 16], sizes = [8, 8], strides = [1, 1]} : vector<8x32xf32> to vector<8x8xf32>
    %cst_136 = arith.constant dense<0.000000e+00> : vector<8x8xf32>
    %264 = tpu.matmul %262, %263, %cst_136 {dimension_numbers = #tpu.dot_dimension_numbers<[1], [1], [0], [0], [0, 0, 1, 0], [], []>} : vector<8x8xf32>, vector<8x8xf32>, vector<8x8xf32> -> vector<8x8xf32>
    %cst_137 = arith.constant 0.353553385 : f32
    %265 = vector.broadcast %cst_137 : f32 to vector<8x8xf32>
    %266 = arith.mulf %264, %265 : vector<8x8xf32>
    %267 = vector.broadcast %5 : vector<1x8xf32> to vector<8x8xf32>
    %268 = arith.addf %266, %267 : vector<8x8xf32>
    %cst_138 = arith.constant dense<0xFF800000> : vector<8xf32>
    %269 = vector.multi_reduction <maximumf>, %268, %cst_138 [1] : vector<8x8xf32> to vector<8xf32>
    %270 = vector.shape_cast %269 : vector<8xf32> to vector<8x1xf32>
    %271 = vector.broadcast %270 : vector<8x1xf32> to vector<8x8xf32>
    %272 = arith.subf %268, %271 : vector<8x8xf32>
    %273 = math.exp %272 : vector<8x8xf32>
    %cst_139 = arith.constant dense<0.000000e+00> : vector<8xf32>
    %274 = vector.multi_reduction <add>, %273, %cst_139 [1] : vector<8x8xf32> to vector<8xf32>
    %275 = vector.shape_cast %274 : vector<8xf32> to vector<8x1xf32>
    %276 = vector.broadcast %275 : vector<8x1xf32> to vector<8x8xf32>
    %277 = arith.divf %273, %276 : vector<8x8xf32>
    %278 = vector.extract_strided_slice %220 {offsets = [0, 16], sizes = [8, 8], strides = [1, 1]} : vector<8x32xf32> to vector<8x8xf32>
    %cst_140 = arith.constant dense<0.000000e+00> : vector<8x8xf32>
    %279 = tpu.matmul %277, %278, %cst_140 {dimension_numbers = #tpu.dot_dimension_numbers<[1], [0], [0], [1], [0, 0, 1, 1], [], []>} : vector<8x8xf32>, vector<8x8xf32>, vector<8x8xf32> -> vector<8x8xf32>
    %280 = vector.extract_strided_slice %189 {offsets = [0, 16], sizes = [32, 8], strides = [1, 1]} : vector<32x32xf32> to vector<32x8xf32>
    %cst_141 = arith.constant dense<0.000000e+00> : vector<8x32xf32>
    %281 = tpu.matmul %279, %280, %cst_141 {dimension_numbers = #tpu.dot_dimension_numbers<[1], [1], [0], [0], [0, 0, 1, 0], [], []>} : vector<8x8xf32>, vector<32x8xf32>, vector<8x32xf32> -> vector<8x32xf32>
    %282 = arith.addf %261, %281 : vector<8x32xf32>
    %283 = vector.extract_strided_slice %210 {offsets = [0, 24], sizes = [8, 8], strides = [1, 1]} : vector<8x32xf32> to vector<8x8xf32>
    %284 = vector.extract_strided_slice %215 {offsets = [0, 24], sizes = [8, 8], strides = [1, 1]} : vector<8x32xf32> to vector<8x8xf32>
    %cst_142 = arith.constant dense<0.000000e+00> : vector<8x8xf32>
    %285 = tpu.matmul %283, %284, %cst_142 {dimension_numbers = #tpu.dot_dimension_numbers<[1], [1], [0], [0], [0, 0, 1, 0], [], []>} : vector<8x8xf32>, vector<8x8xf32>, vector<8x8xf32> -> vector<8x8xf32>
    %cst_143 = arith.constant 0.353553385 : f32
    %286 = vector.broadcast %cst_143 : f32 to vector<8x8xf32>
    %287 = arith.mulf %285, %286 : vector<8x8xf32>
    %288 = vector.broadcast %5 : vector<1x8xf32> to vector<8x8xf32>
    %289 = arith.addf %287, %288 : vector<8x8xf32>
    %cst_144 = arith.constant dense<0xFF800000> : vector<8xf32>
    %290 = vector.multi_reduction <maximumf>, %289, %cst_144 [1] : vector<8x8xf32> to vector<8xf32>
    %291 = vector.shape_cast %290 : vector<8xf32> to vector<8x1xf32>
    %292 = vector.broadcast %291 : vector<8x1xf32> to vector<8x8xf32>
    %293 = arith.subf %289, %292 : vector<8x8xf32>
    %294 = math.exp %293 : vector<8x8xf32>
    %cst_145 = arith.constant dense<0.000000e+00> : vector<8xf32>
    %295 = vector.multi_reduction <add>, %294, %cst_145 [1] : vector<8x8xf32> to vector<8xf32>
    %296 = vector.shape_cast %295 : vector<8xf32> to vector<8x1xf32>
    %297 = vector.broadcast %296 : vector<8x1xf32> to vector<8x8xf32>
    %298 = arith.divf %294, %297 : vector<8x8xf32>
    %299 = vector.extract_strided_slice %220 {offsets = [0, 24], sizes = [8, 8], strides = [1, 1]} : vector<8x32xf32> to vector<8x8xf32>
    %cst_146 = arith.constant dense<0.000000e+00> : vector<8x8xf32>
    %300 = tpu.matmul %298, %299, %cst_146 {dimension_numbers = #tpu.dot_dimension_numbers<[1], [0], [0], [1], [0, 0, 1, 1], [], []>} : vector<8x8xf32>, vector<8x8xf32>, vector<8x8xf32> -> vector<8x8xf32>
    %301 = vector.extract_strided_slice %189 {offsets = [0, 24], sizes = [32, 8], strides = [1, 1]} : vector<32x32xf32> to vector<32x8xf32>
    %cst_147 = arith.constant dense<0.000000e+00> : vector<8x32xf32>
    %302 = tpu.matmul %300, %301, %cst_147 {dimension_numbers = #tpu.dot_dimension_numbers<[1], [1], [0], [0], [0, 0, 1, 0], [], []>} : vector<8x8xf32>, vector<32x8xf32>, vector<8x32xf32> -> vector<8x32xf32>
    %303 = arith.addf %282, %302 : vector<8x32xf32>
    %304 = vector.broadcast %187 : vector<1x32xf32> to vector<8x32xf32>
    %305 = arith.addf %303, %304 : vector<8x32xf32>
    %306 = arith.addf %181, %305 : vector<8x32xf32>
    %cst_148 = arith.constant dense<0.000000e+00> : vector<8xf32>
    %307 = vector.multi_reduction <add>, %306, %cst_148 [1] : vector<8x32xf32> to vector<8xf32>
    %308 = vector.shape_cast %307 : vector<8xf32> to vector<8x1xf32>
    %cst_149 = arith.constant 3.200000e+01 : f32
    %309 = vector.broadcast %cst_149 : f32 to vector<8x1xf32>
    %310 = arith.divf %308, %309 : vector<8x1xf32>
    %311 = vector.broadcast %310 : vector<8x1xf32> to vector<8x32xf32>
    %312 = arith.subf %306, %311 : vector<8x32xf32>
    %313 = arith.mulf %312, %312 : vector<8x32xf32>
    %cst_150 = arith.constant dense<0.000000e+00> : vector<8xf32>
    %314 = vector.multi_reduction <add>, %313, %cst_150 [1] : vector<8x32xf32> to vector<8xf32>
    %315 = vector.shape_cast %314 : vector<8xf32> to vector<8x1xf32>
    %cst_151 = arith.constant 3.200000e+01 : f32
    %316 = vector.broadcast %cst_151 : f32 to vector<8x1xf32>
    %317 = arith.divf %315, %316 : vector<8x1xf32>
    %cst_152 = arith.constant 9.99999974E-6 : f32
    %318 = vector.broadcast %cst_152 : f32 to vector<8x1xf32>
    %319 = arith.addf %317, %318 : vector<8x1xf32>
    %320 = math.rsqrt %319 : vector<8x1xf32>
    %321 = vector.broadcast %320 : vector<8x1xf32> to vector<8x32xf32>
    %322 = arith.mulf %312, %321 : vector<8x32xf32>
    %323 = vector.broadcast %201 : vector<1x32xf32> to vector<8x32xf32>
    %324 = arith.mulf %322, %323 : vector<8x32xf32>
    %325 = vector.broadcast %199 : vector<1x32xf32> to vector<8x32xf32>
    %326 = arith.addf %324, %325 : vector<8x32xf32>
    %cst_153 = arith.constant dense<0.000000e+00> : vector<8x64xf32>
    %327 = tpu.matmul %326, %193, %cst_153 {dimension_numbers = #tpu.dot_dimension_numbers<[1], [1], [0], [0], [0, 0, 1, 0], [], []>} : vector<8x32xf32>, vector<64x32xf32>, vector<8x64xf32> -> vector<8x64xf32>
    %328 = vector.broadcast %191 : vector<1x64xf32> to vector<8x64xf32>
    %329 = arith.addf %327, %328 : vector<8x64xf32>
    %cst_154 = arith.constant 0.000000e+00 : f32
    %330 = vector.broadcast %cst_154 : f32 to vector<8x64xf32>
    %331 = arith.maximumf %329, %330 : vector<8x64xf32>
    %cst_155 = arith.constant dense<0.000000e+00> : vector<8x32xf32>
    %332 = tpu.matmul %331, %197, %cst_155 {dimension_numbers = #tpu.dot_dimension_numbers<[1], [1], [0], [0], [0, 0, 1, 0], [], []>} : vector<8x64xf32>, vector<32x64xf32>, vector<8x32xf32> -> vector<8x32xf32>
    %333 = vector.broadcast %195 : vector<1x32xf32> to vector<8x32xf32>
    %334 = arith.addf %332, %333 : vector<8x32xf32>
    %335 = arith.addf %326, %334 : vector<8x32xf32>
    %cst_156 = arith.constant dense<0.000000e+00> : vector<8xf32>
    %336 = vector.multi_reduction <add>, %335, %cst_156 [1] : vector<8x32xf32> to vector<8xf32>
    %337 = vector.shape_cast %336 : vector<8xf32> to vector<8x1xf32>
    %cst_157 = arith.constant 3.200000e+01 : f32
    %338 = vector.broadcast %cst_157 : f32 to vector<8x1xf32>
    %339 = arith.divf %337, %338 : vector<8x1xf32>
    %340 = vector.broadcast %339 : vector<8x1xf32> to vector<8x32xf32>
    %341 = arith.subf %335, %340 : vector<8x32xf32>
    %342 = arith.mulf %341, %341 : vector<8x32xf32>
    %cst_158 = arith.constant dense<0.000000e+00> : vector<8xf32>
    %343 = vector.multi_reduction <add>, %342, %cst_158 [1] : vector<8x32xf32> to vector<8xf32>
    %344 = vector.shape_cast %343 : vector<8xf32> to vector<8x1xf32>
    %cst_159 = arith.constant 3.200000e+01 : f32
    %345 = vector.broadcast %cst_159 : f32 to vector<8x1xf32>
    %346 = arith.divf %344, %345 : vector<8x1xf32>
    %cst_160 = arith.constant 9.99999974E-6 : f32
    %347 = vector.broadcast %cst_160 : f32 to vector<8x1xf32>
    %348 = arith.addf %346, %347 : vector<8x1xf32>
    %349 = math.rsqrt %348 : vector<8x1xf32>
    %350 = vector.broadcast %349 : vector<8x1xf32> to vector<8x32xf32>
    %351 = arith.mulf %341, %350 : vector<8x32xf32>
    %352 = vector.broadcast %205 : vector<1x32xf32> to vector<8x32xf32>
    %353 = arith.mulf %351, %352 : vector<8x32xf32>
    %354 = vector.broadcast %203 : vector<1x32xf32> to vector<8x32xf32>
    %355 = arith.addf %353, %354 : vector<8x32xf32>
    %c0_161 = arith.constant 0 : index
    %c0_162 = arith.constant 0 : index
    %c0_163 = arith.constant 0 : index
    %356 = vector.load %arg5[%c0_161, %c0_162, %c0_163] : memref<2x1x96xf32, #tpu.memory_space<vmem>>, vector<1x1x96xf32>
    %357 = vector.shape_cast %356 : vector<1x1x96xf32> to vector<1x96xf32>
    %c0_164 = arith.constant 0 : index
    %c0_165 = arith.constant 0 : index
    %c0_166 = arith.constant 0 : index
    %358 = vector.load %arg6[%c0_164, %c0_165, %c0_166] : memref<2x96x32xf32, #tpu.memory_space<vmem>>, vector<1x96x32xf32>
    %359 = vector.shape_cast %358 : vector<1x96x32xf32> to vector<96x32xf32>
    %c0_167 = arith.constant 0 : index
    %c0_168 = arith.constant 0 : index
    %c0_169 = arith.constant 0 : index
    %360 = vector.load %arg7[%c0_167, %c0_168, %c0_169] : memref<2x1x32xf32, #tpu.memory_space<vmem>>, vector<1x1x32xf32>
    %361 = vector.shape_cast %360 : vector<1x1x32xf32> to vector<1x32xf32>
    %c0_170 = arith.constant 0 : index
    %c0_171 = arith.constant 0 : index
    %c0_172 = arith.constant 0 : index
    %362 = vector.load %arg8[%c0_170, %c0_171, %c0_172] : memref<2x32x32xf32, #tpu.memory_space<vmem>>, vector<1x32x32xf32>
    %363 = vector.shape_cast %362 : vector<1x32x32xf32> to vector<32x32xf32>
    %c0_173 = arith.constant 0 : index
    %c0_174 = arith.constant 0 : index
    %c0_175 = arith.constant 0 : index
    %364 = vector.load %arg9[%c0_173, %c0_174, %c0_175] : memref<2x1x96xf32, #tpu.memory_space<vmem>>, vector<1x1x96xf32>
    %365 = vector.shape_cast %364 : vector<1x1x96xf32> to vector<1x96xf32>
    %c0_176 = arith.constant 0 : index
    %c0_177 = arith.constant 0 : index
    %c0_178 = arith.constant 0 : index
    %366 = vector.load %arg10[%c0_176, %c0_177, %c0_178] : memref<2x96x32xf32, #tpu.memory_space<vmem>>, vector<1x96x32xf32>
    %367 = vector.shape_cast %366 : vector<1x96x32xf32> to vector<96x32xf32>
    %c0_179 = arith.constant 0 : index
    %c0_180 = arith.constant 0 : index
    %c0_181 = arith.constant 0 : index
    %368 = vector.load %arg11[%c0_179, %c0_180, %c0_181] : memref<2x1x32xf32, #tpu.memory_space<vmem>>, vector<1x1x32xf32>
    %369 = vector.shape_cast %368 : vector<1x1x32xf32> to vector<1x32xf32>
    %c0_182 = arith.constant 0 : index
    %c0_183 = arith.constant 0 : index
    %c0_184 = arith.constant 0 : index
    %370 = vector.load %arg12[%c0_182, %c0_183, %c0_184] : memref<2x32x32xf32, #tpu.memory_space<vmem>>, vector<1x32x32xf32>
    %371 = vector.shape_cast %370 : vector<1x32x32xf32> to vector<32x32xf32>
    %c0_185 = arith.constant 0 : index
    %c0_186 = arith.constant 0 : index
    %c0_187 = arith.constant 0 : index
    %372 = vector.load %arg13[%c0_185, %c0_186, %c0_187] : memref<2x1x64xf32, #tpu.memory_space<vmem>>, vector<1x1x64xf32>
    %373 = vector.shape_cast %372 : vector<1x1x64xf32> to vector<1x64xf32>
    %c0_188 = arith.constant 0 : index
    %c0_189 = arith.constant 0 : index
    %c0_190 = arith.constant 0 : index
    %374 = vector.load %arg14[%c0_188, %c0_189, %c0_190] : memref<2x64x32xf32, #tpu.memory_space<vmem>>, vector<1x64x32xf32>
    %375 = vector.shape_cast %374 : vector<1x64x32xf32> to vector<64x32xf32>
    %c0_191 = arith.constant 0 : index
    %c0_192 = arith.constant 0 : index
    %c0_193 = arith.constant 0 : index
    %376 = vector.load %arg15[%c0_191, %c0_192, %c0_193] : memref<2x1x32xf32, #tpu.memory_space<vmem>>, vector<1x1x32xf32>
    %377 = vector.shape_cast %376 : vector<1x1x32xf32> to vector<1x32xf32>
    %c0_194 = arith.constant 0 : index
    %c0_195 = arith.constant 0 : index
    %c0_196 = arith.constant 0 : index
    %378 = vector.load %arg16[%c0_194, %c0_195, %c0_196] : memref<2x32x64xf32, #tpu.memory_space<vmem>>, vector<1x32x64xf32>
    %379 = vector.shape_cast %378 : vector<1x32x64xf32> to vector<32x64xf32>
    %c0_197 = arith.constant 0 : index
    %c0_198 = arith.constant 0 : index
    %c0_199 = arith.constant 0 : index
    %380 = vector.load %arg17[%c0_197, %c0_198, %c0_199] : memref<2x1x32xf32, #tpu.memory_space<vmem>>, vector<1x1x32xf32>
    %381 = vector.shape_cast %380 : vector<1x1x32xf32> to vector<1x32xf32>
    %c0_200 = arith.constant 0 : index
    %c0_201 = arith.constant 0 : index
    %c0_202 = arith.constant 0 : index
    %382 = vector.load %arg18[%c0_200, %c0_201, %c0_202] : memref<2x1x32xf32, #tpu.memory_space<vmem>>, vector<1x1x32xf32>
    %383 = vector.shape_cast %382 : vector<1x1x32xf32> to vector<1x32xf32>
    %c0_203 = arith.constant 0 : index
    %c0_204 = arith.constant 0 : index
    %c0_205 = arith.constant 0 : index
    %384 = vector.load %arg19[%c0_203, %c0_204, %c0_205] : memref<2x1x32xf32, #tpu.memory_space<vmem>>, vector<1x1x32xf32>
    %385 = vector.shape_cast %384 : vector<1x1x32xf32> to vector<1x32xf32>
    %c0_206 = arith.constant 0 : index
    %c0_207 = arith.constant 0 : index
    %c0_208 = arith.constant 0 : index
    %386 = vector.load %arg20[%c0_206, %c0_207, %c0_208] : memref<2x1x32xf32, #tpu.memory_space<vmem>>, vector<1x1x32xf32>
    %387 = vector.shape_cast %386 : vector<1x1x32xf32> to vector<1x32xf32>
    %c0_209 = arith.constant 0 : index
    %c0_210 = arith.constant 0 : index
    %c0_211 = arith.constant 0 : index
    %388 = vector.load %arg21[%c0_209, %c0_210, %c0_211] : memref<2x1x32xf32, #tpu.memory_space<vmem>>, vector<1x1x32xf32>
    %389 = vector.shape_cast %388 : vector<1x1x32xf32> to vector<1x32xf32>
    %c0_212 = arith.constant 0 : index
    %c0_213 = arith.constant 0 : index
    %c0_214 = arith.constant 0 : index
    %390 = vector.load %arg22[%c0_212, %c0_213, %c0_214] : memref<2x1x32xf32, #tpu.memory_space<vmem>>, vector<1x1x32xf32>
    %391 = vector.shape_cast %390 : vector<1x1x32xf32> to vector<1x32xf32>
    %392 = vector.extract_strided_slice %359 {offsets = [0, 0], sizes = [32, 32], strides = [1, 1]} : vector<96x32xf32> to vector<32x32xf32>
    %393 = vector.extract_strided_slice %357 {offsets = [0, 0], sizes = [1, 32], strides = [1, 1]} : vector<1x96xf32> to vector<1x32xf32>
    %cst_215 = arith.constant dense<0.000000e+00> : vector<8x32xf32>
    %394 = tpu.matmul %3, %392, %cst_215 {dimension_numbers = #tpu.dot_dimension_numbers<[1], [1], [0], [0], [0, 0, 1, 0], [], []>} : vector<8x32xf32>, vector<32x32xf32>, vector<8x32xf32> -> vector<8x32xf32>
    %395 = vector.broadcast %393 : vector<1x32xf32> to vector<8x32xf32>
    %396 = arith.addf %394, %395 : vector<8x32xf32>
    %397 = vector.extract_strided_slice %359 {offsets = [32, 0], sizes = [32, 32], strides = [1, 1]} : vector<96x32xf32> to vector<32x32xf32>
    %398 = vector.extract_strided_slice %357 {offsets = [0, 32], sizes = [1, 32], strides = [1, 1]} : vector<1x96xf32> to vector<1x32xf32>
    %cst_216 = arith.constant dense<0.000000e+00> : vector<8x32xf32>
    %399 = tpu.matmul %3, %397, %cst_216 {dimension_numbers = #tpu.dot_dimension_numbers<[1], [1], [0], [0], [0, 0, 1, 0], [], []>} : vector<8x32xf32>, vector<32x32xf32>, vector<8x32xf32> -> vector<8x32xf32>
    %400 = vector.broadcast %398 : vector<1x32xf32> to vector<8x32xf32>
    %401 = arith.addf %399, %400 : vector<8x32xf32>
    %402 = vector.extract_strided_slice %359 {offsets = [64, 0], sizes = [32, 32], strides = [1, 1]} : vector<96x32xf32> to vector<32x32xf32>
    %403 = vector.extract_strided_slice %357 {offsets = [0, 64], sizes = [1, 32], strides = [1, 1]} : vector<1x96xf32> to vector<1x32xf32>
    %cst_217 = arith.constant dense<0.000000e+00> : vector<8x32xf32>
    %404 = tpu.matmul %3, %402, %cst_217 {dimension_numbers = #tpu.dot_dimension_numbers<[1], [1], [0], [0], [0, 0, 1, 0], [], []>} : vector<8x32xf32>, vector<32x32xf32>, vector<8x32xf32> -> vector<8x32xf32>
    %405 = vector.broadcast %403 : vector<1x32xf32> to vector<8x32xf32>
    %406 = arith.addf %404, %405 : vector<8x32xf32>
    %407 = vector.extract_strided_slice %396 {offsets = [0, 0], sizes = [8, 8], strides = [1, 1]} : vector<8x32xf32> to vector<8x8xf32>
    %408 = vector.extract_strided_slice %401 {offsets = [0, 0], sizes = [8, 8], strides = [1, 1]} : vector<8x32xf32> to vector<8x8xf32>
    %cst_218 = arith.constant dense<0.000000e+00> : vector<8x8xf32>
    %409 = tpu.matmul %407, %408, %cst_218 {dimension_numbers = #tpu.dot_dimension_numbers<[1], [1], [0], [0], [0, 0, 1, 0], [], []>} : vector<8x8xf32>, vector<8x8xf32>, vector<8x8xf32> -> vector<8x8xf32>
    %cst_219 = arith.constant 0.353553385 : f32
    %410 = vector.broadcast %cst_219 : f32 to vector<8x8xf32>
    %411 = arith.mulf %409, %410 : vector<8x8xf32>
    %412 = vector.broadcast %7 : vector<1x8xf32> to vector<8x8xf32>
    %413 = arith.addf %411, %412 : vector<8x8xf32>
    %cst_220 = arith.constant dense<0xFF800000> : vector<8xf32>
    %414 = vector.multi_reduction <maximumf>, %413, %cst_220 [1] : vector<8x8xf32> to vector<8xf32>
    %415 = vector.shape_cast %414 : vector<8xf32> to vector<8x1xf32>
    %416 = vector.broadcast %415 : vector<8x1xf32> to vector<8x8xf32>
    %417 = arith.subf %413, %416 : vector<8x8xf32>
    %418 = math.exp %417 : vector<8x8xf32>
    %cst_221 = arith.constant dense<0.000000e+00> : vector<8xf32>
    %419 = vector.multi_reduction <add>, %418, %cst_221 [1] : vector<8x8xf32> to vector<8xf32>
    %420 = vector.shape_cast %419 : vector<8xf32> to vector<8x1xf32>
    %421 = vector.broadcast %420 : vector<8x1xf32> to vector<8x8xf32>
    %422 = arith.divf %418, %421 : vector<8x8xf32>
    %423 = vector.extract_strided_slice %406 {offsets = [0, 0], sizes = [8, 8], strides = [1, 1]} : vector<8x32xf32> to vector<8x8xf32>
    %cst_222 = arith.constant dense<0.000000e+00> : vector<8x8xf32>
    %424 = tpu.matmul %422, %423, %cst_222 {dimension_numbers = #tpu.dot_dimension_numbers<[1], [0], [0], [1], [0, 0, 1, 1], [], []>} : vector<8x8xf32>, vector<8x8xf32>, vector<8x8xf32> -> vector<8x8xf32>
    %425 = vector.extract_strided_slice %363 {offsets = [0, 0], sizes = [32, 8], strides = [1, 1]} : vector<32x32xf32> to vector<32x8xf32>
    %cst_223 = arith.constant dense<0.000000e+00> : vector<8x32xf32>
    %426 = tpu.matmul %424, %425, %cst_223 {dimension_numbers = #tpu.dot_dimension_numbers<[1], [1], [0], [0], [0, 0, 1, 0], [], []>} : vector<8x8xf32>, vector<32x8xf32>, vector<8x32xf32> -> vector<8x32xf32>
    %427 = vector.extract_strided_slice %396 {offsets = [0, 8], sizes = [8, 8], strides = [1, 1]} : vector<8x32xf32> to vector<8x8xf32>
    %428 = vector.extract_strided_slice %401 {offsets = [0, 8], sizes = [8, 8], strides = [1, 1]} : vector<8x32xf32> to vector<8x8xf32>
    %cst_224 = arith.constant dense<0.000000e+00> : vector<8x8xf32>
    %429 = tpu.matmul %427, %428, %cst_224 {dimension_numbers = #tpu.dot_dimension_numbers<[1], [1], [0], [0], [0, 0, 1, 0], [], []>} : vector<8x8xf32>, vector<8x8xf32>, vector<8x8xf32> -> vector<8x8xf32>
    %cst_225 = arith.constant 0.353553385 : f32
    %430 = vector.broadcast %cst_225 : f32 to vector<8x8xf32>
    %431 = arith.mulf %429, %430 : vector<8x8xf32>
    %432 = vector.broadcast %7 : vector<1x8xf32> to vector<8x8xf32>
    %433 = arith.addf %431, %432 : vector<8x8xf32>
    %cst_226 = arith.constant dense<0xFF800000> : vector<8xf32>
    %434 = vector.multi_reduction <maximumf>, %433, %cst_226 [1] : vector<8x8xf32> to vector<8xf32>
    %435 = vector.shape_cast %434 : vector<8xf32> to vector<8x1xf32>
    %436 = vector.broadcast %435 : vector<8x1xf32> to vector<8x8xf32>
    %437 = arith.subf %433, %436 : vector<8x8xf32>
    %438 = math.exp %437 : vector<8x8xf32>
    %cst_227 = arith.constant dense<0.000000e+00> : vector<8xf32>
    %439 = vector.multi_reduction <add>, %438, %cst_227 [1] : vector<8x8xf32> to vector<8xf32>
    %440 = vector.shape_cast %439 : vector<8xf32> to vector<8x1xf32>
    %441 = vector.broadcast %440 : vector<8x1xf32> to vector<8x8xf32>
    %442 = arith.divf %438, %441 : vector<8x8xf32>
    %443 = vector.extract_strided_slice %406 {offsets = [0, 8], sizes = [8, 8], strides = [1, 1]} : vector<8x32xf32> to vector<8x8xf32>
    %cst_228 = arith.constant dense<0.000000e+00> : vector<8x8xf32>
    %444 = tpu.matmul %442, %443, %cst_228 {dimension_numbers = #tpu.dot_dimension_numbers<[1], [0], [0], [1], [0, 0, 1, 1], [], []>} : vector<8x8xf32>, vector<8x8xf32>, vector<8x8xf32> -> vector<8x8xf32>
    %445 = vector.extract_strided_slice %363 {offsets = [0, 8], sizes = [32, 8], strides = [1, 1]} : vector<32x32xf32> to vector<32x8xf32>
    %cst_229 = arith.constant dense<0.000000e+00> : vector<8x32xf32>
    %446 = tpu.matmul %444, %445, %cst_229 {dimension_numbers = #tpu.dot_dimension_numbers<[1], [1], [0], [0], [0, 0, 1, 0], [], []>} : vector<8x8xf32>, vector<32x8xf32>, vector<8x32xf32> -> vector<8x32xf32>
    %447 = arith.addf %426, %446 : vector<8x32xf32>
    %448 = vector.extract_strided_slice %396 {offsets = [0, 16], sizes = [8, 8], strides = [1, 1]} : vector<8x32xf32> to vector<8x8xf32>
    %449 = vector.extract_strided_slice %401 {offsets = [0, 16], sizes = [8, 8], strides = [1, 1]} : vector<8x32xf32> to vector<8x8xf32>
    %cst_230 = arith.constant dense<0.000000e+00> : vector<8x8xf32>
    %450 = tpu.matmul %448, %449, %cst_230 {dimension_numbers = #tpu.dot_dimension_numbers<[1], [1], [0], [0], [0, 0, 1, 0], [], []>} : vector<8x8xf32>, vector<8x8xf32>, vector<8x8xf32> -> vector<8x8xf32>
    %cst_231 = arith.constant 0.353553385 : f32
    %451 = vector.broadcast %cst_231 : f32 to vector<8x8xf32>
    %452 = arith.mulf %450, %451 : vector<8x8xf32>
    %453 = vector.broadcast %7 : vector<1x8xf32> to vector<8x8xf32>
    %454 = arith.addf %452, %453 : vector<8x8xf32>
    %cst_232 = arith.constant dense<0xFF800000> : vector<8xf32>
    %455 = vector.multi_reduction <maximumf>, %454, %cst_232 [1] : vector<8x8xf32> to vector<8xf32>
    %456 = vector.shape_cast %455 : vector<8xf32> to vector<8x1xf32>
    %457 = vector.broadcast %456 : vector<8x1xf32> to vector<8x8xf32>
    %458 = arith.subf %454, %457 : vector<8x8xf32>
    %459 = math.exp %458 : vector<8x8xf32>
    %cst_233 = arith.constant dense<0.000000e+00> : vector<8xf32>
    %460 = vector.multi_reduction <add>, %459, %cst_233 [1] : vector<8x8xf32> to vector<8xf32>
    %461 = vector.shape_cast %460 : vector<8xf32> to vector<8x1xf32>
    %462 = vector.broadcast %461 : vector<8x1xf32> to vector<8x8xf32>
    %463 = arith.divf %459, %462 : vector<8x8xf32>
    %464 = vector.extract_strided_slice %406 {offsets = [0, 16], sizes = [8, 8], strides = [1, 1]} : vector<8x32xf32> to vector<8x8xf32>
    %cst_234 = arith.constant dense<0.000000e+00> : vector<8x8xf32>
    %465 = tpu.matmul %463, %464, %cst_234 {dimension_numbers = #tpu.dot_dimension_numbers<[1], [0], [0], [1], [0, 0, 1, 1], [], []>} : vector<8x8xf32>, vector<8x8xf32>, vector<8x8xf32> -> vector<8x8xf32>
    %466 = vector.extract_strided_slice %363 {offsets = [0, 16], sizes = [32, 8], strides = [1, 1]} : vector<32x32xf32> to vector<32x8xf32>
    %cst_235 = arith.constant dense<0.000000e+00> : vector<8x32xf32>
    %467 = tpu.matmul %465, %466, %cst_235 {dimension_numbers = #tpu.dot_dimension_numbers<[1], [1], [0], [0], [0, 0, 1, 0], [], []>} : vector<8x8xf32>, vector<32x8xf32>, vector<8x32xf32> -> vector<8x32xf32>
    %468 = arith.addf %447, %467 : vector<8x32xf32>
    %469 = vector.extract_strided_slice %396 {offsets = [0, 24], sizes = [8, 8], strides = [1, 1]} : vector<8x32xf32> to vector<8x8xf32>
    %470 = vector.extract_strided_slice %401 {offsets = [0, 24], sizes = [8, 8], strides = [1, 1]} : vector<8x32xf32> to vector<8x8xf32>
    %cst_236 = arith.constant dense<0.000000e+00> : vector<8x8xf32>
    %471 = tpu.matmul %469, %470, %cst_236 {dimension_numbers = #tpu.dot_dimension_numbers<[1], [1], [0], [0], [0, 0, 1, 0], [], []>} : vector<8x8xf32>, vector<8x8xf32>, vector<8x8xf32> -> vector<8x8xf32>
    %cst_237 = arith.constant 0.353553385 : f32
    %472 = vector.broadcast %cst_237 : f32 to vector<8x8xf32>
    %473 = arith.mulf %471, %472 : vector<8x8xf32>
    %474 = vector.broadcast %7 : vector<1x8xf32> to vector<8x8xf32>
    %475 = arith.addf %473, %474 : vector<8x8xf32>
    %cst_238 = arith.constant dense<0xFF800000> : vector<8xf32>
    %476 = vector.multi_reduction <maximumf>, %475, %cst_238 [1] : vector<8x8xf32> to vector<8xf32>
    %477 = vector.shape_cast %476 : vector<8xf32> to vector<8x1xf32>
    %478 = vector.broadcast %477 : vector<8x1xf32> to vector<8x8xf32>
    %479 = arith.subf %475, %478 : vector<8x8xf32>
    %480 = math.exp %479 : vector<8x8xf32>
    %cst_239 = arith.constant dense<0.000000e+00> : vector<8xf32>
    %481 = vector.multi_reduction <add>, %480, %cst_239 [1] : vector<8x8xf32> to vector<8xf32>
    %482 = vector.shape_cast %481 : vector<8xf32> to vector<8x1xf32>
    %483 = vector.broadcast %482 : vector<8x1xf32> to vector<8x8xf32>
    %484 = arith.divf %480, %483 : vector<8x8xf32>
    %485 = vector.extract_strided_slice %406 {offsets = [0, 24], sizes = [8, 8], strides = [1, 1]} : vector<8x32xf32> to vector<8x8xf32>
    %cst_240 = arith.constant dense<0.000000e+00> : vector<8x8xf32>
    %486 = tpu.matmul %484, %485, %cst_240 {dimension_numbers = #tpu.dot_dimension_numbers<[1], [0], [0], [1], [0, 0, 1, 1], [], []>} : vector<8x8xf32>, vector<8x8xf32>, vector<8x8xf32> -> vector<8x8xf32>
    %487 = vector.extract_strided_slice %363 {offsets = [0, 24], sizes = [32, 8], strides = [1, 1]} : vector<32x32xf32> to vector<32x8xf32>
    %cst_241 = arith.constant dense<0.000000e+00> : vector<8x32xf32>
    %488 = tpu.matmul %486, %487, %cst_241 {dimension_numbers = #tpu.dot_dimension_numbers<[1], [1], [0], [0], [0, 0, 1, 0], [], []>} : vector<8x8xf32>, vector<32x8xf32>, vector<8x32xf32> -> vector<8x32xf32>
    %489 = arith.addf %468, %488 : vector<8x32xf32>
    %490 = vector.broadcast %361 : vector<1x32xf32> to vector<8x32xf32>
    %491 = arith.addf %489, %490 : vector<8x32xf32>
    %492 = arith.addf %3, %491 : vector<8x32xf32>
    %cst_242 = arith.constant dense<0.000000e+00> : vector<8xf32>
    %493 = vector.multi_reduction <add>, %492, %cst_242 [1] : vector<8x32xf32> to vector<8xf32>
    %494 = vector.shape_cast %493 : vector<8xf32> to vector<8x1xf32>
    %cst_243 = arith.constant 3.200000e+01 : f32
    %495 = vector.broadcast %cst_243 : f32 to vector<8x1xf32>
    %496 = arith.divf %494, %495 : vector<8x1xf32>
    %497 = vector.broadcast %496 : vector<8x1xf32> to vector<8x32xf32>
    %498 = arith.subf %492, %497 : vector<8x32xf32>
    %499 = arith.mulf %498, %498 : vector<8x32xf32>
    %cst_244 = arith.constant dense<0.000000e+00> : vector<8xf32>
    %500 = vector.multi_reduction <add>, %499, %cst_244 [1] : vector<8x32xf32> to vector<8xf32>
    %501 = vector.shape_cast %500 : vector<8xf32> to vector<8x1xf32>
    %cst_245 = arith.constant 3.200000e+01 : f32
    %502 = vector.broadcast %cst_245 : f32 to vector<8x1xf32>
    %503 = arith.divf %501, %502 : vector<8x1xf32>
    %cst_246 = arith.constant 9.99999974E-6 : f32
    %504 = vector.broadcast %cst_246 : f32 to vector<8x1xf32>
    %505 = arith.addf %503, %504 : vector<8x1xf32>
    %506 = math.rsqrt %505 : vector<8x1xf32>
    %507 = vector.broadcast %506 : vector<8x1xf32> to vector<8x32xf32>
    %508 = arith.mulf %498, %507 : vector<8x32xf32>
    %509 = vector.broadcast %383 : vector<1x32xf32> to vector<8x32xf32>
    %510 = arith.mulf %508, %509 : vector<8x32xf32>
    %511 = vector.broadcast %381 : vector<1x32xf32> to vector<8x32xf32>
    %512 = arith.addf %510, %511 : vector<8x32xf32>
    %513 = vector.extract_strided_slice %367 {offsets = [0, 0], sizes = [32, 32], strides = [1, 1]} : vector<96x32xf32> to vector<32x32xf32>
    %514 = vector.extract_strided_slice %365 {offsets = [0, 0], sizes = [1, 32], strides = [1, 1]} : vector<1x96xf32> to vector<1x32xf32>
    %cst_247 = arith.constant dense<0.000000e+00> : vector<8x32xf32>
    %515 = tpu.matmul %512, %513, %cst_247 {dimension_numbers = #tpu.dot_dimension_numbers<[1], [1], [0], [0], [0, 0, 1, 0], [], []>} : vector<8x32xf32>, vector<32x32xf32>, vector<8x32xf32> -> vector<8x32xf32>
    %516 = vector.broadcast %514 : vector<1x32xf32> to vector<8x32xf32>
    %517 = arith.addf %515, %516 : vector<8x32xf32>
    %518 = vector.extract_strided_slice %367 {offsets = [32, 0], sizes = [32, 32], strides = [1, 1]} : vector<96x32xf32> to vector<32x32xf32>
    %519 = vector.extract_strided_slice %365 {offsets = [0, 32], sizes = [1, 32], strides = [1, 1]} : vector<1x96xf32> to vector<1x32xf32>
    %cst_248 = arith.constant dense<0.000000e+00> : vector<8x32xf32>
    %520 = tpu.matmul %355, %518, %cst_248 {dimension_numbers = #tpu.dot_dimension_numbers<[1], [1], [0], [0], [0, 0, 1, 0], [], []>} : vector<8x32xf32>, vector<32x32xf32>, vector<8x32xf32> -> vector<8x32xf32>
    %521 = vector.broadcast %519 : vector<1x32xf32> to vector<8x32xf32>
    %522 = arith.addf %520, %521 : vector<8x32xf32>
    %523 = vector.extract_strided_slice %367 {offsets = [64, 0], sizes = [32, 32], strides = [1, 1]} : vector<96x32xf32> to vector<32x32xf32>
    %524 = vector.extract_strided_slice %365 {offsets = [0, 64], sizes = [1, 32], strides = [1, 1]} : vector<1x96xf32> to vector<1x32xf32>
    %cst_249 = arith.constant dense<0.000000e+00> : vector<8x32xf32>
    %525 = tpu.matmul %355, %523, %cst_249 {dimension_numbers = #tpu.dot_dimension_numbers<[1], [1], [0], [0], [0, 0, 1, 0], [], []>} : vector<8x32xf32>, vector<32x32xf32>, vector<8x32xf32> -> vector<8x32xf32>
    %526 = vector.broadcast %524 : vector<1x32xf32> to vector<8x32xf32>
    %527 = arith.addf %525, %526 : vector<8x32xf32>
    %528 = vector.extract_strided_slice %517 {offsets = [0, 0], sizes = [8, 8], strides = [1, 1]} : vector<8x32xf32> to vector<8x8xf32>
    %529 = vector.extract_strided_slice %522 {offsets = [0, 0], sizes = [8, 8], strides = [1, 1]} : vector<8x32xf32> to vector<8x8xf32>
    %cst_250 = arith.constant dense<0.000000e+00> : vector<8x8xf32>
    %530 = tpu.matmul %528, %529, %cst_250 {dimension_numbers = #tpu.dot_dimension_numbers<[1], [1], [0], [0], [0, 0, 1, 0], [], []>} : vector<8x8xf32>, vector<8x8xf32>, vector<8x8xf32> -> vector<8x8xf32>
    %cst_251 = arith.constant 0.353553385 : f32
    %531 = vector.broadcast %cst_251 : f32 to vector<8x8xf32>
    %532 = arith.mulf %530, %531 : vector<8x8xf32>
    %533 = vector.broadcast %5 : vector<1x8xf32> to vector<8x8xf32>
    %534 = arith.addf %532, %533 : vector<8x8xf32>
    %cst_252 = arith.constant dense<0xFF800000> : vector<8xf32>
    %535 = vector.multi_reduction <maximumf>, %534, %cst_252 [1] : vector<8x8xf32> to vector<8xf32>
    %536 = vector.shape_cast %535 : vector<8xf32> to vector<8x1xf32>
    %537 = vector.broadcast %536 : vector<8x1xf32> to vector<8x8xf32>
    %538 = arith.subf %534, %537 : vector<8x8xf32>
    %539 = math.exp %538 : vector<8x8xf32>
    %cst_253 = arith.constant dense<0.000000e+00> : vector<8xf32>
    %540 = vector.multi_reduction <add>, %539, %cst_253 [1] : vector<8x8xf32> to vector<8xf32>
    %541 = vector.shape_cast %540 : vector<8xf32> to vector<8x1xf32>
    %542 = vector.broadcast %541 : vector<8x1xf32> to vector<8x8xf32>
    %543 = arith.divf %539, %542 : vector<8x8xf32>
    %544 = vector.extract_strided_slice %527 {offsets = [0, 0], sizes = [8, 8], strides = [1, 1]} : vector<8x32xf32> to vector<8x8xf32>
    %cst_254 = arith.constant dense<0.000000e+00> : vector<8x8xf32>
    %545 = tpu.matmul %543, %544, %cst_254 {dimension_numbers = #tpu.dot_dimension_numbers<[1], [0], [0], [1], [0, 0, 1, 1], [], []>} : vector<8x8xf32>, vector<8x8xf32>, vector<8x8xf32> -> vector<8x8xf32>
    %546 = vector.extract_strided_slice %371 {offsets = [0, 0], sizes = [32, 8], strides = [1, 1]} : vector<32x32xf32> to vector<32x8xf32>
    %cst_255 = arith.constant dense<0.000000e+00> : vector<8x32xf32>
    %547 = tpu.matmul %545, %546, %cst_255 {dimension_numbers = #tpu.dot_dimension_numbers<[1], [1], [0], [0], [0, 0, 1, 0], [], []>} : vector<8x8xf32>, vector<32x8xf32>, vector<8x32xf32> -> vector<8x32xf32>
    %548 = vector.extract_strided_slice %517 {offsets = [0, 8], sizes = [8, 8], strides = [1, 1]} : vector<8x32xf32> to vector<8x8xf32>
    %549 = vector.extract_strided_slice %522 {offsets = [0, 8], sizes = [8, 8], strides = [1, 1]} : vector<8x32xf32> to vector<8x8xf32>
    %cst_256 = arith.constant dense<0.000000e+00> : vector<8x8xf32>
    %550 = tpu.matmul %548, %549, %cst_256 {dimension_numbers = #tpu.dot_dimension_numbers<[1], [1], [0], [0], [0, 0, 1, 0], [], []>} : vector<8x8xf32>, vector<8x8xf32>, vector<8x8xf32> -> vector<8x8xf32>
    %cst_257 = arith.constant 0.353553385 : f32
    %551 = vector.broadcast %cst_257 : f32 to vector<8x8xf32>
    %552 = arith.mulf %550, %551 : vector<8x8xf32>
    %553 = vector.broadcast %5 : vector<1x8xf32> to vector<8x8xf32>
    %554 = arith.addf %552, %553 : vector<8x8xf32>
    %cst_258 = arith.constant dense<0xFF800000> : vector<8xf32>
    %555 = vector.multi_reduction <maximumf>, %554, %cst_258 [1] : vector<8x8xf32> to vector<8xf32>
    %556 = vector.shape_cast %555 : vector<8xf32> to vector<8x1xf32>
    %557 = vector.broadcast %556 : vector<8x1xf32> to vector<8x8xf32>
    %558 = arith.subf %554, %557 : vector<8x8xf32>
    %559 = math.exp %558 : vector<8x8xf32>
    %cst_259 = arith.constant dense<0.000000e+00> : vector<8xf32>
    %560 = vector.multi_reduction <add>, %559, %cst_259 [1] : vector<8x8xf32> to vector<8xf32>
    %561 = vector.shape_cast %560 : vector<8xf32> to vector<8x1xf32>
    %562 = vector.broadcast %561 : vector<8x1xf32> to vector<8x8xf32>
    %563 = arith.divf %559, %562 : vector<8x8xf32>
    %564 = vector.extract_strided_slice %527 {offsets = [0, 8], sizes = [8, 8], strides = [1, 1]} : vector<8x32xf32> to vector<8x8xf32>
    %cst_260 = arith.constant dense<0.000000e+00> : vector<8x8xf32>
    %565 = tpu.matmul %563, %564, %cst_260 {dimension_numbers = #tpu.dot_dimension_numbers<[1], [0], [0], [1], [0, 0, 1, 1], [], []>} : vector<8x8xf32>, vector<8x8xf32>, vector<8x8xf32> -> vector<8x8xf32>
    %566 = vector.extract_strided_slice %371 {offsets = [0, 8], sizes = [32, 8], strides = [1, 1]} : vector<32x32xf32> to vector<32x8xf32>
    %cst_261 = arith.constant dense<0.000000e+00> : vector<8x32xf32>
    %567 = tpu.matmul %565, %566, %cst_261 {dimension_numbers = #tpu.dot_dimension_numbers<[1], [1], [0], [0], [0, 0, 1, 0], [], []>} : vector<8x8xf32>, vector<32x8xf32>, vector<8x32xf32> -> vector<8x32xf32>
    %568 = arith.addf %547, %567 : vector<8x32xf32>
    %569 = vector.extract_strided_slice %517 {offsets = [0, 16], sizes = [8, 8], strides = [1, 1]} : vector<8x32xf32> to vector<8x8xf32>
    %570 = vector.extract_strided_slice %522 {offsets = [0, 16], sizes = [8, 8], strides = [1, 1]} : vector<8x32xf32> to vector<8x8xf32>
    %cst_262 = arith.constant dense<0.000000e+00> : vector<8x8xf32>
    %571 = tpu.matmul %569, %570, %cst_262 {dimension_numbers = #tpu.dot_dimension_numbers<[1], [1], [0], [0], [0, 0, 1, 0], [], []>} : vector<8x8xf32>, vector<8x8xf32>, vector<8x8xf32> -> vector<8x8xf32>
    %cst_263 = arith.constant 0.353553385 : f32
    %572 = vector.broadcast %cst_263 : f32 to vector<8x8xf32>
    %573 = arith.mulf %571, %572 : vector<8x8xf32>
    %574 = vector.broadcast %5 : vector<1x8xf32> to vector<8x8xf32>
    %575 = arith.addf %573, %574 : vector<8x8xf32>
    %cst_264 = arith.constant dense<0xFF800000> : vector<8xf32>
    %576 = vector.multi_reduction <maximumf>, %575, %cst_264 [1] : vector<8x8xf32> to vector<8xf32>
    %577 = vector.shape_cast %576 : vector<8xf32> to vector<8x1xf32>
    %578 = vector.broadcast %577 : vector<8x1xf32> to vector<8x8xf32>
    %579 = arith.subf %575, %578 : vector<8x8xf32>
    %580 = math.exp %579 : vector<8x8xf32>
    %cst_265 = arith.constant dense<0.000000e+00> : vector<8xf32>
    %581 = vector.multi_reduction <add>, %580, %cst_265 [1] : vector<8x8xf32> to vector<8xf32>
    %582 = vector.shape_cast %581 : vector<8xf32> to vector<8x1xf32>
    %583 = vector.broadcast %582 : vector<8x1xf32> to vector<8x8xf32>
    %584 = arith.divf %580, %583 : vector<8x8xf32>
    %585 = vector.extract_strided_slice %527 {offsets = [0, 16], sizes = [8, 8], strides = [1, 1]} : vector<8x32xf32> to vector<8x8xf32>
    %cst_266 = arith.constant dense<0.000000e+00> : vector<8x8xf32>
    %586 = tpu.matmul %584, %585, %cst_266 {dimension_numbers = #tpu.dot_dimension_numbers<[1], [0], [0], [1], [0, 0, 1, 1], [], []>} : vector<8x8xf32>, vector<8x8xf32>, vector<8x8xf32> -> vector<8x8xf32>
    %587 = vector.extract_strided_slice %371 {offsets = [0, 16], sizes = [32, 8], strides = [1, 1]} : vector<32x32xf32> to vector<32x8xf32>
    %cst_267 = arith.constant dense<0.000000e+00> : vector<8x32xf32>
    %588 = tpu.matmul %586, %587, %cst_267 {dimension_numbers = #tpu.dot_dimension_numbers<[1], [1], [0], [0], [0, 0, 1, 0], [], []>} : vector<8x8xf32>, vector<32x8xf32>, vector<8x32xf32> -> vector<8x32xf32>
    %589 = arith.addf %568, %588 : vector<8x32xf32>
    %590 = vector.extract_strided_slice %517 {offsets = [0, 24], sizes = [8, 8], strides = [1, 1]} : vector<8x32xf32> to vector<8x8xf32>
    %591 = vector.extract_strided_slice %522 {offsets = [0, 24], sizes = [8, 8], strides = [1, 1]} : vector<8x32xf32> to vector<8x8xf32>
    %cst_268 = arith.constant dense<0.000000e+00> : vector<8x8xf32>
    %592 = tpu.matmul %590, %591, %cst_268 {dimension_numbers = #tpu.dot_dimension_numbers<[1], [1], [0], [0], [0, 0, 1, 0], [], []>} : vector<8x8xf32>, vector<8x8xf32>, vector<8x8xf32> -> vector<8x8xf32>
    %cst_269 = arith.constant 0.353553385 : f32
    %593 = vector.broadcast %cst_269 : f32 to vector<8x8xf32>
    %594 = arith.mulf %592, %593 : vector<8x8xf32>
    %595 = vector.broadcast %5 : vector<1x8xf32> to vector<8x8xf32>
    %596 = arith.addf %594, %595 : vector<8x8xf32>
    %cst_270 = arith.constant dense<0xFF800000> : vector<8xf32>
    %597 = vector.multi_reduction <maximumf>, %596, %cst_270 [1] : vector<8x8xf32> to vector<8xf32>
    %598 = vector.shape_cast %597 : vector<8xf32> to vector<8x1xf32>
    %599 = vector.broadcast %598 : vector<8x1xf32> to vector<8x8xf32>
    %600 = arith.subf %596, %599 : vector<8x8xf32>
    %601 = math.exp %600 : vector<8x8xf32>
    %cst_271 = arith.constant dense<0.000000e+00> : vector<8xf32>
    %602 = vector.multi_reduction <add>, %601, %cst_271 [1] : vector<8x8xf32> to vector<8xf32>
    %603 = vector.shape_cast %602 : vector<8xf32> to vector<8x1xf32>
    %604 = vector.broadcast %603 : vector<8x1xf32> to vector<8x8xf32>
    %605 = arith.divf %601, %604 : vector<8x8xf32>
    %606 = vector.extract_strided_slice %527 {offsets = [0, 24], sizes = [8, 8], strides = [1, 1]} : vector<8x32xf32> to vector<8x8xf32>
    %cst_272 = arith.constant dense<0.000000e+00> : vector<8x8xf32>
    %607 = tpu.matmul %605, %606, %cst_272 {dimension_numbers = #tpu.dot_dimension_numbers<[1], [0], [0], [1], [0, 0, 1, 1], [], []>} : vector<8x8xf32>, vector<8x8xf32>, vector<8x8xf32> -> vector<8x8xf32>
    %608 = vector.extract_strided_slice %371 {offsets = [0, 24], sizes = [32, 8], strides = [1, 1]} : vector<32x32xf32> to vector<32x8xf32>
    %cst_273 = arith.constant dense<0.000000e+00> : vector<8x32xf32>
    %609 = tpu.matmul %607, %608, %cst_273 {dimension_numbers = #tpu.dot_dimension_numbers<[1], [1], [0], [0], [0, 0, 1, 0], [], []>} : vector<8x8xf32>, vector<32x8xf32>, vector<8x32xf32> -> vector<8x32xf32>
    %610 = arith.addf %589, %609 : vector<8x32xf32>
    %611 = vector.broadcast %369 : vector<1x32xf32> to vector<8x32xf32>
    %612 = arith.addf %610, %611 : vector<8x32xf32>
    %613 = arith.addf %512, %612 : vector<8x32xf32>
    %cst_274 = arith.constant dense<0.000000e+00> : vector<8xf32>
    %614 = vector.multi_reduction <add>, %613, %cst_274 [1] : vector<8x32xf32> to vector<8xf32>
    %615 = vector.shape_cast %614 : vector<8xf32> to vector<8x1xf32>
    %cst_275 = arith.constant 3.200000e+01 : f32
    %616 = vector.broadcast %cst_275 : f32 to vector<8x1xf32>
    %617 = arith.divf %615, %616 : vector<8x1xf32>
    %618 = vector.broadcast %617 : vector<8x1xf32> to vector<8x32xf32>
    %619 = arith.subf %613, %618 : vector<8x32xf32>
    %620 = arith.mulf %619, %619 : vector<8x32xf32>
    %cst_276 = arith.constant dense<0.000000e+00> : vector<8xf32>
    %621 = vector.multi_reduction <add>, %620, %cst_276 [1] : vector<8x32xf32> to vector<8xf32>
    %622 = vector.shape_cast %621 : vector<8xf32> to vector<8x1xf32>
    %cst_277 = arith.constant 3.200000e+01 : f32
    %623 = vector.broadcast %cst_277 : f32 to vector<8x1xf32>
    %624 = arith.divf %622, %623 : vector<8x1xf32>
    %cst_278 = arith.constant 9.99999974E-6 : f32
    %625 = vector.broadcast %cst_278 : f32 to vector<8x1xf32>
    %626 = arith.addf %624, %625 : vector<8x1xf32>
    %627 = math.rsqrt %626 : vector<8x1xf32>
    %628 = vector.broadcast %627 : vector<8x1xf32> to vector<8x32xf32>
    %629 = arith.mulf %619, %628 : vector<8x32xf32>
    %630 = vector.broadcast %387 : vector<1x32xf32> to vector<8x32xf32>
    %631 = arith.mulf %629, %630 : vector<8x32xf32>
    %632 = vector.broadcast %385 : vector<1x32xf32> to vector<8x32xf32>
    %633 = arith.addf %631, %632 : vector<8x32xf32>
    %cst_279 = arith.constant dense<0.000000e+00> : vector<8x64xf32>
    %634 = tpu.matmul %633, %375, %cst_279 {dimension_numbers = #tpu.dot_dimension_numbers<[1], [1], [0], [0], [0, 0, 1, 0], [], []>} : vector<8x32xf32>, vector<64x32xf32>, vector<8x64xf32> -> vector<8x64xf32>
    %635 = vector.broadcast %373 : vector<1x64xf32> to vector<8x64xf32>
    %636 = arith.addf %634, %635 : vector<8x64xf32>
    %cst_280 = arith.constant 0.000000e+00 : f32
    %637 = vector.broadcast %cst_280 : f32 to vector<8x64xf32>
    %638 = arith.maximumf %636, %637 : vector<8x64xf32>
    %cst_281 = arith.constant dense<0.000000e+00> : vector<8x32xf32>
    %639 = tpu.matmul %638, %379, %cst_281 {dimension_numbers = #tpu.dot_dimension_numbers<[1], [1], [0], [0], [0, 0, 1, 0], [], []>} : vector<8x64xf32>, vector<32x64xf32>, vector<8x32xf32> -> vector<8x32xf32>
    %640 = vector.broadcast %377 : vector<1x32xf32> to vector<8x32xf32>
    %641 = arith.addf %639, %640 : vector<8x32xf32>
    %642 = arith.addf %633, %641 : vector<8x32xf32>
    %cst_282 = arith.constant dense<0.000000e+00> : vector<8xf32>
    %643 = vector.multi_reduction <add>, %642, %cst_282 [1] : vector<8x32xf32> to vector<8xf32>
    %644 = vector.shape_cast %643 : vector<8xf32> to vector<8x1xf32>
    %cst_283 = arith.constant 3.200000e+01 : f32
    %645 = vector.broadcast %cst_283 : f32 to vector<8x1xf32>
    %646 = arith.divf %644, %645 : vector<8x1xf32>
    %647 = vector.broadcast %646 : vector<8x1xf32> to vector<8x32xf32>
    %648 = arith.subf %642, %647 : vector<8x32xf32>
    %649 = arith.mulf %648, %648 : vector<8x32xf32>
    %cst_284 = arith.constant dense<0.000000e+00> : vector<8xf32>
    %650 = vector.multi_reduction <add>, %649, %cst_284 [1] : vector<8x32xf32> to vector<8xf32>
    %651 = vector.shape_cast %650 : vector<8xf32> to vector<8x1xf32>
    %cst_285 = arith.constant 3.200000e+01 : f32
    %652 = vector.broadcast %cst_285 : f32 to vector<8x1xf32>
    %653 = arith.divf %651, %652 : vector<8x1xf32>
    %cst_286 = arith.constant 9.99999974E-6 : f32
    %654 = vector.broadcast %cst_286 : f32 to vector<8x1xf32>
    %655 = arith.addf %653, %654 : vector<8x1xf32>
    %656 = math.rsqrt %655 : vector<8x1xf32>
    %657 = vector.broadcast %656 : vector<8x1xf32> to vector<8x32xf32>
    %658 = arith.mulf %648, %657 : vector<8x32xf32>
    %659 = vector.broadcast %391 : vector<1x32xf32> to vector<8x32xf32>
    %660 = arith.mulf %658, %659 : vector<8x32xf32>
    %661 = vector.broadcast %389 : vector<1x32xf32> to vector<8x32xf32>
    %662 = arith.addf %660, %661 : vector<8x32xf32>
    %c1_287 = arith.constant 1 : index
    %c0_288 = arith.constant 0 : index
    %c0_289 = arith.constant 0 : index
    %663 = vector.load %arg5[%c1_287, %c0_288, %c0_289] : memref<2x1x96xf32, #tpu.memory_space<vmem>>, vector<1x1x96xf32>
    %664 = vector.shape_cast %663 : vector<1x1x96xf32> to vector<1x96xf32>
    %c1_290 = arith.constant 1 : index
    %c0_291 = arith.constant 0 : index
    %c0_292 = arith.constant 0 : index
    %665 = vector.load %arg6[%c1_290, %c0_291, %c0_292] : memref<2x96x32xf32, #tpu.memory_space<vmem>>, vector<1x96x32xf32>
    %666 = vector.shape_cast %665 : vector<1x96x32xf32> to vector<96x32xf32>
    %c1_293 = arith.constant 1 : index
    %c0_294 = arith.constant 0 : index
    %c0_295 = arith.constant 0 : index
    %667 = vector.load %arg7[%c1_293, %c0_294, %c0_295] : memref<2x1x32xf32, #tpu.memory_space<vmem>>, vector<1x1x32xf32>
    %668 = vector.shape_cast %667 : vector<1x1x32xf32> to vector<1x32xf32>
    %c1_296 = arith.constant 1 : index
    %c0_297 = arith.constant 0 : index
    %c0_298 = arith.constant 0 : index
    %669 = vector.load %arg8[%c1_296, %c0_297, %c0_298] : memref<2x32x32xf32, #tpu.memory_space<vmem>>, vector<1x32x32xf32>
    %670 = vector.shape_cast %669 : vector<1x32x32xf32> to vector<32x32xf32>
    %c1_299 = arith.constant 1 : index
    %c0_300 = arith.constant 0 : index
    %c0_301 = arith.constant 0 : index
    %671 = vector.load %arg9[%c1_299, %c0_300, %c0_301] : memref<2x1x96xf32, #tpu.memory_space<vmem>>, vector<1x1x96xf32>
    %672 = vector.shape_cast %671 : vector<1x1x96xf32> to vector<1x96xf32>
    %c1_302 = arith.constant 1 : index
    %c0_303 = arith.constant 0 : index
    %c0_304 = arith.constant 0 : index
    %673 = vector.load %arg10[%c1_302, %c0_303, %c0_304] : memref<2x96x32xf32, #tpu.memory_space<vmem>>, vector<1x96x32xf32>
    %674 = vector.shape_cast %673 : vector<1x96x32xf32> to vector<96x32xf32>
    %c1_305 = arith.constant 1 : index
    %c0_306 = arith.constant 0 : index
    %c0_307 = arith.constant 0 : index
    %675 = vector.load %arg11[%c1_305, %c0_306, %c0_307] : memref<2x1x32xf32, #tpu.memory_space<vmem>>, vector<1x1x32xf32>
    %676 = vector.shape_cast %675 : vector<1x1x32xf32> to vector<1x32xf32>
    %c1_308 = arith.constant 1 : index
    %c0_309 = arith.constant 0 : index
    %c0_310 = arith.constant 0 : index
    %677 = vector.load %arg12[%c1_308, %c0_309, %c0_310] : memref<2x32x32xf32, #tpu.memory_space<vmem>>, vector<1x32x32xf32>
    %678 = vector.shape_cast %677 : vector<1x32x32xf32> to vector<32x32xf32>
    %c1_311 = arith.constant 1 : index
    %c0_312 = arith.constant 0 : index
    %c0_313 = arith.constant 0 : index
    %679 = vector.load %arg13[%c1_311, %c0_312, %c0_313] : memref<2x1x64xf32, #tpu.memory_space<vmem>>, vector<1x1x64xf32>
    %680 = vector.shape_cast %679 : vector<1x1x64xf32> to vector<1x64xf32>
    %c1_314 = arith.constant 1 : index
    %c0_315 = arith.constant 0 : index
    %c0_316 = arith.constant 0 : index
    %681 = vector.load %arg14[%c1_314, %c0_315, %c0_316] : memref<2x64x32xf32, #tpu.memory_space<vmem>>, vector<1x64x32xf32>
    %682 = vector.shape_cast %681 : vector<1x64x32xf32> to vector<64x32xf32>
    %c1_317 = arith.constant 1 : index
    %c0_318 = arith.constant 0 : index
    %c0_319 = arith.constant 0 : index
    %683 = vector.load %arg15[%c1_317, %c0_318, %c0_319] : memref<2x1x32xf32, #tpu.memory_space<vmem>>, vector<1x1x32xf32>
    %684 = vector.shape_cast %683 : vector<1x1x32xf32> to vector<1x32xf32>
    %c1_320 = arith.constant 1 : index
    %c0_321 = arith.constant 0 : index
    %c0_322 = arith.constant 0 : index
    %685 = vector.load %arg16[%c1_320, %c0_321, %c0_322] : memref<2x32x64xf32, #tpu.memory_space<vmem>>, vector<1x32x64xf32>
    %686 = vector.shape_cast %685 : vector<1x32x64xf32> to vector<32x64xf32>
    %c1_323 = arith.constant 1 : index
    %c0_324 = arith.constant 0 : index
    %c0_325 = arith.constant 0 : index
    %687 = vector.load %arg17[%c1_323, %c0_324, %c0_325] : memref<2x1x32xf32, #tpu.memory_space<vmem>>, vector<1x1x32xf32>
    %688 = vector.shape_cast %687 : vector<1x1x32xf32> to vector<1x32xf32>
    %c1_326 = arith.constant 1 : index
    %c0_327 = arith.constant 0 : index
    %c0_328 = arith.constant 0 : index
    %689 = vector.load %arg18[%c1_326, %c0_327, %c0_328] : memref<2x1x32xf32, #tpu.memory_space<vmem>>, vector<1x1x32xf32>
    %690 = vector.shape_cast %689 : vector<1x1x32xf32> to vector<1x32xf32>
    %c1_329 = arith.constant 1 : index
    %c0_330 = arith.constant 0 : index
    %c0_331 = arith.constant 0 : index
    %691 = vector.load %arg19[%c1_329, %c0_330, %c0_331] : memref<2x1x32xf32, #tpu.memory_space<vmem>>, vector<1x1x32xf32>
    %692 = vector.shape_cast %691 : vector<1x1x32xf32> to vector<1x32xf32>
    %c1_332 = arith.constant 1 : index
    %c0_333 = arith.constant 0 : index
    %c0_334 = arith.constant 0 : index
    %693 = vector.load %arg20[%c1_332, %c0_333, %c0_334] : memref<2x1x32xf32, #tpu.memory_space<vmem>>, vector<1x1x32xf32>
    %694 = vector.shape_cast %693 : vector<1x1x32xf32> to vector<1x32xf32>
    %c1_335 = arith.constant 1 : index
    %c0_336 = arith.constant 0 : index
    %c0_337 = arith.constant 0 : index
    %695 = vector.load %arg21[%c1_335, %c0_336, %c0_337] : memref<2x1x32xf32, #tpu.memory_space<vmem>>, vector<1x1x32xf32>
    %696 = vector.shape_cast %695 : vector<1x1x32xf32> to vector<1x32xf32>
    %c1_338 = arith.constant 1 : index
    %c0_339 = arith.constant 0 : index
    %c0_340 = arith.constant 0 : index
    %697 = vector.load %arg22[%c1_338, %c0_339, %c0_340] : memref<2x1x32xf32, #tpu.memory_space<vmem>>, vector<1x1x32xf32>
    %698 = vector.shape_cast %697 : vector<1x1x32xf32> to vector<1x32xf32>
    %699 = vector.extract_strided_slice %666 {offsets = [0, 0], sizes = [32, 32], strides = [1, 1]} : vector<96x32xf32> to vector<32x32xf32>
    %700 = vector.extract_strided_slice %664 {offsets = [0, 0], sizes = [1, 32], strides = [1, 1]} : vector<1x96xf32> to vector<1x32xf32>
    %cst_341 = arith.constant dense<0.000000e+00> : vector<8x32xf32>
    %701 = tpu.matmul %662, %699, %cst_341 {dimension_numbers = #tpu.dot_dimension_numbers<[1], [1], [0], [0], [0, 0, 1, 0], [], []>} : vector<8x32xf32>, vector<32x32xf32>, vector<8x32xf32> -> vector<8x32xf32>
    %702 = vector.broadcast %700 : vector<1x32xf32> to vector<8x32xf32>
    %703 = arith.addf %701, %702 : vector<8x32xf32>
    %704 = vector.extract_strided_slice %666 {offsets = [32, 0], sizes = [32, 32], strides = [1, 1]} : vector<96x32xf32> to vector<32x32xf32>
    %705 = vector.extract_strided_slice %664 {offsets = [0, 32], sizes = [1, 32], strides = [1, 1]} : vector<1x96xf32> to vector<1x32xf32>
    %cst_342 = arith.constant dense<0.000000e+00> : vector<8x32xf32>
    %706 = tpu.matmul %662, %704, %cst_342 {dimension_numbers = #tpu.dot_dimension_numbers<[1], [1], [0], [0], [0, 0, 1, 0], [], []>} : vector<8x32xf32>, vector<32x32xf32>, vector<8x32xf32> -> vector<8x32xf32>
    %707 = vector.broadcast %705 : vector<1x32xf32> to vector<8x32xf32>
    %708 = arith.addf %706, %707 : vector<8x32xf32>
    %709 = vector.extract_strided_slice %666 {offsets = [64, 0], sizes = [32, 32], strides = [1, 1]} : vector<96x32xf32> to vector<32x32xf32>
    %710 = vector.extract_strided_slice %664 {offsets = [0, 64], sizes = [1, 32], strides = [1, 1]} : vector<1x96xf32> to vector<1x32xf32>
    %cst_343 = arith.constant dense<0.000000e+00> : vector<8x32xf32>
    %711 = tpu.matmul %662, %709, %cst_343 {dimension_numbers = #tpu.dot_dimension_numbers<[1], [1], [0], [0], [0, 0, 1, 0], [], []>} : vector<8x32xf32>, vector<32x32xf32>, vector<8x32xf32> -> vector<8x32xf32>
    %712 = vector.broadcast %710 : vector<1x32xf32> to vector<8x32xf32>
    %713 = arith.addf %711, %712 : vector<8x32xf32>
    %714 = vector.extract_strided_slice %703 {offsets = [0, 0], sizes = [8, 8], strides = [1, 1]} : vector<8x32xf32> to vector<8x8xf32>
    %715 = vector.extract_strided_slice %708 {offsets = [0, 0], sizes = [8, 8], strides = [1, 1]} : vector<8x32xf32> to vector<8x8xf32>
    %cst_344 = arith.constant dense<0.000000e+00> : vector<8x8xf32>
    %716 = tpu.matmul %714, %715, %cst_344 {dimension_numbers = #tpu.dot_dimension_numbers<[1], [1], [0], [0], [0, 0, 1, 0], [], []>} : vector<8x8xf32>, vector<8x8xf32>, vector<8x8xf32> -> vector<8x8xf32>
    %cst_345 = arith.constant 0.353553385 : f32
    %717 = vector.broadcast %cst_345 : f32 to vector<8x8xf32>
    %718 = arith.mulf %716, %717 : vector<8x8xf32>
    %719 = vector.broadcast %7 : vector<1x8xf32> to vector<8x8xf32>
    %720 = arith.addf %718, %719 : vector<8x8xf32>
    %cst_346 = arith.constant dense<0xFF800000> : vector<8xf32>
    %721 = vector.multi_reduction <maximumf>, %720, %cst_346 [1] : vector<8x8xf32> to vector<8xf32>
    %722 = vector.shape_cast %721 : vector<8xf32> to vector<8x1xf32>
    %723 = vector.broadcast %722 : vector<8x1xf32> to vector<8x8xf32>
    %724 = arith.subf %720, %723 : vector<8x8xf32>
    %725 = math.exp %724 : vector<8x8xf32>
    %cst_347 = arith.constant dense<0.000000e+00> : vector<8xf32>
    %726 = vector.multi_reduction <add>, %725, %cst_347 [1] : vector<8x8xf32> to vector<8xf32>
    %727 = vector.shape_cast %726 : vector<8xf32> to vector<8x1xf32>
    %728 = vector.broadcast %727 : vector<8x1xf32> to vector<8x8xf32>
    %729 = arith.divf %725, %728 : vector<8x8xf32>
    %730 = vector.extract_strided_slice %713 {offsets = [0, 0], sizes = [8, 8], strides = [1, 1]} : vector<8x32xf32> to vector<8x8xf32>
    %cst_348 = arith.constant dense<0.000000e+00> : vector<8x8xf32>
    %731 = tpu.matmul %729, %730, %cst_348 {dimension_numbers = #tpu.dot_dimension_numbers<[1], [0], [0], [1], [0, 0, 1, 1], [], []>} : vector<8x8xf32>, vector<8x8xf32>, vector<8x8xf32> -> vector<8x8xf32>
    %732 = vector.extract_strided_slice %670 {offsets = [0, 0], sizes = [32, 8], strides = [1, 1]} : vector<32x32xf32> to vector<32x8xf32>
    %cst_349 = arith.constant dense<0.000000e+00> : vector<8x32xf32>
    %733 = tpu.matmul %731, %732, %cst_349 {dimension_numbers = #tpu.dot_dimension_numbers<[1], [1], [0], [0], [0, 0, 1, 0], [], []>} : vector<8x8xf32>, vector<32x8xf32>, vector<8x32xf32> -> vector<8x32xf32>
    %734 = vector.extract_strided_slice %703 {offsets = [0, 8], sizes = [8, 8], strides = [1, 1]} : vector<8x32xf32> to vector<8x8xf32>
    %735 = vector.extract_strided_slice %708 {offsets = [0, 8], sizes = [8, 8], strides = [1, 1]} : vector<8x32xf32> to vector<8x8xf32>
    %cst_350 = arith.constant dense<0.000000e+00> : vector<8x8xf32>
    %736 = tpu.matmul %734, %735, %cst_350 {dimension_numbers = #tpu.dot_dimension_numbers<[1], [1], [0], [0], [0, 0, 1, 0], [], []>} : vector<8x8xf32>, vector<8x8xf32>, vector<8x8xf32> -> vector<8x8xf32>
    %cst_351 = arith.constant 0.353553385 : f32
    %737 = vector.broadcast %cst_351 : f32 to vector<8x8xf32>
    %738 = arith.mulf %736, %737 : vector<8x8xf32>
    %739 = vector.broadcast %7 : vector<1x8xf32> to vector<8x8xf32>
    %740 = arith.addf %738, %739 : vector<8x8xf32>
    %cst_352 = arith.constant dense<0xFF800000> : vector<8xf32>
    %741 = vector.multi_reduction <maximumf>, %740, %cst_352 [1] : vector<8x8xf32> to vector<8xf32>
    %742 = vector.shape_cast %741 : vector<8xf32> to vector<8x1xf32>
    %743 = vector.broadcast %742 : vector<8x1xf32> to vector<8x8xf32>
    %744 = arith.subf %740, %743 : vector<8x8xf32>
    %745 = math.exp %744 : vector<8x8xf32>
    %cst_353 = arith.constant dense<0.000000e+00> : vector<8xf32>
    %746 = vector.multi_reduction <add>, %745, %cst_353 [1] : vector<8x8xf32> to vector<8xf32>
    %747 = vector.shape_cast %746 : vector<8xf32> to vector<8x1xf32>
    %748 = vector.broadcast %747 : vector<8x1xf32> to vector<8x8xf32>
    %749 = arith.divf %745, %748 : vector<8x8xf32>
    %750 = vector.extract_strided_slice %713 {offsets = [0, 8], sizes = [8, 8], strides = [1, 1]} : vector<8x32xf32> to vector<8x8xf32>
    %cst_354 = arith.constant dense<0.000000e+00> : vector<8x8xf32>
    %751 = tpu.matmul %749, %750, %cst_354 {dimension_numbers = #tpu.dot_dimension_numbers<[1], [0], [0], [1], [0, 0, 1, 1], [], []>} : vector<8x8xf32>, vector<8x8xf32>, vector<8x8xf32> -> vector<8x8xf32>
    %752 = vector.extract_strided_slice %670 {offsets = [0, 8], sizes = [32, 8], strides = [1, 1]} : vector<32x32xf32> to vector<32x8xf32>
    %cst_355 = arith.constant dense<0.000000e+00> : vector<8x32xf32>
    %753 = tpu.matmul %751, %752, %cst_355 {dimension_numbers = #tpu.dot_dimension_numbers<[1], [1], [0], [0], [0, 0, 1, 0], [], []>} : vector<8x8xf32>, vector<32x8xf32>, vector<8x32xf32> -> vector<8x32xf32>
    %754 = arith.addf %733, %753 : vector<8x32xf32>
    %755 = vector.extract_strided_slice %703 {offsets = [0, 16], sizes = [8, 8], strides = [1, 1]} : vector<8x32xf32> to vector<8x8xf32>
    %756 = vector.extract_strided_slice %708 {offsets = [0, 16], sizes = [8, 8], strides = [1, 1]} : vector<8x32xf32> to vector<8x8xf32>
    %cst_356 = arith.constant dense<0.000000e+00> : vector<8x8xf32>
    %757 = tpu.matmul %755, %756, %cst_356 {dimension_numbers = #tpu.dot_dimension_numbers<[1], [1], [0], [0], [0, 0, 1, 0], [], []>} : vector<8x8xf32>, vector<8x8xf32>, vector<8x8xf32> -> vector<8x8xf32>
    %cst_357 = arith.constant 0.353553385 : f32
    %758 = vector.broadcast %cst_357 : f32 to vector<8x8xf32>
    %759 = arith.mulf %757, %758 : vector<8x8xf32>
    %760 = vector.broadcast %7 : vector<1x8xf32> to vector<8x8xf32>
    %761 = arith.addf %759, %760 : vector<8x8xf32>
    %cst_358 = arith.constant dense<0xFF800000> : vector<8xf32>
    %762 = vector.multi_reduction <maximumf>, %761, %cst_358 [1] : vector<8x8xf32> to vector<8xf32>
    %763 = vector.shape_cast %762 : vector<8xf32> to vector<8x1xf32>
    %764 = vector.broadcast %763 : vector<8x1xf32> to vector<8x8xf32>
    %765 = arith.subf %761, %764 : vector<8x8xf32>
    %766 = math.exp %765 : vector<8x8xf32>
    %cst_359 = arith.constant dense<0.000000e+00> : vector<8xf32>
    %767 = vector.multi_reduction <add>, %766, %cst_359 [1] : vector<8x8xf32> to vector<8xf32>
    %768 = vector.shape_cast %767 : vector<8xf32> to vector<8x1xf32>
    %769 = vector.broadcast %768 : vector<8x1xf32> to vector<8x8xf32>
    %770 = arith.divf %766, %769 : vector<8x8xf32>
    %771 = vector.extract_strided_slice %713 {offsets = [0, 16], sizes = [8, 8], strides = [1, 1]} : vector<8x32xf32> to vector<8x8xf32>
    %cst_360 = arith.constant dense<0.000000e+00> : vector<8x8xf32>
    %772 = tpu.matmul %770, %771, %cst_360 {dimension_numbers = #tpu.dot_dimension_numbers<[1], [0], [0], [1], [0, 0, 1, 1], [], []>} : vector<8x8xf32>, vector<8x8xf32>, vector<8x8xf32> -> vector<8x8xf32>
    %773 = vector.extract_strided_slice %670 {offsets = [0, 16], sizes = [32, 8], strides = [1, 1]} : vector<32x32xf32> to vector<32x8xf32>
    %cst_361 = arith.constant dense<0.000000e+00> : vector<8x32xf32>
    %774 = tpu.matmul %772, %773, %cst_361 {dimension_numbers = #tpu.dot_dimension_numbers<[1], [1], [0], [0], [0, 0, 1, 0], [], []>} : vector<8x8xf32>, vector<32x8xf32>, vector<8x32xf32> -> vector<8x32xf32>
    %775 = arith.addf %754, %774 : vector<8x32xf32>
    %776 = vector.extract_strided_slice %703 {offsets = [0, 24], sizes = [8, 8], strides = [1, 1]} : vector<8x32xf32> to vector<8x8xf32>
    %777 = vector.extract_strided_slice %708 {offsets = [0, 24], sizes = [8, 8], strides = [1, 1]} : vector<8x32xf32> to vector<8x8xf32>
    %cst_362 = arith.constant dense<0.000000e+00> : vector<8x8xf32>
    %778 = tpu.matmul %776, %777, %cst_362 {dimension_numbers = #tpu.dot_dimension_numbers<[1], [1], [0], [0], [0, 0, 1, 0], [], []>} : vector<8x8xf32>, vector<8x8xf32>, vector<8x8xf32> -> vector<8x8xf32>
    %cst_363 = arith.constant 0.353553385 : f32
    %779 = vector.broadcast %cst_363 : f32 to vector<8x8xf32>
    %780 = arith.mulf %778, %779 : vector<8x8xf32>
    %781 = vector.broadcast %7 : vector<1x8xf32> to vector<8x8xf32>
    %782 = arith.addf %780, %781 : vector<8x8xf32>
    %cst_364 = arith.constant dense<0xFF800000> : vector<8xf32>
    %783 = vector.multi_reduction <maximumf>, %782, %cst_364 [1] : vector<8x8xf32> to vector<8xf32>
    %784 = vector.shape_cast %783 : vector<8xf32> to vector<8x1xf32>
    %785 = vector.broadcast %784 : vector<8x1xf32> to vector<8x8xf32>
    %786 = arith.subf %782, %785 : vector<8x8xf32>
    %787 = math.exp %786 : vector<8x8xf32>
    %cst_365 = arith.constant dense<0.000000e+00> : vector<8xf32>
    %788 = vector.multi_reduction <add>, %787, %cst_365 [1] : vector<8x8xf32> to vector<8xf32>
    %789 = vector.shape_cast %788 : vector<8xf32> to vector<8x1xf32>
    %790 = vector.broadcast %789 : vector<8x1xf32> to vector<8x8xf32>
    %791 = arith.divf %787, %790 : vector<8x8xf32>
    %792 = vector.extract_strided_slice %713 {offsets = [0, 24], sizes = [8, 8], strides = [1, 1]} : vector<8x32xf32> to vector<8x8xf32>
    %cst_366 = arith.constant dense<0.000000e+00> : vector<8x8xf32>
    %793 = tpu.matmul %791, %792, %cst_366 {dimension_numbers = #tpu.dot_dimension_numbers<[1], [0], [0], [1], [0, 0, 1, 1], [], []>} : vector<8x8xf32>, vector<8x8xf32>, vector<8x8xf32> -> vector<8x8xf32>
    %794 = vector.extract_strided_slice %670 {offsets = [0, 24], sizes = [32, 8], strides = [1, 1]} : vector<32x32xf32> to vector<32x8xf32>
    %cst_367 = arith.constant dense<0.000000e+00> : vector<8x32xf32>
    %795 = tpu.matmul %793, %794, %cst_367 {dimension_numbers = #tpu.dot_dimension_numbers<[1], [1], [0], [0], [0, 0, 1, 0], [], []>} : vector<8x8xf32>, vector<32x8xf32>, vector<8x32xf32> -> vector<8x32xf32>
    %796 = arith.addf %775, %795 : vector<8x32xf32>
    %797 = vector.broadcast %668 : vector<1x32xf32> to vector<8x32xf32>
    %798 = arith.addf %796, %797 : vector<8x32xf32>
    %799 = arith.addf %662, %798 : vector<8x32xf32>
    %cst_368 = arith.constant dense<0.000000e+00> : vector<8xf32>
    %800 = vector.multi_reduction <add>, %799, %cst_368 [1] : vector<8x32xf32> to vector<8xf32>
    %801 = vector.shape_cast %800 : vector<8xf32> to vector<8x1xf32>
    %cst_369 = arith.constant 3.200000e+01 : f32
    %802 = vector.broadcast %cst_369 : f32 to vector<8x1xf32>
    %803 = arith.divf %801, %802 : vector<8x1xf32>
    %804 = vector.broadcast %803 : vector<8x1xf32> to vector<8x32xf32>
    %805 = arith.subf %799, %804 : vector<8x32xf32>
    %806 = arith.mulf %805, %805 : vector<8x32xf32>
    %cst_370 = arith.constant dense<0.000000e+00> : vector<8xf32>
    %807 = vector.multi_reduction <add>, %806, %cst_370 [1] : vector<8x32xf32> to vector<8xf32>
    %808 = vector.shape_cast %807 : vector<8xf32> to vector<8x1xf32>
    %cst_371 = arith.constant 3.200000e+01 : f32
    %809 = vector.broadcast %cst_371 : f32 to vector<8x1xf32>
    %810 = arith.divf %808, %809 : vector<8x1xf32>
    %cst_372 = arith.constant 9.99999974E-6 : f32
    %811 = vector.broadcast %cst_372 : f32 to vector<8x1xf32>
    %812 = arith.addf %810, %811 : vector<8x1xf32>
    %813 = math.rsqrt %812 : vector<8x1xf32>
    %814 = vector.broadcast %813 : vector<8x1xf32> to vector<8x32xf32>
    %815 = arith.mulf %805, %814 : vector<8x32xf32>
    %816 = vector.broadcast %690 : vector<1x32xf32> to vector<8x32xf32>
    %817 = arith.mulf %815, %816 : vector<8x32xf32>
    %818 = vector.broadcast %688 : vector<1x32xf32> to vector<8x32xf32>
    %819 = arith.addf %817, %818 : vector<8x32xf32>
    %820 = vector.extract_strided_slice %674 {offsets = [0, 0], sizes = [32, 32], strides = [1, 1]} : vector<96x32xf32> to vector<32x32xf32>
    %821 = vector.extract_strided_slice %672 {offsets = [0, 0], sizes = [1, 32], strides = [1, 1]} : vector<1x96xf32> to vector<1x32xf32>
    %cst_373 = arith.constant dense<0.000000e+00> : vector<8x32xf32>
    %822 = tpu.matmul %819, %820, %cst_373 {dimension_numbers = #tpu.dot_dimension_numbers<[1], [1], [0], [0], [0, 0, 1, 0], [], []>} : vector<8x32xf32>, vector<32x32xf32>, vector<8x32xf32> -> vector<8x32xf32>
    %823 = vector.broadcast %821 : vector<1x32xf32> to vector<8x32xf32>
    %824 = arith.addf %822, %823 : vector<8x32xf32>
    %825 = vector.extract_strided_slice %674 {offsets = [32, 0], sizes = [32, 32], strides = [1, 1]} : vector<96x32xf32> to vector<32x32xf32>
    %826 = vector.extract_strided_slice %672 {offsets = [0, 32], sizes = [1, 32], strides = [1, 1]} : vector<1x96xf32> to vector<1x32xf32>
    %cst_374 = arith.constant dense<0.000000e+00> : vector<8x32xf32>
    %827 = tpu.matmul %355, %825, %cst_374 {dimension_numbers = #tpu.dot_dimension_numbers<[1], [1], [0], [0], [0, 0, 1, 0], [], []>} : vector<8x32xf32>, vector<32x32xf32>, vector<8x32xf32> -> vector<8x32xf32>
    %828 = vector.broadcast %826 : vector<1x32xf32> to vector<8x32xf32>
    %829 = arith.addf %827, %828 : vector<8x32xf32>
    %830 = vector.extract_strided_slice %674 {offsets = [64, 0], sizes = [32, 32], strides = [1, 1]} : vector<96x32xf32> to vector<32x32xf32>
    %831 = vector.extract_strided_slice %672 {offsets = [0, 64], sizes = [1, 32], strides = [1, 1]} : vector<1x96xf32> to vector<1x32xf32>
    %cst_375 = arith.constant dense<0.000000e+00> : vector<8x32xf32>
    %832 = tpu.matmul %355, %830, %cst_375 {dimension_numbers = #tpu.dot_dimension_numbers<[1], [1], [0], [0], [0, 0, 1, 0], [], []>} : vector<8x32xf32>, vector<32x32xf32>, vector<8x32xf32> -> vector<8x32xf32>
    %833 = vector.broadcast %831 : vector<1x32xf32> to vector<8x32xf32>
    %834 = arith.addf %832, %833 : vector<8x32xf32>
    %835 = vector.extract_strided_slice %824 {offsets = [0, 0], sizes = [8, 8], strides = [1, 1]} : vector<8x32xf32> to vector<8x8xf32>
    %836 = vector.extract_strided_slice %829 {offsets = [0, 0], sizes = [8, 8], strides = [1, 1]} : vector<8x32xf32> to vector<8x8xf32>
    %cst_376 = arith.constant dense<0.000000e+00> : vector<8x8xf32>
    %837 = tpu.matmul %835, %836, %cst_376 {dimension_numbers = #tpu.dot_dimension_numbers<[1], [1], [0], [0], [0, 0, 1, 0], [], []>} : vector<8x8xf32>, vector<8x8xf32>, vector<8x8xf32> -> vector<8x8xf32>
    %cst_377 = arith.constant 0.353553385 : f32
    %838 = vector.broadcast %cst_377 : f32 to vector<8x8xf32>
    %839 = arith.mulf %837, %838 : vector<8x8xf32>
    %840 = vector.broadcast %5 : vector<1x8xf32> to vector<8x8xf32>
    %841 = arith.addf %839, %840 : vector<8x8xf32>
    %cst_378 = arith.constant dense<0xFF800000> : vector<8xf32>
    %842 = vector.multi_reduction <maximumf>, %841, %cst_378 [1] : vector<8x8xf32> to vector<8xf32>
    %843 = vector.shape_cast %842 : vector<8xf32> to vector<8x1xf32>
    %844 = vector.broadcast %843 : vector<8x1xf32> to vector<8x8xf32>
    %845 = arith.subf %841, %844 : vector<8x8xf32>
    %846 = math.exp %845 : vector<8x8xf32>
    %cst_379 = arith.constant dense<0.000000e+00> : vector<8xf32>
    %847 = vector.multi_reduction <add>, %846, %cst_379 [1] : vector<8x8xf32> to vector<8xf32>
    %848 = vector.shape_cast %847 : vector<8xf32> to vector<8x1xf32>
    %849 = vector.broadcast %848 : vector<8x1xf32> to vector<8x8xf32>
    %850 = arith.divf %846, %849 : vector<8x8xf32>
    %851 = vector.extract_strided_slice %834 {offsets = [0, 0], sizes = [8, 8], strides = [1, 1]} : vector<8x32xf32> to vector<8x8xf32>
    %cst_380 = arith.constant dense<0.000000e+00> : vector<8x8xf32>
    %852 = tpu.matmul %850, %851, %cst_380 {dimension_numbers = #tpu.dot_dimension_numbers<[1], [0], [0], [1], [0, 0, 1, 1], [], []>} : vector<8x8xf32>, vector<8x8xf32>, vector<8x8xf32> -> vector<8x8xf32>
    %853 = vector.extract_strided_slice %678 {offsets = [0, 0], sizes = [32, 8], strides = [1, 1]} : vector<32x32xf32> to vector<32x8xf32>
    %cst_381 = arith.constant dense<0.000000e+00> : vector<8x32xf32>
    %854 = tpu.matmul %852, %853, %cst_381 {dimension_numbers = #tpu.dot_dimension_numbers<[1], [1], [0], [0], [0, 0, 1, 0], [], []>} : vector<8x8xf32>, vector<32x8xf32>, vector<8x32xf32> -> vector<8x32xf32>
    %855 = vector.extract_strided_slice %824 {offsets = [0, 8], sizes = [8, 8], strides = [1, 1]} : vector<8x32xf32> to vector<8x8xf32>
    %856 = vector.extract_strided_slice %829 {offsets = [0, 8], sizes = [8, 8], strides = [1, 1]} : vector<8x32xf32> to vector<8x8xf32>
    %cst_382 = arith.constant dense<0.000000e+00> : vector<8x8xf32>
    %857 = tpu.matmul %855, %856, %cst_382 {dimension_numbers = #tpu.dot_dimension_numbers<[1], [1], [0], [0], [0, 0, 1, 0], [], []>} : vector<8x8xf32>, vector<8x8xf32>, vector<8x8xf32> -> vector<8x8xf32>
    %cst_383 = arith.constant 0.353553385 : f32
    %858 = vector.broadcast %cst_383 : f32 to vector<8x8xf32>
    %859 = arith.mulf %857, %858 : vector<8x8xf32>
    %860 = vector.broadcast %5 : vector<1x8xf32> to vector<8x8xf32>
    %861 = arith.addf %859, %860 : vector<8x8xf32>
    %cst_384 = arith.constant dense<0xFF800000> : vector<8xf32>
    %862 = vector.multi_reduction <maximumf>, %861, %cst_384 [1] : vector<8x8xf32> to vector<8xf32>
    %863 = vector.shape_cast %862 : vector<8xf32> to vector<8x1xf32>
    %864 = vector.broadcast %863 : vector<8x1xf32> to vector<8x8xf32>
    %865 = arith.subf %861, %864 : vector<8x8xf32>
    %866 = math.exp %865 : vector<8x8xf32>
    %cst_385 = arith.constant dense<0.000000e+00> : vector<8xf32>
    %867 = vector.multi_reduction <add>, %866, %cst_385 [1] : vector<8x8xf32> to vector<8xf32>
    %868 = vector.shape_cast %867 : vector<8xf32> to vector<8x1xf32>
    %869 = vector.broadcast %868 : vector<8x1xf32> to vector<8x8xf32>
    %870 = arith.divf %866, %869 : vector<8x8xf32>
    %871 = vector.extract_strided_slice %834 {offsets = [0, 8], sizes = [8, 8], strides = [1, 1]} : vector<8x32xf32> to vector<8x8xf32>
    %cst_386 = arith.constant dense<0.000000e+00> : vector<8x8xf32>
    %872 = tpu.matmul %870, %871, %cst_386 {dimension_numbers = #tpu.dot_dimension_numbers<[1], [0], [0], [1], [0, 0, 1, 1], [], []>} : vector<8x8xf32>, vector<8x8xf32>, vector<8x8xf32> -> vector<8x8xf32>
    %873 = vector.extract_strided_slice %678 {offsets = [0, 8], sizes = [32, 8], strides = [1, 1]} : vector<32x32xf32> to vector<32x8xf32>
    %cst_387 = arith.constant dense<0.000000e+00> : vector<8x32xf32>
    %874 = tpu.matmul %872, %873, %cst_387 {dimension_numbers = #tpu.dot_dimension_numbers<[1], [1], [0], [0], [0, 0, 1, 0], [], []>} : vector<8x8xf32>, vector<32x8xf32>, vector<8x32xf32> -> vector<8x32xf32>
    %875 = arith.addf %854, %874 : vector<8x32xf32>
    %876 = vector.extract_strided_slice %824 {offsets = [0, 16], sizes = [8, 8], strides = [1, 1]} : vector<8x32xf32> to vector<8x8xf32>
    %877 = vector.extract_strided_slice %829 {offsets = [0, 16], sizes = [8, 8], strides = [1, 1]} : vector<8x32xf32> to vector<8x8xf32>
    %cst_388 = arith.constant dense<0.000000e+00> : vector<8x8xf32>
    %878 = tpu.matmul %876, %877, %cst_388 {dimension_numbers = #tpu.dot_dimension_numbers<[1], [1], [0], [0], [0, 0, 1, 0], [], []>} : vector<8x8xf32>, vector<8x8xf32>, vector<8x8xf32> -> vector<8x8xf32>
    %cst_389 = arith.constant 0.353553385 : f32
    %879 = vector.broadcast %cst_389 : f32 to vector<8x8xf32>
    %880 = arith.mulf %878, %879 : vector<8x8xf32>
    %881 = vector.broadcast %5 : vector<1x8xf32> to vector<8x8xf32>
    %882 = arith.addf %880, %881 : vector<8x8xf32>
    %cst_390 = arith.constant dense<0xFF800000> : vector<8xf32>
    %883 = vector.multi_reduction <maximumf>, %882, %cst_390 [1] : vector<8x8xf32> to vector<8xf32>
    %884 = vector.shape_cast %883 : vector<8xf32> to vector<8x1xf32>
    %885 = vector.broadcast %884 : vector<8x1xf32> to vector<8x8xf32>
    %886 = arith.subf %882, %885 : vector<8x8xf32>
    %887 = math.exp %886 : vector<8x8xf32>
    %cst_391 = arith.constant dense<0.000000e+00> : vector<8xf32>
    %888 = vector.multi_reduction <add>, %887, %cst_391 [1] : vector<8x8xf32> to vector<8xf32>
    %889 = vector.shape_cast %888 : vector<8xf32> to vector<8x1xf32>
    %890 = vector.broadcast %889 : vector<8x1xf32> to vector<8x8xf32>
    %891 = arith.divf %887, %890 : vector<8x8xf32>
    %892 = vector.extract_strided_slice %834 {offsets = [0, 16], sizes = [8, 8], strides = [1, 1]} : vector<8x32xf32> to vector<8x8xf32>
    %cst_392 = arith.constant dense<0.000000e+00> : vector<8x8xf32>
    %893 = tpu.matmul %891, %892, %cst_392 {dimension_numbers = #tpu.dot_dimension_numbers<[1], [0], [0], [1], [0, 0, 1, 1], [], []>} : vector<8x8xf32>, vector<8x8xf32>, vector<8x8xf32> -> vector<8x8xf32>
    %894 = vector.extract_strided_slice %678 {offsets = [0, 16], sizes = [32, 8], strides = [1, 1]} : vector<32x32xf32> to vector<32x8xf32>
    %cst_393 = arith.constant dense<0.000000e+00> : vector<8x32xf32>
    %895 = tpu.matmul %893, %894, %cst_393 {dimension_numbers = #tpu.dot_dimension_numbers<[1], [1], [0], [0], [0, 0, 1, 0], [], []>} : vector<8x8xf32>, vector<32x8xf32>, vector<8x32xf32> -> vector<8x32xf32>
    %896 = arith.addf %875, %895 : vector<8x32xf32>
    %897 = vector.extract_strided_slice %824 {offsets = [0, 24], sizes = [8, 8], strides = [1, 1]} : vector<8x32xf32> to vector<8x8xf32>
    %898 = vector.extract_strided_slice %829 {offsets = [0, 24], sizes = [8, 8], strides = [1, 1]} : vector<8x32xf32> to vector<8x8xf32>
    %cst_394 = arith.constant dense<0.000000e+00> : vector<8x8xf32>
    %899 = tpu.matmul %897, %898, %cst_394 {dimension_numbers = #tpu.dot_dimension_numbers<[1], [1], [0], [0], [0, 0, 1, 0], [], []>} : vector<8x8xf32>, vector<8x8xf32>, vector<8x8xf32> -> vector<8x8xf32>
    %cst_395 = arith.constant 0.353553385 : f32
    %900 = vector.broadcast %cst_395 : f32 to vector<8x8xf32>
    %901 = arith.mulf %899, %900 : vector<8x8xf32>
    %902 = vector.broadcast %5 : vector<1x8xf32> to vector<8x8xf32>
    %903 = arith.addf %901, %902 : vector<8x8xf32>
    %cst_396 = arith.constant dense<0xFF800000> : vector<8xf32>
    %904 = vector.multi_reduction <maximumf>, %903, %cst_396 [1] : vector<8x8xf32> to vector<8xf32>
    %905 = vector.shape_cast %904 : vector<8xf32> to vector<8x1xf32>
    %906 = vector.broadcast %905 : vector<8x1xf32> to vector<8x8xf32>
    %907 = arith.subf %903, %906 : vector<8x8xf32>
    %908 = math.exp %907 : vector<8x8xf32>
    %cst_397 = arith.constant dense<0.000000e+00> : vector<8xf32>
    %909 = vector.multi_reduction <add>, %908, %cst_397 [1] : vector<8x8xf32> to vector<8xf32>
    %910 = vector.shape_cast %909 : vector<8xf32> to vector<8x1xf32>
    %911 = vector.broadcast %910 : vector<8x1xf32> to vector<8x8xf32>
    %912 = arith.divf %908, %911 : vector<8x8xf32>
    %913 = vector.extract_strided_slice %834 {offsets = [0, 24], sizes = [8, 8], strides = [1, 1]} : vector<8x32xf32> to vector<8x8xf32>
    %cst_398 = arith.constant dense<0.000000e+00> : vector<8x8xf32>
    %914 = tpu.matmul %912, %913, %cst_398 {dimension_numbers = #tpu.dot_dimension_numbers<[1], [0], [0], [1], [0, 0, 1, 1], [], []>} : vector<8x8xf32>, vector<8x8xf32>, vector<8x8xf32> -> vector<8x8xf32>
    %915 = vector.extract_strided_slice %678 {offsets = [0, 24], sizes = [32, 8], strides = [1, 1]} : vector<32x32xf32> to vector<32x8xf32>
    %cst_399 = arith.constant dense<0.000000e+00> : vector<8x32xf32>
    %916 = tpu.matmul %914, %915, %cst_399 {dimension_numbers = #tpu.dot_dimension_numbers<[1], [1], [0], [0], [0, 0, 1, 0], [], []>} : vector<8x8xf32>, vector<32x8xf32>, vector<8x32xf32> -> vector<8x32xf32>
    %917 = arith.addf %896, %916 : vector<8x32xf32>
    %918 = vector.broadcast %676 : vector<1x32xf32> to vector<8x32xf32>
    %919 = arith.addf %917, %918 : vector<8x32xf32>
    %920 = arith.addf %819, %919 : vector<8x32xf32>
    %cst_400 = arith.constant dense<0.000000e+00> : vector<8xf32>
    %921 = vector.multi_reduction <add>, %920, %cst_400 [1] : vector<8x32xf32> to vector<8xf32>
    %922 = vector.shape_cast %921 : vector<8xf32> to vector<8x1xf32>
    %cst_401 = arith.constant 3.200000e+01 : f32
    %923 = vector.broadcast %cst_401 : f32 to vector<8x1xf32>
    %924 = arith.divf %922, %923 : vector<8x1xf32>
    %925 = vector.broadcast %924 : vector<8x1xf32> to vector<8x32xf32>
    %926 = arith.subf %920, %925 : vector<8x32xf32>
    %927 = arith.mulf %926, %926 : vector<8x32xf32>
    %cst_402 = arith.constant dense<0.000000e+00> : vector<8xf32>
    %928 = vector.multi_reduction <add>, %927, %cst_402 [1] : vector<8x32xf32> to vector<8xf32>
    %929 = vector.shape_cast %928 : vector<8xf32> to vector<8x1xf32>
    %cst_403 = arith.constant 3.200000e+01 : f32
    %930 = vector.broadcast %cst_403 : f32 to vector<8x1xf32>
    %931 = arith.divf %929, %930 : vector<8x1xf32>
    %cst_404 = arith.constant 9.99999974E-6 : f32
    %932 = vector.broadcast %cst_404 : f32 to vector<8x1xf32>
    %933 = arith.addf %931, %932 : vector<8x1xf32>
    %934 = math.rsqrt %933 : vector<8x1xf32>
    %935 = vector.broadcast %934 : vector<8x1xf32> to vector<8x32xf32>
    %936 = arith.mulf %926, %935 : vector<8x32xf32>
    %937 = vector.broadcast %694 : vector<1x32xf32> to vector<8x32xf32>
    %938 = arith.mulf %936, %937 : vector<8x32xf32>
    %939 = vector.broadcast %692 : vector<1x32xf32> to vector<8x32xf32>
    %940 = arith.addf %938, %939 : vector<8x32xf32>
    %cst_405 = arith.constant dense<0.000000e+00> : vector<8x64xf32>
    %941 = tpu.matmul %940, %682, %cst_405 {dimension_numbers = #tpu.dot_dimension_numbers<[1], [1], [0], [0], [0, 0, 1, 0], [], []>} : vector<8x32xf32>, vector<64x32xf32>, vector<8x64xf32> -> vector<8x64xf32>
    %942 = vector.broadcast %680 : vector<1x64xf32> to vector<8x64xf32>
    %943 = arith.addf %941, %942 : vector<8x64xf32>
    %cst_406 = arith.constant 0.000000e+00 : f32
    %944 = vector.broadcast %cst_406 : f32 to vector<8x64xf32>
    %945 = arith.maximumf %943, %944 : vector<8x64xf32>
    %cst_407 = arith.constant dense<0.000000e+00> : vector<8x32xf32>
    %946 = tpu.matmul %945, %686, %cst_407 {dimension_numbers = #tpu.dot_dimension_numbers<[1], [1], [0], [0], [0, 0, 1, 0], [], []>} : vector<8x64xf32>, vector<32x64xf32>, vector<8x32xf32> -> vector<8x32xf32>
    %947 = vector.broadcast %684 : vector<1x32xf32> to vector<8x32xf32>
    %948 = arith.addf %946, %947 : vector<8x32xf32>
    %949 = arith.addf %940, %948 : vector<8x32xf32>
    %cst_408 = arith.constant dense<0.000000e+00> : vector<8xf32>
    %950 = vector.multi_reduction <add>, %949, %cst_408 [1] : vector<8x32xf32> to vector<8xf32>
    %951 = vector.shape_cast %950 : vector<8xf32> to vector<8x1xf32>
    %cst_409 = arith.constant 3.200000e+01 : f32
    %952 = vector.broadcast %cst_409 : f32 to vector<8x1xf32>
    %953 = arith.divf %951, %952 : vector<8x1xf32>
    %954 = vector.broadcast %953 : vector<8x1xf32> to vector<8x32xf32>
    %955 = arith.subf %949, %954 : vector<8x32xf32>
    %956 = arith.mulf %955, %955 : vector<8x32xf32>
    %cst_410 = arith.constant dense<0.000000e+00> : vector<8xf32>
    %957 = vector.multi_reduction <add>, %956, %cst_410 [1] : vector<8x32xf32> to vector<8xf32>
    %958 = vector.shape_cast %957 : vector<8xf32> to vector<8x1xf32>
    %cst_411 = arith.constant 3.200000e+01 : f32
    %959 = vector.broadcast %cst_411 : f32 to vector<8x1xf32>
    %960 = arith.divf %958, %959 : vector<8x1xf32>
    %cst_412 = arith.constant 9.99999974E-6 : f32
    %961 = vector.broadcast %cst_412 : f32 to vector<8x1xf32>
    %962 = arith.addf %960, %961 : vector<8x1xf32>
    %963 = math.rsqrt %962 : vector<8x1xf32>
    %964 = vector.broadcast %963 : vector<8x1xf32> to vector<8x32xf32>
    %965 = arith.mulf %955, %964 : vector<8x32xf32>
    %966 = vector.broadcast %698 : vector<1x32xf32> to vector<8x32xf32>
    %967 = arith.mulf %965, %966 : vector<8x32xf32>
    %968 = vector.broadcast %696 : vector<1x32xf32> to vector<8x32xf32>
    %969 = arith.addf %967, %968 : vector<8x32xf32>
    %c0_413 = arith.constant 0 : index
    %c0_414 = arith.constant 0 : index
    %970 = vector.load %arg36[%c0_413, %c0_414] : memref<128x32xf32, #tpu.memory_space<vmem>>, vector<128x32xf32>
    %c0_415 = arith.constant 0 : index
    %c0_416 = arith.constant 0 : index
    %971 = vector.load %arg35[%c0_415, %c0_416] : memref<1x128xf32, #tpu.memory_space<vmem>>, vector<1x128xf32>
    %cst_417 = arith.constant dense<0.000000e+00> : vector<8x128xf32>
    %972 = tpu.matmul %969, %970, %cst_417 {dimension_numbers = #tpu.dot_dimension_numbers<[1], [1], [0], [0], [0, 0, 1, 0], [], []>} : vector<8x32xf32>, vector<128x32xf32>, vector<8x128xf32> -> vector<8x128xf32>
    %973 = vector.broadcast %971 : vector<1x128xf32> to vector<8x128xf32>
    %974 = arith.addf %972, %973 : vector<8x128xf32>
    %c0_418 = arith.constant 0 : index
    %c0_419 = arith.constant 0 : index
    %c0_420 = arith.constant 0 : index
    %975 = vector.load %arg37[%c0_418, %c0_419, %c0_420] : memref<1x8x128xf32, #tpu.memory_space<vmem>>, vector<1x8x128xf32>
    %976 = vector.shape_cast %975 : vector<1x8x128xf32> to vector<8x128xf32>
    %977 = vector.shape_cast %974 : vector<8x128xf32> to vector<1x8x128xf32>
    tpu.vector_store %arg37[%c0_418, %c0_419, %c0_420], %977 {strides = array<i32>} : memref<1x8x128xf32, #tpu.memory_space<vmem>>, vector<1x8x128xf32>,
    return
  }
  func.func @transform_0(%arg0: i32) -> (i32, i32, i32) {
    %c0_i32 = arith.constant 0 : i32
    %c0_i32_0 = arith.constant 0 : i32
    %c0_i32_1 = arith.constant 0 : i32
    return %arg0, %c0_i32, %c0_i32_0 : i32, i32, i32
  }
  func.func @transform_1(%arg0: i32) -> (i32, i32, i32) {
    %c0_i32 = arith.constant 0 : i32
    %c0_i32_0 = arith.constant 0 : i32
    %c0_i32_1 = arith.constant 0 : i32
    return %arg0, %c0_i32, %c0_i32_0 : i32, i32, i32
  }
  func.func @transform_2(%arg0: i32) -> (i32, i32, i32) {
    %c0_i32 = arith.constant 0 : i32
    %c0_i32_0 = arith.constant 0 : i32
    %c0_i32_1 = arith.constant 0 : i32
    return %arg0, %c0_i32, %c0_i32_0 : i32, i32, i32
  }
  func.func @transform_3(%arg0: i32) -> (i32, i32, i32) {
    %c0_i32 = arith.constant 0 : i32
    %c0_i32_0 = arith.constant 0 : i32
    %c0_i32_1 = arith.constant 0 : i32
    return %arg0, %c0_i32, %c0_i32_0 : i32, i32, i32
  }
  func.func @transform_4(%arg0: i32) -> (i32, i32, i32) {
    %c0_i32 = arith.constant 0 : i32
    %c0_i32_0 = arith.constant 0 : i32
    %c0_i32_1 = arith.constant 0 : i32
    %c0_i32_2 = arith.constant 0 : i32
    return %c0_i32, %c0_i32_0, %c0_i32_1 : i32, i32, i32
  }
  func.func @transform_5(%arg0: i32) -> (i32, i32, i32) {
    %c0_i32 = arith.constant 0 : i32
    %c0_i32_0 = arith.constant 0 : i32
    %c0_i32_1 = arith.constant 0 : i32
    %c0_i32_2 = arith.constant 0 : i32
    return %c0_i32, %c0_i32_0, %c0_i32_1 : i32, i32, i32
  }
  func.func @transform_6(%arg0: i32) -> (i32, i32, i32) {
    %c0_i32 = arith.constant 0 : i32
    %c0_i32_0 = arith.constant 0 : i32
    %c0_i32_1 = arith.constant 0 : i32
    %c0_i32_2 = arith.constant 0 : i32
    return %c0_i32, %c0_i32_0, %c0_i32_1 : i32, i32, i32
  }
  func.func @transform_7(%arg0: i32) -> (i32, i32, i32) {
    %c0_i32 = arith.constant 0 : i32
    %c0_i32_0 = arith.constant 0 : i32
    %c0_i32_1 = arith.constant 0 : i32
    %c0_i32_2 = arith.constant 0 : i32
    return %c0_i32, %c0_i32_0, %c0_i32_1 : i32, i32, i32
  }
  func.func @transform_8(%arg0: i32) -> (i32, i32, i32) {
    %c0_i32 = arith.constant 0 : i32
    %c0_i32_0 = arith.constant 0 : i32
    %c0_i32_1 = arith.constant 0 : i32
    %c0_i32_2 = arith.constant 0 : i32
    return %c0_i32, %c0_i32_0, %c0_i32_1 : i32, i32, i32
  }
  func.func @transform_9(%arg0: i32) -> (i32, i32, i32) {
    %c0_i32 = arith.constant 0 : i32
    %c0_i32_0 = arith.constant 0 : i32
    %c0_i32_1 = arith.constant 0 : i32
    %c0_i32_2 = arith.constant 0 : i32
    return %c0_i32, %c0_i32_0, %c0_i32_1 : i32, i32, i32
  }
  func.func @transform_10(%arg0: i32) -> (i32, i32, i32) {
    %c0_i32 = arith.constant 0 : i32
    %c0_i32_0 = arith.constant 0 : i32
    %c0_i32_1 = arith.constant 0 : i32
    %c0_i32_2 = arith.constant 0 : i32
    return %c0_i32, %c0_i32_0, %c0_i32_1 : i32, i32, i32
  }
  func.func @transform_11(%arg0: i32) -> (i32, i32, i32) {
    %c0_i32 = arith.constant 0 : i32
    %c0_i32_0 = arith.constant 0 : i32
    %c0_i32_1 = arith.constant 0 : i32
    %c0_i32_2 = arith.constant 0 : i32
    return %c0_i32, %c0_i32_0, %c0_i32_1 : i32, i32, i32
  }
  func.func @transform_12(%arg0: i32) -> (i32, i32, i32) {
    %c0_i32 = arith.constant 0 : i32
    %c0_i32_0 = arith.constant 0 : i32
    %c0_i32_1 = arith.constant 0 : i32
    %c0_i32_2 = arith.constant 0 : i32
    return %c0_i32, %c0_i32_0, %c0_i32_1 : i32, i32, i32
  }
  func.func @transform_13(%arg0: i32) -> (i32, i32, i32) {
    %c0_i32 = arith.constant 0 : i32
    %c0_i32_0 = arith.constant 0 : i32
    %c0_i32_1 = arith.constant 0 : i32
    %c0_i32_2 = arith.constant 0 : i32
    return %c0_i32, %c0_i32_0, %c0_i32_1 : i32, i32, i32
  }
  func.func @transform_14(%arg0: i32) -> (i32, i32, i32) {
    %c0_i32 = arith.constant 0 : i32
    %c0_i32_0 = arith.constant 0 : i32
    %c0_i32_1 = arith.constant 0 : i32
    %c0_i32_2 = arith.constant 0 : i32
    return %c0_i32, %c0_i32_0, %c0_i32_1 : i32, i32, i32
  }
  func.func @transform_15(%arg0: i32) -> (i32, i32, i32) {
    %c0_i32 = arith.constant 0 : i32
    %c0_i32_0 = arith.constant 0 : i32
    %c0_i32_1 = arith.constant 0 : i32
    %c0_i32_2 = arith.constant 0 : i32
    return %c0_i32, %c0_i32_0, %c0_i32_1 : i32, i32, i32
  }
  func.func @transform_16(%arg0: i32) -> (i32, i32, i32) {
    %c0_i32 = arith.constant 0 : i32
    %c0_i32_0 = arith.constant 0 : i32
    %c0_i32_1 = arith.constant 0 : i32
    %c0_i32_2 = arith.constant 0 : i32
    return %c0_i32, %c0_i32_0, %c0_i32_1 : i32, i32, i32
  }
  func.func @transform_17(%arg0: i32) -> (i32, i32, i32) {
    %c0_i32 = arith.constant 0 : i32
    %c0_i32_0 = arith.constant 0 : i32
    %c0_i32_1 = arith.constant 0 : i32
    %c0_i32_2 = arith.constant 0 : i32
    return %c0_i32, %c0_i32_0, %c0_i32_1 : i32, i32, i32
  }
  func.func @transform_18(%arg0: i32) -> (i32, i32, i32) {
    %c0_i32 = arith.constant 0 : i32
    %c0_i32_0 = arith.constant 0 : i32
    %c0_i32_1 = arith.constant 0 : i32
    %c0_i32_2 = arith.constant 0 : i32
    return %c0_i32, %c0_i32_0, %c0_i32_1 : i32, i32, i32
  }
  func.func @transform_19(%arg0: i32) -> (i32, i32, i32) {
    %c0_i32 = arith.constant 0 : i32
    %c0_i32_0 = arith.constant 0 : i32
    %c0_i32_1 = arith.constant 0 : i32
    %c0_i32_2 = arith.constant 0 : i32
    return %c0_i32, %c0_i32_0, %c0_i32_1 : i32, i32, i32
  }
  func.func @transform_20(%arg0: i32) -> (i32, i32, i32) {
    %c0_i32 = arith.constant 0 : i32
    %c0_i32_0 = arith.constant 0 : i32
    %c0_i32_1 = arith.constant 0 : i32
    %c0_i32_2 = arith.constant 0 : i32
    return %c0_i32, %c0_i32_0, %c0_i32_1 : i32, i32, i32
  }
  func.func @transform_21(%arg0: i32) -> (i32, i32, i32) {
    %c0_i32 = arith.constant 0 : i32
    %c0_i32_0 = arith.constant 0 : i32
    %c0_i32_1 = arith.constant 0 : i32
    %c0_i32_2 = arith.constant 0 : i32
    return %c0_i32, %c0_i32_0, %c0_i32_1 : i32, i32, i32
  }
  func.func @transform_22(%arg0: i32) -> (i32, i32, i32) {
    %c0_i32 = arith.constant 0 : i32
    %c0_i32_0 = arith.constant 0 : i32
    %c0_i32_1 = arith.constant 0 : i32
    %c0_i32_2 = arith.constant 0 : i32
    return %c0_i32, %c0_i32_0, %c0_i32_1 : i32, i32, i32
  }
  func.func @transform_23(%arg0: i32) -> (i32, i32, i32) {
    %c0_i32 = arith.constant 0 : i32
    %c0_i32_0 = arith.constant 0 : i32
    %c0_i32_1 = arith.constant 0 : i32
    %c0_i32_2 = arith.constant 0 : i32
    return %c0_i32, %c0_i32_0, %c0_i32_1 : i32, i32, i32
  }
  func.func @transform_24(%arg0: i32) -> (i32, i32, i32) {
    %c0_i32 = arith.constant 0 : i32
    %c0_i32_0 = arith.constant 0 : i32
    %c0_i32_1 = arith.constant 0 : i32
    %c0_i32_2 = arith.constant 0 : i32
    return %c0_i32, %c0_i32_0, %c0_i32_1 : i32, i32, i32
  }
  func.func @transform_25(%arg0: i32) -> (i32, i32, i32) {
    %c0_i32 = arith.constant 0 : i32
    %c0_i32_0 = arith.constant 0 : i32
    %c0_i32_1 = arith.constant 0 : i32
    %c0_i32_2 = arith.constant 0 : i32
    return %c0_i32, %c0_i32_0, %c0_i32_1 : i32, i32, i32
  }
  func.func @transform_26(%arg0: i32) -> (i32, i32, i32) {
    %c0_i32 = arith.constant 0 : i32
    %c0_i32_0 = arith.constant 0 : i32
    %c0_i32_1 = arith.constant 0 : i32
    %c0_i32_2 = arith.constant 0 : i32
    return %c0_i32, %c0_i32_0, %c0_i32_1 : i32, i32, i32
  }
  func.func @transform_27(%arg0: i32) -> (i32, i32, i32) {
    %c0_i32 = arith.constant 0 : i32
    %c0_i32_0 = arith.constant 0 : i32
    %c0_i32_1 = arith.constant 0 : i32
    %c0_i32_2 = arith.constant 0 : i32
    return %c0_i32, %c0_i32_0, %c0_i32_1 : i32, i32, i32
  }
  func.func @transform_28(%arg0: i32) -> (i32, i32, i32) {
    %c0_i32 = arith.constant 0 : i32
    %c0_i32_0 = arith.constant 0 : i32
    %c0_i32_1 = arith.constant 0 : i32
    %c0_i32_2 = arith.constant 0 : i32
    return %c0_i32, %c0_i32_0, %c0_i32_1 : i32, i32, i32
  }
  func.func @transform_29(%arg0: i32) -> (i32, i32, i32) {
    %c0_i32 = arith.constant 0 : i32
    %c0_i32_0 = arith.constant 0 : i32
    %c0_i32_1 = arith.constant 0 : i32
    %c0_i32_2 = arith.constant 0 : i32
    return %c0_i32, %c0_i32_0, %c0_i32_1 : i32, i32, i32
  }
  func.func @transform_30(%arg0: i32) -> (i32, i32, i32) {
    %c0_i32 = arith.constant 0 : i32
    %c0_i32_0 = arith.constant 0 : i32
    %c0_i32_1 = arith.constant 0 : i32
    %c0_i32_2 = arith.constant 0 : i32
    return %c0_i32, %c0_i32_0, %c0_i32_1 : i32, i32, i32
  }
  func.func @transform_31(%arg0: i32) -> (i32, i32, i32) {
    %c0_i32 = arith.constant 0 : i32
    %c0_i32_0 = arith.constant 0 : i32
    %c0_i32_1 = arith.constant 0 : i32
    %c0_i32_2 = arith.constant 0 : i32
    return %c0_i32, %c0_i32_0, %c0_i32_1 : i32, i32, i32
  }
  func.func @transform_32(%arg0: i32) -> (i32, i32, i32) {
    %c0_i32 = arith.constant 0 : i32
    %c0_i32_0 = arith.constant 0 : i32
    %c0_i32_1 = arith.constant 0 : i32
    %c0_i32_2 = arith.constant 0 : i32
    return %c0_i32, %c0_i32_0, %c0_i32_1 : i32, i32, i32
  }
  func.func @transform_33(%arg0: i32) -> (i32, i32, i32) {
    %c0_i32 = arith.constant 0 : i32
    %c0_i32_0 = arith.constant 0 : i32
    %c0_i32_1 = arith.constant 0 : i32
    %c0_i32_2 = arith.constant 0 : i32
    return %c0_i32, %c0_i32_0, %c0_i32_1 : i32, i32, i32
  }
  func.func @transform_34(%arg0: i32) -> (i32, i32) {
    %c0_i32 = arith.constant 0 : i32
    %c0_i32_0 = arith.constant 0 : i32
    %c0_i32_1 = arith.constant 0 : i32
    return %c0_i32, %c0_i32_0 : i32, i32
  }
  func.func @transform_35(%arg0: i32) -> (i32, i32) {
    %c0_i32 = arith.constant 0 : i32
    %c0_i32_0 = arith.constant 0 : i32
    %c0_i32_1 = arith.constant 0 : i32
    return %c0_i32, %c0_i32_0 : i32, i32
  }
  func.func @transform_36(%arg0: i32) -> (i32, i32, i32) {
    %c0_i32 = arith.constant 0 : i32
    %c0_i32_0 = arith.constant 0 : i32
    %c0_i32_1 = arith.constant 0 : i32
    return %arg0, %c0_i32, %c0_i32_0 : i32, i32, i32
  }
}

</mosaic_0001>

<bundles_post_ra>
// kernel: transformer_forward.1
= control target key start
LH: loop header
LB: loop body
LE: loop exit
PB: predicated region body
PF: predicated region fallthrough
CT: control target
= control target key end

     0   :  { %s12436_s6 = smov 1   ;;  %s12437_s10 = smov 2   ;;  %s14377_s0 = inlined_call_operand.smem [shape: u32[37], index: -1, kind: input, shape index: {}] }
   0x1   :  { %s12488_s5 = sld [smem:[%s14377_s0]]   ;;  %s12438_s14 = smov 3  }
   0x2   :  { %s12493_s9 = sld [smem:[%s14377_s0 + %s12436_s6]]   ;;  %s12439_s18 = smov 4  }
   0x3   :  { %s12498_s13 = sld [smem:[%s14377_s0 + %s12437_s10]]   ;;  %s12440_s22 = smov 5  }
   0x4   :  { %s12503_s17 = sld [smem:[%s14377_s0 + %s12438_s14]]   ;;  %s12441_s26 = smov 6  }
   0x5   :  { %s12508_s21 = sld [smem:[%s14377_s0 + %s12439_s18]]   ;;  %s12442_s30 = smov 7  }
   0x6   :  { %s12513_s25 = sld [smem:[%s14377_s0 + %s12440_s22]]   ;;  %s12443_s4 = smov 8  }
   0x7   :  { %14432 = sst [smem:[#allocation5_spill]] %s12488_s5  ;;  %s12444_s10 = smov 9  }
   0x8   :  { %14433 = sst [smem:[#allocation6_spill]] %s12493_s9  ;;  %s12445_s15 = smov 10  }
   0x9   :  { %14434 = sst [smem:[#allocation7_spill]] %s12498_s13  ;;  %s12446_s20 = smov 11  }
   0xa   :  { %14435 = sst [smem:[#allocation8_spill]] %s12503_s17  ;;  %s12448_s1 = smov 13  }
   0xb   :  { %14436 = sst [smem:[#allocation9_spill]] %s12508_s21  ;;  %s12449_s7 = smov 14  }
   0xc   :  { %s12518_s29 = sld [smem:[%s14377_s0 + %s12441_s26]]   ;;  %s12447_s26 = smov 12  }
   0xd   :  { %s12523_s3 = sld [smem:[%s14377_s0 + %s12442_s30]]   ;;  %s12451_s22 = smov 16  }
   0xe   :  { %s12528_s8 = sld [smem:[%s14377_s0 + %s12443_s4]]   ;;  %s12452_s28 = smov 17  }
   0xf   :  { %s12533_s14 = sld [smem:[%s14377_s0 + %s12444_s10]]  }
  0x10   :  { %s12538_s19 = sld [smem:[%s14377_s0 + %s12445_s15]]   ;;  %s12450_s15 = smov 15  }
  0x11   :  { %s12543_s24 = sld [smem:[%s14377_s0 + %s12446_s20]]  }
  0x12   :  { %14437 = sst [smem:[#allocation10_spill]] %s12518_s29 }
  0x13   :  { %14438 = sst [smem:[#allocation11_spill]] %s12523_s3 }
  0x14   :  { %14439 = sst [smem:[#allocation12_spill]] %s12528_s8 }
  0x15   :  { %14440 = sst [smem:[#allocation13_spill]] %s12533_s14 }
  0x16   :  { %14441 = sst [smem:[#allocation14_spill]] %s12538_s19 }
  0x17   :  { %14442 = sst [smem:[#allocation15_spill]] %s12543_s24 }
  0x18   :  { %s12548_s30 = sld [smem:[%s14377_s0 + %s12447_s26]]  }
  0x19   :  { %s12553_s6 = sld [smem:[%s14377_s0 + %s12448_s1]]  }
  0x1a   :  { %s12558_s12 = sld [smem:[%s14377_s0 + %s12449_s7]]   ;;  %s12453_s7 = smov 18  }
  0x1b   :  { %s12563_s20 = sld [smem:[%s14377_s0 + %s12450_s15]]   ;;  %s12454_s15 = smov 19  }
  0x1c   :  { %s12568_s27 = sld [smem:[%s14377_s0 + %s12451_s22]]   ;;  %s12455_s22 = smov 20  }
  0x1d   :  { %s12573_s4 = sld [smem:[%s14377_s0 + %s12452_s28]]   ;;  %s12456_s28 = smov 21  }
  0x1e   :  { %14443 = sst [smem:[#allocation16_spill]] %s12548_s30 }
  0x1f   :  { %14444 = sst [smem:[#allocation17_spill]] %s12553_s6 }
  0x20   :  { %14445 = sst [smem:[#allocation18_spill]] %s12558_s12 }
  0x21   :  { %14446 = sst [smem:[#allocation19_spill]] %s12563_s20 }
  0x22   :  { %14447 = sst [smem:[#allocation20_spill]] %s12568_s27 }
  0x23   :  { %14448 = sst [smem:[#allocation21_spill]] %s12573_s4 }
  0x24   :  { %s12578_s12 = sld [smem:[%s14377_s0 + %s12453_s7]]   ;;  %s12457_s7 = smov 22  }
  0x25   :  { %s12583_s30 = sld [smem:[%s14377_s0 + %s12454_s15]]   ;;  %s12458_s15 = smov 23  }
  0x26   :  { %s12588_s20 = sld [smem:[%s14377_s0 + %s12455_s22]]   ;;  %s12459_s22 = smov 24  }
  0x27   :  { %s12593_s6 = sld [smem:[%s14377_s0 + %s12456_s28]]   ;;  %s12460_s28 = smov 25  }
  0x2a   :  { %14449 = sst [smem:[#allocation22_spill]] %s12578_s12 }
  0x2b   :  { %14450 = sst [smem:[#allocation23_spill]] %s12583_s30 }
  0x2c   :  { %14451 = sst [smem:[#allocation24_spill]] %s12588_s20 }
  0x2d   :  { %14452 = sst [smem:[#allocation25_spill]] %s12593_s6 }
  0x2e   :  { %s12598_s12 = sld [smem:[%s14377_s0 + %s12457_s7]]   ;;  %s12461_s7 = smov 26  }
  0x2f   :  { %s12603_s30 = sld [smem:[%s14377_s0 + %s12458_s15]]   ;;  %s12462_s15 = smov 27  }
  0x30   :  { %s12608_s20 = sld [smem:[%s14377_s0 + %s12459_s22]]   ;;  %s12463_s22 = smov 28  }
  0x31   :  { %s12613_s6 = sld [smem:[%s14377_s0 + %s12460_s28]]   ;;  %s12464_s28 = smov 29  }
  0x32   :  { %s12618_s19 = sld [smem:[%s14377_s0 + %s12461_s7]]   ;;  %s12465_s7 = smov 30  }
  0x33   :  { %s12623_s24 = sld [smem:[%s14377_s0 + %s12462_s15]]   ;;  %s12466_s15 = smov 31  }
  0x34   :  { %14453 = sst [smem:[#allocation26_spill]] %s12598_s12 }
  0x35   :  { %14454 = sst [smem:[#allocation27_spill]] %s12603_s30 }
  0x36   :  { %14455 = sst [smem:[#allocation28_spill]] %s12608_s20 }
  0x37   :  { %14456 = sst [smem:[#allocation29_spill]] %s12613_s6 }
  0x38   :  { %14457 = sst [smem:[#allocation30_spill]] %s12618_s19 }
  0x39   :  { %14458 = sst [smem:[#allocation31_spill]] %s12623_s24 }
  0x3a   :  { %s12628_s27 = sld [smem:[%s14377_s0 + %s12463_s22]]   ;;  %s12467_s22 = smov 32  }
  0x3b   :  { %s12633_s4 = sld [smem:[%s14377_s0 + %s12464_s28]]   ;;  %s12468_s28 = smov 33  }
  0x3c   :  { %s12638_s8 = sld [smem:[%s14377_s0 + %s12465_s7]]   ;;  %s12469_s7 = smov 34  }
  0x3d   :  { %s12643_s29 = sld [smem:[%s14377_s0 + %s12466_s15]]   ;;  %s12470_s15 = smov 35  }
  0x3e   :  { %s12648_s14 = sld [smem:[%s14377_s0 + %s12467_s22]]   ;;  %s12471_s22 = smov 36  }
  0x3f   :  { %s12653_s3 = sld [smem:[%s14377_s0 + %s12468_s28]]  }
  0x40   :  { %14459 = sst [smem:[#allocation32_spill]] %s12628_s27 }
  0x41   :  { %14460 = sst [smem:[#allocation33_spill]] %s12633_s4 }
  0x42   :  { %14461 = sst [smem:[#allocation34_spill]] %s12638_s8 }
  0x43   :  { %14462 = sst [smem:[#allocation35_spill]] %s12643_s29 }
  0x44   :  { %14463 = sst [smem:[#allocation36_spill]] %s12648_s14 }
  0x45   :  { %14464 = sst [smem:[#allocation37_spill]] %s12653_s3 }
  0x46   :  { %s12658_s17 = sld [smem:[%s14377_s0 + %s12469_s7]]  }
  0x47   :  { %s12663_s21 = sld [smem:[%s14377_s0 + %s12470_s15]]  }
  0x48   :  { %s12668_s9 = sld [smem:[%s14377_s0 + %s12471_s22]]  }
  0x4e   :  { %14465 = sst [smem:[#allocation38_spill]] %s12668_s9 }
  0x4f   :  { %78 = vsyncpa [#allocation3], 0 }
  0x50   :  { %80 = vsyncpa [#allocation3 + $0x1], 0  ;;  %s12670_s28 = smov 0   ;;  %s12672_s1 = smov 0  }
  0x51   :  { %s12674_s2 = smov 0   ;;  %s12676_s7 = smov 0  }
  0x52 LB: > { %s14466_s30 = sld [smem:[#allocation27_spill]]  ;;  %s12691_s0 = sadd.s32 4294967295, %s12434_s7   ;;  %s12434_s7 = sphi %s12676_s7, %s14523_s7   ;;  %s12430_s2 = sphi %s12674_s2, %s14525_s2   ;;  %s12426_s1 = sphi %s12672_s1, %s14527_s1   ;;  %s12422_s28 = sphi %s12670_s28, %s14526_s28  }
  0x53   : > { %s14467_s29 = sld [smem:[#allocation35_spill]]  ;;  %s10436_s10 = sadd.s32 4294967294, %s12434_s7  }
  0x54   : > { %s14468_s27 = sld [smem:[#allocation32_spill]]  ;;  %s12695_s11 = sadd.s32 1, %s12434_s7  }
  0x55   : > { %s14469_s24 = sld [smem:[#allocation31_spill]]  ;;  %s869_s15 = sadd.s32 1, %s12430_s2 }
  0x56   : > { %s14470_s14 = sld [smem:[#allocation36_spill]]  ;;  %s866_s16 = ssub.s32 %s12434_s7, %s12695_s11 }
  0x57   : > { %s14471_s3 = sld [smem:[#allocation37_spill]]  ;;  %p879_p0 = scmp.ne.s32.totalorder %s12430_s2, %s12426_s1 }
  0x58   : > { %s14472_s19 = sld [smem:[#allocation30_spill]]  ;;  %p867_p1 = scmp.eq.s32.totalorder %s866_s16, 0 }
  0x59   : > { %s14473_s20 = sld [smem:[#allocation28_spill]]  ;;  %p880_p2 = scmp.eq.s32.totalorder %s12691_s0, 1 }
  0x5a   : > { %s14474_s4 = sld [smem:[#allocation33_spill]]  ;;  %p885_p3 = scmp.ne.s32.totalorder %s12426_s1, %s12422_s28 }
  0x5b   : > { %s14475_s8 = sld [smem:[#allocation34_spill]]  ;;  %p886_p4 = scmp.eq.s32.totalorder %s10436_s10, 1 }
  0x5c   : > { %s14476_s6 = sld [smem:[#allocation29_spill]]  ;;  %p12708_p5 = por %p880_p2, %p879_p0 }
  0x5d   : > { %s14477_s12 = sld [smem:[#allocation26_spill]]  ;;  %p12712_p6 = por %p886_p4, %p885_p3 }
  0x5e   : > { %14478 = sst [smem:[#allocation39_spill]] %s12422_s28  ;;  %p10439_p7 = scmp.ge.s32.totalorder %s12434_s7, 1 }
  0x5f   : > { %14479 = sst [smem:[#allocation40_spill]] %s12430_s2  ;;  %p1026_p8 = scmp.lt.s32.totalorder %s12434_s7, 3 }
  0x60   : > { %14480 = sst [smem:[#allocation41_spill]] %s12691_s0 }
  0x61   : > { %14481 = sst [smem:[#allocation42_spill]] %s12695_s11  ;;  %p1027_p9 = pnand %p10439_p7, %p1026_p8 }
  0x62   : > { %s12706_s18 = scalar_select %p867_p1, %s12430_s2, %s869_s15  }
  0x63   : > { %s14483_s22 = scalar_select %p12708_p5, 1, 0 }
  0x64   : > { %14482 = sst [smem:[#allocation43_spill]] %s12706_s18  ;;  %1030 = sbr.rel (%p1027_p9) target bundleno = 20501 (0x5015), region = 164 }
  0x65   : > { %14484 = sst [smem:[#allocation44_spill]] %s14483_s22  ;;  %p1125_p10 = scmp.lt.s32.totalorder (!%p1027_p9), %s12691_s0, 1 }
  0x66   : > { %s14485_s23 = scalar_select %p12712_p6, 1, 0 }
  0x67   : > { %s14487_s5 = sld [smem:[#allocation5_spill]] (!%p1027_p9)  ;;  %s14398_s26 = smov (!%p1027_p9), 96  }
  0x68   : > { %14486 = sst [smem:[#allocation45_spill]] %s14485_s23 }
  0x69   : > { %v1147_v0 = vld [vmem:[%s14466_s30 + $0x18] sm:$0xff]  ;;  %vm1185_vm0 = vcmask 261120   ;;  %v12472_v1 = vmov 0.0   ;;  %vm12473_vm1 = vmmov 0   ;;  %v10443_v2 = vld [vmem:[%s14477_s12] ss:$0 sm:$0xff] }
  0x6a   : > { %11316 = vmatprep.subr.mxu0 %v12472_v1  ;;  %11324 = vmatprep.mubr.msk.f32.mxu0 %vm12473_vm1, %v12472_v1  ;;  %v1146_v3 = vld [vmem:[%s14466_s30 + $0x10] sm:$0xff]  ;;  %s12730_s10 = scalar_select %p1125_p10, %s12691_s0, 1  ;;  %v1145_v4 = vld [vmem:[%s14466_s30 + $0x8] sm:$0xff]  ;;  %v1144_v5 = vld [vmem:[%s14466_s30] sm:$0xff]  ;;  %vm1441_vm2 = vcmask 64512   ;;  %vm2612_vm3 = vcmask 523264  }
  0x6b   : > { %11317 = vmatpush3.xpose.msk.msra.mxu0 %vm1185_vm0, %v1147_v0  ;;  %11349 = vmatprep.subr.mxu1 %v12472_v1  ;;  %v1151_v7 = vld [vmem:[%s14466_s30 + $0x38] sm:$0xff]  ;;  %v1150_v8 = vld [vmem:[%s14466_s30 + $0x30] sm:$0xff]  ;;  %v1149_v9 = vld [vmem:[%s14466_s30 + $0x28] sm:$0xff]  ;;  %s14488_s13 = sld [smem:[#allocation7_spill]] }
  0x6c   : > { %11318 = vmatprep.subr.mxu0 %v12472_v1  ;;  %1271 = vrot.lane.b32.xlu0 %v10443_v2, %s14398_s26  ;;  %s14395_s15 = sshll.u32 %s12730_s10, 3  ;;  %v1148_v10 = vld [vmem:[%s14466_s30 + $0x20] sm:$0xff]  ;;  %v1155_v18 = vld [vmem:[%s14466_s30 + $0x58] sm:$0xff]  ;;  %v1154_v19 = vld [vmem:[%s14466_s30 + $0x50] sm:$0xff]  ;;  %s14402_s26 = smov 112  }
  0x6d   : > { %11351 = vmatprep.mubr.msk.f32.mxu1 %vm12473_vm1, %v12472_v1  ;;  %s1128_s16 = scalar_lea.vmem %s14487_s5, %s14395_s15  ;;  %s14400_s15 = smov 120   ;;  %v1153_v20 = vld [vmem:[%s14466_s30 + $0x48] sm:$0xff]  ;;  %v1152_v21 = vld [vmem:[%s14466_s30 + $0x40] sm:$0xff] }
  0x6e   : > { %v12745_v6 = vld [vmem:[%s1128_s16] sm:$0xff]  ;;  %s14396_s16 = smov 64   ;;  %s14490_s5 = smov 112  }
  0x6f   : > { %11319 = vmatpush3.xpose.msk.msra.mxu0 %vm1185_vm0, %v1146_v3  ;;  %1356 = vrot.lane.b32.xlu1 %v10443_v2, %s14396_s16  ;;  %s14508_s18 = sld [smem:[#allocation23_spill]] }
  0x70   : > { %11320 = vmatprep.subr.mxu0 %v12472_v1  ;;  %s14509_s2 = sld [smem:[#allocation22_spill]] }
  0x71   : > { %s12800_s16 = scalar_lea.vmem %s14488_s13, %s12730_s10  ;;  %s14494_s13 = sld [smem:[#allocation6_spill]] }
  0x72   : > { %v12803_v22 = vld [vmem:[%s12800_s16] ss:$0 sm:$0xff]  ;;  %s14511_s23 = sld [smem:[#allocation16_spill]] }
  0x73   : > { %11321 = vmatpush3.xpose.msk.msra.mxu0 %vm1185_vm0, %v1145_v4  ;;  %s14512_s28 = sld [smem:[#allocation18_spill]] }
  0x74   : > { %11322 = vmatprep.subr.mxu0 %v12472_v1 }
  0x76   : > { %s14510_s11 = smov %s14509_s2 }
  0x77   : > { %11323 = vmatpush3.xpose.msk.msra.mxu0 %vm1185_vm0, %v1144_v5 }
  0x78   : > { %11327 = vmatprep.subr.mxu0 %v12472_v1 }
  0x79   : > { %s14513_s22 = smov %s14512_s28 }
  0x7a   : > { %11325 = vmatmul.mubr.msk.f32.vlgmr.msra.gmra.mxu0 %vm1185_vm0, %v12745_v6 }
  0x7b   : > { %11328 = vmatpush3.xpose.msk.msra.mxu0 %vm1185_vm0, %v1151_v7  ;;  %11335 = vmatprep.mubr.msk.f32.mxu0 %vm12473_vm1, %v12472_v1 }
  0x7c   : > { %11329 = vmatprep.subr.mxu0 %v12472_v1 }
  0x7f   : > { %11330 = vmatpush3.xpose.msk.msra.mxu0 %vm1185_vm0, %v1150_v8 }
  0x80   : > { %11331 = vmatprep.subr.mxu0 %v12472_v1 }
  0x83   : > { %11332 = vmatpush3.xpose.msk.msra.mxu0 %vm1185_vm0, %v1149_v9 }
  0x84   : > { %11333 = vmatprep.subr.mxu0 %v12472_v1 }
  0x87   : > { %11334 = vmatpush3.xpose.msk.msra.mxu0 %vm1185_vm0, %v1148_v10 }
  0x88   : > { %11338 = vmatprep.subr.mxu0 %v12472_v1 }
  0x8a   : > { %11336 = vmatmul.mubr.msk.f32.vlgmr.msra.gmra.mxu0 %vm1185_vm0, %v12745_v6 }
  0x8b   : > { %11346 = vmatprep.mubr.msk.f32.mxu0 %vm12473_vm1, %v12472_v1  ;;  %11339 = vmatpush3.xpose.msk.msra.mxu0 %vm1185_vm0, %v1155_v18 }
  0x8c   : > { %11340 = vmatprep.subr.mxu0 %v12472_v1 }
  0x8f   : > { %11341 = vmatpush3.xpose.msk.msra.mxu0 %vm1185_vm0, %v1154_v19 }
  0x90   : > { %11342 = vmatprep.subr.mxu0 %v12472_v1 }
  0x93   : > { %11343 = vmatpush3.xpose.msk.msra.mxu0 %vm1185_vm0, %v1153_v20 }
  0x94   : > { %11344 = vmatprep.subr.mxu0 %v12472_v1 }
  0x97   : > { %11345 = vmatpush3.xpose.msk.msra.mxu0 %vm1185_vm0, %v1152_v21 }
  0x98   : > { %11369 = vmatprep.subr.mxu0 %v12472_v1 }
  0x9a   : > { %11347 = vmatmul.mubr.msk.f32.vlgmr.msra.gmra.mxu0 %vm1185_vm0, %v12745_v6 }
  0x9b   : > { %11377 = vmatprep.mubr.msk.f32.mxu0 %vm12473_vm1, %v12472_v1 }
  0xde   : > { %v1272_v13 = vpop.permute.xlu0 %1271 }
  0xe1   : > { %v1357_v28 = vpop.permute.xlu1 %1356 }
 0x13a   : > { %v1267_v11 = vpop.f32.mrf.mxu0 }
 0x13b   : > { %v12775_v17 = vadd.f32 %v10443_v2, %v1267_v11 }
 0x13c   : > { %v11326_v12 = vpop.f32.mrf.mxu0 }
 0x14a   : > { %v1352_v14 = vpop.f32.mrf.mxu0 }
 0x14b   : > { %v12769_v15 = vadd.f32 %v1352_v14, %v1272_v13 }
 0x14c   : > { %v11337_v16 = vpop.f32.mrf.mxu0 }
 0x14d   : > { %1612 = vrot.lane.b32.xlu1 %v12769_v15, %s14400_s15  ;;  %11350 = vmatpush3.xpose.msk.msra.mxu1 %vm1441_vm2, %v12769_v15 }
 0x14e   : > { %11354 = vmatprep.subr.mxu1 %v12472_v1 }
 0x150   : > { %11352 = vmatmul.mubr.msk.f32.vlgmr.msra.gmra.mxu1 %vm1441_vm2, %v12775_v17 }
 0x151   : > { %11356 = vmatprep.mubr.msk.f32.mxu1 %vm12473_vm1, %v12472_v1 }
 0x15a   : > { %v1437_v29 = vpop.f32.mrf.mxu0 }
 0x15b   : > { %v12807_v30 = vadd.f32 %v1437_v29, %v1357_v28 }
 0x15c   : > { %v11348_v31 = vpop.f32.mrf.mxu0 }
 0x15d   : > { %11355 = vmatpush3.msra.mxu1 %v12807_v30 }
 0x15e   : > { %11359 = vmatprep.subr.mxu1 %v12472_v1 }
 0x1bf   : > { %v1613_v37 = vpop.permute.xlu1 %1612 }
 0x210   : > { %v1514_v23 = vpop.f32.mrf.mxu1 }
 0x211   : > { %v1518_v24 = vmul.f32 0.35355338, %v1514_v23 }
 0x212   : > { %v11353_v25 = vpop.f32.mrf.mxu1 }
 0x213   : > { %v1525_v26 = vadd.f32 %v12803_v22, %v1518_v24  ;;  %v1158_v24 = vld [vmem:[%s14476_s6 + $0x8] sm:$0xff]  ;;  %v1159_v25 = vld [vmem:[%s14476_s6 + $0x10] sm:$0xff] }
 0x215   : > { %v1526_v27 = vsel %vm1441_vm2, %v1525_v26, -inf }
 0x216   : > { %1527 = vmax.xlane.f32.xlu0 %v1526_v27 }
 0x22c   : > { %1702 = vrot.lane.b32.xlu0 %v12807_v30, %s14400_s15 }
 0x29f   : > { %v1528_v32 = vpop.xlane.xlu0 %1527 }
 0x2a0   : > { %v1529_v33 = vsub.f32 %v1525_v26, %v1528_v32  ;;  %v1157_v26 = vld [vmem:[%s14476_s6] sm:$0xff] }
 0x2a2   : > { %v1530_v34 = vmul.f32 1.442695, %v1529_v33  ;;  %v1160_v33 = vld [vmem:[%s14476_s6 + $0x18] sm:$0xff] }
 0x2a3   : > { %v1703_v41 = vpop.permute.xlu0 %1702 }
 0x2a4   : > { %12255 = vpow2.f32 %v1530_v34 }
 0x2b1   : > { %v12256_v35 = vpop.eup %12255 }
 0x2b2   : > { %v1532_v36 = vsel %vm1441_vm2, %v12256_v35, 0.0 }
 0x2b3   : > { %1533 = vadd.xlane.f32.xlu1 %v1532_v36 }
 0x2c4   : > { %1610 = vrot.lane.b32.xlu1 %v12775_v17, %s14400_s15  ;;  %s14404_s15 = smov 104  }
 0x33c   : > { %v1534_v38 = vpop.xlane.xlu1 %1533 }
 0x33d   : > { %12257 = vrcp.f32 %v1534_v38 }
 0x340   : > { %v1611_v42 = vpop.permute.xlu1 %1610 }
 0x34a   : > { %v12258_v39 = vpop.eup %12257 }
 0x34b   : > { %v1536_v40 = vmul.f32 %v12258_v39, %v12256_v35 }
 0x34d   : > { %11357 = vmatmul.mubr.msk.f32.vlgmr.msra.gmra.mxu1 %vm1441_vm2, %v1536_v40 }
 0x34e   : > { %11360 = vmatpush3.xpose.msk.msra.mxu1 %vm1441_vm2, %v1613_v37  ;;  %11361 = vmatprep.mubr.msk.f32.mxu1 %vm12473_vm1, %v12472_v1 }
 0x34f   : > { %11364 = vmatprep.subr.mxu1 %v12472_v1 }
 0x351   : > { %11362 = vmatmul.mubr.msk.f32.vlgmr.msra.gmra.mxu1 %vm1441_vm2, %v1611_v42 }
 0x352   : > { %11365 = vmatpush3.msra.mxu1 %v1703_v41  ;;  %11366 = vmatprep.mubr.msk.f32.mxu1 %vm12473_vm1, %v12472_v1 }
 0x353   : > { %11391 = vmatprep.subr.mxu1 %v12472_v1 }
 0x40d   : > { %v12825_v43 = vpop.f32.mrf.mxu1 }
 0x40f   : > { %v11358_v44 = vpop.f32.mrf.mxu1 }
 0x411   : > { %v1684_v45 = vpop.f32.mrf.mxu1 }
 0x412   : > { %v1688_v46 = vmul.f32 0.35355338, %v1684_v45 }
 0x413   : > { %v11363_v47 = vpop.f32.mrf.mxu1 }
 0x414   : > { %v1689_v48 = vadd.f32 %v12803_v22, %v1688_v46 }
 0x416   : > { %v1690_v49 = vsel %vm1441_vm2, %v1689_v48, -inf }
 0x417   : > { %1691 = vmax.xlane.f32.xlu1 %v1690_v49 }
 0x4a0   : > { %v1692_v50 = vpop.xlane.xlu1 %1691 }
 0x4a1   : > { %v1693_v51 = vsub.f32 %v1689_v48, %v1692_v50 }
 0x4a3   : > { %v1694_v52 = vmul.f32 1.442695, %v1693_v51 }
 0x4a5   : > { %12259 = vpow2.f32 %v1694_v52 }
 0x4b2   : > { %v12260_v53 = vpop.eup %12259 }
 0x4b3   : > { %v1696_v54 = vsel %vm1441_vm2, %v12260_v53, 0.0 }
 0x4b4   : > { %1697 = vadd.xlane.f32.xlu0 %v1696_v54 }
 0x4ca   : > { %1954 = vrot.lane.b32.xlu0 %v12769_v15, %s14402_s26 }
 0x4ce   : > { %1952 = vrot.lane.b32.xlu0 %v12775_v17, %s14402_s26 }
 0x53d   : > { %v1698_v55 = vpop.xlane.xlu0 %1697 }
 0x53e   : > { %12261 = vrcp.f32 %v1698_v55 }
 0x541   : > { %v1955_v57 = vpop.permute.xlu0 %1954 }
 0x545   : > { %v1953_v59 = vpop.permute.xlu0 %1952 }
 0x54b   : > { %v12262_v56 = vpop.eup %12261 }
 0x54c   : > { %v1700_v58 = vmul.f32 %v12262_v56, %v12260_v53 }
 0x54e   : > { %11367 = vmatmul.mubr.msk.f32.vlgmr.msra.gmra.mxu1 %vm1441_vm2, %v1700_v58 }
 0x54f   : > { %11392 = vmatpush3.xpose.msk.msra.mxu1 %vm1441_vm2, %v1955_v57  ;;  %11393 = vmatprep.mubr.msk.f32.mxu1 %vm12473_vm1, %v12472_v1 }
 0x550   : > { %11396 = vmatprep.subr.mxu1 %v12472_v1 }
 0x552   : > { %11394 = vmatmul.mubr.msk.f32.vlgmr.msra.gmra.mxu1 %vm1441_vm2, %v1953_v59  ;;  %v10492_v59 = vld [vmem:[%s14473_s20] ss:$0 sm:$0xff] }
 0x553   : > { %11398 = vmatprep.mubr.msk.f32.mxu1 %vm12473_vm1, %v12472_v1 }
 0x60e   : > { %v12842_v60 = vpop.f32.mrf.mxu1 }
 0x610   : > { %v11368_v61 = vpop.f32.mrf.mxu1 }
 0x612   : > { %v2026_v62 = vpop.f32.mrf.mxu1 }
 0x613   : > { %v2030_v63 = vmul.f32 0.35355338, %v2026_v62 }
 0x614   : > { %v11395_v0 = vpop.f32.mrf.mxu1 }
 0x615   : > { %v2031_v2 = vadd.f32 %v12803_v22, %v2030_v63 }
 0x617   : > { %v2032_v3 = vsel %vm1441_vm2, %v2031_v2, -inf }
 0x618   : > { %2033 = vmax.xlane.f32.xlu1 %v2032_v3  ;;  %v1169_v3 = vld [vmem:[%s14469_s24 + $0x38] sm:$0xff] }
 0x629   : > { %2043 = vrot.lane.b32.xlu1 %v12807_v30, %s14402_s26  ;;  %s14489_s26 = smov 120  }
 0x62d   : > { %2211 = vrot.lane.b32.xlu1 %v12769_v15, %s14404_s15 }
 0x631   : > { %2209 = vrot.lane.b32.xlu1 %v12775_v17, %s14404_s15 }
 0x6a1   : > { %v2034_v4 = vpop.xlane.xlu1 %2033 }
 0x6a2   : > { %v2035_v5 = vsub.f32 %v2031_v2, %v2034_v4  ;;  %v1168_v4 = vld [vmem:[%s14469_s24 + $0x30] sm:$0xff] }
 0x6a4   : > { %v2036_v7 = vmul.f32 1.442695, %v2035_v5 }
 0x6a5   : > { %v2044_v8 = vpop.permute.xlu1 %2043 }
 0x6a6   : > { %12263 = vpow2.f32 %v2036_v7  ;;  %11397 = vmatpush3.msra.mxu1 %v2044_v8 }
 0x6a7   : > { %11412 = vmatprep.subr.mxu1 %v12472_v1 }
 0x6a9   : > { %v2212_v13 = vpop.permute.xlu1 %2211 }
 0x6ad   : > { %v2210_v15 = vpop.permute.xlu1 %2209 }
 0x6b3   : > { %v12264_v9 = vpop.eup %12263 }
 0x6b4   : > { %v2038_v10 = vsel %vm1441_vm2, %v12264_v9, 0.0 }
 0x6b5   : > { %2039 = vadd.xlane.f32.xlu0 %v2038_v10  ;;  %v1167_v10 = vld [vmem:[%s14469_s24 + $0x28] sm:$0xff] }
 0x73e   : > { %v2040_v11 = vpop.xlane.xlu0 %2039 }
 0x73f   : > { %12265 = vrcp.f32 %v2040_v11  ;;  %v1166_v11 = vld [vmem:[%s14469_s24 + $0x20] sm:$0xff] }
 0x74c   : > { %v12266_v12 = vpop.eup %12265 }
 0x74d   : > { %v2042_v14 = vmul.f32 %v12266_v12, %v12264_v9  ;;  %v1165_v12 = vld [vmem:[%s14469_s24 + $0x18] sm:$0xff] }
 0x74f   : > { %11399 = vmatmul.mubr.msk.f32.vlgmr.msra.gmra.mxu1 %vm1441_vm2, %v2042_v14  ;;  %v1163_v14 = vld [vmem:[%s14469_s24 + $0x8] sm:$0xff] }
 0x750   : > { %11413 = vmatpush3.xpose.msk.msra.mxu1 %vm1441_vm2, %v2212_v13  ;;  %11414 = vmatprep.mubr.msk.f32.mxu1 %vm12473_vm1, %v12472_v1  ;;  %v1164_v13 = vld [vmem:[%s14469_s24 + $0x10] sm:$0xff] }
 0x751   : > { %11417 = vmatprep.subr.mxu1 %v12472_v1 }
 0x753   : > { %11415 = vmatmul.mubr.msk.f32.vlgmr.msra.gmra.mxu1 %vm1441_vm2, %v2210_v15  ;;  %v1162_v15 = vld [vmem:[%s14469_s24] sm:$0xff] }
 0x754   : > { %11419 = vmatprep.mubr.msk.f32.mxu1 %vm12473_vm1, %v12472_v1 }
 0x80f   : > { %v12862_v16 = vpop.f32.mrf.mxu1 }
 0x811   : > { %v11400_v17 = vpop.f32.mrf.mxu1 }
 0x812   : > { %v1173_v17 = vld [vmem:[%s14474_s4 + $0x10] sm:$0xff] }
 0x813   : > { %v2283_v18 = vpop.f32.mrf.mxu1 }
 0x814   : > { %v2287_v19 = vmul.f32 0.35355338, %v2283_v18  ;;  %v1172_v18 = vld [vmem:[%s14474_s4 + $0x8] sm:$0xff] }
 0x815   : > { %v11416_v20 = vpop.f32.mrf.mxu1 }
 0x816   : > { %v2288_v21 = vadd.f32 %v12803_v22, %v2287_v19 }
 0x818   : > { %v2289_v23 = vsel %vm1441_vm2, %v2288_v21, -inf }
 0x819   : > { %2290 = vmax.xlane.f32.xlu1 %v2289_v23 }
 0x82a   : > { %1784 = vrot.lane.b32.xlu1 %v1158_v24, %s14489_s26 }
 0x82e   : > { %2380 = vrot.lane.b32.xlu1 %v1159_v25, %s14404_s15 }
 0x832   : > { %2378 = vrot.lane.b32.xlu1 %v1158_v24, %s14404_s15 }
 0x836   : > { %2376 = vrot.lane.b32.xlu1 %v1157_v26, %s14404_s15 }
 0x8a2   : > { %v2291_v27 = vpop.xlane.xlu1 %2290 }
 0x8a3   : > { %v2292_v28 = vsub.f32 %v2288_v21, %v2291_v27 }
 0x8a5   : > { %v2293_v29 = vmul.f32 1.442695, %v2292_v28 }
 0x8a6   : > { %v1785_v38 = vpop.permute.xlu1 %1784 }
 0x8a7   : > { %12267 = vpow2.f32 %v2293_v29  ;;  %v1171_v29 = vld [vmem:[%s14474_s4] sm:$0xff] }
 0x8aa   : > { %v2381_v42 = vpop.permute.xlu1 %2380 }
 0x8ae   : > { %v2379_v45 = vpop.permute.xlu1 %2378 }
 0x8b2   : > { %v2377_v46 = vpop.permute.xlu1 %2376 }
 0x8b4   : > { %v12268_v31 = vpop.eup %12267 }
 0x8b5   : > { %v2295_v32 = vsel %vm1441_vm2, %v12268_v31, 0.0 }
 0x8b6   : > { %2296 = vadd.xlane.f32.xlu0 %v2295_v32 }
 0x8cc   : > { %2300 = vrot.lane.b32.xlu0 %v12807_v30, %s14404_s15 }
 0x8d0   : > { %1788 = vrot.lane.b32.xlu0 %v1160_v33, %s14489_s26 }
 0x8d4   : > { %1786 = vrot.lane.b32.xlu0 %v1159_v25, %s14489_s26 }
 0x8d8   : > { %1782 = vrot.lane.b32.xlu0 %v1157_v26, %s14489_s26 }
 0x8dc   : > { %2125 = vrot.lane.b32.xlu0 %v1160_v33, %s14490_s5 }
 0x8e0   : > { %2382 = vrot.lane.b32.xlu0 %v1160_v33, %s14404_s15  ;;  %s14491_s15 = smov 96  }
 0x8e4   : > { %2123 = vrot.lane.b32.xlu0 %v1159_v25, %s14490_s5 }
 0x8e8   : > { %2121 = vrot.lane.b32.xlu0 %v1158_v24, %s14490_s5 }
 0x8ec   : > { %2119 = vrot.lane.b32.xlu0 %v1157_v26, %s14490_s5 }
 0x93f   : > { %v2297_v34 = vpop.xlane.xlu0 %2296 }
 0x940   : > { %12269 = vrcp.f32 %v2297_v34 }
 0x943   : > { %v2301_v30 = vpop.permute.xlu0 %2300 }
 0x944   : > { %11418 = vmatpush3.msra.mxu1 %v2301_v30 }
 0x945   : > { %11422 = vmatprep.subr.mxu1 %v12472_v1 }
 0x947   : > { %v1789_v35 = vpop.permute.xlu0 %1788 }
 0x948   : > { %11370 = vmatpush3.xpose.msk.msra.mxu0 %vm1441_vm2, %v1789_v35  ;;  %v10505_v35 = vld [vmem:[%s14468_s27] ss:$0 sm:$0xff] }
 0x949   : > { %11371 = vmatprep.subr.mxu0 %v12472_v1 }
 0x94b   : > { %v1787_v36 = vpop.permute.xlu0 %1786 }
 0x94c   : > { %11372 = vmatpush3.xpose.msk.msra.mxu0 %vm1441_vm2, %v1787_v36 }
 0x94d   : > { %v12270_v37 = vpop.eup %12269  ;;  %11373 = vmatprep.subr.mxu0 %v12472_v1 }
 0x94e   : > { %v2299_v39 = vmul.f32 %v12270_v37, %v12268_v31  ;;  %v10495_v31 = vld [vmem:[%s14472_s19] ss:$0 sm:$0xff] }
 0x94f   : > { %v1783_v40 = vpop.permute.xlu0 %1782 }
 0x950   : > { %11374 = vmatpush3.xpose.msk.msra.mxu0 %vm1441_vm2, %v1785_v38  ;;  %11420 = vmatmul.mubr.msk.f32.vlgmr.msra.gmra.mxu1 %vm1441_vm2, %v2299_v39 }
 0x951   : > { %11375 = vmatprep.subr.mxu0 %v12472_v1  ;;  %11430 = vmatprep.mubr.msk.f32.mxu1 %vm12473_vm1, %v12472_v1 }
 0x953   : > { %v2126_v41 = vpop.permute.xlu0 %2125 }
 0x954   : > { %11376 = vmatpush3.xpose.msk.msra.mxu0 %vm1441_vm2, %v1783_v40 }
 0x955   : > { %11380 = vmatprep.subr.mxu0 %v12472_v1 }
 0x957   : > { %11378 = vmatmul.mubr.msk.f32.vlgmr.msra.gmra.mxu0 %vm1441_vm2, %v12842_v60  ;;  %v2383_v44 = vpop.permute.xlu0 %2382 }
 0x958   : > { %11381 = vmatpush3.xpose.msk.msra.mxu0 %vm1441_vm2, %v1160_v33  ;;  %11388 = vmatprep.mubr.msk.f32.mxu0 %vm12473_vm1, %v12472_v1 }
 0x959   : > { %11382 = vmatprep.subr.mxu0 %v12472_v1  ;;  %11423 = vmatpush3.xpose.msk.msra.mxu1 %vm1441_vm2, %v2383_v44 }
 0x95a   : > { %11424 = vmatprep.subr.mxu1 %v12472_v1 }
 0x95b   : > { %v2124_v47 = vpop.permute.xlu0 %2123 }
 0x95c   : > { %11383 = vmatpush3.xpose.msk.msra.mxu0 %vm1441_vm2, %v1159_v25 }
 0x95d   : > { %11384 = vmatprep.subr.mxu0 %v12472_v1  ;;  %11425 = vmatpush3.xpose.msk.msra.mxu1 %vm1441_vm2, %v2381_v42 }
 0x95e   : > { %11426 = vmatprep.subr.mxu1 %v12472_v1 }
 0x95f   : > { %v2122_v48 = vpop.permute.xlu0 %2121 }
 0x960   : > { %11385 = vmatpush3.xpose.msk.msra.mxu0 %vm1441_vm2, %v1158_v24  ;;  %v10493_v24 = vld [vmem:[%s14467_s29] ss:$0 sm:$0xff] }
 0x961   : > { %11386 = vmatprep.subr.mxu0 %v12472_v1  ;;  %11427 = vmatpush3.xpose.msk.msra.mxu1 %vm1441_vm2, %v2379_v45 }
 0x962   : > { %11428 = vmatprep.subr.mxu1 %v12472_v1 }
 0x963   : > { %v2120_v49 = vpop.permute.xlu0 %2119 }
 0x964   : > { %11387 = vmatpush3.xpose.msk.msra.mxu0 %vm1441_vm2, %v1157_v26  ;;  %v10494_v26 = vld [vmem:[%s14475_s8] ss:$0 sm:$0xff] }
 0x965   : > { %11401 = vmatprep.subr.mxu0 %v12472_v1  ;;  %11429 = vmatpush3.xpose.msk.msra.mxu1 %vm1441_vm2, %v2377_v46 }
 0x966   : > { %11452 = vmatprep.subr.mxu1 %v12472_v1 }
 0x967   : > { %11389 = vmatmul.mubr.msk.f32.vlgmr.msra.gmra.mxu0 %vm1441_vm2, %v12825_v43 }
 0x968   : > { %11402 = vmatpush3.xpose.msk.msra.mxu0 %vm1441_vm2, %v2126_v41  ;;  %11409 = vmatprep.mubr.msk.f32.mxu0 %vm12473_vm1, %v12472_v1 }
 0x969   : > { %11403 = vmatprep.subr.mxu0 %v12472_v1 }
 0x96c   : > { %11404 = vmatpush3.xpose.msk.msra.mxu0 %vm1441_vm2, %v2124_v47  ;;  %v10517_v47 = vld [vmem:[%s14466_s30 + $0x78] sm:$0xff] }
 0x96d   : > { %11405 = vmatprep.subr.mxu0 %v12472_v1 }
 0x970   : > { %11406 = vmatpush3.xpose.msk.msra.mxu0 %vm1441_vm2, %v2122_v48  ;;  %v10521_v48 = vld [vmem:[%s14466_s30 + $0x98] sm:$0xff] }
 0x971   : > { %11407 = vmatprep.subr.mxu0 %v12472_v1 }
 0x974   : > { %11408 = vmatpush3.xpose.msk.msra.mxu0 %vm1441_vm2, %v2120_v49  ;;  %v10516_v49 = vld [vmem:[%s14466_s30 + $0x70] sm:$0xff] }
 0x975   : > { %11433 = vmatprep.subr.mxu0 %v12472_v1 }
 0x977   : > { %11410 = vmatmul.mubr.msk.f32.vlgmr.msra.gmra.mxu0 %vm1441_vm2, %v12862_v16  ;;  %v1174_v16 = vld [vmem:[%s14474_s4 + $0x18] sm:$0xff] }
 0x978   : > { %11449 = vmatprep.mubr.msk.f32.mxu0 %vm12473_vm1, %v12472_v1  ;;  %11434 = vmatpush3.xpose.msk.msra.mxu0 %vm1185_vm0, %v1169_v3  ;;  %v10523_v3 = vld [vmem:[%s14466_s30 + $0xa8] sm:$0xff] }
 0x979   : > { %11435 = vmatprep.subr.mxu0 %v12472_v1 }
 0x97c   : > { %11436 = vmatpush3.xpose.msk.msra.mxu0 %vm1185_vm0, %v1168_v4  ;;  %v10522_v4 = vld [vmem:[%s14466_s30 + $0xa0] sm:$0xff] }
 0x97d   : > { %11437 = vmatprep.subr.mxu0 %v12472_v1 }
 0x980   : > { %11438 = vmatpush3.xpose.msk.msra.mxu0 %vm1185_vm0, %v1167_v10 }
 0x981   : > { %11439 = vmatprep.subr.mxu0 %v12472_v1 }
 0x984   : > { %11440 = vmatpush3.xpose.msk.msra.mxu0 %vm1185_vm0, %v1166_v11 }
 0x985   : > { %11441 = vmatprep.subr.mxu0 %v12472_v1 }
 0x988   : > { %11442 = vmatpush3.xpose.msk.msra.mxu0 %vm1185_vm0, %v1165_v12 }
 0x989   : > { %11443 = vmatprep.subr.mxu0 %v12472_v1 }
 0x98c   : > { %11444 = vmatpush3.xpose.msk.msra.mxu0 %vm1185_vm0, %v1164_v13 }
 0x98d   : > { %11445 = vmatprep.subr.mxu0 %v12472_v1 }
 0x990   : > { %11446 = vmatpush3.xpose.msk.msra.mxu0 %vm1185_vm0, %v1163_v14 }
 0x991   : > { %11447 = vmatprep.subr.mxu0 %v12472_v1 }
 0x994   : > { %11448 = vmatpush3.xpose.msk.msra.mxu0 %vm1185_vm0, %v1162_v15 }
 0x995   : > { %11474 = vmatprep.subr.mxu0 %v12472_v1 }
 0xa10   : > { %v2372_v43 = vpop.f32.mrf.mxu1 }
 0xa11   : > { %11431 = vmatmul.mubr.msk.f32.vlgmr.msra.gmra.mxu1 %vm1441_vm2, %v2372_v43  ;;  %v10520_v43 = vld [vmem:[%s14466_s30 + $0x90] sm:$0xff] }
 0xa12   : > { %v11421_v50 = vpop.f32.mrf.mxu1  ;;  %11460 = vmatprep.mubr.msk.f32.mxu1 %vm12473_vm1, %v12472_v1  ;;  %11453 = vmatpush3.xpose.msk.msra.mxu1 %vm2612_vm3, %v1174_v16 }
 0xa13   : > { %11454 = vmatprep.subr.mxu1 %v12472_v1  ;;  %v10515_v50 = vld [vmem:[%s14466_s30 + $0x68] sm:$0xff] }
 0xa16   : > { %11455 = vmatpush3.xpose.msk.msra.mxu1 %vm2612_vm3, %v1173_v17 }
 0xa17   : > { %v1867_v51 = vpop.f32.mrf.mxu0  ;;  %11456 = vmatprep.subr.mxu1 %v12472_v1 }
 0xa19   : > { %v11379_v52 = vpop.f32.mrf.mxu0 }
 0xa1a   : > { %11457 = vmatpush3.xpose.msk.msra.mxu1 %vm2612_vm3, %v1172_v18  ;;  %v10514_v52 = vld [vmem:[%s14466_s30 + $0x60] sm:$0xff] }
 0xa1b   : > { %11458 = vmatprep.subr.mxu1 %v12472_v1 }
 0xa1e   : > { %11459 = vmatpush3.xpose.msk.msra.mxu1 %vm2612_vm3, %v1171_v29 }
 0xa1f   : > { %11463 = vmatprep.subr.mxu1 %v12472_v1 }
 0xa27   : > { %v1948_v53 = vpop.f32.mrf.mxu0 }
 0xa28   : > { %v1949_v54 = vadd.f32 %v1948_v53, %v1867_v51  ;;  %v10519_v51 = vld [vmem:[%s14466_s30 + $0x88] sm:$0xff]  ;;  %v10518_v53 = vld [vmem:[%s14466_s30 + $0x80] sm:$0xff] }
 0xa29   : > { %v11390_v55 = vpop.f32.mrf.mxu0 }
 0xa37   : > { %v2204_v56 = vpop.f32.mrf.mxu0 }
 0xa38   : > { %v2208_v57 = vadd.f32 %v2204_v56, %v1949_v54  ;;  %v10549_v54 = vld [vmem:[%s14477_s12 + $0x1] ss:$0 sm:$0xff]  ;;  %s14492_s12 = smov 64  }
 0xa39   : > { %v11411_v58 = vpop.f32.mrf.mxu0 }
 0xad1   : > { %v2461_v60 = vpop.f32.mrf.mxu1 }
 0xad2   : > { %v2465_v61 = vadd.f32 %v2461_v60, %v2208_v57 }
 0xad3   : > { %v11432_v62 = vpop.f32.mrf.mxu1 }
 0xad4   : > { %v2472_v63 = vadd.f32 %v10492_v59, %v2465_v61  ;;  %v10511_v59 = vld [vmem:[%s14471_s3] ss:$0 sm:$0xff] }
 0xad5   : > { %v10512_v61 = vld [vmem:[%s14470_s14] ss:$0 sm:$0xff] }
 0xad6   : > { %v2473_v0 = vadd.f32 %v2472_v63, %v12745_v6 }
 0xad8   : > { %v2474_v2 = vsel %vm1185_vm0, %v2473_v0, 0.0 }
 0xad9   : > { %2475 = vadd.xlane.f32.xlu0 %v2474_v2  ;;  %v10524_v2 = vld [vmem:[%s14466_s30 + $0xb0] sm:$0xff] }
 0xb62   : > { %v2476_v5 = vpop.xlane.xlu0 %2475 }
 0xb63   : > { %v2478_v7 = vmul.f32 0.03125, %v2476_v5 }
 0xb65   : > { %v2479_v8 = vsub.f32 %v2473_v0, %v2478_v7  ;;  %v10525_v0 = vld [vmem:[%s14466_s30 + $0xb8] sm:$0xff]  ;;  %s14507_s30 = sld [smem:[#allocation19_spill]] }
 0xb67   : > { %v2480_v6 = vmul.f32 %v2479_v8, %v2479_v8 }
 0xb69   : > { %v2481_v9 = vsel %vm1185_vm0, %v2480_v6, 0.0 }
 0xb6a   : > { %2482 = vadd.xlane.f32.xlu1 %v2481_v9 }
 0xb7b   : > { %2865 = vrot.lane.b32.xlu1 %v10549_v54, %s14491_s15 }
 0xbf3   : > { %v2483_v19 = vpop.xlane.xlu1 %2482 }
 0xbf4   : > { %v2484_v20 = vmul.f32 0.03125, %v2483_v19 }
 0xbf6   : > { %v2485_v21 = vadd.f32 1e-05, %v2484_v20 }
 0xbf7   : > { %v2866_v5 = vpop.permute.xlu1 %2865 }
 0xbf8   : > { %12271 = vrsqrt.f32 %v2485_v21 }
 0xc05   : > { %v12272_v23 = vpop.eup %12271 }
 0xc06   : > { %v2487_v25 = vmul.f32 %v12272_v23, %v2479_v8 }
 0xc08   : > { %v2494_v27 = vmul.f32 %v10493_v24, %v2487_v25 }
 0xc0a   : > { %v2501_v28 = vadd.f32 %v10494_v26, %v2494_v27 }
 0xc0c   : > { %11450 = vmatmul.mubr.msk.f32.vlgmr.msra.gmra.mxu0 %vm1185_vm0, %v2501_v28 }
 0xc0d   : > { %11482 = vmatprep.mubr.msk.f32.mxu0 %vm12473_vm1, %v12472_v1  ;;  %11475 = vmatpush3.xpose.msk.msra.mxu0 %vm1185_vm0, %v10521_v48  ;;  %v13092_v48 = vld [vmem:[%s14476_s6 + $0x38] sm:$0xff] }
 0xc0e   : > { %11476 = vmatprep.subr.mxu0 %v12472_v1 }
 0xc11   : > { %11477 = vmatpush3.xpose.msk.msra.mxu0 %vm1185_vm0, %v10520_v43 }
 0xc12   : > { %11478 = vmatprep.subr.mxu0 %v12472_v1 }
 0xc15   : > { %11479 = vmatpush3.xpose.msk.msra.mxu0 %vm1185_vm0, %v10519_v51 }
 0xc16   : > { %11480 = vmatprep.subr.mxu0 %v12472_v1 }
 0xc19   : > { %11481 = vmatpush3.xpose.msk.msra.mxu0 %vm1185_vm0, %v10518_v53 }
 0xc1a   : > { %11496 = vmatprep.subr.mxu0 %v12472_v1 }
 0xccc   : > { %v2601_v32 = vpop.f32.mrf.mxu0 }
 0xccd   : > { %v2602_v33 = vadd.f32 %v10495_v31, %v2601_v32 }
 0xcce   : > { %v11451_v34 = vpop.f32.mrf.mxu0 }
 0xccf   : > { %v2605_v30 = vmax.f32 %v2602_v33, 0.0 }
 0xcd1   : > { %11461 = vmatmul.mubr.msk.f32.vlgmr.msra.gmra.mxu1 %vm2612_vm3, %v2605_v30 }
 0xcd2   : > { %11471 = vmatprep.mubr.msk.f32.mxu1 %vm12473_vm1, %v12472_v1  ;;  %11464 = vmatpush3.xpose.msk.msra.mxu1 %vm1185_vm0, %v10517_v47 }
 0xcd3   : > { %11465 = vmatprep.subr.mxu1 %v12472_v1 }
 0xcd6   : > { %11466 = vmatpush3.xpose.msk.msra.mxu1 %vm1185_vm0, %v10516_v49  ;;  %v13097_v49 = vld [vmem:[%s14476_s6 + $0x20] sm:$0xff] }
 0xcd7   : > { %11467 = vmatprep.subr.mxu1 %v12472_v1 }
 0xcda   : > { %11468 = vmatpush3.xpose.msk.msra.mxu1 %vm1185_vm0, %v10515_v50 }
 0xcdb   : > { %11469 = vmatprep.subr.mxu1 %v12472_v1 }
 0xcde   : > { %11470 = vmatpush3.xpose.msk.msra.mxu1 %vm1185_vm0, %v10514_v52 }
 0xcdf   : > { %11485 = vmatprep.subr.mxu1 %v12472_v1 }
 0xd91   : > { %v2694_v36 = vpop.f32.mrf.mxu1 }
 0xd92   : > { %v2695_v37 = vadd.f32 %v10505_v35, %v2694_v36 }
 0xd93   : > { %v11462_v38 = vpop.f32.mrf.mxu1 }
 0xd94   : > { %v2698_v39 = vadd.f32 %v2695_v37, %v2501_v28 }
 0xd96   : > { %v2699_v40 = vsel %vm1185_vm0, %v2698_v39, 0.0 }
 0xd97   : > { %2700 = vadd.xlane.f32.xlu0 %v2699_v40  ;;  %v13083_v40 = vld [vmem:[%s14476_s6 + $0x28] sm:$0xff] }
 0xe20   : > { %v2701_v41 = vpop.xlane.xlu0 %2700 }
 0xe21   : > { %v2702_v42 = vmul.f32 0.03125, %v2701_v41 }
 0xe23   : > { %v2703_v44 = vsub.f32 %v2698_v39, %v2702_v42  ;;  %v13078_v39 = vld [vmem:[%s14476_s6 + $0x30] sm:$0xff]  ;;  %s14493_s6 = smov 104  }
 0xe25   : > { %v2704_v45 = vmul.f32 %v2703_v44, %v2703_v44 }
 0xe27   : > { %v2705_v46 = vsel %vm1185_vm0, %v2704_v45, 0.0 }
 0xe28   : > { %2706 = vadd.xlane.f32.xlu0 %v2705_v46 }
 0xeb1   : > { %v2707_v55 = vpop.xlane.xlu0 %2706 }
 0xeb2   : > { %v2708_v56 = vmul.f32 0.03125, %v2707_v55 }
 0xeb4   : > { %v2709_v57 = vadd.f32 1e-05, %v2708_v56 }
 0xeb6   : > { %12273 = vrsqrt.f32 %v2709_v57 }
 0xec3   : > { %v12274_v58 = vpop.eup %12273 }
 0xec4   : > { %v2711_v60 = vmul.f32 %v12274_v58, %v2703_v44 }
 0xec6   : > { %v2718_v62 = vmul.f32 %v10511_v59, %v2711_v60 }
 0xec8   : > { %v13016_v63 = vadd.f32 %v10512_v61, %v2718_v62 }
 0xeca   : > { %11472 = vmatmul.mubr.msk.f32.vlgmr.msra.gmra.mxu1 %vm1185_vm0, %v13016_v63  ;;  %11483 = vmatmul.mubr.msk.f32.vlgmr.msra.gmra.mxu0 %vm1185_vm0, %v13016_v63 }
 0xecb   : > { %11486 = vmatpush3.xpose.msk.msra.mxu1 %vm1185_vm0, %v10525_v0  ;;  %11493 = vmatprep.mubr.msk.f32.mxu1 %vm12473_vm1, %v12472_v1 }
 0xecc   : > { %11487 = vmatprep.subr.mxu1 %v12472_v1  ;;  %11498 = vmatprep.mubr.msk.f32.mxu0 %vm12473_vm1, %v12472_v1 }
 0xecf   : > { %11488 = vmatpush3.xpose.msk.msra.mxu1 %vm1185_vm0, %v10524_v2 }
 0xed0   : > { %11489 = vmatprep.subr.mxu1 %v12472_v1 }
 0xed3   : > { %11490 = vmatpush3.xpose.msk.msra.mxu1 %vm1185_vm0, %v10523_v3 }
 0xed4   : > { %11491 = vmatprep.subr.mxu1 %v12472_v1 }
 0xed7   : > { %11492 = vmatpush3.xpose.msk.msra.mxu1 %vm1185_vm0, %v10522_v4 }
 0xed8   : > { %11511 = vmatprep.subr.mxu1 %v12472_v1 }
 0xeda   : > { %11494 = vmatmul.mubr.msk.f32.vlgmr.msra.gmra.mxu1 %vm1185_vm0, %v13016_v63 }
 0xedb   : > { %11513 = vmatprep.mubr.msk.f32.mxu1 %vm12473_vm1, %v12472_v1 }
 0xf8a   : > { %v2861_v7 = vpop.f32.mrf.mxu1  ;;  %v2946_v8 = vpop.f32.mrf.mxu0 }
 0xf8b   : > { %v13042_v6 = vadd.f32 %v2946_v8, %v2866_v5  ;;  %v13048_v11 = vadd.f32 %v10549_v54, %v2861_v7 }
 0xf8c   : > { %v11473_v9 = vpop.f32.mrf.mxu1  ;;  %v11484_v10 = vpop.f32.mrf.mxu0 }
 0xf8d   : > { %3199 = vrot.lane.b32.xlu1 %v13042_v6, %s14489_s26  ;;  %11497 = vmatpush3.xpose.msk.msra.mxu0 %vm1441_vm2, %v13042_v6 }
 0xf8e   : > { %11501 = vmatprep.subr.mxu0 %v12472_v1 }
 0xf90   : > { %11499 = vmatmul.mubr.msk.f32.vlgmr.msra.gmra.mxu0 %vm1441_vm2, %v13048_v11 }
 0xf91   : > { %3197 = vrot.lane.b32.xlu1 %v13048_v11, %s14489_s26  ;;  %11503 = vmatprep.mubr.msk.f32.mxu0 %vm12473_vm1, %v12472_v1 }
 0xf9a   : > { %v3031_v12 = vpop.f32.mrf.mxu1 }
 0xf9c   : > { %v11495_v13 = vpop.f32.mrf.mxu1 }
 0xfff   : > { %v3200_v29 = vpop.permute.xlu1 %3199 }
0x1003   : > { %v3198_v32 = vpop.permute.xlu1 %3197 }
0x1050   : > { %v3107_v14 = vpop.f32.mrf.mxu0 }
0x1051   : > { %v3111_v15 = vmul.f32 0.35355338, %v3107_v14 }
0x1052   : > { %v11500_v16 = vpop.f32.mrf.mxu0 }
0x1053   : > { %v3112_v17 = vadd.f32 %v12803_v22, %v3111_v15 }
0x1055   : > { %v3113_v18 = vsel %vm1441_vm2, %v3112_v17, -inf }
0x1056   : > { %3114 = vmax.xlane.f32.xlu0 %v3113_v18 }
0x10df   : > { %v3115_v19 = vpop.xlane.xlu0 %3114 }
0x10e0   : > { %v3116_v20 = vsub.f32 %v3112_v17, %v3115_v19 }
0x10e2   : > { %v3117_v21 = vmul.f32 1.442695, %v3116_v20 }
0x10e4   : > { %12275 = vpow2.f32 %v3117_v21 }
0x10f1   : > { %v12276_v23 = vpop.eup %12275 }
0x10f2   : > { %v3119_v24 = vsel %vm1441_vm2, %v12276_v23, 0.0 }
0x10f3   : > { %3120 = vadd.xlane.f32.xlu0 %v3119_v24 }
0x1109   : > { %2950 = vrot.lane.b32.xlu0 %v10549_v54, %s14492_s12 }
0x117c   : > { %v3121_v25 = vpop.xlane.xlu0 %3120 }
0x117d   : > { %12277 = vrcp.f32 %v3121_v25 }
0x1180   : > { %v2951_v26 = vpop.permute.xlu0 %2950 }
0x1181   : > { %v13061_v27 = vadd.f32 %v3031_v12, %v2951_v26 }
0x1183   : > { %11502 = vmatpush3.msra.mxu0 %v13061_v27 }
0x1184   : > { %11506 = vmatprep.subr.mxu0 %v12472_v1 }
0x118a   : > { %v12278_v28 = vpop.eup %12277 }
0x118b   : > { %v3123_v31 = vmul.f32 %v12278_v28, %v12276_v23 }
0x118d   : > { %11504 = vmatmul.mubr.msk.f32.vlgmr.msra.gmra.mxu0 %vm1441_vm2, %v3123_v31 }
0x118e   : > { %11507 = vmatpush3.xpose.msk.msra.mxu0 %vm1441_vm2, %v3200_v29  ;;  %11508 = vmatprep.mubr.msk.f32.mxu0 %vm12473_vm1, %v12472_v1 }
0x118f   : > { %11516 = vmatprep.subr.mxu0 %v12472_v1 }
0x1191   : > { %11509 = vmatmul.mubr.msk.f32.vlgmr.msra.gmra.mxu0 %vm1441_vm2, %v3198_v32 }
0x1192   : > { %11524 = vmatprep.mubr.msk.f32.mxu0 %vm12473_vm1, %v12472_v1 }
0x124d   : > { %v3193_v33 = vpop.f32.mrf.mxu0 }
0x124f   : > { %v11505_v34 = vpop.f32.mrf.mxu0 }
0x1251   : > { %v3271_v30 = vpop.f32.mrf.mxu0 }
0x1252   : > { %v3275_v35 = vmul.f32 0.35355338, %v3271_v30 }
0x1253   : > { %v11510_v36 = vpop.f32.mrf.mxu0 }
0x1254   : > { %v3276_v37 = vadd.f32 %v12803_v22, %v3275_v35 }
0x1256   : > { %v3277_v38 = vsel %vm1441_vm2, %v3276_v37, -inf }
0x1257   : > { %3278 = vmax.xlane.f32.xlu1 %v3277_v38 }
0x1268   : > { %3289 = vrot.lane.b32.xlu1 %v13061_v27, %s14489_s26 }
0x126c   : > { %3373 = vrot.lane.b32.xlu1 %v13078_v39, %s14489_s26 }
0x1270   : > { %3371 = vrot.lane.b32.xlu1 %v13083_v40, %s14489_s26 }
0x1274   : > { %3541 = vrot.lane.b32.xlu1 %v13042_v6, %s14490_s5 }
0x12e0   : > { %v3279_v41 = vpop.xlane.xlu1 %3278 }
0x12e1   : > { %v3280_v42 = vsub.f32 %v3276_v37, %v3279_v41 }
0x12e3   : > { %v3281_v44 = vmul.f32 1.442695, %v3280_v42 }
0x12e4   : > { %v3290_v45 = vpop.permute.xlu1 %3289 }
0x12e5   : > { %12279 = vpow2.f32 %v3281_v44  ;;  %11512 = vmatpush3.msra.mxu1 %v3290_v45 }
0x12e6   : > { %11527 = vmatprep.subr.mxu1 %v12472_v1 }
0x12e8   : > { %v3374_v51 = vpop.permute.xlu1 %3373 }
0x12ec   : > { %v3372_v52 = vpop.permute.xlu1 %3371 }
0x12f0   : > { %v3542_v57 = vpop.permute.xlu1 %3541 }
0x12f2   : > { %v12280_v46 = vpop.eup %12279 }
0x12f3   : > { %v3283_v47 = vsel %vm1441_vm2, %v12280_v46, 0.0 }
0x12f4   : > { %3284 = vadd.xlane.f32.xlu0 %v3283_v47 }
0x130a   : > { %3375 = vrot.lane.b32.xlu0 %v13092_v48, %s14489_s26 }
0x130e   : > { %3369 = vrot.lane.b32.xlu0 %v13097_v49, %s14489_s26 }
0x1312   : > { %3539 = vrot.lane.b32.xlu0 %v13048_v11, %s14490_s5 }
0x137d   : > { %v3285_v43 = vpop.xlane.xlu0 %3284 }
0x137e   : > { %12281 = vrcp.f32 %v3285_v43 }
0x1381   : > { %v3376_v50 = vpop.permute.xlu0 %3375 }
0x1382   : > { %11517 = vmatpush3.xpose.msk.msra.mxu0 %vm1441_vm2, %v3376_v50 }
0x1383   : > { %11518 = vmatprep.subr.mxu0 %v12472_v1 }
0x1385   : > { %v3370_v55 = vpop.permute.xlu0 %3369 }
0x1386   : > { %11519 = vmatpush3.xpose.msk.msra.mxu0 %vm1441_vm2, %v3374_v51 }
0x1387   : > { %11520 = vmatprep.subr.mxu0 %v12472_v1 }
0x1389   : > { %v3540_v59 = vpop.permute.xlu0 %3539 }
0x138a   : > { %11521 = vmatpush3.xpose.msk.msra.mxu0 %vm1441_vm2, %v3372_v52 }
0x138b   : > { %v12282_v53 = vpop.eup %12281  ;;  %11522 = vmatprep.subr.mxu0 %v12472_v1 }
0x138c   : > { %v3287_v54 = vmul.f32 %v12282_v53, %v12280_v46 }
0x138e   : > { %11514 = vmatmul.mubr.msk.f32.vlgmr.msra.gmra.mxu1 %vm1441_vm2, %v3287_v54  ;;  %11523 = vmatpush3.xpose.msk.msra.mxu0 %vm1441_vm2, %v3370_v55  ;;  %v10539_v55 = vld [vmem:[%s14469_s24 + $0x78] sm:$0xff] }
0x138f   : > { %11528 = vmatpush3.xpose.msk.msra.mxu1 %vm1441_vm2, %v13092_v48  ;;  %11535 = vmatprep.mubr.msk.f32.mxu1 %vm12473_vm1, %v12472_v1 }
0x1390   : > { %11529 = vmatprep.subr.mxu1 %v12472_v1  ;;  %11538 = vmatprep.subr.mxu0 %v12472_v1 }
0x1393   : > { %11530 = vmatpush3.xpose.msk.msra.mxu1 %vm1441_vm2, %v13078_v39 }
0x1394   : > { %11531 = vmatprep.subr.mxu1 %v12472_v1 }
0x1397   : > { %11532 = vmatpush3.xpose.msk.msra.mxu1 %vm1441_vm2, %v13083_v40 }
0x1398   : > { %11533 = vmatprep.subr.mxu1 %v12472_v1 }
0x139b   : > { %11534 = vmatpush3.xpose.msk.msra.mxu1 %vm1441_vm2, %v13097_v49 }
0x139c   : > { %11543 = vmatprep.subr.mxu1 %v12472_v1 }
0x139e   : > { %11536 = vmatmul.mubr.msk.f32.vlgmr.msra.gmra.mxu1 %vm1441_vm2, %v3193_v33 }
0x139f   : > { %11545 = vmatprep.mubr.msk.f32.mxu1 %vm12473_vm1, %v12472_v1 }
0x144e   : > { %v3361_v56 = vpop.f32.mrf.mxu1 }
0x144f   : > { %11525 = vmatmul.mubr.msk.f32.vlgmr.msra.gmra.mxu0 %vm1441_vm2, %v3361_v56  ;;  %v10538_v56 = vld [vmem:[%s14469_s24 + $0x70] sm:$0xff] }
0x1450   : > { %11539 = vmatpush3.xpose.msk.msra.mxu0 %vm1441_vm2, %v3542_v57  ;;  %v11515_v58 = vpop.f32.mrf.mxu1  ;;  %11540 = vmatprep.mubr.msk.f32.mxu0 %vm12473_vm1, %v12472_v1 }
0x1451   : > { %11548 = vmatprep.subr.mxu0 %v12472_v1 }
0x1453   : > { %11541 = vmatmul.mubr.msk.f32.vlgmr.msra.gmra.mxu0 %vm1441_vm2, %v3540_v59 }
0x1454   : > { %11556 = vmatprep.mubr.msk.f32.mxu0 %vm12473_vm1, %v12472_v1 }
0x145e   : > { %v13137_v60 = vpop.f32.mrf.mxu1 }
0x1460   : > { %v11537_v61 = vpop.f32.mrf.mxu1 }
0x1461   : > { %v10537_v61 = vld [vmem:[%s14469_s24 + $0x68] sm:$0xff] }
0x150f   : > { %v13139_v62 = vpop.f32.mrf.mxu0 }
0x1510   : > { %v3536_v44 = vadd.f32 %v13137_v60, %v13139_v62  ;;  %v10536_v62 = vld [vmem:[%s14469_s24 + $0x60] sm:$0xff] }
0x1511   : > { %v11526_v0 = vpop.f32.mrf.mxu0 }
0x1512   : > { %v10535_v0 = vld [vmem:[%s14469_s24 + $0x58] sm:$0xff] }
0x1513   : > { %v3613_v2 = vpop.f32.mrf.mxu0 }
0x1514   : > { %v3617_v3 = vmul.f32 0.35355338, %v3613_v2  ;;  %v10534_v2 = vld [vmem:[%s14469_s24 + $0x50] sm:$0xff] }
0x1515   : > { %v11542_v4 = vpop.f32.mrf.mxu0 }
0x1516   : > { %v3618_v5 = vadd.f32 %v12803_v22, %v3617_v3  ;;  %v10533_v3 = vld [vmem:[%s14469_s24 + $0x48] sm:$0xff]  ;;  %v10532_v4 = vld [vmem:[%s14469_s24 + $0x40] sm:$0xff]  ;;  %s14504_s24 = sld [smem:[#allocation15_spill]] }
0x1518   : > { %v3619_v7 = vsel %vm1441_vm2, %v3618_v5, -inf }
0x1519   : > { %3620 = vmax.xlane.f32.xlu1 %v3619_v7  ;;  %v10543_v7 = vld [vmem:[%s14474_s4 + $0x30] sm:$0xff] }
0x152a   : > { %3798 = vrot.lane.b32.xlu1 %v13042_v6, %s14493_s6 }
0x152e   : > { %3796 = vrot.lane.b32.xlu1 %v13048_v11, %s14493_s6 }
0x15a2   : > { %v3621_v8 = vpop.xlane.xlu1 %3620 }
0x15a3   : > { %v3622_v9 = vsub.f32 %v3618_v5, %v3621_v8  ;;  %v10544_v5 = vld [vmem:[%s14474_s4 + $0x38] sm:$0xff]  ;;  %v10542_v8 = vld [vmem:[%s14474_s4 + $0x28] sm:$0xff] }
0x15a5   : > { %v3623_v10 = vmul.f32 1.442695, %v3622_v9 }
0x15a6   : > { %v3799_v16 = vpop.permute.xlu1 %3798 }
0x15a7   : > { %12283 = vpow2.f32 %v3623_v10 }
0x15aa   : > { %v3797_v17 = vpop.permute.xlu1 %3796 }
0x15b4   : > { %v12284_v12 = vpop.eup %12283 }
0x15b5   : > { %v3625_v13 = vsel %vm1441_vm2, %v12284_v12, 0.0 }
0x15b6   : > { %3626 = vadd.xlane.f32.xlu0 %v3625_v13 }
0x15cc   : > { %3630 = vrot.lane.b32.xlu0 %v13061_v27, %s14490_s5 }
0x163f   : > { %v3627_v14 = vpop.xlane.xlu0 %3626 }
0x1640   : > { %12285 = vrcp.f32 %v3627_v14  ;;  %v10598_v14 = vld [vmem:[%s14467_s29 + $0x1] ss:$0 sm:$0xff]  ;;  %s14506_s29 = sld [smem:[#allocation17_spill]] }
0x1643   : > { %v3631_v15 = vpop.permute.xlu0 %3630 }
0x1644   : > { %11544 = vmatpush3.msra.mxu1 %v3631_v15 }
0x1645   : > { %11559 = vmatprep.subr.mxu1 %v12472_v1 }
0x164d   : > { %v12286_v6 = vpop.eup %12285 }
0x164e   : > { %v3629_v11 = vmul.f32 %v12286_v6, %v12284_v12  ;;  %v10599_v6 = vld [vmem:[%s14475_s8 + $0x1] ss:$0 sm:$0xff]  ;;  %s14495_s8 = sld [smem:[#allocation9_spill]] }
0x1650   : > { %11546 = vmatmul.mubr.msk.f32.vlgmr.msra.gmra.mxu1 %vm1441_vm2, %v3629_v11 }
0x1651   : > { %11560 = vmatpush3.xpose.msk.msra.mxu1 %vm1441_vm2, %v3799_v16  ;;  %11561 = vmatprep.mubr.msk.f32.mxu1 %vm12473_vm1, %v12472_v1 }
0x1652   : > { %11564 = vmatprep.subr.mxu1 %v12472_v1 }
0x1654   : > { %11562 = vmatmul.mubr.msk.f32.vlgmr.msra.gmra.mxu1 %vm1441_vm2, %v3797_v17  ;;  %v4319_v17 = vld [vmem:[%s12513_s25 + $0x38] sm:$0xff] }
0x1655   : > { %11566 = vmatprep.mubr.msk.f32.mxu1 %vm12473_vm1, %v12472_v1 }
0x1710   : > { %v3702_v18 = vpop.f32.mrf.mxu1 }
0x1712   : > { %v11547_v19 = vpop.f32.mrf.mxu1 }
0x1713   : > { %v4318_v19 = vld [vmem:[%s12513_s25 + $0x30] sm:$0xff] }
0x1714   : > { %v3870_v20 = vpop.f32.mrf.mxu1 }
0x1715   : > { %v3874_v21 = vmul.f32 0.35355338, %v3870_v20  ;;  %v4317_v20 = vld [vmem:[%s12513_s25 + $0x28] sm:$0xff] }
0x1716   : > { %v11563_v23 = vpop.f32.mrf.mxu1 }
0x1717   : > { %v3875_v24 = vadd.f32 %v12803_v22, %v3874_v21  ;;  %v4316_v21 = vld [vmem:[%s12513_s25 + $0x20] sm:$0xff] }
0x1719   : > { %v3876_v25 = vsel %vm1441_vm2, %v3875_v24, -inf }
0x171a   : > { %3877 = vmax.xlane.f32.xlu0 %v3876_v25  ;;  %v10600_v25 = vld [vmem:[%s14472_s19 + $0x1] ss:$0 sm:$0xff]  ;;  %s14501_s19 = sld [smem:[#allocation12_spill]] }
0x1730   : > { %3887 = vrot.lane.b32.xlu0 %v13061_v27, %s14493_s6 }
0x1734   : > { %3969 = vrot.lane.b32.xlu0 %v13092_v48, %s14493_s6 }
0x1738   : > { %3967 = vrot.lane.b32.xlu0 %v13078_v39, %s14493_s6 }
0x173c   : > { %3965 = vrot.lane.b32.xlu0 %v13083_v40, %s14493_s6 }
0x1740   : > { %3963 = vrot.lane.b32.xlu0 %v13097_v49, %s14493_s6 }
0x17a3   : > { %v3878_v26 = vpop.xlane.xlu0 %3877 }
0x17a4   : > { %v3879_v22 = vsub.f32 %v3875_v24, %v3878_v26  ;;  %v13278_v24 = vld [vmem:[%s14495_s8] ss:$0 sm:$0xff] }
0x17a6   : > { %v3880_v28 = vmul.f32 1.442695, %v3879_v22 }
0x17a7   : > { %v3888_v29 = vpop.permute.xlu0 %3887 }
0x17a8   : > { %12287 = vpow2.f32 %v3880_v28  ;;  %11565 = vmatpush3.msra.mxu1 %v3888_v29 }
0x17a9   : > { %11569 = vmatprep.subr.mxu1 %v12472_v1 }
0x17ab   : > { %v3970_v30 = vpop.permute.xlu0 %3969 }
0x17af   : > { %v3968_v38 = vpop.permute.xlu0 %3967 }
0x17b5   : > { %v12288_v27 = vpop.eup %12287 }
0x17b6   : > { %v3882_v31 = vsel %vm1441_vm2, %v12288_v27, 0.0 }
0x17b7   : > { %3883 = vadd.xlane.f32.xlu1 %v3882_v31  ;;  %v4314_v31 = vld [vmem:[%s12513_s25 + $0x10] sm:$0xff] }
0x17c8   : > { %3712 = vrot.lane.b32.xlu1 %v13092_v48, %s14490_s5 }
0x17cc   : > { %3710 = vrot.lane.b32.xlu1 %v13078_v39, %s14490_s5 }
0x17d0   : > { %3708 = vrot.lane.b32.xlu1 %v13083_v40, %s14490_s5  ;;  %v3966_v40 = vpop.permute.xlu0 %3965 }
0x17d4   : > { %3706 = vrot.lane.b32.xlu1 %v13097_v49, %s14490_s5  ;;  %v3964_v41 = vpop.permute.xlu0 %3963  ;;  %v10597_v49 = vld [vmem:[%s14473_s20 + $0x1] ss:$0 sm:$0xff] }
0x1840   : > { %v3884_v32 = vpop.xlane.xlu1 %3883 }
0x1841   : > { %12289 = vrcp.f32 %v3884_v32  ;;  %v4313_v32 = vld [vmem:[%s12513_s25 + $0x8] sm:$0xff] }
0x1844   : > { %v3713_v33 = vpop.permute.xlu1 %3712 }
0x1845   : > { %11549 = vmatpush3.xpose.msk.msra.mxu0 %vm1441_vm2, %v3713_v33  ;;  %v4312_v33 = vld [vmem:[%s12513_s25] sm:$0xff] }
0x1846   : > { %11550 = vmatprep.subr.mxu0 %v12472_v1 }
0x1848   : > { %v3711_v34 = vpop.permute.xlu1 %3710 }
0x1849   : > { %11551 = vmatpush3.xpose.msk.msra.mxu0 %vm1441_vm2, %v3711_v34 }
0x184a   : > { %11552 = vmatprep.subr.mxu0 %v12472_v1 }
0x184c   : > { %v3709_v35 = vpop.permute.xlu1 %3708 }
0x184d   : > { %11553 = vmatpush3.xpose.msk.msra.mxu0 %vm1441_vm2, %v3709_v35 }
0x184e   : > { %v12290_v36 = vpop.eup %12289  ;;  %11554 = vmatprep.subr.mxu0 %v12472_v1 }
0x184f   : > { %v3886_v37 = vmul.f32 %v12290_v36, %v12288_v27  ;;  %v4315_v27 = vld [vmem:[%s12513_s25 + $0x18] sm:$0xff] }
0x1850   : > { %v3707_v39 = vpop.permute.xlu1 %3706 }
0x1851   : > { %11555 = vmatpush3.xpose.msk.msra.mxu0 %vm1441_vm2, %v3707_v39  ;;  %11567 = vmatmul.mubr.msk.f32.vlgmr.msra.gmra.mxu1 %vm1441_vm2, %v3886_v37 }
0x1852   : > { %11570 = vmatpush3.xpose.msk.msra.mxu1 %vm1441_vm2, %v3970_v30  ;;  %11577 = vmatprep.mubr.msk.f32.mxu1 %vm12473_vm1, %v12472_v1 }
0x1853   : > { %11571 = vmatprep.subr.mxu1 %v12472_v1  ;;  %11580 = vmatprep.subr.mxu0 %v12472_v1 }
0x1854   : > { %11557 = vmatmul.mubr.msk.f32.vlgmr.msra.gmra.mxu0 %vm1441_vm2, %v3702_v18  ;;  %v10541_v18 = vld [vmem:[%s14474_s4 + $0x20] sm:$0xff]  ;;  %s14496_s4 = sshll.u32 %s12730_s10, 3 }
0x1855   : > { %11596 = vmatprep.mubr.msk.f32.mxu0 %vm12473_vm1, %v12472_v1  ;;  %11581 = vmatpush3.xpose.msk.msra.mxu0 %vm1185_vm0, %v10539_v55  ;;  %s1132_s20 = scalar_lea.vmem %s14494_s13, %s14496_s4  ;;  %s14497_s13 = sld [smem:[#allocation8_spill]] }
0x1856   : > { %11572 = vmatpush3.xpose.msk.msra.mxu1 %vm1441_vm2, %v3968_v38  ;;  %11582 = vmatprep.subr.mxu0 %v12472_v1  ;;  %v13270_v23 = vld [vmem:[%s1132_s20] sm:$0xff]  ;;  %s14498_s4 = sld [smem:[#allocation11_spill]] }
0x1857   : > { %11573 = vmatprep.subr.mxu1 %v12472_v1 }
0x1859   : > { %11583 = vmatpush3.xpose.msk.msra.mxu0 %vm1185_vm0, %v10538_v56 }
0x185a   : > { %11574 = vmatpush3.xpose.msk.msra.mxu1 %vm1441_vm2, %v3966_v40  ;;  %11584 = vmatprep.subr.mxu0 %v12472_v1 }
0x185b   : > { %11575 = vmatprep.subr.mxu1 %v12472_v1  ;;  %s13338_s20 = scalar_lea.vmem %s14497_s13, %s12730_s10  ;;  %s14499_s10 = sld [smem:[#allocation13_spill]] }
0x185c   : > { %s14500_s13 = sld [smem:[#allocation10_spill]] }
0x185d   : > { %11585 = vmatpush3.xpose.msk.msra.mxu0 %vm1185_vm0, %v10537_v61 }
0x185e   : > { %11576 = vmatpush3.xpose.msk.msra.mxu1 %vm1441_vm2, %v3964_v41  ;;  %11586 = vmatprep.subr.mxu0 %v12472_v1 }
0x185f   : > { %11599 = vmatprep.subr.mxu1 %v12472_v1 }
0x1861   : > { %11587 = vmatpush3.xpose.msk.msra.mxu0 %vm1185_vm0, %v10536_v62 }
0x1862   : > { %11588 = vmatprep.subr.mxu0 %v12472_v1 }
0x1865   : > { %11589 = vmatpush3.xpose.msk.msra.mxu0 %vm1185_vm0, %v10535_v0 }
0x1866   : > { %11590 = vmatprep.subr.mxu0 %v12472_v1 }
0x1869   : > { %11591 = vmatpush3.xpose.msk.msra.mxu0 %vm1185_vm0, %v10534_v2 }
0x186a   : > { %11592 = vmatprep.subr.mxu0 %v12472_v1 }
0x186d   : > { %11593 = vmatpush3.xpose.msk.msra.mxu0 %vm1185_vm0, %v10533_v3 }
0x186e   : > { %11594 = vmatprep.subr.mxu0 %v12472_v1 }
0x1871   : > { %11595 = vmatpush3.xpose.msk.msra.mxu0 %vm1185_vm0, %v10532_v4 }
0x1872   : > { %11621 = vmatprep.subr.mxu0 %v12472_v1 }
0x1911   : > { %v3959_v42 = vpop.f32.mrf.mxu1 }
0x1912   : > { %11578 = vmatmul.mubr.msk.f32.vlgmr.msra.gmra.mxu1 %vm1441_vm2, %v3959_v42  ;;  %v4323_v42 = vld [vmem:[%s12513_s25 + $0x58] sm:$0xff] }
0x1913   : > { %v11568_v45 = vpop.f32.mrf.mxu1  ;;  %11607 = vmatprep.mubr.msk.f32.mxu1 %vm12473_vm1, %v12472_v1  ;;  %11600 = vmatpush3.xpose.msk.msra.mxu1 %vm2612_vm3, %v10544_v5 }
0x1914   : > { %v3791_v46 = vpop.f32.mrf.mxu0  ;;  %11601 = vmatprep.subr.mxu1 %v12472_v1  ;;  %v4321_v45 = vld [vmem:[%s12513_s25 + $0x48] sm:$0xff] }
0x1915   : > { %v3795_v47 = vadd.f32 %v3791_v46, %v3536_v44  ;;  %v4322_v44 = vld [vmem:[%s12513_s25 + $0x50] sm:$0xff]  ;;  %v4320_v46 = vld [vmem:[%s12513_s25 + $0x40] sm:$0xff] }
0x1916   : > { %v11558_v48 = vpop.f32.mrf.mxu0 }
0x1917   : > { %11602 = vmatpush3.xpose.msk.msra.mxu1 %vm2612_vm3, %v10543_v7 }
0x1918   : > { %11603 = vmatprep.subr.mxu1 %v12472_v1 }
0x191b   : > { %11604 = vmatpush3.xpose.msk.msra.mxu1 %vm2612_vm3, %v10542_v8 }
0x191c   : > { %11605 = vmatprep.subr.mxu1 %v12472_v1 }
0x191f   : > { %11606 = vmatpush3.xpose.msk.msra.mxu1 %vm2612_vm3, %v10541_v18 }
0x1920   : > { %11610 = vmatprep.subr.mxu1 %v12472_v1 }
0x19d2   : > { %v4048_v43 = vpop.f32.mrf.mxu1 }
0x19d3   : > { %v4052_v50 = vadd.f32 %v4048_v43, %v3795_v47  ;;  %v13341_v47 = vld [vmem:[%s13338_s20] ss:$0 sm:$0xff] }
0x19d4   : > { %v11579_v51 = vpop.f32.mrf.mxu1 }
0x19d5   : > { %v4059_v52 = vadd.f32 %v10597_v49, %v4052_v50 }
0x19d7   : > { %v4060_v53 = vadd.f32 %v4059_v52, %v13016_v63 }
0x19d9   : > { %v4061_v54 = vsel %vm1185_vm0, %v4060_v53, 0.0 }
0x19da   : > { %4062 = vadd.xlane.f32.xlu1 %v4061_v54 }
0x1a63   : > { %v4063_v57 = vpop.xlane.xlu1 %4062 }
0x1a64   : > { %v4064_v58 = vmul.f32 0.03125, %v4063_v57 }
0x1a66   : > { %v4065_v59 = vsub.f32 %v4060_v53, %v4064_v58 }
0x1a68   : > { %v4066_v63 = vmul.f32 %v4065_v59, %v4065_v59 }
0x1a6a   : > { %v4067_v60 = vsel %vm1185_vm0, %v4066_v63, 0.0 }
0x1a6b   : > { %4068 = vadd.xlane.f32.xlu0 %v4067_v60 }
0x1a81   : > { %4458 = vrot.lane.b32.xlu0 %v13278_v24, %s14491_s15 }
0x1af4   : > { %v4069_v9 = vpop.xlane.xlu0 %4068 }
0x1af5   : > { %v4070_v10 = vmul.f32 0.03125, %v4069_v9 }
0x1af7   : > { %v4071_v12 = vadd.f32 1e-05, %v4070_v10 }
0x1af8   : > { %v4459_v34 = vpop.permute.xlu0 %4458 }
0x1af9   : > { %12291 = vrsqrt.f32 %v4071_v12  ;;  %v13363_v12 = vld [vmem:[%s14498_s4 + $0x18] sm:$0xff] }
0x1b06   : > { %v12292_v13 = vpop.eup %12291 }
0x1b07   : > { %v4073_v15 = vmul.f32 %v12292_v13, %v4065_v59  ;;  %v13368_v13 = vld [vmem:[%s14498_s4 + $0x10] sm:$0xff] }
0x1b09   : > { %v4080_v16 = vmul.f32 %v10598_v14, %v4073_v15  ;;  %v13373_v14 = vld [vmem:[%s14498_s4] sm:$0xff] }
0x1b0b   : > { %v13247_v11 = vadd.f32 %v10599_v6, %v4080_v16 }
0x1b0d   : > { %11597 = vmatmul.mubr.msk.f32.vlgmr.msra.gmra.mxu0 %vm1185_vm0, %v13247_v11 }
0x1b0e   : > { %11629 = vmatprep.mubr.msk.f32.mxu0 %vm12473_vm1, %v12472_v1  ;;  %11622 = vmatpush3.xpose.msk.msra.mxu0 %vm1185_vm0, %v4319_v17 }
0x1b0f   : > { %11623 = vmatprep.subr.mxu0 %v12472_v1 }
0x1b12   : > { %11624 = vmatpush3.xpose.msk.msra.mxu0 %vm1185_vm0, %v4318_v19 }
0x1b13   : > { %11625 = vmatprep.subr.mxu0 %v12472_v1 }
0x1b16   : > { %11626 = vmatpush3.xpose.msk.msra.mxu0 %vm1185_vm0, %v4317_v20 }
0x1b17   : > { %11627 = vmatprep.subr.mxu0 %v12472_v1 }
0x1b1a   : > { %11628 = vmatpush3.xpose.msk.msra.mxu0 %vm1185_vm0, %v4316_v21  ;;  %v13387_v21 = vld [vmem:[%s14498_s4 + $0x8] sm:$0xff] }
0x1b1b   : > { %11643 = vmatprep.subr.mxu0 %v12472_v1 }
0x1b1d   : > { %11630 = vmatmul.mubr.msk.f32.vlgmr.msra.gmra.mxu0 %vm1185_vm0, %v13270_v23 }
0x1b1e   : > { %11645 = vmatprep.mubr.msk.f32.mxu0 %vm12473_vm1, %v12472_v1 }
0x1bcd   : > { %v4187_v26 = vpop.f32.mrf.mxu0 }
0x1bce   : > { %v4188_v22 = vadd.f32 %v10600_v25, %v4187_v26 }
0x1bcf   : > { %v11598_v28 = vpop.f32.mrf.mxu0 }
0x1bd0   : > { %v4191_v29 = vmax.f32 %v4188_v22, 0.0 }
0x1bd2   : > { %11608 = vmatmul.mubr.msk.f32.vlgmr.msra.gmra.mxu1 %vm2612_vm3, %v4191_v29 }
0x1bd3   : > { %11611 = vmatpush3.xpose.msk.msra.mxu1 %vm1185_vm0, %v4315_v27  ;;  %11618 = vmatprep.mubr.msk.f32.mxu1 %vm12473_vm1, %v12472_v1 }
0x1bd4   : > { %11612 = vmatprep.subr.mxu1 %v12472_v1 }
0x1bd7   : > { %11613 = vmatpush3.xpose.msk.msra.mxu1 %vm1185_vm0, %v4314_v31 }
0x1bd8   : > { %11614 = vmatprep.subr.mxu1 %v12472_v1 }
0x1bdb   : > { %11615 = vmatpush3.xpose.msk.msra.mxu1 %vm1185_vm0, %v4313_v32 }
0x1bdc   : > { %11616 = vmatprep.subr.mxu1 %v12472_v1 }
0x1bdd   : > { %v4539_v30 = vpop.f32.mrf.mxu0 }
0x1bde   : > { %v13302_v35 = vadd.f32 %v4539_v30, %v4459_v34 }
0x1bdf   : > { %11617 = vmatpush3.xpose.msk.msra.mxu1 %vm1185_vm0, %v4312_v33  ;;  %v11631_v36 = vpop.f32.mrf.mxu0 }
0x1be0   : > { %11632 = vmatprep.subr.mxu1 %v12472_v1  ;;  %4798 = vrot.lane.b32.xlu0 %v13302_v35, %s14489_s26 }
0x1be1   : > { %11644 = vmatpush3.xpose.msk.msra.mxu0 %vm1441_vm2, %v13302_v35 }
0x1be2   : > { %11619 = vmatmul.mubr.msk.f32.vlgmr.msra.gmra.mxu1 %vm1185_vm0, %v13270_v23  ;;  %11648 = vmatprep.subr.mxu0 %v12472_v1 }
0x1be3   : > { %11640 = vmatprep.mubr.msk.f32.mxu1 %vm12473_vm1, %v12472_v1  ;;  %11633 = vmatpush3.xpose.msk.msra.mxu1 %vm1185_vm0, %v4323_v42 }
0x1be4   : > { %11634 = vmatprep.subr.mxu1 %v12472_v1 }
0x1be7   : > { %11635 = vmatpush3.xpose.msk.msra.mxu1 %vm1185_vm0, %v4322_v44 }
0x1be8   : > { %11636 = vmatprep.subr.mxu1 %v12472_v1 }
0x1beb   : > { %11637 = vmatpush3.xpose.msk.msra.mxu1 %vm1185_vm0, %v4321_v45 }
0x1bec   : > { %11638 = vmatprep.subr.mxu1 %v12472_v1 }
0x1bef   : > { %11639 = vmatpush3.xpose.msk.msra.mxu1 %vm1185_vm0, %v4320_v46 }
0x1bf0   : > { %11658 = vmatprep.subr.mxu1 %v12472_v1 }
0x1bf2   : > { %11641 = vmatmul.mubr.msk.f32.vlgmr.msra.gmra.mxu1 %vm1185_vm0, %v13270_v23 }
0x1bf3   : > { %11660 = vmatprep.mubr.msk.f32.mxu1 %vm12473_vm1, %v12472_v1 }
0x1c52   : > { %v4799_v62 = vpop.permute.xlu0 %4798 }
0x1c92   : > { %v13309_v37 = vpop.f32.mrf.mxu1 }
0x1c94   : > { %v11609_v38 = vpop.f32.mrf.mxu1 }
0x1ca2   : > { %v4454_v39 = vpop.f32.mrf.mxu1 }
0x1ca3   : > { %v13312_v40 = vadd.f32 %v13278_v24, %v4454_v39 }
0x1ca4   : > { %v11620_v41 = vpop.f32.mrf.mxu1 }
0x1ca5   : > { %4796 = vrot.lane.b32.xlu0 %v13312_v40, %s14489_s26  ;;  %11646 = vmatmul.mubr.msk.f32.vlgmr.msra.gmra.mxu0 %vm1441_vm2, %v13312_v40 }
0x1ca6   : > { %11650 = vmatprep.mubr.msk.f32.mxu0 %vm12473_vm1, %v12472_v1 }
0x1cb2   : > { %v4624_v57 = vpop.f32.mrf.mxu1 }
0x1cb4   : > { %v11642_v58 = vpop.f32.mrf.mxu1 }
0x1d17   : > { %v4797_v2 = vpop.permute.xlu0 %4796 }
0x1d65   : > { %v4700_v48 = vpop.f32.mrf.mxu0 }
0x1d66   : > { %v4704_v49 = vmul.f32 0.35355338, %v4700_v48 }
0x1d67   : > { %v11647_v43 = vpop.f32.mrf.mxu0 }
0x1d68   : > { %v4711_v50 = vadd.f32 %v13341_v47, %v4704_v49 }
0x1d6a   : > { %v4712_v51 = vsel %vm1441_vm2, %v4711_v50, -inf }
0x1d6b   : > { %4713 = vmax.xlane.f32.xlu1 %v4712_v51 }
0x1df4   : > { %v4714_v52 = vpop.xlane.xlu1 %4713 }
0x1df5   : > { %v4715_v53 = vsub.f32 %v4711_v50, %v4714_v52 }
0x1df7   : > { %v4716_v54 = vmul.f32 1.442695, %v4715_v53 }
0x1df9   : > { %12293 = vpow2.f32 %v4716_v54 }
0x1e06   : > { %v12294_v55 = vpop.eup %12293 }
0x1e07   : > { %v4718_v56 = vsel %vm1441_vm2, %v12294_v55, 0.0 }
0x1e08   : > { %4719 = vadd.xlane.f32.xlu1 %v4718_v56 }
0x1e19   : > { %4543 = vrot.lane.b32.xlu1 %v13278_v24, %s14492_s12 }
0x1e91   : > { %v4720_v59 = vpop.xlane.xlu1 %4719 }
0x1e92   : > { %12295 = vrcp.f32 %v4720_v59 }
0x1e95   : > { %v4544_v63 = vpop.permute.xlu1 %4543 }
0x1e96   : > { %v13348_v60 = vadd.f32 %v4624_v57, %v4544_v63 }
0x1e98   : > { %11649 = vmatpush3.msra.mxu0 %v13348_v60 }
0x1e99   : > { %11653 = vmatprep.subr.mxu0 %v12472_v1 }
0x1e9f   : > { %v12296_v61 = vpop.eup %12295 }
0x1ea0   : > { %v4722_v0 = vmul.f32 %v12296_v61, %v12294_v55 }
0x1ea2   : > { %11651 = vmatmul.mubr.msk.f32.vlgmr.msra.gmra.mxu0 %vm1441_vm2, %v4722_v0 }
0x1ea3   : > { %11654 = vmatpush3.xpose.msk.msra.mxu0 %vm1441_vm2, %v4799_v62  ;;  %11655 = vmatprep.mubr.msk.f32.mxu0 %vm12473_vm1, %v12472_v1 }
0x1ea4   : > { %11663 = vmatprep.subr.mxu0 %v12472_v1 }
0x1ea6   : > { %11656 = vmatmul.mubr.msk.f32.vlgmr.msra.gmra.mxu0 %vm1441_vm2, %v4797_v2 }
0x1ea7   : > { %11671 = vmatprep.mubr.msk.f32.mxu0 %vm12473_vm1, %v12472_v1 }
0x1f62   : > { %v4792_v3 = vpop.f32.mrf.mxu0 }
0x1f64   : > { %v11652_v4 = vpop.f32.mrf.mxu0 }
0x1f66   : > { %v4870_v5 = vpop.f32.mrf.mxu0 }
0x1f67   : > { %v4874_v7 = vmul.f32 0.35355338, %v4870_v5  ;;  %v10610_v5 = vld [vmem:[%s14468_s27 + $0x1] ss:$0 sm:$0xff]  ;;  %s14505_s27 = sld [smem:[#allocation14_spill]] }
0x1f68   : > { %v11657_v8 = vpop.f32.mrf.mxu0 }
0x1f69   : > { %v4875_v9 = vadd.f32 %v13341_v47, %v4874_v7  ;;  %v4280_v7 = vadd.f32 %v10610_v5, %v13309_v37 }
0x1f6b   : > { %v4876_v10 = vsel %vm1441_vm2, %v4875_v9, -inf  ;;  %v4283_v8 = vadd.f32 %v4280_v7, %v13247_v11 }
0x1f6c   : > { %4877 = vmax.xlane.f32.xlu1 %v4876_v10 }
0x1f7d   : > { %4974 = vrot.lane.b32.xlu1 %v13363_v12, %s14489_s26 }
0x1f81   : > { %4972 = vrot.lane.b32.xlu1 %v13368_v13, %s14489_s26 }
0x1f85   : > { %4968 = vrot.lane.b32.xlu1 %v13373_v14, %s14489_s26 }
0x1f89   : > { %5138 = vrot.lane.b32.xlu1 %v13312_v40, %s14490_s5 }
0x1ff5   : > { %v4878_v15 = vpop.xlane.xlu1 %4877 }
0x1ff6   : > { %v4879_v6 = vsub.f32 %v4875_v9, %v4878_v15  ;;  %v4284_v9 = vsel %vm1185_vm0, %v4283_v8, 0.0 }
0x1ff8   : > { %v4880_v16 = vmul.f32 1.442695, %v4879_v6 }
0x1ff9   : > { %v4975_v17 = vpop.permute.xlu1 %4974 }
0x1ffa   : > { %12297 = vpow2.f32 %v4880_v16  ;;  %11664 = vmatpush3.xpose.msk.msra.mxu0 %vm1441_vm2, %v4975_v17 }
0x1ffb   : > { %11665 = vmatprep.subr.mxu0 %v12472_v1 }
0x1ffd   : > { %v4973_v18 = vpop.permute.xlu1 %4972 }
0x1ffe   : > { %11666 = vmatpush3.xpose.msk.msra.mxu0 %vm1441_vm2, %v4973_v18 }
0x1fff   : > { %11667 = vmatprep.subr.mxu0 %v12472_v1 }
0x2001   : > { %v4969_v22 = vpop.permute.xlu1 %4968 }
0x2005   : > { %v5139_v33 = vpop.permute.xlu1 %5138 }
0x2007   : > { %v12298_v19 = vpop.eup %12297 }
0x2008   : > { %v4882_v20 = vsel %vm1441_vm2, %v12298_v19, 0.0 }
0x2009   : > { %4883 = vadd.xlane.f32.xlu0 %v4882_v20 }
0x201f   : > { %4888 = vrot.lane.b32.xlu0 %v13348_v60, %s14489_s26 }
0x2023   : > { %4970 = vrot.lane.b32.xlu0 %v13387_v21, %s14489_s26 }
0x2027   : > { %5140 = vrot.lane.b32.xlu0 %v13302_v35, %s14490_s5 }
0x2092   : > { %v4884_v24 = vpop.xlane.xlu0 %4883 }
0x2093   : > { %12299 = vrcp.f32 %v4884_v24 }
0x2096   : > { %v4889_v25 = vpop.permute.xlu0 %4888 }
0x2097   : > { %11659 = vmatpush3.msra.mxu1 %v4889_v25  ;;  %v4337_v25 = vld [vmem:[%s14499_s10 + $0x38] sm:$0xff] }
0x2098   : > { %11674 = vmatprep.subr.mxu1 %v12472_v1 }
0x209a   : > { %v4971_v26 = vpop.permute.xlu0 %4970 }
0x209b   : > { %11668 = vmatpush3.xpose.msk.msra.mxu0 %vm1441_vm2, %v4971_v26 }
0x209c   : > { %11669 = vmatprep.subr.mxu0 %v12472_v1 }
0x209e   : > { %v5141_v31 = vpop.permute.xlu0 %5140 }
0x209f   : > { %11670 = vmatpush3.xpose.msk.msra.mxu0 %vm1441_vm2, %v4969_v22 }
0x20a0   : > { %v12300_v28 = vpop.eup %12299  ;;  %11685 = vmatprep.subr.mxu0 %v12472_v1 }
0x20a1   : > { %v4886_v29 = vmul.f32 %v12300_v28, %v12298_v19 }
0x20a3   : > { %11661 = vmatmul.mubr.msk.f32.vlgmr.msra.gmra.mxu1 %vm1441_vm2, %v4886_v29 }
0x20a4   : > { %11675 = vmatpush3.xpose.msk.msra.mxu1 %vm1441_vm2, %v13363_v12  ;;  %11682 = vmatprep.mubr.msk.f32.mxu1 %vm12473_vm1, %v12472_v1 }
0x20a5   : > { %11676 = vmatprep.subr.mxu1 %v12472_v1 }
0x20a8   : > { %11677 = vmatpush3.xpose.msk.msra.mxu1 %vm1441_vm2, %v13368_v13 }
0x20a9   : > { %11678 = vmatprep.subr.mxu1 %v12472_v1 }
0x20ac   : > { %11679 = vmatpush3.xpose.msk.msra.mxu1 %vm1441_vm2, %v13387_v21 }
0x20ad   : > { %11680 = vmatprep.subr.mxu1 %v12472_v1 }
0x20b0   : > { %11681 = vmatpush3.xpose.msk.msra.mxu1 %vm1441_vm2, %v13373_v14 }
0x20b1   : > { %11690 = vmatprep.subr.mxu1 %v12472_v1 }
0x20b3   : > { %11683 = vmatmul.mubr.msk.f32.vlgmr.msra.gmra.mxu1 %vm1441_vm2, %v4792_v3 }
0x20b4   : > { %11692 = vmatprep.mubr.msk.f32.mxu1 %vm12473_vm1, %v12472_v1 }
0x2163   : > { %v4960_v27 = vpop.f32.mrf.mxu1 }
0x2164   : > { %11672 = vmatmul.mubr.msk.f32.vlgmr.msra.gmra.mxu0 %vm1441_vm2, %v4960_v27 }
0x2165   : > { %11686 = vmatpush3.xpose.msk.msra.mxu0 %vm1441_vm2, %v5141_v31  ;;  %v11662_v32 = vpop.f32.mrf.mxu1  ;;  %11687 = vmatprep.mubr.msk.f32.mxu0 %vm12473_vm1, %v12472_v1 }
0x2166   : > { %11695 = vmatprep.subr.mxu0 %v12472_v1  ;;  %v4336_v32 = vld [vmem:[%s14499_s10 + $0x30] sm:$0xff] }
0x2168   : > { %11688 = vmatmul.mubr.msk.f32.vlgmr.msra.gmra.mxu0 %vm1441_vm2, %v5139_v33 }
0x2169   : > { %11703 = vmatprep.mubr.msk.f32.mxu0 %vm12473_vm1, %v12472_v1 }
0x2173   : > { %v13424_v34 = vpop.f32.mrf.mxu1 }
0x2175   : > { %v11684_v30 = vpop.f32.mrf.mxu1 }
0x2224   : > { %v13426_v36 = vpop.f32.mrf.mxu0 }
0x2225   : > { %v5135_v28 = vadd.f32 %v13424_v34, %v13426_v36  ;;  %v4335_v34 = vld [vmem:[%s14499_s10 + $0x28] sm:$0xff]  ;;  %v4334_v36 = vld [vmem:[%s14499_s10 + $0x20] sm:$0xff] }
0x2226   : > { %v11673_v38 = vpop.f32.mrf.mxu0 }
0x2228   : > { %v5212_v39 = vpop.f32.mrf.mxu0 }
0x2229   : > { %v5216_v41 = vmul.f32 0.35355338, %v5212_v39 }
0x222a   : > { %v11689_v42 = vpop.f32.mrf.mxu0 }
0x222b   : > { %v5217_v44 = vadd.f32 %v13341_v47, %v5216_v41  ;;  %v10616_v41 = vld [vmem:[%s14471_s3 + $0x1] ss:$0 sm:$0xff]  ;;  %s14502_s3 = sld [smem:[#allocation21_spill]] }
0x222d   : > { %v5218_v45 = vsel %vm1441_vm2, %v5217_v44, -inf }
0x222e   : > { %5219 = vmax.xlane.f32.xlu0 %v5218_v45 }
0x2231   : > { %v10668_v7 = vld [vmem:[%s14502_s3] ss:$0 sm:$0xff] }
0x2244   : > { %5229 = vrot.lane.b32.xlu0 %v13348_v60, %s14490_s5 }
0x2248   : > { %5395 = vrot.lane.b32.xlu0 %v13312_v40, %s14493_s6 }
0x22b7   : > { %v5220_v46 = vpop.xlane.xlu0 %5219 }
0x22b8   : > { %v5221_v48 = vsub.f32 %v5217_v44, %v5220_v46  ;;  %v10617_v44 = vld [vmem:[%s14470_s14 + $0x1] ss:$0 sm:$0xff]  ;;  %s14503_s14 = sld [smem:[#allocation20_spill]] }
0x22ba   : > { %v5222_v49 = vmul.f32 1.442695, %v5221_v48  ;;  %v10667_v48 = vld [vmem:[%s14500_s13] ss:$0 sm:$0xff] }
0x22bb   : > { %v5230_v43 = vpop.permute.xlu0 %5229 }
0x22bc   : > { %12301 = vpow2.f32 %v5222_v49  ;;  %11691 = vmatpush3.msra.mxu1 %v5230_v43 }
0x22bd   : > { %11706 = vmatprep.subr.mxu1 %v12472_v1 }
0x22bf   : > { %v5396_v55 = vpop.permute.xlu0 %5395 }
0x22c9   : > { %v12302_v50 = vpop.eup %12301 }
0x22ca   : > { %v5224_v51 = vsel %vm1441_vm2, %v12302_v50, 0.0 }
0x22cb   : > { %5225 = vadd.xlane.f32.xlu1 %v5224_v51 }
0x22dc   : > { %5397 = vrot.lane.b32.xlu1 %v13302_v35, %s14493_s6 }
0x2354   : > { %v5226_v52 = vpop.xlane.xlu1 %5225 }
0x2355   : > { %12303 = vrcp.f32 %v5226_v52 }
0x2358   : > { %v5398_v40 = vpop.permute.xlu1 %5397 }
0x2362   : > { %v12304_v53 = vpop.eup %12303 }
0x2363   : > { %v5228_v54 = vmul.f32 %v12304_v53, %v12302_v50 }
0x2365   : > { %11693 = vmatmul.mubr.msk.f32.vlgmr.msra.gmra.mxu1 %vm1441_vm2, %v5228_v54  ;;  %v13524_v54 = vld [vmem:[%s14501_s19] ss:$0 sm:$0xff] }
0x2366   : > { %11707 = vmatpush3.xpose.msk.msra.mxu1 %vm1441_vm2, %v5398_v40  ;;  %11708 = vmatprep.mubr.msk.f32.mxu1 %vm12473_vm1, %v12472_v1 }
0x2367   : > { %11711 = vmatprep.subr.mxu1 %v12472_v1 }
0x2369   : > { %11709 = vmatmul.mubr.msk.f32.vlgmr.msra.gmra.mxu1 %vm1441_vm2, %v5396_v55 }
0x236a   : > { %11713 = vmatprep.mubr.msk.f32.mxu1 %vm12473_vm1, %v12472_v1 }
0x2425   : > { %v5301_v35 = vpop.f32.mrf.mxu1 }
0x2427   : > { %v11694_v56 = vpop.f32.mrf.mxu1 }
0x2429   : > { %v5469_v57 = vpop.f32.mrf.mxu1 }
0x242a   : > { %v5473_v58 = vmul.f32 0.35355338, %v5469_v57 }
0x242b   : > { %v11710_v59 = vpop.f32.mrf.mxu1 }
0x242c   : > { %v5474_v63 = vadd.f32 %v13341_v47, %v5473_v58 }
0x242e   : > { %v5475_v61 = vsel %vm1441_vm2, %v5474_v63, -inf }
0x242f   : > { %5476 = vmax.xlane.f32.xlu1 %v5475_v61  ;;  %v4333_v61 = vld [vmem:[%s14499_s10 + $0x18] sm:$0xff] }
0x2440   : > { %5311 = vrot.lane.b32.xlu1 %v13363_v12, %s14490_s5 }
0x2444   : > { %5568 = vrot.lane.b32.xlu1 %v13363_v12, %s14493_s6 }
0x2448   : > { %5566 = vrot.lane.b32.xlu1 %v13368_v13, %s14493_s6 }
0x244c   : > { %5564 = vrot.lane.b32.xlu1 %v13387_v21, %s14493_s6 }
0x2450   : > { %5562 = vrot.lane.b32.xlu1 %v13373_v14, %s14493_s6 }
0x24b8   : > { %v5477_v47 = vpop.xlane.xlu1 %5476 }
0x24b9   : > { %v5478_v62 = vsub.f32 %v5474_v63, %v5477_v47  ;;  %v4332_v47 = vld [vmem:[%s14499_s10 + $0x10] sm:$0xff] }
0x24bb   : > { %v5479_v0 = vmul.f32 1.442695, %v5478_v62  ;;  %v4331_v62 = vld [vmem:[%s14499_s10 + $0x8] sm:$0xff] }
0x24bc   : > { %v5312_v4 = vpop.permute.xlu1 %5311 }
0x24bd   : > { %12305 = vpow2.f32 %v5479_v0  ;;  %11696 = vmatpush3.xpose.msk.msra.mxu0 %vm1441_vm2, %v5312_v4  ;;  %v4330_v0 = vld [vmem:[%s14499_s10] sm:$0xff] }
0x24be   : > { %11697 = vmatprep.subr.mxu0 %v12472_v1 }
0x24ca   : > { %v12306_v2 = vpop.eup %12305 }
0x24cb   : > { %v5481_v3 = vsel %vm1441_vm2, %v12306_v2, 0.0 }
0x24cc   : > { %5482 = vadd.xlane.f32.xlu0 %v5481_v3 }
0x24e2   : > { %5486 = vrot.lane.b32.xlu0 %v13348_v60, %s14493_s6 }
0x24e6   : > { %5309 = vrot.lane.b32.xlu0 %v13368_v13, %s14490_s5  ;;  %v5569_v13 = vpop.permute.xlu1 %5568 }
0x24ea   : > { %5307 = vrot.lane.b32.xlu0 %v13387_v21, %s14490_s5  ;;  %v5567_v15 = vpop.permute.xlu1 %5566 }
0x24ee   : > { %5305 = vrot.lane.b32.xlu0 %v13373_v14, %s14490_s5  ;;  %v5565_v16 = vpop.permute.xlu1 %5564 }
0x24f2   : > { %v5563_v17 = vpop.permute.xlu1 %5562 }
0x250d   : > { %4285 = vadd.xlane.f32.xlu0 %v4284_v9  ;;  %v10669_v9 = vld [vmem:[%s14503_s14] ss:$0 sm:$0xff] }
0x2555   : > { %v5483_v10 = vpop.xlane.xlu0 %5482 }
0x2556   : > { %12307 = vrcp.f32 %v5483_v10 }
0x2559   : > { %v5487_v60 = vpop.permute.xlu0 %5486 }
0x255a   : > { %11712 = vmatpush3.msra.mxu1 %v5487_v60 }
0x255b   : > { %11716 = vmatprep.subr.mxu1 %v12472_v1 }
0x255d   : > { %v5310_v12 = vpop.permute.xlu0 %5309 }
0x255e   : > { %11698 = vmatpush3.xpose.msk.msra.mxu0 %vm1441_vm2, %v5310_v12  ;;  %v4341_v12 = vld [vmem:[%s14499_s10 + $0x58] sm:$0xff] }
0x255f   : > { %11699 = vmatprep.subr.mxu0 %v12472_v1 }
0x2561   : > { %v5308_v14 = vpop.permute.xlu0 %5307 }
0x2562   : > { %11700 = vmatpush3.xpose.msk.msra.mxu0 %vm1441_vm2, %v5308_v14  ;;  %v4339_v14 = vld [vmem:[%s14499_s10 + $0x48] sm:$0xff] }
0x2563   : > { %v12308_v37 = vpop.eup %12307  ;;  %11701 = vmatprep.subr.mxu0 %v12472_v1 }
0x2564   : > { %v5485_v11 = vmul.f32 %v12308_v37, %v12306_v2  ;;  %v4338_v37 = vld [vmem:[%s14499_s10 + $0x40] sm:$0xff] }
0x2565   : > { %v5306_v6 = vpop.permute.xlu0 %5305 }
0x2566   : > { %11702 = vmatpush3.xpose.msk.msra.mxu0 %vm1441_vm2, %v5306_v6  ;;  %11714 = vmatmul.mubr.msk.f32.vlgmr.msra.gmra.mxu1 %vm1441_vm2, %v5485_v11 }
0x2567   : > { %11717 = vmatpush3.xpose.msk.msra.mxu1 %vm1441_vm2, %v5569_v13  ;;  %11724 = vmatprep.mubr.msk.f32.mxu1 %vm12473_vm1, %v12472_v1  ;;  %v4340_v13 = vld [vmem:[%s14499_s10 + $0x50] sm:$0xff] }
0x2568   : > { %11718 = vmatprep.subr.mxu1 %v12472_v1  ;;  %11727 = vmatprep.subr.mxu0 %v12472_v1 }
0x2569   : > { %11704 = vmatmul.mubr.msk.f32.vlgmr.msra.gmra.mxu0 %vm1441_vm2, %v5301_v35 }
0x256a   : > { %11735 = vmatprep.mubr.msk.f32.mxu0 %vm12473_vm1, %v12472_v1  ;;  %11728 = vmatpush3.xpose.msk.msra.mxu0 %vm1185_vm0, %v4333_v61 }
0x256b   : > { %11719 = vmatpush3.xpose.msk.msra.mxu1 %vm1441_vm2, %v5567_v15  ;;  %11729 = vmatprep.subr.mxu0 %v12472_v1 }
0x256c   : > { %11720 = vmatprep.subr.mxu1 %v12472_v1 }
0x256e   : > { %11730 = vmatpush3.xpose.msk.msra.mxu0 %vm1185_vm0, %v4332_v47 }
0x256f   : > { %11721 = vmatpush3.xpose.msk.msra.mxu1 %vm1441_vm2, %v5565_v16  ;;  %11731 = vmatprep.subr.mxu0 %v12472_v1 }
0x2570   : > { %11722 = vmatprep.subr.mxu1 %v12472_v1 }
0x2572   : > { %11732 = vmatpush3.xpose.msk.msra.mxu0 %vm1185_vm0, %v4331_v62 }
0x2573   : > { %11723 = vmatpush3.xpose.msk.msra.mxu1 %vm1441_vm2, %v5563_v17  ;;  %11733 = vmatprep.subr.mxu0 %v12472_v1 }
0x2574   : > { %11738 = vmatprep.subr.mxu1 %v12472_v1 }
0x2576   : > { %11734 = vmatpush3.xpose.msk.msra.mxu0 %vm1185_vm0, %v4330_v0 }
0x2577   : > { %11749 = vmatprep.subr.mxu0 %v12472_v1 }
0x2596   : > { %v4286_v18 = vpop.xlane.xlu0 %4285 }
0x2597   : > { %v4287_v19 = vmul.f32 0.03125, %v4286_v18 }
0x2599   : > { %v4288_v20 = vsub.f32 %v4283_v8, %v4287_v19 }
0x259b   : > { %v4289_v21 = vmul.f32 %v4288_v20, %v4288_v20 }
0x259d   : > { %v4290_v24 = vsel %vm1185_vm0, %v4289_v21, 0.0 }
0x259e   : > { %4291 = vadd.xlane.f32.xlu0 %v4290_v24 }
0x2626   : > { %v5558_v26 = vpop.f32.mrf.mxu1 }
0x2627   : > { %v4292_v22 = vpop.xlane.xlu0 %4291  ;;  %11725 = vmatmul.mubr.msk.f32.vlgmr.msra.gmra.mxu1 %vm1441_vm2, %v5558_v26 }
0x2628   : > { %v4293_v29 = vmul.f32 0.03125, %v4292_v22  ;;  %v11715_v27 = vpop.f32.mrf.mxu1  ;;  %11739 = vmatpush3.xpose.msk.msra.mxu1 %vm1185_vm0, %v4337_v25  ;;  %11746 = vmatprep.mubr.msk.f32.mxu1 %vm12473_vm1, %v12472_v1  ;;  %v13587_v25 = vld [vmem:[%s12800_s16] ss:$0 sm:$0xff] }
0x2629   : > { %v5390_v31 = vpop.f32.mrf.mxu0  ;;  %11740 = vmatprep.subr.mxu1 %v12472_v1 }
0x262a   : > { %v4294_v33 = vadd.f32 1e-05, %v4293_v29  ;;  %v5394_v30 = vadd.f32 %v5390_v31, %v5135_v28 }
0x262b   : > { %v11705_v38 = vpop.f32.mrf.mxu0 }
0x262c   : > { %12309 = vrsqrt.f32 %v4294_v33  ;;  %11741 = vmatpush3.xpose.msk.msra.mxu1 %vm1185_vm0, %v4336_v32  ;;  %v13596_v38 = vld [vmem:[%s14504_s24 + $0x18] sm:$0xff] }
0x262d   : > { %11742 = vmatprep.subr.mxu1 %v12472_v1 }
0x2630   : > { %11743 = vmatpush3.xpose.msk.msra.mxu1 %vm1185_vm0, %v4335_v34 }
0x2631   : > { %11744 = vmatprep.subr.mxu1 %v12472_v1 }
0x2634   : > { %11745 = vmatpush3.xpose.msk.msra.mxu1 %vm1185_vm0, %v4334_v36  ;;  %v13601_v36 = vld [vmem:[%s14504_s24 + $0x10] sm:$0xff] }
0x2635   : > { %11760 = vmatprep.subr.mxu1 %v12472_v1 }
0x2639   : > { %v12310_v39 = vpop.eup %12309 }
0x263a   : > { %v4296_v42 = vmul.f32 %v12310_v39, %v4288_v20  ;;  %v13606_v39 = vld [vmem:[%s14504_s24] sm:$0xff] }
0x263c   : > { %v4303_v45 = vmul.f32 %v10616_v41, %v4296_v42 }
0x263e   : > { %v13514_v46 = vadd.f32 %v10617_v44, %v4303_v45 }
0x2640   : > { %11747 = vmatmul.mubr.msk.f32.vlgmr.msra.gmra.mxu1 %vm1185_vm0, %v13514_v46 }
0x2641   : > { %11762 = vmatprep.mubr.msk.f32.mxu1 %vm12473_vm1, %v12472_v1 }
0x26e7   : > { %v5647_v49 = vpop.f32.mrf.mxu1 }
0x26e8   : > { %v5651_v43 = vadd.f32 %v5647_v49, %v5394_v30 }
0x26e9   : > { %v11726_v50 = vpop.f32.mrf.mxu1 }
0x26ea   : > { %v5658_v51 = vadd.f32 %v10667_v48, %v5651_v43 }
0x26ec   : > { %v5659_v52 = vadd.f32 %v5658_v51, %v13270_v23 }
0x26ee   : > { %v5660_v53 = vsel %vm1185_vm0, %v5659_v52, 0.0 }
0x26ef   : > { %5661 = vadd.xlane.f32.xlu1 %v5660_v53 }
0x2700   : > { %v5862_v40 = vpop.f32.mrf.mxu1  ;;  %5778 = vrot.lane.b32.xlu1 %v13524_v54, %s14491_s15 }
0x2702   : > { %v11748_v55 = vpop.f32.mrf.mxu1 }
0x2778   : > { %v5662_v35 = vpop.xlane.xlu1 %5661 }
0x2779   : > { %v5663_v56 = vmul.f32 0.03125, %v5662_v35 }
0x277b   : > { %v5664_v57 = vsub.f32 %v5659_v52, %v5663_v56 }
0x277c   : > { %v5779_v58 = vpop.permute.xlu1 %5778 }
0x277d   : > { %v13528_v59 = vadd.f32 %v5862_v40, %v5779_v58  ;;  %v5665_v23 = vmul.f32 %v5664_v57, %v5664_v57 }
0x277f   : > { %11761 = vmatpush3.xpose.msk.msra.mxu1 %vm1441_vm2, %v13528_v59  ;;  %v5666_v63 = vsel %vm1185_vm0, %v5665_v23, 0.0 }
0x2780   : > { %5667 = vadd.xlane.f32.xlu0 %v5666_v63  ;;  %11765 = vmatprep.subr.mxu1 %v12472_v1 }
0x2796   : > { %6115 = vrot.lane.b32.xlu0 %v13528_v59, %s14489_s26 }
0x2809   : > { %v5668_v2 = vpop.xlane.xlu0 %5667 }
0x280a   : > { %v5669_v3 = vmul.f32 0.03125, %v5668_v2 }
0x280c   : > { %v5670_v4 = vadd.f32 1e-05, %v5669_v3 }
0x280d   : > { %v6116_v11 = vpop.permute.xlu0 %6115 }
0x280e   : > { %12311 = vrsqrt.f32 %v5670_v4 }
0x281b   : > { %v12312_v5 = vpop.eup %12311 }
0x281c   : > { %v5672_v8 = vmul.f32 %v12312_v5, %v5664_v57 }
0x281e   : > { %v5679_v10 = vmul.f32 %v10668_v7, %v5672_v8 }
0x2820   : > { %v13550_v60 = vadd.f32 %v10669_v9, %v5679_v10 }
0x2822   : > { %11736 = vmatmul.mubr.msk.f32.vlgmr.msra.gmra.mxu0 %vm1185_vm0, %v13550_v60 }
0x2823   : > { %11750 = vmatpush3.xpose.msk.msra.mxu0 %vm1185_vm0, %v4341_v12  ;;  %11757 = vmatprep.mubr.msk.f32.mxu0 %vm12473_vm1, %v12472_v1 }
0x2824   : > { %11751 = vmatprep.subr.mxu0 %v12472_v1 }
0x2827   : > { %11752 = vmatpush3.xpose.msk.msra.mxu0 %vm1185_vm0, %v4340_v13 }
0x2828   : > { %11753 = vmatprep.subr.mxu0 %v12472_v1 }
0x282b   : > { %11754 = vmatpush3.xpose.msk.msra.mxu0 %vm1185_vm0, %v4339_v14 }
0x282c   : > { %11755 = vmatprep.subr.mxu0 %v12472_v1 }
0x282f   : > { %11756 = vmatpush3.xpose.msk.msra.mxu0 %vm1185_vm0, %v4338_v37 }
0x2830   : > { %11770 = vmatprep.subr.mxu0 %v12472_v1 }
0x2832   : > { %11758 = vmatmul.mubr.msk.f32.vlgmr.msra.gmra.mxu0 %vm1185_vm0, %v13514_v46 }
0x2833   : > { %11771 = vmatpush3.xpose.msk.msra.mxu0 %vm1441_vm2, %v6116_v11  ;;  %11772 = vmatprep.mubr.msk.f32.mxu0 %vm12473_vm1, %v12472_v1 }
0x2834   : > { %11780 = vmatprep.subr.mxu0 %v12472_v1 }
0x28e2   : > { %v5774_v15 = vpop.f32.mrf.mxu0 }
0x28e3   : > { %v13575_v6 = vadd.f32 %v13524_v54, %v5774_v15 }
0x28e4   : > { %v11737_v16 = vpop.f32.mrf.mxu0 }
0x28e5   : > { %6113 = vrot.lane.b32.xlu1 %v13575_v6, %s14489_s26  ;;  %11763 = vmatmul.mubr.msk.f32.vlgmr.msra.gmra.mxu1 %vm1441_vm2, %v13575_v6 }
0x28e6   : > { %11767 = vmatprep.mubr.msk.f32.mxu1 %vm12473_vm1, %v12472_v1 }
0x28f2   : > { %v5947_v17 = vpop.f32.mrf.mxu0 }
0x28f4   : > { %v11759_v18 = vpop.f32.mrf.mxu0 }
0x2957   : > { %v6114_v19 = vpop.permute.xlu1 %6113 }
0x2958   : > { %11773 = vmatmul.mubr.msk.f32.vlgmr.msra.gmra.mxu0 %vm1441_vm2, %v6114_v19 }
0x2959   : > { %11788 = vmatprep.mubr.msk.f32.mxu0 %vm12473_vm1, %v12472_v1 }
0x29a5   : > { %v6023_v20 = vpop.f32.mrf.mxu1 }
0x29a6   : > { %v6027_v21 = vmul.f32 0.35355338, %v6023_v20 }
0x29a7   : > { %v11764_v24 = vpop.f32.mrf.mxu1 }
0x29a8   : > { %v6028_v26 = vadd.f32 %v13587_v25, %v6027_v21 }
0x29aa   : > { %v6029_v22 = vsel %vm1441_vm2, %v6028_v26, -inf }
0x29ab   : > { %6030 = vmax.xlane.f32.xlu1 %v6029_v22 }
0x2a18   : > { %v6187_v28 = vpop.f32.mrf.mxu0 }
0x2a19   : > { %v6191_v29 = vmul.f32 0.35355338, %v6187_v28 }
0x2a1a   : > { %v11774_v27 = vpop.f32.mrf.mxu0 }
0x2a1b   : > { %v6192_v31 = vadd.f32 %v13587_v25, %v6191_v29 }
0x2a1d   : > { %v6193_v32 = vsel %vm1441_vm2, %v6192_v31, -inf }
0x2a1e   : > { %6194 = vmax.xlane.f32.xlu0 %v6193_v32 }
0x2a34   : > { %v6031_v33 = vpop.xlane.xlu1 %6030  ;;  %5866 = vrot.lane.b32.xlu0 %v13524_v54, %s14492_s12  ;;  %v13625_v54 = vld [vmem:[%s14504_s24 + $0x8] sm:$0xff] }
0x2a35   : > { %v6032_v30 = vsub.f32 %v6028_v26, %v6031_v33 }
0x2a37   : > { %v6033_v34 = vmul.f32 1.442695, %v6032_v30 }
0x2a38   : > { %6291 = vrot.lane.b32.xlu0 %v13596_v38, %s14489_s26 }
0x2a39   : > { %12313 = vpow2.f32 %v6033_v34 }
0x2a3c   : > { %6289 = vrot.lane.b32.xlu0 %v13601_v36, %s14489_s26 }
0x2a40   : > { %6285 = vrot.lane.b32.xlu0 %v13606_v39, %s14489_s26 }
0x2a44   : > { %6455 = vrot.lane.b32.xlu0 %v13575_v6, %s14490_s5 }
0x2a46   : > { %v12314_v41 = vpop.eup %12313 }
0x2a47   : > { %v6035_v42 = vsel %vm1441_vm2, %v12314_v41, 0.0 }
0x2a48   : > { %6036 = vadd.xlane.f32.xlu1 %v6035_v42 }
0x2aa7   : > { %v6195_v44 = vpop.xlane.xlu0 %6194 }
0x2aa8   : > { %v6196_v45 = vsub.f32 %v6192_v31, %v6195_v44 }
0x2aaa   : > { %v6197_v48 = vmul.f32 1.442695, %v6196_v45 }
0x2aab   : > { %v5867_v49 = vpop.permute.xlu0 %5866 }
0x2aac   : > { %12315 = vpow2.f32 %v6197_v48  ;;  %v13613_v43 = vadd.f32 %v5947_v17, %v5867_v49 }
0x2aae   : > { %11766 = vmatpush3.msra.mxu1 %v13613_v43 }
0x2aaf   : > { %v6292_v50 = vpop.permute.xlu0 %6291  ;;  %11775 = vmatprep.subr.mxu1 %v12472_v1 }
0x2ab0   : > { %11781 = vmatpush3.xpose.msk.msra.mxu0 %vm1441_vm2, %v6292_v50 }
0x2ab1   : > { %11782 = vmatprep.subr.mxu0 %v12472_v1 }
0x2ab3   : > { %v6290_v51 = vpop.permute.xlu0 %6289 }
0x2ab4   : > { %11783 = vmatpush3.xpose.msk.msra.mxu0 %vm1441_vm2, %v6290_v51 }
0x2ab5   : > { %11784 = vmatprep.subr.mxu0 %v12472_v1 }
0x2ab7   : > { %v6286_v23 = vpop.permute.xlu0 %6285 }
0x2ab9   : > { %v12316_v52 = vpop.eup %12315 }
0x2aba   : > { %v6199_v53 = vsel %vm1441_vm2, %v12316_v52, 0.0 }
0x2abb   : > { %6200 = vadd.xlane.f32.xlu1 %v6199_v53  ;;  %v6456_v4 = vpop.permute.xlu0 %6455 }
0x2acc   : > { %6205 = vrot.lane.b32.xlu1 %v13613_v43, %s14489_s26 }
0x2ad0   : > { %6287 = vrot.lane.b32.xlu1 %v13625_v54, %s14489_s26 }
0x2ad1   : > { %v6037_v40 = vpop.xlane.xlu1 %6036 }
0x2ad2   : > { %12317 = vrcp.f32 %v6037_v40 }
0x2ad4   : > { %6457 = vrot.lane.b32.xlu1 %v13528_v59, %s14490_s5 }
0x2adf   : > { %v12318_v55 = vpop.eup %12317 }
0x2ae0   : > { %v6039_v35 = vmul.f32 %v12318_v55, %v12314_v41 }
0x2ae2   : > { %11768 = vmatmul.mubr.msk.f32.vlgmr.msra.gmra.mxu1 %vm1441_vm2, %v6039_v35 }
0x2ae3   : > { %11777 = vmatprep.mubr.msk.f32.mxu1 %vm12473_vm1, %v12472_v1 }
0x2b44   : > { %v6201_v56 = vpop.xlane.xlu1 %6200 }
0x2b45   : > { %12319 = vrcp.f32 %v6201_v56 }
0x2b48   : > { %v6206_v57 = vpop.permute.xlu1 %6205 }
0x2b49   : > { %11776 = vmatpush3.msra.mxu1 %v6206_v57  ;;  %v10718_v57 = vld [vmem:[%s14505_s27] ss:$0 sm:$0xff] }
0x2b4a   : > { %11791 = vmatprep.subr.mxu1 %v12472_v1 }
0x2b4c   : > { %v6288_v58 = vpop.permute.xlu1 %6287 }
0x2b4d   : > { %11785 = vmatpush3.xpose.msk.msra.mxu0 %vm1441_vm2, %v6288_v58 }
0x2b4e   : > { %11786 = vmatprep.subr.mxu0 %v12472_v1 }
0x2b50   : > { %v6458_v2 = vpop.permute.xlu1 %6457 }
0x2b51   : > { %11787 = vmatpush3.xpose.msk.msra.mxu0 %vm1441_vm2, %v6286_v23 }
0x2b52   : > { %v12320_v63 = vpop.eup %12319  ;;  %11802 = vmatprep.subr.mxu0 %v12472_v1 }
0x2b53   : > { %v6203_v61 = vmul.f32 %v12320_v63, %v12316_v52 }
0x2b55   : > { %11778 = vmatmul.mubr.msk.f32.vlgmr.msra.gmra.mxu1 %vm1441_vm2, %v6203_v61 }
0x2b56   : > { %11792 = vmatpush3.xpose.msk.msra.mxu1 %vm1441_vm2, %v13596_v38  ;;  %11799 = vmatprep.mubr.msk.f32.mxu1 %vm12473_vm1, %v12472_v1 }
0x2b57   : > { %11793 = vmatprep.subr.mxu1 %v12472_v1 }
0x2b5a   : > { %11794 = vmatpush3.xpose.msk.msra.mxu1 %vm1441_vm2, %v13601_v36 }
0x2b5b   : > { %11795 = vmatprep.subr.mxu1 %v12472_v1 }
0x2b5e   : > { %11796 = vmatpush3.xpose.msk.msra.mxu1 %vm1441_vm2, %v13625_v54 }
0x2b5f   : > { %11797 = vmatprep.subr.mxu1 %v12472_v1 }
0x2b62   : > { %11798 = vmatpush3.xpose.msk.msra.mxu1 %vm1441_vm2, %v13606_v39 }
0x2b63   : > { %11807 = vmatprep.subr.mxu1 %v12472_v1 }
0x2ba2   : > { %v6109_v47 = vpop.f32.mrf.mxu1 }
0x2ba3   : > { %11800 = vmatmul.mubr.msk.f32.vlgmr.msra.gmra.mxu1 %vm1441_vm2, %v6109_v47 }
0x2ba4   : > { %v11769_v62 = vpop.f32.mrf.mxu1  ;;  %11809 = vmatprep.mubr.msk.f32.mxu1 %vm12473_vm1, %v12472_v1 }
0x2c15   : > { %v6277_v0 = vpop.f32.mrf.mxu1 }
0x2c16   : > { %11789 = vmatmul.mubr.msk.f32.vlgmr.msra.gmra.mxu0 %vm1441_vm2, %v6277_v0  ;;  %v4355_v0 = vld [vmem:[%s14506_s29 + $0x38] sm:$0xff] }
0x2c17   : > { %11803 = vmatpush3.xpose.msk.msra.mxu0 %vm1441_vm2, %v6458_v2  ;;  %v11779_v3 = vpop.f32.mrf.mxu1  ;;  %11804 = vmatprep.mubr.msk.f32.mxu0 %vm12473_vm1, %v12472_v1  ;;  %v4354_v2 = vld [vmem:[%s14506_s29 + $0x30] sm:$0xff] }
0x2c18   : > { %11812 = vmatprep.subr.mxu0 %v12472_v1 }
0x2c1a   : > { %11805 = vmatmul.mubr.msk.f32.vlgmr.msra.gmra.mxu0 %vm1441_vm2, %v6456_v4 }
0x2c1b   : > { %11820 = vmatprep.mubr.msk.f32.mxu0 %vm12473_vm1, %v12472_v1 }
0x2c63   : > { %v13665_v5 = vpop.f32.mrf.mxu1 }
0x2c65   : > { %v11801_v7 = vpop.f32.mrf.mxu1 }
0x2cd6   : > { %v13667_v8 = vpop.f32.mrf.mxu0 }
0x2cd8   : > { %v11790_v9 = vpop.f32.mrf.mxu0 }
0x2cd9   : > { %v4352_v9 = vld [vmem:[%s14506_s29 + $0x20] sm:$0xff] }
0x2cda   : > { %v6529_v10 = vpop.f32.mrf.mxu0 }
0x2cdb   : > { %v6533_v12 = vmul.f32 0.35355338, %v6529_v10  ;;  %v4351_v10 = vld [vmem:[%s14506_s29 + $0x18] sm:$0xff] }
0x2cdc   : > { %v11806_v13 = vpop.f32.mrf.mxu0 }
0x2cdd   : > { %v6534_v14 = vadd.f32 %v13587_v25, %v6533_v12  ;;  %v4350_v12 = vld [vmem:[%s14506_s29 + $0x10] sm:$0xff]  ;;  %v4349_v13 = vld [vmem:[%s14506_s29 + $0x8] sm:$0xff] }
0x2cdf   : > { %v6535_v37 = vsel %vm1441_vm2, %v6534_v14, -inf }
0x2ce0   : > { %6536 = vmax.xlane.f32.xlu1 %v6535_v37  ;;  %v4360_v37 = vld [vmem:[%s14507_s30 + $0x18] sm:$0xff] }
0x2cf1   : > { %6714 = vrot.lane.b32.xlu1 %v13528_v59, %s14493_s6 }
0x2cf5   : > { %6712 = vrot.lane.b32.xlu1 %v13575_v6, %s14493_s6 }
0x2d69   : > { %v6537_v11 = vpop.xlane.xlu1 %6536 }
0x2d6a   : > { %v6538_v15 = vsub.f32 %v6534_v14, %v6537_v11  ;;  %v4348_v14 = vld [vmem:[%s14506_s29] sm:$0xff]  ;;  %v4359_v11 = vld [vmem:[%s14507_s30 + $0x10] sm:$0xff] }
0x2d6c   : > { %v6539_v16 = vmul.f32 1.442695, %v6538_v15  ;;  %v4358_v15 = vld [vmem:[%s14507_s30 + $0x8] sm:$0xff] }
0x2d6d   : > { %v6715_v21 = vpop.permute.xlu1 %6714 }
0x2d6e   : > { %12321 = vpow2.f32 %v6539_v16 }
0x2d71   : > { %v6713_v24 = vpop.permute.xlu1 %6712 }
0x2d7b   : > { %v12322_v17 = vpop.eup %12321 }
0x2d7c   : > { %v6541_v18 = vsel %vm1441_vm2, %v12322_v17, 0.0 }
0x2d7d   : > { %6542 = vadd.xlane.f32.xlu0 %v6541_v18 }
0x2d93   : > { %6546 = vrot.lane.b32.xlu0 %v13613_v43, %s14490_s5 }
0x2e06   : > { %v6543_v19 = vpop.xlane.xlu0 %6542 }
0x2e07   : > { %12323 = vrcp.f32 %v6543_v19 }
0x2e0a   : > { %v6547_v20 = vpop.permute.xlu0 %6546 }
0x2e0b   : > { %11808 = vmatpush3.msra.mxu1 %v6547_v20  ;;  %v10719_v20 = vld [vmem:[%s14508_s18] ss:$0 sm:$0xff] }
0x2e0c   : > { %11823 = vmatprep.subr.mxu1 %v12472_v1 }
0x2e14   : > { %v12324_v59 = vpop.eup %12323 }
0x2e15   : > { %v6545_v6 = vmul.f32 %v12324_v59, %v12322_v17 }
0x2e17   : > { %11810 = vmatmul.mubr.msk.f32.vlgmr.msra.gmra.mxu1 %vm1441_vm2, %v6545_v6 }
0x2e18   : > { %11824 = vmatpush3.xpose.msk.msra.mxu1 %vm1441_vm2, %v6715_v21  ;;  %11825 = vmatprep.mubr.msk.f32.mxu1 %vm12473_vm1, %v12472_v1  ;;  %v10720_v21 = vld [vmem:[%s14509_s2] ss:$0 sm:$0xff]  ;;  %s14516_s2 = sld [smem:[#allocation24_spill]] }
0x2e19   : > { %11828 = vmatprep.subr.mxu1 %v12472_v1 }
0x2e1b   : > { %11826 = vmatmul.mubr.msk.f32.vlgmr.msra.gmra.mxu1 %vm1441_vm2, %v6713_v24 }
0x2e1c   : > { %11830 = vmatprep.mubr.msk.f32.mxu1 %vm12473_vm1, %v12472_v1 }
0x2e1e   : > { %s14517_s0 = smov %s14516_s2 }
0x2ed7   : > { %v6618_v26 = vpop.f32.mrf.mxu1 }
0x2ed9   : > { %v11811_v22 = vpop.f32.mrf.mxu1 }
0x2eda   : > { %v10721_v22 = vld [vmem:[%s14511_s23] ss:$0 sm:$0xff] }
0x2edb   : > { %v6786_v28 = vpop.f32.mrf.mxu1 }
0x2edc   : > { %v6790_v29 = vmul.f32 0.35355338, %v6786_v28 }
0x2edd   : > { %v11827_v27 = vpop.f32.mrf.mxu1 }
0x2ede   : > { %v6791_v31 = vadd.f32 %v13587_v25, %v6790_v29 }
0x2ee0   : > { %v6792_v32 = vsel %vm1441_vm2, %v6791_v31, -inf }
0x2ee1   : > { %6793 = vmax.xlane.f32.xlu0 %v6792_v32  ;;  %v10731_v32 = vld [vmem:[%s14512_s28] ss:$0 sm:$0xff]  ;;  %s14514_s28 = sld [smem:[#allocation25_spill]] }
0x2ee7   : > { %s14515_s9 = smov %s14514_s28 }
0x2ef7   : > { %6803 = vrot.lane.b32.xlu0 %v13613_v43, %s14493_s6 }
0x2efb   : > { %6885 = vrot.lane.b32.xlu0 %v13596_v38, %s14493_s6 }
0x2eff   : > { %6883 = vrot.lane.b32.xlu0 %v13601_v36, %s14493_s6 }
0x2f03   : > { %6881 = vrot.lane.b32.xlu0 %v13625_v54, %s14493_s6 }
0x2f07   : > { %6879 = vrot.lane.b32.xlu0 %v13606_v39, %s14493_s6 }
0x2f6a   : > { %v6794_v33 = vpop.xlane.xlu0 %6793 }
0x2f6b   : > { %v6795_v25 = vsub.f32 %v6791_v31, %v6794_v33 }
0x2f6d   : > { %v6796_v30 = vmul.f32 1.442695, %v6795_v25 }
0x2f6e   : > { %v6804_v34 = vpop.permute.xlu0 %6803 }
0x2f6f   : > { %12325 = vpow2.f32 %v6796_v30  ;;  %11829 = vmatpush3.msra.mxu1 %v6804_v34 }
0x2f70   : > { %11833 = vmatprep.subr.mxu1 %v12472_v1 }
0x2f7c   : > { %v12326_v41 = vpop.eup %12325 }
0x2f7d   : > { %v6798_v42 = vsel %vm1441_vm2, %v12326_v41, 0.0 }
0x2f7e   : > { %6799 = vadd.xlane.f32.xlu1 %v6798_v42 }
0x2f8f   : > { %6628 = vrot.lane.b32.xlu1 %v13596_v38, %s14490_s5  ;;  %v6886_v38 = vpop.permute.xlu0 %6885 }
0x2f93   : > { %6626 = vrot.lane.b32.xlu1 %v13601_v36, %s14490_s5  ;;  %v6884_v43 = vpop.permute.xlu0 %6883 }
0x2f97   : > { %6624 = vrot.lane.b32.xlu1 %v13625_v54, %s14490_s5  ;;  %v6882_v51 = vpop.permute.xlu0 %6881  ;;  %v6452_v54 = vadd.f32 %v13665_v5, %v13667_v8  ;;  %v4353_v8 = vld [vmem:[%s14506_s29 + $0x28] sm:$0xff] }
0x2f9b   : > { %6622 = vrot.lane.b32.xlu1 %v13606_v39, %s14490_s5  ;;  %v6880_v52 = vpop.permute.xlu0 %6879 }
0x3007   : > { %v6800_v44 = vpop.xlane.xlu1 %6799 }
0x3008   : > { %12327 = vrcp.f32 %v6800_v44 }
0x300b   : > { %v6629_v45 = vpop.permute.xlu1 %6628 }
0x300c   : > { %11813 = vmatpush3.xpose.msk.msra.mxu0 %vm1441_vm2, %v6629_v45 }
0x300d   : > { %11814 = vmatprep.subr.mxu0 %v12472_v1 }
0x300f   : > { %v6627_v48 = vpop.permute.xlu1 %6626 }
0x3010   : > { %11815 = vmatpush3.xpose.msk.msra.mxu0 %vm1441_vm2, %v6627_v48 }
0x3011   : > { %11816 = vmatprep.subr.mxu0 %v12472_v1 }
0x3013   : > { %v6625_v36 = vpop.permute.xlu1 %6624 }
0x3014   : > { %11817 = vmatpush3.xpose.msk.msra.mxu0 %vm1441_vm2, %v6625_v36  ;;  %v10743_v36 = vld [vmem:[%s12513_s25 + $0x78] sm:$0xff] }
0x3015   : > { %v12328_v49 = vpop.eup %12327  ;;  %11818 = vmatprep.subr.mxu0 %v12472_v1 }
0x3016   : > { %v6802_v39 = vmul.f32 %v12328_v49, %v12326_v41  ;;  %v10747_v49 = vld [vmem:[%s12513_s25 + $0x98] sm:$0xff] }
0x3017   : > { %v6623_v50 = vpop.permute.xlu1 %6622 }
0x3018   : > { %11819 = vmatpush3.xpose.msk.msra.mxu0 %vm1441_vm2, %v6623_v50  ;;  %11831 = vmatmul.mubr.msk.f32.vlgmr.msra.gmra.mxu1 %vm1441_vm2, %v6802_v39  ;;  %v10742_v39 = vld [vmem:[%s12513_s25 + $0x70] sm:$0xff]  ;;  %v10741_v50 = vld [vmem:[%s12513_s25 + $0x68] sm:$0xff] }
0x3019   : > { %11834 = vmatpush3.xpose.msk.msra.mxu1 %vm1441_vm2, %v6886_v38  ;;  %11841 = vmatprep.mubr.msk.f32.mxu1 %vm12473_vm1, %v12472_v1 }
0x301a   : > { %11835 = vmatprep.subr.mxu1 %v12472_v1  ;;  %11844 = vmatprep.subr.mxu0 %v12472_v1 }
0x301b   : > { %11821 = vmatmul.mubr.msk.f32.vlgmr.msra.gmra.mxu0 %vm1441_vm2, %v6618_v26  ;;  %v4357_v26 = vld [vmem:[%s14507_s30] sm:$0xff] }
0x301c   : > { %11860 = vmatprep.mubr.msk.f32.mxu0 %vm12473_vm1, %v12472_v1  ;;  %11845 = vmatpush3.xpose.msk.msra.mxu0 %vm1185_vm0, %v4355_v0  ;;  %v10749_v0 = vld [vmem:[%s12513_s25 + $0xa8] sm:$0xff] }
0x301d   : > { %11836 = vmatpush3.xpose.msk.msra.mxu1 %vm1441_vm2, %v6884_v43  ;;  %11846 = vmatprep.subr.mxu0 %v12472_v1  ;;  %v10746_v43 = vld [vmem:[%s12513_s25 + $0x90] sm:$0xff] }
0x301e   : > { %11837 = vmatprep.subr.mxu1 %v12472_v1 }
0x3020   : > { %11847 = vmatpush3.xpose.msk.msra.mxu0 %vm1185_vm0, %v4354_v2  ;;  %v10748_v2 = vld [vmem:[%s12513_s25 + $0xa0] sm:$0xff] }
0x3021   : > { %11838 = vmatpush3.xpose.msk.msra.mxu1 %vm1441_vm2, %v6882_v51  ;;  %11848 = vmatprep.subr.mxu0 %v12472_v1  ;;  %v10745_v51 = vld [vmem:[%s12513_s25 + $0x88] sm:$0xff] }
0x3022   : > { %11839 = vmatprep.subr.mxu1 %v12472_v1 }
0x3024   : > { %11849 = vmatpush3.xpose.msk.msra.mxu0 %vm1185_vm0, %v4353_v8 }
0x3025   : > { %11840 = vmatpush3.xpose.msk.msra.mxu1 %vm1441_vm2, %v6880_v52  ;;  %11850 = vmatprep.subr.mxu0 %v12472_v1  ;;  %v10740_v52 = vld [vmem:[%s12513_s25 + $0x60] sm:$0xff] }
0x3026   : > { %11863 = vmatprep.subr.mxu1 %v12472_v1 }
0x3028   : > { %11851 = vmatpush3.xpose.msk.msra.mxu0 %vm1185_vm0, %v4352_v9 }
0x3029   : > { %11852 = vmatprep.subr.mxu0 %v12472_v1 }
0x302c   : > { %11853 = vmatpush3.xpose.msk.msra.mxu0 %vm1185_vm0, %v4351_v10 }
0x302d   : > { %11854 = vmatprep.subr.mxu0 %v12472_v1 }
0x3030   : > { %11855 = vmatpush3.xpose.msk.msra.mxu0 %vm1185_vm0, %v4350_v12 }
0x3031   : > { %11856 = vmatprep.subr.mxu0 %v12472_v1 }
0x3034   : > { %11857 = vmatpush3.xpose.msk.msra.mxu0 %vm1185_vm0, %v4349_v13 }
0x3035   : > { %11858 = vmatprep.subr.mxu0 %v12472_v1 }
0x3038   : > { %11859 = vmatpush3.xpose.msk.msra.mxu0 %vm1185_vm0, %v4348_v14 }
0x3039   : > { %11885 = vmatprep.subr.mxu0 %v12472_v1 }
0x30d8   : > { %v6875_v53 = vpop.f32.mrf.mxu1 }
0x30d9   : > { %11842 = vmatmul.mubr.msk.f32.vlgmr.msra.gmra.mxu1 %vm1441_vm2, %v6875_v53  ;;  %v10744_v53 = vld [vmem:[%s12513_s25 + $0x80] sm:$0xff] }
0x30da   : > { %v11832_v40 = vpop.f32.mrf.mxu1  ;;  %11871 = vmatprep.mubr.msk.f32.mxu1 %vm12473_vm1, %v12472_v1  ;;  %11864 = vmatpush3.xpose.msk.msra.mxu1 %vm2612_vm3, %v4360_v37 }
0x30db   : > { %v6707_v55 = vpop.f32.mrf.mxu0  ;;  %11865 = vmatprep.subr.mxu1 %v12472_v1 }
0x30dc   : > { %v6711_v35 = vadd.f32 %v6707_v55, %v6452_v54  ;;  %v10795_v54 = vld [vmem:[%s14495_s8 + $0x1] ss:$0 sm:$0xff] }
0x30dd   : > { %v11822_v56 = vpop.f32.mrf.mxu0 }
0x30de   : > { %11866 = vmatpush3.xpose.msk.msra.mxu1 %vm2612_vm3, %v4359_v11  ;;  %v13858_v11 = vld [vmem:[%s13338_s20] ss:$0 sm:$0xff] }
0x30df   : > { %11867 = vmatprep.subr.mxu1 %v12472_v1 }
0x30e2   : > { %11868 = vmatpush3.xpose.msk.msra.mxu1 %vm2612_vm3, %v4358_v15 }
0x30e3   : > { %11869 = vmatprep.subr.mxu1 %v12472_v1 }
0x30e6   : > { %11870 = vmatpush3.xpose.msk.msra.mxu1 %vm2612_vm3, %v4357_v26 }
0x30e7   : > { %11874 = vmatprep.subr.mxu1 %v12472_v1 }
0x3199   : > { %v6964_v58 = vpop.f32.mrf.mxu1 }
0x319a   : > { %v6968_v23 = vadd.f32 %v6964_v58, %v6711_v35 }
0x319b   : > { %v11843_v63 = vpop.f32.mrf.mxu1 }
0x319c   : > { %v6975_v61 = vadd.f32 %v10718_v57, %v6968_v23  ;;  %v10737_v57 = vld [vmem:[%s14514_s28] ss:$0 sm:$0xff] }
0x319d   : > { %v10738_v23 = vld [vmem:[%s14516_s2] ss:$0 sm:$0xff] }
0x319e   : > { %v6976_v47 = vadd.f32 %v6975_v61, %v13550_v60 }
0x31a0   : > { %v6977_v62 = vsel %vm1185_vm0, %v6976_v47, 0.0 }
0x31a1   : > { %6978 = vadd.xlane.f32.xlu1 %v6977_v62  ;;  %v10750_v62 = vld [vmem:[%s12513_s25 + $0xb0] sm:$0xff] }
0x322a   : > { %v6979_v3 = vpop.xlane.xlu1 %6978 }
0x322b   : > { %v6980_v4 = vmul.f32 0.03125, %v6979_v3 }
0x322d   : > { %v6981_v5 = vsub.f32 %v6976_v47, %v6980_v4  ;;  %v10751_v47 = vld [vmem:[%s12513_s25 + $0xb8] sm:$0xff] }
0x322f   : > { %v6982_v60 = vmul.f32 %v6981_v5, %v6981_v5 }
0x3231   : > { %v6983_v7 = vsel %vm1185_vm0, %v6982_v60, 0.0 }
0x3232   : > { %6984 = vadd.xlane.f32.xlu0 %v6983_v7 }
0x32bb   : > { %v6985_v16 = vpop.xlane.xlu0 %6984 }
0x32bc   : > { %v6986_v17 = vmul.f32 0.03125, %v6985_v16 }
0x32be   : > { %v6987_v18 = vadd.f32 1e-05, %v6986_v17 }
0x32c0   : > { %12329 = vrsqrt.f32 %v6987_v18 }
0x32cd   : > { %v12330_v19 = vpop.eup %12329 }
0x32ce   : > { %v6989_v59 = vmul.f32 %v12330_v19, %v6981_v5 }
0x32d0   : > { %v6996_v6 = vmul.f32 %v10719_v20, %v6989_v59 }
0x32d2   : > { %v7003_v24 = vadd.f32 %v10720_v21, %v6996_v6 }
0x32d4   : > { %11861 = vmatmul.mubr.msk.f32.vlgmr.msra.gmra.mxu0 %vm1185_vm0, %v7003_v24 }
0x32d5   : > { %11893 = vmatprep.mubr.msk.f32.mxu0 %vm12473_vm1, %v12472_v1  ;;  %11886 = vmatpush3.xpose.msk.msra.mxu0 %vm1185_vm0, %v10747_v49 }
0x32d6   : > { %11887 = vmatprep.subr.mxu0 %v12472_v1 }
0x32d9   : > { %11888 = vmatpush3.xpose.msk.msra.mxu0 %vm1185_vm0, %v10746_v43 }
0x32da   : > { %11889 = vmatprep.subr.mxu0 %v12472_v1 }
0x32dd   : > { %11890 = vmatpush3.xpose.msk.msra.mxu0 %vm1185_vm0, %v10745_v51 }
0x32de   : > { %11891 = vmatprep.subr.mxu0 %v12472_v1 }
0x32e1   : > { %11892 = vmatpush3.xpose.msk.msra.mxu0 %vm1185_vm0, %v10744_v53 }
0x32e2   : > { %11907 = vmatprep.subr.mxu0 %v12472_v1 }
0x3394   : > { %v7103_v28 = vpop.f32.mrf.mxu0 }
0x3395   : > { %v7104_v29 = vadd.f32 %v10721_v22, %v7103_v28 }
0x3396   : > { %v11862_v27 = vpop.f32.mrf.mxu0 }
0x3397   : > { %v7107_v31 = vmax.f32 %v7104_v29, 0.0 }
0x3399   : > { %11872 = vmatmul.mubr.msk.f32.vlgmr.msra.gmra.mxu1 %vm2612_vm3, %v7107_v31 }
0x339a   : > { %11882 = vmatprep.mubr.msk.f32.mxu1 %vm12473_vm1, %v12472_v1  ;;  %11875 = vmatpush3.xpose.msk.msra.mxu1 %vm1185_vm0, %v10743_v36 }
0x339b   : > { %11876 = vmatprep.subr.mxu1 %v12472_v1 }
0x339e   : > { %11877 = vmatpush3.xpose.msk.msra.mxu1 %vm1185_vm0, %v10742_v39 }
0x339f   : > { %11878 = vmatprep.subr.mxu1 %v12472_v1 }
0x33a2   : > { %11879 = vmatpush3.xpose.msk.msra.mxu1 %vm1185_vm0, %v10741_v50  ;;  %v13903_v50 = vld [vmem:[%s14498_s4 + $0x28] sm:$0xff] }
0x33a3   : > { %11880 = vmatprep.subr.mxu1 %v12472_v1 }
0x33a6   : > { %11881 = vmatpush3.xpose.msk.msra.mxu1 %vm1185_vm0, %v10740_v52 }
0x33a7   : > { %11896 = vmatprep.subr.mxu1 %v12472_v1 }
0x3459   : > { %v7195_v33 = vpop.f32.mrf.mxu1 }
0x345a   : > { %v7196_v25 = vadd.f32 %v10731_v32, %v7195_v33 }
0x345b   : > { %v11873_v30 = vpop.f32.mrf.mxu1 }
0x345c   : > { %v7199_v34 = vadd.f32 %v7196_v25, %v7003_v24 }
0x345e   : > { %v7200_v41 = vsel %vm1185_vm0, %v7199_v34, 0.0 }
0x345f   : > { %7201 = vadd.xlane.f32.xlu0 %v7200_v41  ;;  %v13879_v41 = vld [vmem:[%s14498_s4 + $0x38] sm:$0xff] }
0x3475   : > { %7392 = vrot.lane.b32.xlu0 %v10795_v54, %s14491_s15 }
0x34e8   : > { %v7202_v42 = vpop.xlane.xlu0 %7201 }
0x34e9   : > { %v7203_v44 = vmul.f32 0.03125, %v7202_v42  ;;  %v13884_v42 = vld [vmem:[%s14498_s4 + $0x30] sm:$0xff] }
0x34eb   : > { %v7204_v45 = vsub.f32 %v7199_v34, %v7203_v44  ;;  %v13889_v44 = vld [vmem:[%s14498_s4 + $0x20] sm:$0xff]  ;;  %s12479_s4 = smov [#allocation2]  }
0x34ec   : > { %v7393_v3 = vpop.permute.xlu0 %7392  ;;  %s12378_s8 = sshll.u32 %s12479_s4, 4  ;;  %s12379_s8 = int_to_ptr.vmem [resolvable:$false] %s12378_s8 }
0x34ed   : > { %v7205_v48 = vmul.f32 %v7204_v45, %v7204_v45 }
0x34ef   : > { %v7206_v38 = vsel %vm1185_vm0, %v7205_v48, 0.0 }
0x34f0   : > { %7207 = vadd.xlane.f32.xlu1 %v7206_v38 }
0x3579   : > { %v7208_v40 = vpop.xlane.xlu1 %7207 }
0x357a   : > { %v7209_v55 = vmul.f32 0.03125, %v7208_v40 }
0x357c   : > { %v7210_v35 = vadd.f32 1e-05, %v7209_v55 }
0x357e   : > { %12331 = vrsqrt.f32 %v7210_v35 }
0x358b   : > { %v12332_v56 = vpop.eup %12331 }
0x358c   : > { %v7212_v58 = vmul.f32 %v12332_v56, %v7204_v45 }
0x358e   : > { %v7219_v63 = vmul.f32 %v10737_v57, %v7212_v58 }
0x3590   : > { %v13816_v61 = vadd.f32 %v10738_v23, %v7219_v63 }
0x3592   : > { %11883 = vmatmul.mubr.msk.f32.vlgmr.msra.gmra.mxu1 %vm1185_vm0, %v13816_v61  ;;  %11894 = vmatmul.mubr.msk.f32.vlgmr.msra.gmra.mxu0 %vm1185_vm0, %v13816_v61 }
0x3593   : > { %11897 = vmatpush3.xpose.msk.msra.mxu1 %vm1185_vm0, %v10751_v47  ;;  %11904 = vmatprep.mubr.msk.f32.mxu1 %vm12473_vm1, %v12472_v1 }
0x3594   : > { %11898 = vmatprep.subr.mxu1 %v12472_v1  ;;  %11909 = vmatprep.mubr.msk.f32.mxu0 %vm12473_vm1, %v12472_v1 }
0x3597   : > { %11899 = vmatpush3.xpose.msk.msra.mxu1 %vm1185_vm0, %v10750_v62 }
0x3598   : > { %11900 = vmatprep.subr.mxu1 %v12472_v1 }
0x359b   : > { %11901 = vmatpush3.xpose.msk.msra.mxu1 %vm1185_vm0, %v10749_v0 }
0x359c   : > { %11902 = vmatprep.subr.mxu1 %v12472_v1 }
0x359f   : > { %11903 = vmatpush3.xpose.msk.msra.mxu1 %vm1185_vm0, %v10748_v2 }
0x35a0   : > { %11922 = vmatprep.subr.mxu1 %v12472_v1 }
0x35a2   : > { %11905 = vmatmul.mubr.msk.f32.vlgmr.msra.gmra.mxu1 %vm1185_vm0, %v13816_v61 }
0x35a3   : > { %11924 = vmatprep.mubr.msk.f32.mxu1 %vm12473_vm1, %v12472_v1 }
0x3652   : > { %v7388_v4 = vpop.f32.mrf.mxu1  ;;  %v7473_v5 = vpop.f32.mrf.mxu0 }
0x3653   : > { %v13842_v60 = vadd.f32 %v7473_v5, %v7393_v3  ;;  %v13848_v9 = vadd.f32 %v10795_v54, %v7388_v4 }
0x3654   : > { %v11884_v7 = vpop.f32.mrf.mxu1  ;;  %v11895_v8 = vpop.f32.mrf.mxu0 }
0x3655   : > { %7726 = vrot.lane.b32.xlu0 %v13842_v60, %s14489_s26  ;;  %11908 = vmatpush3.xpose.msk.msra.mxu0 %vm1441_vm2, %v13842_v60 }
0x3656   : > { %11912 = vmatprep.subr.mxu0 %v12472_v1 }
0x3658   : > { %11910 = vmatmul.mubr.msk.f32.vlgmr.msra.gmra.mxu0 %vm1441_vm2, %v13848_v9 }
0x3659   : > { %7724 = vrot.lane.b32.xlu0 %v13848_v9, %s14489_s26  ;;  %11914 = vmatprep.mubr.msk.f32.mxu0 %vm12473_vm1, %v12472_v1 }
0x3662   : > { %v7558_v10 = vpop.f32.mrf.mxu1 }
0x3664   : > { %v11906_v12 = vpop.f32.mrf.mxu1 }
0x36c7   : > { %v7727_v22 = vpop.permute.xlu0 %7726 }
0x36cb   : > { %v7725_v29 = vpop.permute.xlu0 %7724 }
0x3718   : > { %v7634_v13 = vpop.f32.mrf.mxu0 }
0x3719   : > { %v7638_v14 = vmul.f32 0.35355338, %v7634_v13 }
0x371a   : > { %v11911_v37 = vpop.f32.mrf.mxu0 }
0x371b   : > { %v7639_v15 = vadd.f32 %v13858_v11, %v7638_v14 }
0x371d   : > { %v7640_v16 = vsel %vm1441_vm2, %v7639_v15, -inf }
0x371e   : > { %7641 = vmax.xlane.f32.xlu1 %v7640_v16 }
0x37a7   : > { %v7642_v17 = vpop.xlane.xlu1 %7641 }
0x37a8   : > { %v7643_v18 = vsub.f32 %v7639_v15, %v7642_v17 }
0x37aa   : > { %v7644_v19 = vmul.f32 1.442695, %v7643_v18 }
0x37ac   : > { %12333 = vpow2.f32 %v7644_v19 }
0x37b9   : > { %v12334_v20 = vpop.eup %12333 }
0x37ba   : > { %v7646_v59 = vsel %vm1441_vm2, %v12334_v20, 0.0 }
0x37bb   : > { %7647 = vadd.xlane.f32.xlu1 %v7646_v59 }
0x37cc   : > { %7477 = vrot.lane.b32.xlu1 %v10795_v54, %s14492_s12 }
0x3844   : > { %v7648_v21 = vpop.xlane.xlu1 %7647 }
0x3845   : > { %12335 = vrcp.f32 %v7648_v21 }
0x3848   : > { %v7478_v6 = vpop.permute.xlu1 %7477 }
0x3849   : > { %v13864_v24 = vadd.f32 %v7558_v10, %v7478_v6 }
0x384b   : > { %11913 = vmatpush3.msra.mxu0 %v13864_v24 }
0x384c   : > { %11917 = vmatprep.subr.mxu0 %v12472_v1 }
0x3852   : > { %v12336_v26 = vpop.eup %12335 }
0x3853   : > { %v7650_v28 = vmul.f32 %v12336_v26, %v12334_v20 }
0x3855   : > { %11915 = vmatmul.mubr.msk.f32.vlgmr.msra.gmra.mxu0 %vm1441_vm2, %v7650_v28 }
0x3856   : > { %11918 = vmatpush3.xpose.msk.msra.mxu0 %vm1441_vm2, %v7727_v22  ;;  %11919 = vmatprep.mubr.msk.f32.mxu0 %vm12473_vm1, %v12472_v1 }
0x3857   : > { %11927 = vmatprep.subr.mxu0 %v12472_v1 }
0x3859   : > { %11920 = vmatmul.mubr.msk.f32.vlgmr.msra.gmra.mxu0 %vm1441_vm2, %v7725_v29 }
0x385a   : > { %11935 = vmatprep.mubr.msk.f32.mxu0 %vm12473_vm1, %v12472_v1 }
0x3915   : > { %v7720_v27 = vpop.f32.mrf.mxu0 }
0x3917   : > { %v11916_v31 = vpop.f32.mrf.mxu0 }
0x3919   : > { %v7798_v32 = vpop.f32.mrf.mxu0 }
0x391a   : > { %v7802_v33 = vmul.f32 0.35355338, %v7798_v32 }
0x391b   : > { %v11921_v25 = vpop.f32.mrf.mxu0 }
0x391c   : > { %v7803_v30 = vadd.f32 %v13858_v11, %v7802_v33 }
0x391e   : > { %v7804_v34 = vsel %vm1441_vm2, %v7803_v30, -inf }
0x391f   : > { %7805 = vmax.xlane.f32.xlu1 %v7804_v34 }
0x3930   : > { %7902 = vrot.lane.b32.xlu1 %v13879_v41, %s14489_s26 }
0x3934   : > { %7900 = vrot.lane.b32.xlu1 %v13884_v42, %s14489_s26 }
0x3938   : > { %7896 = vrot.lane.b32.xlu1 %v13889_v44, %s14489_s26 }
0x393c   : > { %8066 = vrot.lane.b32.xlu1 %v13848_v9, %s14490_s5 }
0x39a8   : > { %v7806_v45 = vpop.xlane.xlu1 %7805 }
0x39a9   : > { %v7807_v48 = vsub.f32 %v7803_v30, %v7806_v45 }
0x39ab   : > { %v7808_v38 = vmul.f32 1.442695, %v7807_v48  ;;  %v10765_v48 = vld [vmem:[%s14499_s10 + $0x98] sm:$0xff] }
0x39ac   : > { %v7903_v36 = vpop.permute.xlu1 %7902 }
0x39ad   : > { %12337 = vpow2.f32 %v7808_v38  ;;  %11928 = vmatpush3.xpose.msk.msra.mxu0 %vm1441_vm2, %v7903_v36 }
0x39ae   : > { %11929 = vmatprep.subr.mxu0 %v12472_v1 }
0x39b0   : > { %v7901_v49 = vpop.permute.xlu1 %7900 }
0x39b1   : > { %11930 = vmatpush3.xpose.msk.msra.mxu0 %vm1441_vm2, %v7901_v49 }
0x39b2   : > { %11931 = vmatprep.subr.mxu0 %v12472_v1 }
0x39b4   : > { %v7897_v54 = vpop.permute.xlu1 %7896 }
0x39b8   : > { %v8067_v58 = vpop.permute.xlu1 %8066 }
0x39ba   : > { %v12338_v39 = vpop.eup %12337 }
0x39bb   : > { %v7810_v43 = vsel %vm1441_vm2, %v12338_v39, 0.0 }
0x39bc   : > { %7811 = vadd.xlane.f32.xlu0 %v7810_v43  ;;  %v10764_v43 = vld [vmem:[%s14499_s10 + $0x90] sm:$0xff] }
0x39d2   : > { %7816 = vrot.lane.b32.xlu0 %v13864_v24, %s14489_s26 }
0x39d6   : > { %7898 = vrot.lane.b32.xlu0 %v13903_v50, %s14489_s26 }
0x39da   : > { %8068 = vrot.lane.b32.xlu0 %v13842_v60, %s14490_s5 }
0x3a45   : > { %v7812_v51 = vpop.xlane.xlu0 %7811 }
0x3a46   : > { %12339 = vrcp.f32 %v7812_v51 }
0x3a49   : > { %v7817_v52 = vpop.permute.xlu0 %7816 }
0x3a4a   : > { %11923 = vmatpush3.msra.mxu1 %v7817_v52  ;;  %v10763_v52 = vld [vmem:[%s14499_s10 + $0x88] sm:$0xff] }
0x3a4b   : > { %11938 = vmatprep.subr.mxu1 %v12472_v1 }
0x3a4d   : > { %v7899_v53 = vpop.permute.xlu0 %7898 }
0x3a4e   : > { %11932 = vmatpush3.xpose.msk.msra.mxu0 %vm1441_vm2, %v7899_v53  ;;  %v10762_v53 = vld [vmem:[%s14499_s10 + $0x80] sm:$0xff] }
0x3a4f   : > { %11933 = vmatprep.subr.mxu0 %v12472_v1 }
0x3a51   : > { %v8069_v56 = vpop.permute.xlu0 %8068 }
0x3a52   : > { %11934 = vmatpush3.xpose.msk.msra.mxu0 %vm1441_vm2, %v7897_v54  ;;  %v10843_v54 = vld [vmem:[%s14500_s13 + $0x1] ss:$0 sm:$0xff] }
0x3a53   : > { %v12340_v40 = vpop.eup %12339  ;;  %11949 = vmatprep.subr.mxu0 %v12472_v1 }
0x3a54   : > { %v7814_v55 = vmul.f32 %v12340_v40, %v12338_v39 }
0x3a56   : > { %11925 = vmatmul.mubr.msk.f32.vlgmr.msra.gmra.mxu1 %vm1441_vm2, %v7814_v55 }
0x3a57   : > { %11939 = vmatpush3.xpose.msk.msra.mxu1 %vm1441_vm2, %v13879_v41  ;;  %11946 = vmatprep.mubr.msk.f32.mxu1 %vm12473_vm1, %v12472_v1 }
0x3a58   : > { %11940 = vmatprep.subr.mxu1 %v12472_v1 }
0x3a5b   : > { %11941 = vmatpush3.xpose.msk.msra.mxu1 %vm1441_vm2, %v13884_v42 }
0x3a5c   : > { %11942 = vmatprep.subr.mxu1 %v12472_v1 }
0x3a5f   : > { %11943 = vmatpush3.xpose.msk.msra.mxu1 %vm1441_vm2, %v13903_v50 }
0x3a60   : > { %11944 = vmatprep.subr.mxu1 %v12472_v1 }
0x3a63   : > { %11945 = vmatpush3.xpose.msk.msra.mxu1 %vm1441_vm2, %v13889_v44 }
0x3a64   : > { %11954 = vmatprep.subr.mxu1 %v12472_v1 }
0x3a66   : > { %11947 = vmatmul.mubr.msk.f32.vlgmr.msra.gmra.mxu1 %vm1441_vm2, %v7720_v27 }
0x3a67   : > { %11956 = vmatprep.mubr.msk.f32.mxu1 %vm12473_vm1, %v12472_v1 }
0x3b16   : > { %v7888_v35 = vpop.f32.mrf.mxu1 }
0x3b17   : > { %11936 = vmatmul.mubr.msk.f32.vlgmr.msra.gmra.mxu0 %vm1441_vm2, %v7888_v35 }
0x3b18   : > { %11950 = vmatpush3.xpose.msk.msra.mxu0 %vm1441_vm2, %v8069_v56  ;;  %v11926_v57 = vpop.f32.mrf.mxu1  ;;  %11951 = vmatprep.mubr.msk.f32.mxu0 %vm12473_vm1, %v12472_v1 }
0x3b19   : > { %11959 = vmatprep.subr.mxu0 %v12472_v1 }
0x3b1b   : > { %11952 = vmatmul.mubr.msk.f32.vlgmr.msra.gmra.mxu0 %vm1441_vm2, %v8067_v58 }
0x3b1c   : > { %11967 = vmatprep.mubr.msk.f32.mxu0 %vm12473_vm1, %v12472_v1 }
0x3b26   : > { %v13940_v23 = vpop.f32.mrf.mxu1 }
0x3b28   : > { %v11948_v63 = vpop.f32.mrf.mxu1 }
0x3bd7   : > { %v13942_v47 = vpop.f32.mrf.mxu0 }
0x3bd8   : > { %v8063_v36 = vadd.f32 %v13940_v23, %v13942_v47  ;;  %v14031_v47 = vld [vmem:[%s14501_s19 + $0x1] ss:$0 sm:$0xff] }
0x3bd9   : > { %v11937_v62 = vpop.f32.mrf.mxu0 }
0x3bdb   : > { %v8140_v0 = vpop.f32.mrf.mxu0 }
0x3bdc   : > { %v8144_v2 = vmul.f32 0.35355338, %v8140_v0 }
0x3bdd   : > { %v11953_v3 = vpop.f32.mrf.mxu0 }
0x3bde   : > { %v8145_v4 = vadd.f32 %v13858_v11, %v8144_v2 }
0x3be0   : > { %v8146_v5 = vsel %vm1441_vm2, %v8145_v4, -inf }
0x3be1   : > { %8147 = vmax.xlane.f32.xlu0 %v8146_v5 }
0x3bf7   : > { %8157 = vrot.lane.b32.xlu0 %v13864_v24, %s14490_s5 }
0x3bfb   : > { %8323 = vrot.lane.b32.xlu0 %v13848_v9, %s14493_s6 }
0x3c6a   : > { %v8148_v7 = vpop.xlane.xlu0 %8147 }
0x3c6b   : > { %v8149_v8 = vsub.f32 %v8145_v4, %v8148_v7  ;;  %v10761_v7 = vld [vmem:[%s14499_s10 + $0x78] sm:$0xff] }
0x3c6d   : > { %v8150_v10 = vmul.f32 1.442695, %v8149_v8  ;;  %v10760_v8 = vld [vmem:[%s14499_s10 + $0x70] sm:$0xff] }
0x3c6e   : > { %v8158_v12 = vpop.permute.xlu0 %8157 }
0x3c6f   : > { %12341 = vpow2.f32 %v8150_v10  ;;  %11955 = vmatpush3.msra.mxu1 %v8158_v12  ;;  %v10759_v10 = vld [vmem:[%s14499_s10 + $0x68] sm:$0xff]  ;;  %v10758_v12 = vld [vmem:[%s14499_s10 + $0x60] sm:$0xff] }
0x3c70   : > { %11970 = vmatprep.subr.mxu1 %v12472_v1 }
0x3c72   : > { %v8324_v17 = vpop.permute.xlu0 %8323 }
0x3c7c   : > { %v12342_v13 = vpop.eup %12341 }
0x3c7d   : > { %v8152_v14 = vsel %vm1441_vm2, %v12342_v13, 0.0 }
0x3c7e   : > { %8153 = vadd.xlane.f32.xlu1 %v8152_v14 }
0x3c8f   : > { %8325 = vrot.lane.b32.xlu1 %v13842_v60, %s14493_s6 }
0x3d07   : > { %v8154_v37 = vpop.xlane.xlu1 %8153 }
0x3d08   : > { %12343 = vrcp.f32 %v8154_v37 }
0x3d0b   : > { %v8326_v9 = vpop.permute.xlu1 %8325 }
0x3d15   : > { %v12344_v15 = vpop.eup %12343 }
0x3d16   : > { %v8156_v16 = vmul.f32 %v12344_v15, %v12342_v13 }
0x3d18   : > { %11957 = vmatmul.mubr.msk.f32.vlgmr.msra.gmra.mxu1 %vm1441_vm2, %v8156_v16  ;;  %v10844_v16 = vld [vmem:[%s14502_s3 + $0x1] ss:$0 sm:$0xff] }
0x3d19   : > { %11971 = vmatpush3.xpose.msk.msra.mxu1 %vm1441_vm2, %v8326_v9  ;;  %11972 = vmatprep.mubr.msk.f32.mxu1 %vm12473_vm1, %v12472_v1 }
0x3d1a   : > { %11975 = vmatprep.subr.mxu1 %v12472_v1 }
0x3d1c   : > { %11973 = vmatmul.mubr.msk.f32.vlgmr.msra.gmra.mxu1 %vm1441_vm2, %v8324_v17  ;;  %v10845_v17 = vld [vmem:[%s14503_s14 + $0x1] ss:$0 sm:$0xff] }
0x3d1d   : > { %11977 = vmatprep.mubr.msk.f32.mxu1 %vm12473_vm1, %v12472_v1 }
0x3dd8   : > { %v8229_v60 = vpop.f32.mrf.mxu1 }
0x3dda   : > { %v11958_v18 = vpop.f32.mrf.mxu1 }
0x3ddc   : > { %v8397_v19 = vpop.f32.mrf.mxu1 }
0x3ddd   : > { %v8401_v20 = vmul.f32 0.35355338, %v8397_v19  ;;  %v10769_v19 = vld [vmem:[%s14499_s10 + $0xb8] sm:$0xff] }
0x3dde   : > { %v11974_v59 = vpop.f32.mrf.mxu1 }
0x3ddf   : > { %v8402_v21 = vadd.f32 %v13858_v11, %v8401_v20  ;;  %v10768_v20 = vld [vmem:[%s14499_s10 + $0xb0] sm:$0xff]  ;;  %v10767_v59 = vld [vmem:[%s14499_s10 + $0xa8] sm:$0xff] }
0x3de1   : > { %v8403_v6 = vsel %vm1441_vm2, %v8402_v21, -inf }
0x3de2   : > { %8404 = vmax.xlane.f32.xlu1 %v8403_v6 }
0x3df3   : > { %8239 = vrot.lane.b32.xlu1 %v13879_v41, %s14490_s5 }
0x3df7   : > { %8496 = vrot.lane.b32.xlu1 %v13879_v41, %s14493_s6 }
0x3dfb   : > { %8494 = vrot.lane.b32.xlu1 %v13884_v42, %s14493_s6 }
0x3dff   : > { %8492 = vrot.lane.b32.xlu1 %v13903_v50, %s14493_s6 }
0x3e03   : > { %8490 = vrot.lane.b32.xlu1 %v13889_v44, %s14493_s6 }
0x3e6b   : > { %v8405_v26 = vpop.xlane.xlu1 %8404 }
0x3e6c   : > { %v8406_v11 = vsub.f32 %v8402_v21, %v8405_v26  ;;  %v10766_v21 = vld [vmem:[%s14499_s10 + $0xa0] sm:$0xff] }
0x3e6e   : > { %v8407_v22 = vmul.f32 1.442695, %v8406_v11 }
0x3e6f   : > { %v8240_v27 = vpop.permute.xlu1 %8239 }
0x3e70   : > { %12345 = vpow2.f32 %v8407_v22  ;;  %11960 = vmatpush3.xpose.msk.msra.mxu0 %vm1441_vm2, %v8240_v27 }
0x3e71   : > { %11961 = vmatprep.subr.mxu0 %v12472_v1 }
0x3e73   : > { %v8497_v25 = vpop.permute.xlu1 %8496 }
0x3e77   : > { %v8495_v41 = vpop.permute.xlu1 %8494 }
0x3e7d   : > { %v12346_v28 = vpop.eup %12345 }
0x3e7e   : > { %v8409_v29 = vsel %vm1441_vm2, %v12346_v28, 0.0 }
0x3e7f   : > { %8410 = vadd.xlane.f32.xlu0 %v8409_v29 }
0x3e95   : > { %8414 = vrot.lane.b32.xlu0 %v13864_v24, %s14493_s6 }
0x3e99   : > { %8237 = vrot.lane.b32.xlu0 %v13884_v42, %s14490_s5 }
0x3e9d   : > { %8235 = vrot.lane.b32.xlu0 %v13903_v50, %s14490_s5 }
0x3ea1   : > { %8233 = vrot.lane.b32.xlu0 %v13889_v44, %s14490_s5  ;;  %v8493_v44 = vpop.permute.xlu1 %8492 }
0x3ea5   : > { %v8491_v45 = vpop.permute.xlu1 %8490 }
0x3f08   : > { %v8411_v31 = vpop.xlane.xlu0 %8410 }
0x3f09   : > { %12347 = vrcp.f32 %v8411_v31 }
0x3f0c   : > { %v8415_v32 = vpop.permute.xlu0 %8414 }
0x3f0d   : > { %11976 = vmatpush3.msra.mxu1 %v8415_v32 }
0x3f0e   : > { %11980 = vmatprep.subr.mxu1 %v12472_v1 }
0x3f10   : > { %v8238_v33 = vpop.permute.xlu0 %8237 }
0x3f11   : > { %11962 = vmatpush3.xpose.msk.msra.mxu0 %vm1441_vm2, %v8238_v33  ;;  %v14094_v33 = vld [vmem:[%s12800_s16] ss:$0 sm:$0xff] }
0x3f12   : > { %11963 = vmatprep.subr.mxu0 %v12472_v1 }
0x3f14   : > { %v8236_v24 = vpop.permute.xlu0 %8235 }
0x3f15   : > { %11964 = vmatpush3.xpose.msk.msra.mxu0 %vm1441_vm2, %v8236_v24 }
0x3f16   : > { %v12348_v30 = vpop.eup %12347  ;;  %11965 = vmatprep.subr.mxu0 %v12472_v1 }
0x3f17   : > { %v8413_v34 = vmul.f32 %v12348_v30, %v12346_v28 }
0x3f18   : > { %v8234_v42 = vpop.permute.xlu0 %8233 }
0x3f19   : > { %11966 = vmatpush3.xpose.msk.msra.mxu0 %vm1441_vm2, %v8234_v42  ;;  %11978 = vmatmul.mubr.msk.f32.vlgmr.msra.gmra.mxu1 %vm1441_vm2, %v8413_v34 }
0x3f1a   : > { %11981 = vmatpush3.xpose.msk.msra.mxu1 %vm1441_vm2, %v8497_v25  ;;  %11988 = vmatprep.mubr.msk.f32.mxu1 %vm12473_vm1, %v12472_v1 }
0x3f1b   : > { %11982 = vmatprep.subr.mxu1 %v12472_v1  ;;  %11991 = vmatprep.subr.mxu0 %v12472_v1 }
0x3f1c   : > { %11968 = vmatmul.mubr.msk.f32.vlgmr.msra.gmra.mxu0 %vm1441_vm2, %v8229_v60 }
0x3f1d   : > { %11999 = vmatprep.mubr.msk.f32.mxu0 %vm12473_vm1, %v12472_v1  ;;  %11992 = vmatpush3.xpose.msk.msra.mxu0 %vm1185_vm0, %v10761_v7 }
0x3f1e   : > { %11983 = vmatpush3.xpose.msk.msra.mxu1 %vm1441_vm2, %v8495_v41  ;;  %11993 = vmatprep.subr.mxu0 %v12472_v1 }
0x3f1f   : > { %11984 = vmatprep.subr.mxu1 %v12472_v1 }
0x3f21   : > { %11994 = vmatpush3.xpose.msk.msra.mxu0 %vm1185_vm0, %v10760_v8 }
0x3f22   : > { %11985 = vmatpush3.xpose.msk.msra.mxu1 %vm1441_vm2, %v8493_v44  ;;  %11995 = vmatprep.subr.mxu0 %v12472_v1 }
0x3f23   : > { %11986 = vmatprep.subr.mxu1 %v12472_v1 }
0x3f25   : > { %11996 = vmatpush3.xpose.msk.msra.mxu0 %vm1185_vm0, %v10759_v10 }
0x3f26   : > { %11987 = vmatpush3.xpose.msk.msra.mxu1 %vm1441_vm2, %v8491_v45  ;;  %11997 = vmatprep.subr.mxu0 %v12472_v1 }
0x3f27   : > { %12002 = vmatprep.subr.mxu1 %v12472_v1 }
0x3f29   : > { %11998 = vmatpush3.xpose.msk.msra.mxu0 %vm1185_vm0, %v10758_v12 }
0x3f2a   : > { %12013 = vmatprep.subr.mxu0 %v12472_v1 }
0x3fd9   : > { %v8486_v38 = vpop.f32.mrf.mxu1 }
0x3fda   : > { %11989 = vmatmul.mubr.msk.f32.vlgmr.msra.gmra.mxu1 %vm1441_vm2, %v8486_v38  ;;  %v14103_v38 = vld [vmem:[%s14504_s24 + $0x38] sm:$0xff] }
0x3fdb   : > { %12003 = vmatpush3.xpose.msk.msra.mxu1 %vm1185_vm0, %v10765_v48  ;;  %v11979_v49 = vpop.f32.mrf.mxu1  ;;  %12010 = vmatprep.mubr.msk.f32.mxu1 %vm12473_vm1, %v12472_v1 }
0x3fdc   : > { %v8318_v39 = vpop.f32.mrf.mxu0  ;;  %12004 = vmatprep.subr.mxu1 %v12472_v1  ;;  %v14108_v49 = vld [vmem:[%s14504_s24 + $0x30] sm:$0xff] }
0x3fdd   : > { %v8322_v50 = vadd.f32 %v8318_v39, %v8063_v36  ;;  %v14113_v39 = vld [vmem:[%s14504_s24 + $0x20] sm:$0xff] }
0x3fde   : > { %v11969_v51 = vpop.f32.mrf.mxu0 }
0x3fdf   : > { %12005 = vmatpush3.xpose.msk.msra.mxu1 %vm1185_vm0, %v10764_v43 }
0x3fe0   : > { %12006 = vmatprep.subr.mxu1 %v12472_v1 }
0x3fe3   : > { %12007 = vmatpush3.xpose.msk.msra.mxu1 %vm1185_vm0, %v10763_v52 }
0x3fe4   : > { %12008 = vmatprep.subr.mxu1 %v12472_v1 }
0x3fe7   : > { %12009 = vmatpush3.xpose.msk.msra.mxu1 %vm1185_vm0, %v10762_v53 }
0x3fe8   : > { %12024 = vmatprep.subr.mxu1 %v12472_v1 }
0x3fea   : > { %12011 = vmatmul.mubr.msk.f32.vlgmr.msra.gmra.mxu1 %vm1185_vm0, %v13514_v46 }
0x3feb   : > { %12026 = vmatprep.mubr.msk.f32.mxu1 %vm12473_vm1, %v12472_v1 }
0x409a   : > { %v8575_v40 = vpop.f32.mrf.mxu1 }
0x409b   : > { %v8579_v55 = vadd.f32 %v8575_v40, %v8322_v50 }
0x409c   : > { %v11990_v35 = vpop.f32.mrf.mxu1 }
0x409d   : > { %v8586_v56 = vadd.f32 %v10843_v54, %v8579_v55 }
0x409f   : > { %v8587_v57 = vadd.f32 %v8586_v56, %v13816_v61 }
0x40a1   : > { %v8588_v58 = vsel %vm1185_vm0, %v8587_v57, 0.0 }
0x40a2   : > { %8589 = vadd.xlane.f32.xlu0 %v8588_v58  ;;  %v14132_v58 = vld [vmem:[%s14504_s24 + $0x28] sm:$0xff] }
0x40aa   : > { %v8787_v23 = vpop.f32.mrf.mxu1 }
0x40ac   : > { %v12012_v63 = vpop.f32.mrf.mxu1 }
0x40b8   : > { %8706 = vrot.lane.b32.xlu0 %v14031_v47, %s14491_s15 }
0x412b   : > { %v8590_v62 = vpop.xlane.xlu0 %8589 }
0x412c   : > { %v8591_v0 = vmul.f32 0.03125, %v8590_v62 }
0x412e   : > { %v8592_v2 = vsub.f32 %v8587_v57, %v8591_v0 }
0x412f   : > { %v8707_v3 = vpop.permute.xlu0 %8706 }
0x4130   : > { %v14035_v4 = vadd.f32 %v8787_v23, %v8707_v3  ;;  %v8593_v61 = vmul.f32 %v8592_v2, %v8592_v2 }
0x4132   : > { %12025 = vmatpush3.xpose.msk.msra.mxu1 %vm1441_vm2, %v14035_v4  ;;  %v8594_v5 = vsel %vm1185_vm0, %v8593_v61, 0.0 }
0x4133   : > { %8595 = vadd.xlane.f32.xlu1 %v8594_v5  ;;  %12029 = vmatprep.subr.mxu1 %v12472_v1 }
0x4144   : > { %9040 = vrot.lane.b32.xlu1 %v14035_v4, %s14489_s26 }
0x41bc   : > { %v8596_v13 = vpop.xlane.xlu1 %8595 }
0x41bd   : > { %v8597_v14 = vmul.f32 0.03125, %v8596_v13 }
0x41bf   : > { %v8598_v37 = vadd.f32 1e-05, %v8597_v14 }
0x41c0   : > { %v9041_v6 = vpop.permute.xlu1 %9040 }
0x41c1   : > { %12349 = vrsqrt.f32 %v8598_v37 }
0x41ce   : > { %v12350_v15 = vpop.eup %12349 }
0x41cf   : > { %v8600_v9 = vmul.f32 %v12350_v15, %v8592_v2 }
0x41d1   : > { %v8607_v60 = vmul.f32 %v10844_v16, %v8600_v9 }
0x41d3   : > { %v14057_v18 = vadd.f32 %v10845_v17, %v8607_v60 }
0x41d5   : > { %12000 = vmatmul.mubr.msk.f32.vlgmr.msra.gmra.mxu0 %vm1185_vm0, %v14057_v18 }
0x41d6   : > { %12014 = vmatpush3.xpose.msk.msra.mxu0 %vm1185_vm0, %v10769_v19  ;;  %12021 = vmatprep.mubr.msk.f32.mxu0 %vm12473_vm1, %v12472_v1 }
0x41d7   : > { %12015 = vmatprep.subr.mxu0 %v12472_v1 }
0x41da   : > { %12016 = vmatpush3.xpose.msk.msra.mxu0 %vm1185_vm0, %v10768_v20 }
0x41db   : > { %12017 = vmatprep.subr.mxu0 %v12472_v1 }
0x41de   : > { %12018 = vmatpush3.xpose.msk.msra.mxu0 %vm1185_vm0, %v10767_v59 }
0x41df   : > { %12019 = vmatprep.subr.mxu0 %v12472_v1 }
0x41e2   : > { %12020 = vmatpush3.xpose.msk.msra.mxu0 %vm1185_vm0, %v10766_v21 }
0x41e3   : > { %12034 = vmatprep.subr.mxu0 %v12472_v1 }
0x41e5   : > { %12022 = vmatmul.mubr.msk.f32.vlgmr.msra.gmra.mxu0 %vm1185_vm0, %v13514_v46 }
0x41e6   : > { %12035 = vmatpush3.xpose.msk.msra.mxu0 %vm1441_vm2, %v9041_v6  ;;  %12036 = vmatprep.mubr.msk.f32.mxu0 %vm12473_vm1, %v12472_v1 }
0x41e7   : > { %12044 = vmatprep.subr.mxu0 %v12472_v1 }
0x4295   : > { %v8702_v26 = vpop.f32.mrf.mxu0 }
0x4296   : > { %v14082_v11 = vadd.f32 %v14031_v47, %v8702_v26 }
0x4297   : > { %v12001_v22 = vpop.f32.mrf.mxu0 }
0x4298   : > { %9038 = vrot.lane.b32.xlu0 %v14082_v11, %s14489_s26  ;;  %12027 = vmatmul.mubr.msk.f32.vlgmr.msra.gmra.mxu1 %vm1441_vm2, %v14082_v11 }
0x4299   : > { %12031 = vmatprep.mubr.msk.f32.mxu1 %vm12473_vm1, %v12472_v1 }
0x42a5   : > { %v8872_v46 = vpop.f32.mrf.mxu0 }
0x42a7   : > { %v12023_v28 = vpop.f32.mrf.mxu0 }
0x430a   : > { %v9039_v29 = vpop.permute.xlu0 %9038 }
0x430b   : > { %12037 = vmatmul.mubr.msk.f32.vlgmr.msra.gmra.mxu0 %vm1441_vm2, %v9039_v29 }
0x430c   : > { %12052 = vmatprep.mubr.msk.f32.mxu0 %vm12473_vm1, %v12472_v1 }
0x4358   : > { %v8948_v27 = vpop.f32.mrf.mxu1 }
0x4359   : > { %v8952_v31 = vmul.f32 0.35355338, %v8948_v27 }
0x435a   : > { %v12028_v32 = vpop.f32.mrf.mxu1 }
0x435b   : > { %v8953_v25 = vadd.f32 %v14094_v33, %v8952_v31 }
0x435d   : > { %v8954_v24 = vsel %vm1441_vm2, %v8953_v25, -inf }
0x435e   : > { %8955 = vmax.xlane.f32.xlu1 %v8954_v24 }
0x43cb   : > { %v9112_v30 = vpop.f32.mrf.mxu0 }
0x43cc   : > { %v9116_v34 = vmul.f32 0.35355338, %v9112_v30 }
0x43cd   : > { %v12038_v41 = vpop.f32.mrf.mxu0 }
0x43ce   : > { %v9117_v42 = vadd.f32 %v14094_v33, %v9116_v34 }
0x43d0   : > { %v9118_v44 = vsel %vm1441_vm2, %v9117_v42, -inf }
0x43d1   : > { %9119 = vmax.xlane.f32.xlu0 %v9118_v44 }
0x43e7   : > { %v8956_v45 = vpop.xlane.xlu1 %8955  ;;  %8791 = vrot.lane.b32.xlu0 %v14031_v47, %s14492_s12 }
0x43e8   : > { %v8957_v48 = vsub.f32 %v8953_v25, %v8956_v45 }
0x43ea   : > { %v8958_v36 = vmul.f32 1.442695, %v8957_v48 }
0x43eb   : > { %9216 = vrot.lane.b32.xlu0 %v14103_v38, %s14489_s26 }
0x43ec   : > { %12351 = vpow2.f32 %v8958_v36 }
0x43ef   : > { %9214 = vrot.lane.b32.xlu0 %v14108_v49, %s14489_s26 }
0x43f3   : > { %9210 = vrot.lane.b32.xlu0 %v14113_v39, %s14489_s26 }
0x43f7   : > { %9380 = vrot.lane.b32.xlu0 %v14082_v11, %s14490_s5 }
0x43f9   : > { %v12352_v43 = vpop.eup %12351 }
0x43fa   : > { %v8960_v50 = vsel %vm1441_vm2, %v12352_v43, 0.0 }
0x43fb   : > { %8961 = vadd.xlane.f32.xlu1 %v8960_v50 }
0x445a   : > { %v9120_v51 = vpop.xlane.xlu0 %9119 }
0x445b   : > { %v9121_v52 = vsub.f32 %v9117_v42, %v9120_v51 }
0x445d   : > { %v9122_v53 = vmul.f32 1.442695, %v9121_v52 }
0x445e   : > { %v8792_v54 = vpop.permute.xlu0 %8791 }
0x445f   : > { %12353 = vpow2.f32 %v9122_v53  ;;  %v14120_v40 = vadd.f32 %v8872_v46, %v8792_v54 }
0x4461   : > { %12030 = vmatpush3.msra.mxu1 %v14120_v40 }
0x4462   : > { %v9217_v55 = vpop.permute.xlu0 %9216  ;;  %12039 = vmatprep.subr.mxu1 %v12472_v1 }
0x4463   : > { %12045 = vmatpush3.xpose.msk.msra.mxu0 %vm1441_vm2, %v9217_v55 }
0x4464   : > { %12046 = vmatprep.subr.mxu0 %v12472_v1 }
0x4466   : > { %v9215_v35 = vpop.permute.xlu0 %9214 }
0x4467   : > { %12047 = vmatpush3.xpose.msk.msra.mxu0 %vm1441_vm2, %v9215_v35 }
0x4468   : > { %12048 = vmatprep.subr.mxu0 %v12472_v1 }
0x446a   : > { %v9211_v3 = vpop.permute.xlu0 %9210 }
0x446c   : > { %v12354_v56 = vpop.eup %12353 }
0x446d   : > { %v9124_v57 = vsel %vm1441_vm2, %v12354_v56, 0.0 }
0x446e   : > { %9125 = vadd.xlane.f32.xlu1 %v9124_v57  ;;  %v9381_v14 = vpop.permute.xlu0 %9380 }
0x447f   : > { %9130 = vrot.lane.b32.xlu1 %v14120_v40, %s14489_s26 }
0x4483   : > { %9212 = vrot.lane.b32.xlu1 %v14132_v58, %s14489_s26  ;;  %s1122_s26 = sand.u32 1, %s12426_s1  }
0x4484   : > { %v8962_v23 = vpop.xlane.xlu1 %8961  ;;  %s10440_s15 = sshll.u32 %s1122_s26, 3  ;;  %s10298_s3 = scalar_lea.sflag [#allocation3], %s1122_s26 }
0x4485   : > { %12355 = vrcp.f32 %v8962_v23  ;;  %s1124_s20 = scalar_lea.vmem [#allocation2], %s10440_s15 }
0x4486   : > { %s10311_s28 = sshll.u32 %s1124_s20, 4  ;;  %s10312_s28 = int_to_ptr.vmem [resolvable:$true] %s10311_s28 }
0x4487   : > { %9382 = vrot.lane.b32.xlu1 %v14035_v4, %s14490_s5  ;;  %p12381_p0 = scmp.lt.s32.totalorder %s10312_s28, %s12379_s8 }
0x4492   : > { %v12356_v63 = vpop.eup %12355 }
0x4493   : > { %v8964_v47 = vmul.f32 %v12356_v63, %v12352_v43 }
0x4495   : > { %12032 = vmatmul.mubr.msk.f32.vlgmr.msra.gmra.mxu1 %vm1441_vm2, %v8964_v47 }
0x4496   : > { %12041 = vmatprep.mubr.msk.f32.mxu1 %vm12473_vm1, %v12472_v1 }
0x44f7   : > { %v9126_v62 = vpop.xlane.xlu1 %9125 }
0x44f8   : > { %12357 = vrcp.f32 %v9126_v62  ;;  %v10894_v62 = vld [vmem:[%s14505_s27 + $0x1] ss:$0 sm:$0xff] }
0x44fb   : > { %v9131_v0 = vpop.permute.xlu1 %9130 }
0x44fc   : > { %12040 = vmatpush3.msra.mxu1 %v9131_v0 }
0x44fd   : > { %12055 = vmatprep.subr.mxu1 %v12472_v1 }
0x44ff   : > { %v9213_v2 = vpop.permute.xlu1 %9212 }
0x4500   : > { %12049 = vmatpush3.xpose.msk.msra.mxu0 %vm1441_vm2, %v9213_v2 }
0x4501   : > { %12050 = vmatprep.subr.mxu0 %v12472_v1 }
0x4503   : > { %v9383_v12 = vpop.permute.xlu1 %9382 }
0x4504   : > { %12051 = vmatpush3.xpose.msk.msra.mxu0 %vm1441_vm2, %v9211_v3 }
0x4505   : > { %v12358_v61 = vpop.eup %12357  ;;  %12066 = vmatprep.subr.mxu0 %v12472_v1 }
0x4506   : > { %v9128_v5 = vmul.f32 %v12358_v61, %v12354_v56 }
0x4508   : > { %12042 = vmatmul.mubr.msk.f32.vlgmr.msra.gmra.mxu1 %vm1441_vm2, %v9128_v5 }
0x4509   : > { %12056 = vmatpush3.xpose.msk.msra.mxu1 %vm1441_vm2, %v14103_v38  ;;  %12063 = vmatprep.mubr.msk.f32.mxu1 %vm12473_vm1, %v12472_v1 }
0x450a   : > { %12057 = vmatprep.subr.mxu1 %v12472_v1 }
0x450d   : > { %12058 = vmatpush3.xpose.msk.msra.mxu1 %vm1441_vm2, %v14108_v49 }
0x450e   : > { %12059 = vmatprep.subr.mxu1 %v12472_v1 }
0x4511   : > { %12060 = vmatpush3.xpose.msk.msra.mxu1 %vm1441_vm2, %v14132_v58 }
0x4512   : > { %12061 = vmatprep.subr.mxu1 %v12472_v1 }
0x4515   : > { %12062 = vmatpush3.xpose.msk.msra.mxu1 %vm1441_vm2, %v14113_v39 }
0x4516   : > { %12071 = vmatprep.subr.mxu1 %v12472_v1 }
0x4555   : > { %v9034_v7 = vpop.f32.mrf.mxu1 }
0x4556   : > { %12064 = vmatmul.mubr.msk.f32.vlgmr.msra.gmra.mxu1 %vm1441_vm2, %v9034_v7 }
0x4557   : > { %v12033_v8 = vpop.f32.mrf.mxu1  ;;  %12073 = vmatprep.mubr.msk.f32.mxu1 %vm12473_vm1, %v12472_v1 }
0x4558   : > { %v10783_v8 = vld [vmem:[%s14506_s29 + $0x78] sm:$0xff] }
0x45c8   : > { %v9202_v10 = vpop.f32.mrf.mxu1 }
0x45c9   : > { %12053 = vmatmul.mubr.msk.f32.vlgmr.msra.gmra.mxu0 %vm1441_vm2, %v9202_v10  ;;  %v10782_v10 = vld [vmem:[%s14506_s29 + $0x70] sm:$0xff] }
0x45ca   : > { %12067 = vmatpush3.xpose.msk.msra.mxu0 %vm1441_vm2, %v9383_v12  ;;  %v12043_v13 = vpop.f32.mrf.mxu1  ;;  %12068 = vmatprep.mubr.msk.f32.mxu0 %vm12473_vm1, %v12472_v1 }
0x45cb   : > { %12076 = vmatprep.subr.mxu0 %v12472_v1 }
0x45cd   : > { %12069 = vmatmul.mubr.msk.f32.vlgmr.msra.gmra.mxu0 %vm1441_vm2, %v9381_v14 }
0x45ce   : > { %12084 = vmatprep.mubr.msk.f32.mxu0 %vm12473_vm1, %v12472_v1 }
0x4616   : > { %v14172_v37 = vpop.f32.mrf.mxu1 }
0x4618   : > { %v12065_v15 = vpop.f32.mrf.mxu1 }
0x4619   : > { %v10781_v15 = vld [vmem:[%s14506_s29 + $0x68] sm:$0xff] }
0x4689   : > { %v14174_v16 = vpop.f32.mrf.mxu0 }
0x468a   : > { %v9377_v57 = vadd.f32 %v14172_v37, %v14174_v16  ;;  %v10780_v16 = vld [vmem:[%s14506_s29 + $0x60] sm:$0xff] }
0x468b   : > { %v12054_v9 = vpop.f32.mrf.mxu0 }
0x468c   : > { %v10779_v9 = vld [vmem:[%s14506_s29 + $0x58] sm:$0xff] }
0x468d   : > { %v9454_v17 = vpop.f32.mrf.mxu0 }
0x468e   : > { %v9458_v60 = vmul.f32 0.35355338, %v9454_v17  ;;  %v10778_v17 = vld [vmem:[%s14506_s29 + $0x50] sm:$0xff] }
0x468f   : > { %v12070_v19 = vpop.f32.mrf.mxu0 }
0x4690   : > { %v9459_v20 = vadd.f32 %v14094_v33, %v9458_v60  ;;  %v10777_v60 = vld [vmem:[%s14506_s29 + $0x48] sm:$0xff]  ;;  %v10776_v19 = vld [vmem:[%s14506_s29 + $0x40] sm:$0xff] }
0x4692   : > { %v9460_v59 = vsel %vm1441_vm2, %v9459_v20, -inf }
0x4693   : > { %9461 = vmax.xlane.f32.xlu1 %v9460_v59  ;;  %v10787_v59 = vld [vmem:[%s14507_s30 + $0x30] sm:$0xff] }
0x46a4   : > { %9639 = vrot.lane.b32.xlu1 %v14035_v4, %s14493_s6 }
0x46a8   : > { %9637 = vrot.lane.b32.xlu1 %v14082_v11, %s14493_s6 }
0x471c   : > { %v9462_v21 = vpop.xlane.xlu1 %9461 }
0x471d   : > { %v9463_v6 = vsub.f32 %v9459_v20, %v9462_v21  ;;  %v10788_v20 = vld [vmem:[%s14507_s30 + $0x38] sm:$0xff]  ;;  %v10786_v21 = vld [vmem:[%s14507_s30 + $0x28] sm:$0xff] }
0x471f   : > { %v9464_v26 = vmul.f32 1.442695, %v9463_v6 }
0x4720   : > { %v9640_v27 = vpop.permute.xlu1 %9639 }
0x4721   : > { %12359 = vpow2.f32 %v9464_v26 }
0x4724   : > { %v9638_v31 = vpop.permute.xlu1 %9637 }
0x472e   : > { %v12360_v22 = vpop.eup %12359 }
0x472f   : > { %v9466_v46 = vsel %vm1441_vm2, %v12360_v22, 0.0 }
0x4730   : > { %9467 = vadd.xlane.f32.xlu0 %v9466_v46 }
0x4746   : > { %9471 = vrot.lane.b32.xlu0 %v14120_v40, %s14490_s5 }
0x47b9   : > { %v9468_v28 = vpop.xlane.xlu0 %9467 }
0x47ba   : > { %12361 = vrcp.f32 %v9468_v28  ;;  %v10895_v28 = vld [vmem:[%s14508_s18 + $0x1] ss:$0 sm:$0xff] }
0x47bd   : > { %v9472_v29 = vpop.permute.xlu0 %9471 }
0x47be   : > { %12072 = vmatpush3.msra.mxu1 %v9472_v29 }
0x47bf   : > { %12087 = vmatprep.subr.mxu1 %v12472_v1 }
0x47c7   : > { %v12362_v4 = vpop.eup %12361 }
0x47c8   : > { %v9470_v11 = vmul.f32 %v12362_v4, %v12360_v22  ;;  %v10896_v4 = vld [vmem:[%s14510_s11 + $0x1] ss:$0 sm:$0xff] }
0x47ca   : > { %12074 = vmatmul.mubr.msk.f32.vlgmr.msra.gmra.mxu1 %vm1441_vm2, %v9470_v11 }
0x47cb   : > { %12088 = vmatpush3.xpose.msk.msra.mxu1 %vm1441_vm2, %v9640_v27  ;;  %12089 = vmatprep.mubr.msk.f32.mxu1 %vm12473_vm1, %v12472_v1 }
0x47cc   : > { %12092 = vmatprep.subr.mxu1 %v12472_v1 }
0x47ce   : > { %12090 = vmatmul.mubr.msk.f32.vlgmr.msra.gmra.mxu1 %vm1441_vm2, %v9638_v31  ;;  %v10785_v31 = vld [vmem:[%s14507_s30 + $0x20] sm:$0xff] }
0x47cf   : > { %12094 = vmatprep.mubr.msk.f32.mxu1 %vm12473_vm1, %v12472_v1 }
0x488a   : > { %v9543_v32 = vpop.f32.mrf.mxu1 }
0x488c   : > { %v12075_v25 = vpop.f32.mrf.mxu1 }
0x488e   : > { %v9711_v24 = vpop.f32.mrf.mxu1 }
0x488f   : > { %v9715_v30 = vmul.f32 0.35355338, %v9711_v24 }
0x4890   : > { %v12091_v34 = vpop.f32.mrf.mxu1 }
0x4891   : > { %v9716_v41 = vadd.f32 %v14094_v33, %v9715_v30 }
0x4893   : > { %v9717_v42 = vsel %vm1441_vm2, %v9716_v41, -inf }
0x4894   : > { %9718 = vmax.xlane.f32.xlu0 %v9717_v42 }
0x48aa   : > { %9728 = vrot.lane.b32.xlu0 %v14120_v40, %s14493_s6 }
0x48ae   : > { %9810 = vrot.lane.b32.xlu0 %v14103_v38, %s14493_s6 }
0x48b2   : > { %9808 = vrot.lane.b32.xlu0 %v14108_v49, %s14493_s6 }
0x48b6   : > { %9806 = vrot.lane.b32.xlu0 %v14132_v58, %s14493_s6 }
0x48ba   : > { %9804 = vrot.lane.b32.xlu0 %v14113_v39, %s14493_s6  ;;  %s14519_s6 = sld [smem:[#allocation38_spill]] }
0x491d   : > { %v9719_v44 = vpop.xlane.xlu0 %9718 }
0x491e   : > { %v9720_v33 = vsub.f32 %v9716_v41, %v9719_v44  ;;  %v10907_v41 = vld [vmem:[%s14513_s22 + $0x1] ss:$0 sm:$0xff] }
0x4920   : > { %v9721_v45 = vmul.f32 1.442695, %v9720_v33 }
0x4921   : > { %v9729_v48 = vpop.permute.xlu0 %9728 }
0x4922   : > { %12363 = vpow2.f32 %v9721_v45  ;;  %12093 = vmatpush3.msra.mxu1 %v9729_v48 }
0x4923   : > { %12097 = vmatprep.subr.mxu1 %v12472_v1 }
0x492f   : > { %v12364_v36 = vpop.eup %12363 }
0x4930   : > { %v9723_v43 = vsel %vm1441_vm2, %v12364_v36, 0.0 }
0x4931   : > { %9724 = vadd.xlane.f32.xlu1 %v9723_v43  ;;  %v10166_v43 = vld [vmem:[%s12663_s21 + $0x70] sm:$0xff] }
0x4942   : > { %9553 = vrot.lane.b32.xlu1 %v14103_v38, %s14490_s5  ;;  %v9811_v38 = vpop.permute.xlu0 %9810 }
0x4946   : > { %9551 = vrot.lane.b32.xlu1 %v14108_v49, %s14490_s5  ;;  %v9809_v54 = vpop.permute.xlu0 %9808 }
0x494a   : > { %9549 = vrot.lane.b32.xlu1 %v14132_v58, %s14490_s5  ;;  %v9807_v55 = vpop.permute.xlu0 %9806 }
0x494e   : > { %9547 = vrot.lane.b32.xlu1 %v14113_v39, %s14490_s5  ;;  %v9805_v35 = vpop.permute.xlu0 %9804  ;;  %s14518_s5 = sld [smem:[#allocation41_spill]] }
0x4954   : > { %s10934_s16 = sshll.u32 %s14518_s5, 7 }
0x4955   : > { %s14346_s2 = scalar_lea.hbm %s14519_s6, %s10934_s16 }
0x49ba   : > { %v9725_v50 = vpop.xlane.xlu1 %9724 }
0x49bb   : > { %12365 = vrcp.f32 %v9725_v50  ;;  %v10165_v50 = vld [vmem:[%s12663_s21 + $0x68] sm:$0xff] }
0x49be   : > { %v9554_v51 = vpop.permute.xlu1 %9553 }
0x49bf   : > { %12077 = vmatpush3.xpose.msk.msra.mxu0 %vm1441_vm2, %v9554_v51  ;;  %v10164_v51 = vld [vmem:[%s12663_s21 + $0x60] sm:$0xff] }
0x49c0   : > { %12078 = vmatprep.subr.mxu0 %v12472_v1 }
0x49c2   : > { %v9552_v52 = vpop.permute.xlu1 %9551 }
0x49c3   : > { %12079 = vmatpush3.xpose.msk.msra.mxu0 %vm1441_vm2, %v9552_v52  ;;  %v10163_v52 = vld [vmem:[%s12663_s21 + $0x58] sm:$0xff] }
0x49c4   : > { %12080 = vmatprep.subr.mxu0 %v12472_v1 }
0x49c6   : > { %v9550_v49 = vpop.permute.xlu1 %9549 }
0x49c7   : > { %12081 = vmatpush3.xpose.msk.msra.mxu0 %vm1441_vm2, %v9550_v49  ;;  %v10161_v49 = vld [vmem:[%s12663_s21 + $0x48] sm:$0xff] }
0x49c8   : > { %v12366_v53 = vpop.eup %12365  ;;  %12082 = vmatprep.subr.mxu0 %v12472_v1 }
0x49c9   : > { %v9727_v39 = vmul.f32 %v12366_v53, %v12364_v36  ;;  %v10167_v36 = vld [vmem:[%s12663_s21 + $0x78] sm:$0xff]  ;;  %v10160_v53 = vld [vmem:[%s12663_s21 + $0x40] sm:$0xff] }
0x49ca   : > { %v9548_v40 = vpop.permute.xlu1 %9547 }
0x49cb   : > { %12083 = vmatpush3.xpose.msk.msra.mxu0 %vm1441_vm2, %v9548_v40  ;;  %12095 = vmatmul.mubr.msk.f32.vlgmr.msra.gmra.mxu1 %vm1441_vm2, %v9727_v39  ;;  %v10159_v39 = vld [vmem:[%s12663_s21 + $0x38] sm:$0xff] }
0x49cc   : > { %12098 = vmatpush3.xpose.msk.msra.mxu1 %vm1441_vm2, %v9811_v38  ;;  %12105 = vmatprep.mubr.msk.f32.mxu1 %vm12473_vm1, %v12472_v1  ;;  %v10162_v38 = vld [vmem:[%s12663_s21 + $0x50] sm:$0xff] }
0x49cd   : > { %12099 = vmatprep.subr.mxu1 %v12472_v1  ;;  %12108 = vmatprep.subr.mxu0 %v12472_v1 }
0x49ce   : > { %12085 = vmatmul.mubr.msk.f32.vlgmr.msra.gmra.mxu0 %vm1441_vm2, %v9543_v32  ;;  %v10897_v32 = vld [vmem:[%s14511_s23 + $0x1] ss:$0 sm:$0xff] }
0x49cf   : > { %12124 = vmatprep.mubr.msk.f32.mxu0 %vm12473_vm1, %v12472_v1  ;;  %12109 = vmatpush3.xpose.msk.msra.mxu0 %vm1185_vm0, %v10783_v8 }
0x49d0   : > { %12100 = vmatpush3.xpose.msk.msra.mxu1 %vm1441_vm2, %v9809_v54  ;;  %12110 = vmatprep.subr.mxu0 %v12472_v1  ;;  %v10158_v54 = vld [vmem:[%s12663_s21 + $0x30] sm:$0xff] }
0x49d1   : > { %12101 = vmatprep.subr.mxu1 %v12472_v1 }
0x49d3   : > { %12111 = vmatpush3.xpose.msk.msra.mxu0 %vm1185_vm0, %v10782_v10  ;;  %v10914_v10 = vld [vmem:[%s14517_s0 + $0x1] ss:$0 sm:$0xff]  ;;  %s12374_s0 = scalar_lea.vmem %s10312_s28, 128 }
0x49d4   : > { %12102 = vmatpush3.xpose.msk.msra.mxu1 %vm1441_vm2, %v9807_v55  ;;  %12112 = vmatprep.subr.mxu0 %v12472_v1  ;;  %p12375_p11 = scmp.ne.s32.totalorder %s10312_s28, %s12374_s0 }
0x49d5   : > { %12103 = vmatprep.subr.mxu1 %v12472_v1 }
0x49d6   : > { %p12376_p12 = pnand %p12375_p11, %p12708_p5 }
0x49d7   : > { %12113 = vmatpush3.xpose.msk.msra.mxu0 %vm1185_vm0, %v10781_v15 }
0x49d8   : > { %12104 = vmatpush3.xpose.msk.msra.mxu1 %vm1441_vm2, %v9805_v35  ;;  %12114 = vmatprep.subr.mxu0 %v12472_v1  ;;  %p12377_p13 = pneg %p12376_p12 }
0x49d9   : > { %12127 = vmatprep.subr.mxu1 %v12472_v1 }
0x49db   : > { %12115 = vmatpush3.xpose.msk.msra.mxu0 %vm1185_vm0, %v10780_v16 }
0x49dc   : > { %12116 = vmatprep.subr.mxu0 %v12472_v1 }
0x49df   : > { %12117 = vmatpush3.xpose.msk.msra.mxu0 %vm1185_vm0, %v10779_v9 }
0x49e0   : > { %12118 = vmatprep.subr.mxu0 %v12472_v1 }
0x49e3   : > { %12119 = vmatpush3.xpose.msk.msra.mxu0 %vm1185_vm0, %v10778_v17 }
0x49e4   : > { %12120 = vmatprep.subr.mxu0 %v12472_v1 }
0x49e7   : > { %12121 = vmatpush3.xpose.msk.msra.mxu0 %vm1185_vm0, %v10777_v60 }
0x49e8   : > { %12122 = vmatprep.subr.mxu0 %v12472_v1 }
0x49eb   : > { %12123 = vmatpush3.xpose.msk.msra.mxu0 %vm1185_vm0, %v10776_v19 }
0x4a8b   : > { %v9800_v56 = vpop.f32.mrf.mxu1 }
0x4a8c   : > { %12106 = vmatmul.mubr.msk.f32.vlgmr.msra.gmra.mxu1 %vm1441_vm2, %v9800_v56 }
0x4a8d   : > { %v12096_v58 = vpop.f32.mrf.mxu1  ;;  %12135 = vmatprep.mubr.msk.f32.mxu1 %vm12473_vm1, %v12472_v1  ;;  %12128 = vmatpush3.xpose.msk.msra.mxu1 %vm2612_vm3, %v10788_v20 }
0x4a8e   : > { %v9632_v23 = vpop.f32.mrf.mxu0  ;;  %12129 = vmatprep.subr.mxu1 %v12472_v1  ;;  %v10157_v58 = vld [vmem:[%s12663_s21 + $0x28] sm:$0xff] }
0x4a8f   : > { %v9636_v63 = vadd.f32 %v9632_v23, %v9377_v57  ;;  %v10156_v23 = vld [vmem:[%s12663_s21 + $0x20] sm:$0xff] }
0x4a90   : > { %v12086_v47 = vpop.f32.mrf.mxu0 }
0x4a91   : > { %12130 = vmatpush3.xpose.msk.msra.mxu1 %vm2612_vm3, %v10787_v59  ;;  %v10154_v47 = vld [vmem:[%s12663_s21 + $0x10] sm:$0xff] }
0x4a92   : > { %12131 = vmatprep.subr.mxu1 %v12472_v1 }
0x4a95   : > { %12132 = vmatpush3.xpose.msk.msra.mxu1 %vm2612_vm3, %v10786_v21 }
0x4a96   : > { %12133 = vmatprep.subr.mxu1 %v12472_v1 }
0x4a99   : > { %12134 = vmatpush3.xpose.msk.msra.mxu1 %vm2612_vm3, %v10785_v31 }
0x4a9a   : > { %12138 = vmatprep.subr.mxu1 %v12472_v1 }
0x4b4c   : > { %v9889_v0 = vpop.f32.mrf.mxu1 }
0x4b4d   : > { %v9893_v2 = vadd.f32 %v9889_v0, %v9636_v63  ;;  %v10155_v63 = vld [vmem:[%s12663_s21 + $0x18] sm:$0xff]  ;;  %v10152_v0 = vld [vmem:[%s12663_s21] sm:$0xff] }
0x4b4e   : > { %v12107_v3 = vpop.f32.mrf.mxu1 }
0x4b4f   : > { %v9900_v61 = vadd.f32 %v10894_v62, %v9893_v2  ;;  %v10153_v62 = vld [vmem:[%s12663_s21 + $0x8] sm:$0xff] }
0x4b51   : > { %v9901_v5 = vadd.f32 %v9900_v61, %v14057_v18 }
0x4b53   : > { %v9902_v7 = vsel %vm1185_vm0, %v9901_v5, 0.0 }
0x4b54   : > { %9903 = vadd.xlane.f32.xlu1 %v9902_v7  ;;  %v10913_v7 = vld [vmem:[%s14515_s9 + $0x1] ss:$0 sm:$0xff]  ;;  %s12380_s9 = scalar_lea.vmem %s12379_s8, 256 }
0x4b55   : > { %p12382_p1 = scmp.lt.s32.totalorder %s12380_s9, %s12374_s0 }
0x4b57   : > { %p12383_p2 = por %p12382_p1, %p12381_p0 }
0x4b59   : > { %p12384_p3 = pnand %p12383_p2, %p12377_p13 }
0x4bdd   : > { %v9904_v12 = vpop.xlane.xlu1 %9903 }
0x4bde   : > { %v9905_v13 = vmul.f32 0.03125, %v9904_v12 }
0x4be0   : > { %v9906_v14 = vsub.f32 %v9901_v5, %v9905_v13 }
0x4be2   : > { %v9907_v18 = vmul.f32 %v9906_v14, %v9906_v14 }
0x4be4   : > { %v9908_v37 = vsel %vm1185_vm0, %v9907_v18, 0.0 }
0x4be5   : > { %9909 = vadd.xlane.f32.xlu0 %v9908_v37 }
0x4c6e   : > { %v9910_v6 = vpop.xlane.xlu0 %9909 }
0x4c6f   : > { %v9911_v26 = vmul.f32 0.03125, %v9910_v6 }
0x4c71   : > { %v9912_v22 = vadd.f32 1e-05, %v9911_v26 }
0x4c73   : > { %12367 = vrsqrt.f32 %v9912_v22 }
0x4c80   : > { %v12368_v46 = vpop.eup %12367 }
0x4c81   : > { %v9914_v29 = vmul.f32 %v12368_v46, %v9906_v14 }
0x4c83   : > { %v9921_v27 = vmul.f32 %v10895_v28, %v9914_v29 }
0x4c85   : > { %v9928_v11 = vadd.f32 %v10896_v4, %v9921_v27 }
0x4c87   : > { %12125 = vmatmul.mubr.msk.f32.vlgmr.msra.gmra.mxu0 %vm1185_vm0, %v9928_v11 }
0x4d47   : > { %v10028_v25 = vpop.f32.mrf.mxu0 }
0x4d48   : > { %v10029_v24 = vadd.f32 %v10897_v32, %v10028_v25 }
0x4d49   : > { %v12126_v30 = vpop.f32.mrf.mxu0 }
0x4d4a   : > { %v10032_v34 = vmax.f32 %v10029_v24, 0.0 }
0x4d4c   : > { %12136 = vmatmul.mubr.msk.f32.vlgmr.msra.gmra.mxu1 %vm2612_vm3, %v10032_v34 }
0x4d4d   : > { %12170 = vmatprep.mubr.msk.f32.mxu1 %vm12473_vm1, %v12472_v1  ;;  %12139 = vmatpush3.xpose.msk.msra.mxu1 %vm1185_vm0, %v10167_v36 }
0x4d4e   : > { %12140 = vmatprep.subr.mxu1 %v12472_v1 }
0x4d51   : > { %12141 = vmatpush3.xpose.msk.msra.mxu1 %vm1185_vm0, %v10166_v43 }
0x4d52   : > { %12142 = vmatprep.subr.mxu1 %v12472_v1 }
0x4d55   : > { %12143 = vmatpush3.xpose.msk.msra.mxu1 %vm1185_vm0, %v10165_v50 }
0x4d56   : > { %12144 = vmatprep.subr.mxu1 %v12472_v1 }
0x4d59   : > { %12145 = vmatpush3.xpose.msk.msra.mxu1 %vm1185_vm0, %v10164_v51 }
0x4d5a   : > { %12146 = vmatprep.subr.mxu1 %v12472_v1 }
0x4d5d   : > { %12147 = vmatpush3.xpose.msk.msra.mxu1 %vm1185_vm0, %v10163_v52 }
0x4d5e   : > { %12148 = vmatprep.subr.mxu1 %v12472_v1 }
0x4d61   : > { %12149 = vmatpush3.xpose.msk.msra.mxu1 %vm1185_vm0, %v10162_v38 }
0x4d62   : > { %12150 = vmatprep.subr.mxu1 %v12472_v1 }
0x4d65   : > { %12151 = vmatpush3.xpose.msk.msra.mxu1 %vm1185_vm0, %v10161_v49 }
0x4d66   : > { %12152 = vmatprep.subr.mxu1 %v12472_v1 }
0x4d69   : > { %12153 = vmatpush3.xpose.msk.msra.mxu1 %vm1185_vm0, %v10160_v53 }
0x4d6a   : > { %12154 = vmatprep.subr.mxu1 %v12472_v1 }
0x4d6d   : > { %12155 = vmatpush3.xpose.msk.msra.mxu1 %vm1185_vm0, %v10159_v39 }
0x4d6e   : > { %12156 = vmatprep.subr.mxu1 %v12472_v1 }
0x4d71   : > { %12157 = vmatpush3.xpose.msk.msra.mxu1 %vm1185_vm0, %v10158_v54 }
0x4d72   : > { %12158 = vmatprep.subr.mxu1 %v12472_v1 }
0x4d75   : > { %12159 = vmatpush3.xpose.msk.msra.mxu1 %vm1185_vm0, %v10157_v58 }
0x4d76   : > { %12160 = vmatprep.subr.mxu1 %v12472_v1 }
0x4d79   : > { %12161 = vmatpush3.xpose.msk.msra.mxu1 %vm1185_vm0, %v10156_v23 }
0x4d7a   : > { %12162 = vmatprep.subr.mxu1 %v12472_v1 }
0x4d7d   : > { %12163 = vmatpush3.xpose.msk.msra.mxu1 %vm1185_vm0, %v10155_v63 }
0x4d7e   : > { %12164 = vmatprep.subr.mxu1 %v12472_v1 }
0x4d81   : > { %12165 = vmatpush3.xpose.msk.msra.mxu1 %vm1185_vm0, %v10154_v47 }
0x4d82   : > { %12166 = vmatprep.subr.mxu1 %v12472_v1 }
0x4d85   : > { %12167 = vmatpush3.xpose.msk.msra.mxu1 %vm1185_vm0, %v10153_v62 }
0x4d86   : > { %12168 = vmatprep.subr.mxu1 %v12472_v1  ;;  %v10915_v1 = vld [vmem:[%s12658_s17] ss:$0 sm:$0xff] }
0x4d89   : > { %12169 = vmatpush3.xpose.msk.msra.mxu1 %vm1185_vm0, %v10152_v0 }
0x4e0c   : > { %v10120_v42 = vpop.f32.mrf.mxu1 }
0x4e0d   : > { %v10121_v44 = vadd.f32 %v10907_v41, %v10120_v42 }
0x4e0e   : > { %v12137_v33 = vpop.f32.mrf.mxu1 }
0x4e0f   : > { %v10124_v45 = vadd.f32 %v10121_v44, %v9928_v11 }
0x4e11   : > { %v10125_v48 = vsel %vm1185_vm0, %v10124_v45, 0.0 }
0x4e12   : > { %10126 = vadd.xlane.f32.xlu0 %v10125_v48 }
0x4e9b   : > { %v10127_v40 = vpop.xlane.xlu0 %10126 }
0x4e9c   : > { %v10128_v55 = vmul.f32 0.03125, %v10127_v40 }
0x4e9e   : > { %v10129_v35 = vsub.f32 %v10124_v45, %v10128_v55 }
0x4ea0   : > { %v10130_v56 = vmul.f32 %v10129_v35, %v10129_v35 }
0x4ea2   : > { %v10131_v57 = vsel %vm1185_vm0, %v10130_v56, 0.0 }
0x4ea3   : > { %10132 = vadd.xlane.f32.xlu1 %v10131_v57 }
0x4f2c   : > { %v10133_v2 = vpop.xlane.xlu1 %10132 }
0x4f2d   : > { %v10134_v3 = vmul.f32 0.03125, %v10133_v2 }
0x4f2f   : > { %v10135_v61 = vadd.f32 1e-05, %v10134_v3 }
0x4f31   : > { %12369 = vrsqrt.f32 %v10135_v61 }
0x4f3e   : > { %v12370_v5 = vpop.eup %12369 }
0x4f3f   : > { %v10137_v8 = vmul.f32 %v12370_v5, %v10129_v35 }
0x4f41   : > { %v10144_v12 = vmul.f32 %v10913_v7, %v10137_v8 }
0x4f43   : > { %v10151_v13 = vadd.f32 %v10914_v10, %v10144_v12 }
0x4f45   : > { %12171 = vmatmul.mubr.msk.f32.vlgmr.msra.gmra.mxu1 %vm1185_vm0, %v10151_v13 }
0x5005   : > { %v10292_v14 = vpop.f32.mrf.mxu1 }
0x5006   : > { %v10293_v18 = vadd.f32 %v10915_v1, %v10292_v14 }
0x5007   : > { %v12172_v37 = vpop.f32.mrf.mxu1 }
0x5008   : > { %10296 = vst [vmem:[%s1124_s20] sm:$0xff] %v10293_v18 }
0x5009   : > { %12387 = shalt.err (!%p12384_p3)
}
0x500a   : > { %s12388_s5 = scalar_lea.hbm %s14346_s2, 128  ;;  %s12392_s26 = scalar_lea.hbm %s14519_s6, 256 }
0x500b   : > { %p12389_p4 = scmp.ne.s32.totalorder %s14346_s2, %s12388_s5  ;;  %p12393_p9 = scmp.lt.s32.totalorder %s14346_s2, %s14519_s6 }
0x500c   : > { %p12394_p10 = scmp.lt.s32.totalorder %s12392_s26, %s12388_s5 }
0x500d   : > { %p12390_p7 = pnand %p12389_p4, %p12708_p5 }
0x500e   : > { %p12395_p11 = por %p12394_p10, %p12393_p9 }
0x500f   : > { %p12391_p8 = pneg %p12390_p7 }
0x5011   : > { %p12396_p12 = pnand %p12395_p11, %p12391_p8 }
0x5013   : > { %12399 = shalt.err (!%p12396_p12)
}
0x5014   : > { %12173 = dma.vmem_to_hbm [thread:$0]  (%p12708_p5), %s10312_s28, 128, %s14346_s2, %s10298_s3  }
0x5015 PF: > { %s14521_s9 = sld [smem:[#allocation39_spill]]  ;;  %p12179_p13 = scmp.ge.s32.totalorder %s12434_s7, 2 }
0x5017   : > { %p12176_p0 = pnand %p12179_p13, %p12712_p6 }
0x5019   : > { %p12177_p1 = pneg %p12176_p0 }
0x501b   : > { %s10323_s0 = sand.u32 1, %s14521_s9  }
0x501c   : > { %s10324_s4 = scalar_lea.sflag [#allocation3], %s10323_s0 }
0x501d   : > { %12417 = dma.done.wait (%p12177_p1), %s10324_s4, 128  }
0x501e   : > { %12419 = vsyncadd (%p12177_p1), %s10324_s4, 4294967168  ;;  %s14523_s7 = sld [smem:[#allocation42_spill]]  ;;  %s14526_s28 = smov %s12426_s1 }
0x501f   : > { %s14524_s15 = sld [smem:[#allocation40_spill]] }
0x5020   : > { %s14525_s2 = sld [smem:[#allocation43_spill]] }
0x5024   : > { %p83_p2 = scmp.ge.s32.totalorder %s14523_s7, 4  }
0x5025   : > { %s14527_s1 = smov %s14524_s15 }
0x5026   :  { %85 = sbr.rel (!%p83_p2) target bundleno = 82 (0x52), region = 274 }
0x502b   :  { %10329 = vsyncpa [#allocation3], 1 }
0x502c   :  { %10331 = vsyncpa [#allocation3 + $0x1], 1 }

</bundles_post_ra>
